<compile_context>
chip_gen: v6e
topology: v6e:2x2x1
jax: 0.10.0
libtpu: 0.0.40
codegen_flags: <defaults>
</compile_context>

<pallas_src>
import functools

import jax
import jax.numpy as jnp
from jax.experimental import pallas as pl
from jax.experimental.pallas import tpu as pltpu


def _mhsa_kernel(x_ref, wqkv_ref, bqkv_ref, wo_ref, bo_ref, o_ref, *,
                 num_heads, head_dim):
    b_blk, S, H = x_ref.shape
    M = b_blk * S

    x2d = x_ref[...].reshape(M, H)          # fold the batch block into M
    in_dtype = x2d.dtype

    # Fused QKV projection: one (M, H) x (H, 3H) MXU matmul, f32 accumulation.
    # Cast the result back to the input dtype so the attention matmuls below
    # take the fast (bf16) MXU path when the caller runs in bf16.
    qkv = jnp.dot(x2d, wqkv_ref[...], preferred_element_type=jnp.float32)
    qkv = (qkv + bqkv_ref[...].astype(jnp.float32)).astype(in_dtype)     # (M, 3H)

    q = qkv[:, :H]                    # softmax scale pre-folded into wq/bq
    k = qkv[:, H:2 * H]
    v = qkv[:, 2 * H:]

    # One explicit relayout per tensor to a head-major (nh*b, S, d) layout.
    # Every following contraction has the batch dim leading and contracts on
    # the minor dim, so no further transposes / relayouts are generated.
    def to_heads(t):
        t = t.reshape(M, num_heads, head_dim)
        t = jnp.transpose(t, (1, 0, 2))                       # (nh, M, d)
        return t.reshape(num_heads * b_blk, S, head_dim)      # free regroup

    qh, kh, vh = to_heads(q), to_heads(k), to_heads(v)

    # scores over the merged (head, batch) axis g.
    scores = jnp.einsum("gqd,gkd->gqk", qh, kh,
                        preferred_element_type=jnp.float32)   # (nh*b, S, S) f32

    # Numerically-stable softmax over keys.  Exact division (not the approx
    # reciprocal): exp dominates the EUP cost and exact keeps parity tight.
    scores = scores - jnp.max(scores, axis=-1, keepdims=True)
    p = jnp.exp(scores)
    p = p / jnp.sum(p, axis=-1, keepdims=True)
    p = p.astype(in_dtype)                                    # bf16 MXU path

    ctx = jnp.einsum("gqk,gkd->gqd", p, vh,
                     preferred_element_type=jnp.float32).astype(in_dtype)

    # Output projection with the head merge folded in: out = sum_h ctx_h @ wo[h].
    # ctx stays head-major ((nh, M, d) is a free regroup of (nh*b, S, d)); no
    # (h,q,d)->(q,h,d) transpose or concat before the projection.
    ctx = ctx.reshape(num_heads, M, head_dim)
    wo = wo_ref[...]                                          # (nh, d, H)
    out = jnp.dot(ctx[0], wo[0], preferred_element_type=jnp.float32)
    for h in range(1, num_heads):
        out = out + jnp.dot(ctx[h], wo[h], preferred_element_type=jnp.float32)
    out = out + bo_ref[...].astype(jnp.float32)

    o_ref[...] = out.reshape(b_blk, S, H).astype(o_ref.dtype)


def pack_mhsa_params(params, *, num_heads, dtype=None):
    """One-time host-side packing (avoids per-forward HBM concatenations).

    - Q/K/V weights/biases packed into a single (H, 3H) / (1, 3H) pair.
    - The 1/sqrt(head_dim) softmax scale is folded into wq / bq.
    - wo reshaped to (num_heads, head_dim, H) so the head merge fuses into the
      output projection.
    Weights are stored pre-transposed as (in, out): y = x @ W + b.
    """
    H = params["wq"].shape[0]
    head_dim = H // num_heads
    scale = head_dim ** -0.5
    wqkv = jnp.concatenate(
        [params["wq"] * scale, params["wk"], params["wv"]], axis=1)
    bqkv = jnp.concatenate(
        [params["bq"] * scale, params["bk"], params["bv"]]).reshape(1, 3 * H)
    wo_r = params["wo"].reshape(num_heads, head_dim, H)
    bo = params["bo"].reshape(1, H)
    packed = {"wqkv": wqkv, "bqkv": bqkv, "wo_r": wo_r, "bo": bo}
    if dtype is not None:
        packed = {k: v.astype(dtype) for k, v in packed.items()}
    return packed


def _pick_batch_block(batch, seq_len, target_rows=512):
    """Largest divisor of `batch` with folded M = b_blk * seq_len <= target_rows.

    Folding batch elements into the projection M dimension keeps the MXU rows
    fed (a lone S=16 block uses 6-12% of the 128/256-row MXU) and amortizes the
    per-grid-step overhead.  Pass batch_block explicitly if you need >=2 grid
    steps for megacore sharding.
    """
    best = 1
    for cand in range(1, batch + 1):
        if batch % cand == 0 and cand * seq_len <= max(target_rows, seq_len):
            best = cand
    return best


def _vmem_budget_bytes():
    # Generation-aware cap: ~80% of physical VMEM (v7x: ~51 MiB of 64;
    # v5e/v6e: ~102 MiB of 128), leaving headroom for Mosaic internal scratch.
    try:
        cap = int(pltpu.get_tpu_info().vmem_capacity_bytes)
    except Exception:
        cap = 64 * 1024 * 1024   # conservative fallback (v7x physical size)
    return int(cap * 0.8)


def multi_head_self_attention(x, packed_params, *, num_heads, batch_block=None):
    """x: (B, S, H).  packed_params: output of pack_mhsa_params."""
    B, S, H = x.shape
    assert H % num_heads == 0, "hidden_size must be divisible by num_heads"
    head_dim = H // num_heads

    wqkv = packed_params["wqkv"]      # (H, 3H), scale folded into the q block
    bqkv = packed_params["bqkv"]      # (1, 3H)
    wo_r = packed_params["wo_r"]      # (nh, d, H)
    bo = packed_params["bo"]          # (1, H)

    if batch_block is None:
        batch_block = _pick_batch_block(B, S)
    if B % batch_block != 0:
        raise ValueError(f"batch_block={batch_block} must divide batch={B}")
    b_blk = batch_block
    M = b_blk * S
    grid = (B // b_blk,)

    kernel = functools.partial(
        _mhsa_kernel, num_heads=num_heads, head_dim=head_dim)

    # VMEM accounting: weights (x2 in case single-buffering is unavailable),
    # double-buffered x/out blocks, f32/in-dtype intermediates; 2x headroom,
    # clamped to the generation-aware budget.
    x_item = jnp.dtype(x.dtype).itemsize
    w_item = jnp.dtype(wqkv.dtype).itemsize
    weight_bytes = (H * 3 * H + 3 * H + num_heads * head_dim * H + H) * w_item
    io_bytes = 2 * 2 * M * H * x_item
    inter_bytes = (M * 3 * H + 4 * M * H) * 4 + 2 * num_heads * b_blk * S * S * 4
    needed = 2 * weight_bytes + io_bytes + inter_bytes
    vmem_limit = int(min(max(2 * needed, 8 * 1024 * 1024), _vmem_budget_bytes()))

    x_spec = pl.BlockSpec((b_blk, S, H), lambda i: (i, 0, 0))
    o_spec = pl.BlockSpec((b_blk, S, H), lambda i: (i, 0, 0))

    def call(single_buffer_weights):
        # Grid-invariant weights/biases: constant index_map (fetched once) and,
        # when supported, a single VMEM buffer instead of the default two.
        const_kw = (
            {"pipeline_mode": pl.Buffered(buffer_count=1)}
            if single_buffer_weights else {})
        wqkv_spec = pl.BlockSpec((H, 3 * H), lambda i: (0, 0), **const_kw)
        bqkv_spec = pl.BlockSpec((1, 3 * H), lambda i: (0, 0), **const_kw)
        wo_spec = pl.BlockSpec((num_heads, head_dim, H),
                               lambda i: (0, 0, 0), **const_kw)
        bo_spec = pl.BlockSpec((1, H), lambda i: (0, 0), **const_kw)
        return pl.pallas_call(
            kernel,
            out_shape=jax.ShapeDtypeStruct((B, S, H), x.dtype),
            grid_spec=pltpu.PrefetchScalarGridSpec(
                num_scalar_prefetch=0,
                grid=grid,
                in_specs=[x_spec, wqkv_spec, bqkv_spec, wo_spec, bo_spec],
                out_specs=o_spec,
            ),
            compiler_params=pltpu.CompilerParams(
                dimension_semantics=("parallel",),
                vmem_limit_bytes=vmem_limit),
        )(x, wqkv, bqkv, wo_r, bo)

    try:
        return call(single_buffer_weights=True)
    except Exception:
        # Fallback for builds without pipeline_mode / Buffered(1) support.
        return call(single_buffer_weights=False)


def _reference(x, params, *, num_heads):
    """Pure-JAX reference reproducing the PyTorch forward (mask=None)."""
    B, S, H = x.shape
    d = H // num_heads
    scale = d ** -0.5

    def lin(t, w, b):
        return t @ w + b

    q = lin(x, params["wq"], params["bq"]).reshape(B, S, num_heads, d).transpose(0, 2, 1, 3)
    k = lin(x, params["wk"], params["bk"]).reshape(B, S, num_heads, d).transpose(0, 2, 1, 3)
    v = lin(x, params["wv"], params["bv"]).reshape(B, S, num_heads, d).transpose(0, 2, 1, 3)
    scores = jnp.einsum("bhqd,bhkd->bhqk", q, k) * scale
    attn = jax.nn.softmax(scores, axis=-1)
    out = jnp.einsum("bhqk,bhkd->bhqd", attn, v)
    out = out.transpose(0, 2, 1, 3).reshape(B, S, H)
    return lin(out, params["wo"], params["bo"])


def _init_params(key, hidden):
    # Deterministic init, roughly matching nn.Linear's uniform(-1/sqrt(in), 1/sqrt(in)).
    bound = hidden ** -0.5
    keys = jax.random.split(key, 8)
    names = ["wq", "bq", "wk", "bk", "wv", "bv", "wo", "bo"]
    params = {}
    for i, name in enumerate(names):
        shape = (hidden, hidden) if name.startswith("w") else (hidden,)
        params[name] = jax.random.uniform(
            keys[i], shape, jnp.float32, minval=-bound, maxval=bound)
    return params


if __name__ == "__main__":
    # H multiple of 128 -> lane-dense output tiles; B=4 exercises batch blocking.
    B, S, H, NUM_HEADS = 4, 16, 128, 4

    key = jax.random.PRNGKey(0)
    kx, kp = jax.random.split(key)
    x = jax.random.normal(kx, (B, S, H), jnp.float32)
    params = _init_params(kp, H)
    ref = _reference(x, params, num_heads=NUM_HEADS)

    # f32 path: tight check vs. the pure-JAX reference (exact-division softmax).
    packed_f32 = pack_mhsa_params(params, num_heads=NUM_HEADS)
    out = multi_head_self_attention(x, packed_f32, num_heads=NUM_HEADS)
    out = jax.block_until_ready(out)
    assert out.shape == (B, S, H)
    assert jnp.allclose(out, ref, atol=2e-3, rtol=2e-3), "f32 mismatch vs reference"

    # bf16 path: exercises the fast MXU route (operands cast back to bf16 before
    # every attention matmul); looser tolerance reflects bf16 operand rounding.
    packed_bf16 = pack_mhsa_params(params, num_heads=NUM_HEADS, dtype=jnp.bfloat16)
    out_bf16 = multi_head_self_attention(
        x.astype(jnp.bfloat16), packed_bf16, num_heads=NUM_HEADS)
    out_bf16 = jax.block_until_ready(out_bf16)
    assert out_bf16.shape == (B, S, H)
    assert jnp.allclose(out_bf16.astype(jnp.float32), ref, atol=5e-2, rtol=5e-2), \
        "bf16 mismatch vs reference"

    print("KERNEL_OK")
</pallas_src>

<mosaic_0001>
module attributes {stable_mosaic.version = 11 : i64} {
  func.func @_mhsa_kernel(%arg0: i32, %arg1: memref<4x16x128xf32, #tpu.memory_space<vmem>>, %arg2: memref<128x384xf32, #tpu.memory_space<vmem>>, %arg3: memref<1x384xf32, #tpu.memory_space<vmem>>, %arg4: memref<4x32x128xf32, #tpu.memory_space<vmem>>, %arg5: memref<1x128xf32, #tpu.memory_space<vmem>>, %arg6: memref<4x16x128xf32, #tpu.memory_space<vmem>>) attributes {dimension_semantics = [#tpu.dimension_semantics<parallel>], iteration_bounds = array<i64: 1>, scalar_prefetch = 0 : i64, scratch_operands = 0 : i64, tpu.core_type = #tpu.core_type<tc>, window_params = [{transform_indices = @transform_0, window_bounds = array<i64: 4, 16, 128>}, {pipeline_mode = #tpu.pipeline_mode<synchronous>, transform_indices = @transform_1, window_bounds = array<i64: 128, 384>}, {pipeline_mode = #tpu.pipeline_mode<synchronous>, transform_indices = @transform_2, window_bounds = array<i64: 1, 384>}, {pipeline_mode = #tpu.pipeline_mode<synchronous>, transform_indices = @transform_3, window_bounds = array<i64: 4, 32, 128>}, {pipeline_mode = #tpu.pipeline_mode<synchronous>, transform_indices = @transform_4, window_bounds = array<i64: 1, 128>}, {transform_indices = @transform_5, window_bounds = array<i64: 4, 16, 128>}]} {
    %c0 = arith.constant 0 : index
    %c0_0 = arith.constant 0 : index
    %c0_1 = arith.constant 0 : index
    %0 = vector.load %arg1[%c0, %c0_0, %c0_1] : memref<4x16x128xf32, #tpu.memory_space<vmem>>, vector<4x16x128xf32>
    %1 = vector.shape_cast %0 : vector<4x16x128xf32> to vector<64x128xf32>
    %c0_2 = arith.constant 0 : index
    %c0_3 = arith.constant 0 : index
    %2 = vector.load %arg2[%c0_2, %c0_3] : memref<128x384xf32, #tpu.memory_space<vmem>>, vector<128x384xf32>
    %cst = arith.constant dense<0.000000e+00> : vector<64x384xf32>
    %3 = tpu.matmul %1, %2, %cst {dimension_numbers = #tpu.dot_dimension_numbers<[1], [0], [0], [1], [0, 0, 1, 1], [], []>} : vector<64x128xf32>, vector<128x384xf32>, vector<64x384xf32> -> vector<64x384xf32>
    %c0_4 = arith.constant 0 : index
    %c0_5 = arith.constant 0 : index
    %4 = vector.load %arg3[%c0_4, %c0_5] : memref<1x384xf32, #tpu.memory_space<vmem>>, vector<1x384xf32>
    %5 = vector.broadcast %4 : vector<1x384xf32> to vector<64x384xf32>
    %6 = arith.addf %3, %5 : vector<64x384xf32>
    %7 = vector.extract_strided_slice %6 {offsets = [0, 0], sizes = [64, 128], strides = [1, 1]} : vector<64x384xf32> to vector<64x128xf32>
    %8 = vector.extract_strided_slice %6 {offsets = [0, 128], sizes = [64, 128], strides = [1, 1]} : vector<64x384xf32> to vector<64x128xf32>
    %9 = vector.extract_strided_slice %6 {offsets = [0, 256], sizes = [64, 128], strides = [1, 1]} : vector<64x384xf32> to vector<64x128xf32>
    %10 = vector.shape_cast %7 : vector<64x128xf32> to vector<64x4x32xf32>
    %11 = tpu.transpose %10, [1, 0, 2] : vector<64x4x32xf32> -> vector<4x64x32xf32>
    %12 = vector.shape_cast %11 : vector<4x64x32xf32> to vector<16x16x32xf32>
    %13 = vector.shape_cast %8 : vector<64x128xf32> to vector<64x4x32xf32>
    %14 = tpu.transpose %13, [1, 0, 2] : vector<64x4x32xf32> -> vector<4x64x32xf32>
    %15 = vector.shape_cast %14 : vector<4x64x32xf32> to vector<16x16x32xf32>
    %16 = vector.shape_cast %9 : vector<64x128xf32> to vector<64x4x32xf32>
    %17 = tpu.transpose %16, [1, 0, 2] : vector<64x4x32xf32> -> vector<4x64x32xf32>
    %18 = vector.shape_cast %17 : vector<4x64x32xf32> to vector<16x16x32xf32>
    "tpu.trace_start"() <{level = 10 : i32, message = "gqd,gkd->gqk"}> : () -> ()
    %cst_6 = arith.constant dense<0.000000e+00> : vector<16x16x16xf32>
    %19 = tpu.matmul %12, %15, %cst_6 {dimension_numbers = #tpu.dot_dimension_numbers<[2], [2], [1], [1], [0, 0, 0, 1, 1, 1], [0], [0]>} : vector<16x16x32xf32>, vector<16x16x32xf32>, vector<16x16x16xf32> -> vector<16x16x16xf32>
    "tpu.trace_stop"() : () -> ()
    %cst_7 = arith.constant dense<0xFF800000> : vector<16x16xf32>
    %20 = vector.multi_reduction <maximumf>, %19, %cst_7 [2] : vector<16x16x16xf32> to vector<16x16xf32>
    %21 = vector.shape_cast %20 : vector<16x16xf32> to vector<16x16x1xf32>
    %22 = vector.broadcast %21 : vector<16x16x1xf32> to vector<16x16x16xf32>
    %23 = arith.subf %19, %22 : vector<16x16x16xf32>
    %24 = math.exp %23 : vector<16x16x16xf32>
    %cst_8 = arith.constant dense<0.000000e+00> : vector<16x16xf32>
    %25 = vector.multi_reduction <add>, %24, %cst_8 [2] : vector<16x16x16xf32> to vector<16x16xf32>
    %26 = vector.shape_cast %25 : vector<16x16xf32> to vector<16x16x1xf32>
    %27 = vector.broadcast %26 : vector<16x16x1xf32> to vector<16x16x16xf32>
    %28 = arith.divf %24, %27 : vector<16x16x16xf32>
    "tpu.trace_start"() <{level = 10 : i32, message = "gqk,gkd->gqd"}> : () -> ()
    %cst_9 = arith.constant dense<0.000000e+00> : vector<16x16x32xf32>
    %29 = tpu.matmul %28, %18, %cst_9 {dimension_numbers = #tpu.dot_dimension_numbers<[2], [1], [1], [2], [0, 0, 0, 1, 1, 2], [0], [0]>} : vector<16x16x16xf32>, vector<16x16x32xf32>, vector<16x16x32xf32> -> vector<16x16x32xf32>
    "tpu.trace_stop"() : () -> ()
    %30 = vector.shape_cast %29 : vector<16x16x32xf32> to vector<4x64x32xf32>
    %c0_10 = arith.constant 0 : index
    %c0_11 = arith.constant 0 : index
    %c0_12 = arith.constant 0 : index
    %31 = vector.load %arg4[%c0_10, %c0_11, %c0_12] : memref<4x32x128xf32, #tpu.memory_space<vmem>>, vector<4x32x128xf32>
    %32 = vector.extract_strided_slice %30 {offsets = [0, 0, 0], sizes = [1, 64, 32], strides = [1, 1, 1]} : vector<4x64x32xf32> to vector<1x64x32xf32>
    %33 = vector.shape_cast %32 : vector<1x64x32xf32> to vector<64x32xf32>
    %34 = vector.extract_strided_slice %31 {offsets = [0, 0, 0], sizes = [1, 32, 128], strides = [1, 1, 1]} : vector<4x32x128xf32> to vector<1x32x128xf32>
    %35 = vector.shape_cast %34 : vector<1x32x128xf32> to vector<32x128xf32>
    %cst_13 = arith.constant dense<0.000000e+00> : vector<64x128xf32>
    %36 = tpu.matmul %33, %35, %cst_13 {dimension_numbers = #tpu.dot_dimension_numbers<[1], [0], [0], [1], [0, 0, 1, 1], [], []>} : vector<64x32xf32>, vector<32x128xf32>, vector<64x128xf32> -> vector<64x128xf32>
    %37 = vector.extract_strided_slice %30 {offsets = [1, 0, 0], sizes = [1, 64, 32], strides = [1, 1, 1]} : vector<4x64x32xf32> to vector<1x64x32xf32>
    %38 = vector.shape_cast %37 : vector<1x64x32xf32> to vector<64x32xf32>
    %39 = vector.extract_strided_slice %31 {offsets = [1, 0, 0], sizes = [1, 32, 128], strides = [1, 1, 1]} : vector<4x32x128xf32> to vector<1x32x128xf32>
    %40 = vector.shape_cast %39 : vector<1x32x128xf32> to vector<32x128xf32>
    %cst_14 = arith.constant dense<0.000000e+00> : vector<64x128xf32>
    %41 = tpu.matmul %38, %40, %cst_14 {dimension_numbers = #tpu.dot_dimension_numbers<[1], [0], [0], [1], [0, 0, 1, 1], [], []>} : vector<64x32xf32>, vector<32x128xf32>, vector<64x128xf32> -> vector<64x128xf32>
    %42 = arith.addf %36, %41 : vector<64x128xf32>
    %43 = vector.extract_strided_slice %30 {offsets = [2, 0, 0], sizes = [1, 64, 32], strides = [1, 1, 1]} : vector<4x64x32xf32> to vector<1x64x32xf32>
    %44 = vector.shape_cast %43 : vector<1x64x32xf32> to vector<64x32xf32>
    %45 = vector.extract_strided_slice %31 {offsets = [2, 0, 0], sizes = [1, 32, 128], strides = [1, 1, 1]} : vector<4x32x128xf32> to vector<1x32x128xf32>
    %46 = vector.shape_cast %45 : vector<1x32x128xf32> to vector<32x128xf32>
    %cst_15 = arith.constant dense<0.000000e+00> : vector<64x128xf32>
    %47 = tpu.matmul %44, %46, %cst_15 {dimension_numbers = #tpu.dot_dimension_numbers<[1], [0], [0], [1], [0, 0, 1, 1], [], []>} : vector<64x32xf32>, vector<32x128xf32>, vector<64x128xf32> -> vector<64x128xf32>
    %48 = arith.addf %42, %47 : vector<64x128xf32>
    %49 = vector.extract_strided_slice %30 {offsets = [3, 0, 0], sizes = [1, 64, 32], strides = [1, 1, 1]} : vector<4x64x32xf32> to vector<1x64x32xf32>
    %50 = vector.shape_cast %49 : vector<1x64x32xf32> to vector<64x32xf32>
    %51 = vector.extract_strided_slice %31 {offsets = [3, 0, 0], sizes = [1, 32, 128], strides = [1, 1, 1]} : vector<4x32x128xf32> to vector<1x32x128xf32>
    %52 = vector.shape_cast %51 : vector<1x32x128xf32> to vector<32x128xf32>
    %cst_16 = arith.constant dense<0.000000e+00> : vector<64x128xf32>
    %53 = tpu.matmul %50, %52, %cst_16 {dimension_numbers = #tpu.dot_dimension_numbers<[1], [0], [0], [1], [0, 0, 1, 1], [], []>} : vector<64x32xf32>, vector<32x128xf32>, vector<64x128xf32> -> vector<64x128xf32>
    %54 = arith.addf %48, %53 : vector<64x128xf32>
    %c0_17 = arith.constant 0 : index
    %c0_18 = arith.constant 0 : index
    %55 = vector.load %arg5[%c0_17, %c0_18] : memref<1x128xf32, #tpu.memory_space<vmem>>, vector<1x128xf32>
    %56 = vector.broadcast %55 : vector<1x128xf32> to vector<64x128xf32>
    %57 = arith.addf %54, %56 : vector<64x128xf32>
    %58 = vector.shape_cast %57 : vector<64x128xf32> to vector<4x16x128xf32>
    %c0_19 = arith.constant 0 : index
    %c0_20 = arith.constant 0 : index
    %c0_21 = arith.constant 0 : index
    %59 = vector.load %arg6[%c0_19, %c0_20, %c0_21] : memref<4x16x128xf32, #tpu.memory_space<vmem>>, vector<4x16x128xf32>
    tpu.vector_store %arg6[%c0_19, %c0_20, %c0_21], %58 {strides = array<i32>} : memref<4x16x128xf32, #tpu.memory_space<vmem>>, vector<4x16x128xf32>,
    return
  }
  func.func @transform_0(%arg0: i32) -> (i32, i32, i32) {
    %c0_i32 = arith.constant 0 : i32
    %c0_i32_0 = arith.constant 0 : i32
    %c0_i32_1 = arith.constant 0 : i32
    return %arg0, %c0_i32, %c0_i32_0 : i32, i32, i32
  }
  func.func @transform_1(%arg0: i32) -> (i32, i32) {
    %c0_i32 = arith.constant 0 : i32
    %c0_i32_0 = arith.constant 0 : i32
    %c0_i32_1 = arith.constant 0 : i32
    return %c0_i32, %c0_i32_0 : i32, i32
  }
  func.func @transform_2(%arg0: i32) -> (i32, i32) {
    %c0_i32 = arith.constant 0 : i32
    %c0_i32_0 = arith.constant 0 : i32
    %c0_i32_1 = arith.constant 0 : i32
    return %c0_i32, %c0_i32_0 : i32, i32
  }
  func.func @transform_3(%arg0: i32) -> (i32, i32, i32) {
    %c0_i32 = arith.constant 0 : i32
    %c0_i32_0 = arith.constant 0 : i32
    %c0_i32_1 = arith.constant 0 : i32
    %c0_i32_2 = arith.constant 0 : i32
    return %c0_i32, %c0_i32_0, %c0_i32_1 : i32, i32, i32
  }
  func.func @transform_4(%arg0: i32) -> (i32, i32) {
    %c0_i32 = arith.constant 0 : i32
    %c0_i32_0 = arith.constant 0 : i32
    %c0_i32_1 = arith.constant 0 : i32
    return %c0_i32, %c0_i32_0 : i32, i32
  }
  func.func @transform_5(%arg0: i32) -> (i32, i32, i32) {
    %c0_i32 = arith.constant 0 : i32
    %c0_i32_0 = arith.constant 0 : i32
    %c0_i32_1 = arith.constant 0 : i32
    return %arg0, %c0_i32, %c0_i32_0 : i32, i32, i32
  }
}

module attributes {stable_mosaic.version = 11 : i64} {
  func.func @_mhsa_kernel(%arg0: i32, %arg1: memref<4x16x128xf32, #tpu.memory_space<vmem>>, %arg2: memref<128x384xf32, #tpu.memory_space<vmem>>, %arg3: memref<1x384xf32, #tpu.memory_space<vmem>>, %arg4: memref<4x32x128xf32, #tpu.memory_space<vmem>>, %arg5: memref<1x128xf32, #tpu.memory_space<vmem>>, %arg6: memref<4x16x128xf32, #tpu.memory_space<vmem>>) attributes {dimension_semantics = [#tpu.dimension_semantics<parallel>], iteration_bounds = array<i64: 1>, scalar_prefetch = 0 : i64, scratch_operands = 0 : i64, tpu.core_type = #tpu.core_type<tc>, window_params = [{transform_indices = @transform_0, window_bounds = array<i64: 4, 16, 128>}, {pipeline_mode = #tpu.pipeline_mode<synchronous>, transform_indices = @transform_1, window_bounds = array<i64: 128, 384>}, {pipeline_mode = #tpu.pipeline_mode<synchronous>, transform_indices = @transform_2, window_bounds = array<i64: 1, 384>}, {pipeline_mode = #tpu.pipeline_mode<synchronous>, transform_indices = @transform_3, window_bounds = array<i64: 4, 32, 128>}, {pipeline_mode = #tpu.pipeline_mode<synchronous>, transform_indices = @transform_4, window_bounds = array<i64: 1, 128>}, {transform_indices = @transform_5, window_bounds = array<i64: 4, 16, 128>}]} {
    %c0 = arith.constant 0 : index
    %c0_0 = arith.constant 0 : index
    %c0_1 = arith.constant 0 : index
    %0 = vector.load %arg1[%c0, %c0_0, %c0_1] : memref<4x16x128xf32, #tpu.memory_space<vmem>>, vector<4x16x128xf32>
    %1 = vector.shape_cast %0 : vector<4x16x128xf32> to vector<64x128xf32>
    %c0_2 = arith.constant 0 : index
    %c0_3 = arith.constant 0 : index
    %2 = vector.load %arg2[%c0_2, %c0_3] : memref<128x384xf32, #tpu.memory_space<vmem>>, vector<128x384xf32>
    %cst = arith.constant dense<0.000000e+00> : vector<64x384xf32>
    %3 = tpu.matmul %1, %2, %cst {dimension_numbers = #tpu.dot_dimension_numbers<[1], [0], [0], [1], [0, 0, 1, 1], [], []>} : vector<64x128xf32>, vector<128x384xf32>, vector<64x384xf32> -> vector<64x384xf32>
    %c0_4 = arith.constant 0 : index
    %c0_5 = arith.constant 0 : index
    %4 = vector.load %arg3[%c0_4, %c0_5] : memref<1x384xf32, #tpu.memory_space<vmem>>, vector<1x384xf32>
    %5 = vector.broadcast %4 : vector<1x384xf32> to vector<64x384xf32>
    %6 = arith.addf %3, %5 : vector<64x384xf32>
    %7 = vector.extract_strided_slice %6 {offsets = [0, 0], sizes = [64, 128], strides = [1, 1]} : vector<64x384xf32> to vector<64x128xf32>
    %8 = vector.extract_strided_slice %6 {offsets = [0, 128], sizes = [64, 128], strides = [1, 1]} : vector<64x384xf32> to vector<64x128xf32>
    %9 = vector.extract_strided_slice %6 {offsets = [0, 256], sizes = [64, 128], strides = [1, 1]} : vector<64x384xf32> to vector<64x128xf32>
    %10 = vector.shape_cast %7 : vector<64x128xf32> to vector<64x4x32xf32>
    %11 = tpu.transpose %10, [1, 0, 2] : vector<64x4x32xf32> -> vector<4x64x32xf32>
    %12 = vector.shape_cast %11 : vector<4x64x32xf32> to vector<16x16x32xf32>
    %13 = vector.shape_cast %8 : vector<64x128xf32> to vector<64x4x32xf32>
    %14 = tpu.transpose %13, [1, 0, 2] : vector<64x4x32xf32> -> vector<4x64x32xf32>
    %15 = vector.shape_cast %14 : vector<4x64x32xf32> to vector<16x16x32xf32>
    %16 = vector.shape_cast %9 : vector<64x128xf32> to vector<64x4x32xf32>
    %17 = tpu.transpose %16, [1, 0, 2] : vector<64x4x32xf32> -> vector<4x64x32xf32>
    %18 = vector.shape_cast %17 : vector<4x64x32xf32> to vector<16x16x32xf32>
    "tpu.trace_start"() <{level = 10 : i32, message = "gqd,gkd->gqk"}> : () -> ()
    %cst_6 = arith.constant dense<0.000000e+00> : vector<16x16x16xf32>
    %19 = tpu.matmul %12, %15, %cst_6 {dimension_numbers = #tpu.dot_dimension_numbers<[2], [2], [1], [1], [0, 0, 0, 1, 1, 1], [0], [0]>} : vector<16x16x32xf32>, vector<16x16x32xf32>, vector<16x16x16xf32> -> vector<16x16x16xf32>
    "tpu.trace_stop"() : () -> ()
    %cst_7 = arith.constant dense<0xFF800000> : vector<16x16xf32>
    %20 = vector.multi_reduction <maximumf>, %19, %cst_7 [2] : vector<16x16x16xf32> to vector<16x16xf32>
    %21 = vector.shape_cast %20 : vector<16x16xf32> to vector<16x16x1xf32>
    %22 = vector.broadcast %21 : vector<16x16x1xf32> to vector<16x16x16xf32>
    %23 = arith.subf %19, %22 : vector<16x16x16xf32>
    %24 = math.exp %23 : vector<16x16x16xf32>
    %cst_8 = arith.constant dense<0.000000e+00> : vector<16x16xf32>
    %25 = vector.multi_reduction <add>, %24, %cst_8 [2] : vector<16x16x16xf32> to vector<16x16xf32>
    %26 = vector.shape_cast %25 : vector<16x16xf32> to vector<16x16x1xf32>
    %27 = vector.broadcast %26 : vector<16x16x1xf32> to vector<16x16x16xf32>
    %28 = arith.divf %24, %27 : vector<16x16x16xf32>
    "tpu.trace_start"() <{level = 10 : i32, message = "gqk,gkd->gqd"}> : () -> ()
    %cst_9 = arith.constant dense<0.000000e+00> : vector<16x16x32xf32>
    %29 = tpu.matmul %28, %18, %cst_9 {dimension_numbers = #tpu.dot_dimension_numbers<[2], [1], [1], [2], [0, 0, 0, 1, 1, 2], [0], [0]>} : vector<16x16x16xf32>, vector<16x16x32xf32>, vector<16x16x32xf32> -> vector<16x16x32xf32>
    "tpu.trace_stop"() : () -> ()
    %30 = vector.shape_cast %29 : vector<16x16x32xf32> to vector<4x64x32xf32>
    %c0_10 = arith.constant 0 : index
    %c0_11 = arith.constant 0 : index
    %c0_12 = arith.constant 0 : index
    %31 = vector.load %arg4[%c0_10, %c0_11, %c0_12] : memref<4x32x128xf32, #tpu.memory_space<vmem>>, vector<4x32x128xf32>
    %32 = vector.extract_strided_slice %30 {offsets = [0, 0, 0], sizes = [1, 64, 32], strides = [1, 1, 1]} : vector<4x64x32xf32> to vector<1x64x32xf32>
    %33 = vector.shape_cast %32 : vector<1x64x32xf32> to vector<64x32xf32>
    %34 = vector.extract_strided_slice %31 {offsets = [0, 0, 0], sizes = [1, 32, 128], strides = [1, 1, 1]} : vector<4x32x128xf32> to vector<1x32x128xf32>
    %35 = vector.shape_cast %34 : vector<1x32x128xf32> to vector<32x128xf32>
    %cst_13 = arith.constant dense<0.000000e+00> : vector<64x128xf32>
    %36 = tpu.matmul %33, %35, %cst_13 {dimension_numbers = #tpu.dot_dimension_numbers<[1], [0], [0], [1], [0, 0, 1, 1], [], []>} : vector<64x32xf32>, vector<32x128xf32>, vector<64x128xf32> -> vector<64x128xf32>
    %37 = vector.extract_strided_slice %30 {offsets = [1, 0, 0], sizes = [1, 64, 32], strides = [1, 1, 1]} : vector<4x64x32xf32> to vector<1x64x32xf32>
    %38 = vector.shape_cast %37 : vector<1x64x32xf32> to vector<64x32xf32>
    %39 = vector.extract_strided_slice %31 {offsets = [1, 0, 0], sizes = [1, 32, 128], strides = [1, 1, 1]} : vector<4x32x128xf32> to vector<1x32x128xf32>
    %40 = vector.shape_cast %39 : vector<1x32x128xf32> to vector<32x128xf32>
    %cst_14 = arith.constant dense<0.000000e+00> : vector<64x128xf32>
    %41 = tpu.matmul %38, %40, %cst_14 {dimension_numbers = #tpu.dot_dimension_numbers<[1], [0], [0], [1], [0, 0, 1, 1], [], []>} : vector<64x32xf32>, vector<32x128xf32>, vector<64x128xf32> -> vector<64x128xf32>
    %42 = arith.addf %36, %41 : vector<64x128xf32>
    %43 = vector.extract_strided_slice %30 {offsets = [2, 0, 0], sizes = [1, 64, 32], strides = [1, 1, 1]} : vector<4x64x32xf32> to vector<1x64x32xf32>
    %44 = vector.shape_cast %43 : vector<1x64x32xf32> to vector<64x32xf32>
    %45 = vector.extract_strided_slice %31 {offsets = [2, 0, 0], sizes = [1, 32, 128], strides = [1, 1, 1]} : vector<4x32x128xf32> to vector<1x32x128xf32>
    %46 = vector.shape_cast %45 : vector<1x32x128xf32> to vector<32x128xf32>
    %cst_15 = arith.constant dense<0.000000e+00> : vector<64x128xf32>
    %47 = tpu.matmul %44, %46, %cst_15 {dimension_numbers = #tpu.dot_dimension_numbers<[1], [0], [0], [1], [0, 0, 1, 1], [], []>} : vector<64x32xf32>, vector<32x128xf32>, vector<64x128xf32> -> vector<64x128xf32>
    %48 = arith.addf %42, %47 : vector<64x128xf32>
    %49 = vector.extract_strided_slice %30 {offsets = [3, 0, 0], sizes = [1, 64, 32], strides = [1, 1, 1]} : vector<4x64x32xf32> to vector<1x64x32xf32>
    %50 = vector.shape_cast %49 : vector<1x64x32xf32> to vector<64x32xf32>
    %51 = vector.extract_strided_slice %31 {offsets = [3, 0, 0], sizes = [1, 32, 128], strides = [1, 1, 1]} : vector<4x32x128xf32> to vector<1x32x128xf32>
    %52 = vector.shape_cast %51 : vector<1x32x128xf32> to vector<32x128xf32>
    %cst_16 = arith.constant dense<0.000000e+00> : vector<64x128xf32>
    %53 = tpu.matmul %50, %52, %cst_16 {dimension_numbers = #tpu.dot_dimension_numbers<[1], [0], [0], [1], [0, 0, 1, 1], [], []>} : vector<64x32xf32>, vector<32x128xf32>, vector<64x128xf32> -> vector<64x128xf32>
    %54 = arith.addf %48, %53 : vector<64x128xf32>
    %c0_17 = arith.constant 0 : index
    %c0_18 = arith.constant 0 : index
    %55 = vector.load %arg5[%c0_17, %c0_18] : memref<1x128xf32, #tpu.memory_space<vmem>>, vector<1x128xf32>
    %56 = vector.broadcast %55 : vector<1x128xf32> to vector<64x128xf32>
    %57 = arith.addf %54, %56 : vector<64x128xf32>
    %58 = vector.shape_cast %57 : vector<64x128xf32> to vector<4x16x128xf32>
    %c0_19 = arith.constant 0 : index
    %c0_20 = arith.constant 0 : index
    %c0_21 = arith.constant 0 : index
    %59 = vector.load %arg6[%c0_19, %c0_20, %c0_21] : memref<4x16x128xf32, #tpu.memory_space<vmem>>, vector<4x16x128xf32>
    tpu.vector_store %arg6[%c0_19, %c0_20, %c0_21], %58 {strides = array<i32>} : memref<4x16x128xf32, #tpu.memory_space<vmem>>, vector<4x16x128xf32>,
    return
  }
  func.func @transform_0(%arg0: i32) -> (i32, i32, i32) {
    %c0_i32 = arith.constant 0 : i32
    %c0_i32_0 = arith.constant 0 : i32
    %c0_i32_1 = arith.constant 0 : i32
    return %arg0, %c0_i32, %c0_i32_0 : i32, i32, i32
  }
  func.func @transform_1(%arg0: i32) -> (i32, i32) {
    %c0_i32 = arith.constant 0 : i32
    %c0_i32_0 = arith.constant 0 : i32
    %c0_i32_1 = arith.constant 0 : i32
    return %c0_i32, %c0_i32_0 : i32, i32
  }
  func.func @transform_2(%arg0: i32) -> (i32, i32) {
    %c0_i32 = arith.constant 0 : i32
    %c0_i32_0 = arith.constant 0 : i32
    %c0_i32_1 = arith.constant 0 : i32
    return %c0_i32, %c0_i32_0 : i32, i32
  }
  func.func @transform_3(%arg0: i32) -> (i32, i32, i32) {
    %c0_i32 = arith.constant 0 : i32
    %c0_i32_0 = arith.constant 0 : i32
    %c0_i32_1 = arith.constant 0 : i32
    %c0_i32_2 = arith.constant 0 : i32
    return %c0_i32, %c0_i32_0, %c0_i32_1 : i32, i32, i32
  }
  func.func @transform_4(%arg0: i32) -> (i32, i32) {
    %c0_i32 = arith.constant 0 : i32
    %c0_i32_0 = arith.constant 0 : i32
    %c0_i32_1 = arith.constant 0 : i32
    return %c0_i32, %c0_i32_0 : i32, i32
  }
  func.func @transform_5(%arg0: i32) -> (i32, i32, i32) {
    %c0_i32 = arith.constant 0 : i32
    %c0_i32_0 = arith.constant 0 : i32
    %c0_i32_1 = arith.constant 0 : i32
    return %arg0, %c0_i32, %c0_i32_0 : i32, i32, i32
  }
}

</mosaic_0001>

<bundles_post_ra>
// kernel: tpu_custom_call.1
= control target key start
LH: loop header
LB: loop body
LE: loop exit
PB: predicated region body
PF: predicated region fallthrough
CT: control target
= control target key end

     0   :  { %10 = vsyncpa [#allocation3], 0  ;;  %s10655_s0 = inlined_call_operand.hbm [shape: f32[4,16,128], index: 0, kind: input, shape index: {}]   ;;  %s10656_s1 = inlined_call_operand.hbm [shape: f32[128,384], index: 1, kind: input, shape index: {}]   ;;  %s10657_s2 = inlined_call_operand.vmem [shape: f32[1,384], index: 2, kind: input, shape index: {}]   ;;  %s10658_s3 = inlined_call_operand.hbm [shape: f32[4,32,128], index: 3, kind: input, shape index: {}]   ;;  %s10659_s4 = inlined_call_operand.vmem [shape: f32[1,128], index: 4, kind: input, shape index: {}]   ;;  %s10660_s5 = inlined_call_operand.hbm [shape: f32[4,16,128], index: 5, kind: output, shape index: {}]  }
   0x1   :  { %11 = vsyncpa [#allocation6], 0 }
   0x2   :  { %12 = vsyncpa [#allocation4], 0  ;;  %s8441_s18 = smov [#allocation5]  }
   0x3   :  { %s30_s19 = sshll.u32 %s8441_s18, 4  ;;  %s31_s19 = int_to_ptr.vmem [resolvable:$true] %s30_s19 }
   0x4   :  { %s8363_s20 = scalar_lea.vmem %s31_s19, 6144  ;;  %p8368_p1 = scmp.lt.s32.totalorder %s31_s19, %s31_s19 }
   0x5   :  { %p8364_p0 = scmp.ne.s32.totalorder %s31_s19, %s8363_s20  ;;  %p8369_p2 = scmp.lt.s32.totalorder %s8363_s20, %s8363_s20 }
   0x7   :  { %p8370_p3 = por %p8369_p2, %p8368_p1 }
   0x9   :  { %p8371_p4 = pnand %p8370_p3, %p8364_p0 }
   0xb   :  { %8374 = shalt.err (!%p8371_p4)
}
   0xc   :  { %s8442_s21 = smov 384   ;;  %s8443_s22 = smov 24  }
   0xd   :  { %36 = dma.hbm_to_vmem [thread:$0]  %s10656_s1, 6144, %s31_s19, [#allocation6], %s8442_s21, %s8442_s21, %s8443_s22  }
   0xe   :  { %s8444_s25 = smov [#allocation2]  }
   0xf   :  { %s18_s26 = sshll.u32 %s8444_s25, 4  ;;  %s19_s26 = int_to_ptr.vmem [resolvable:$true] %s18_s26 }
  0x10   :  { %s8383_s27 = scalar_lea.vmem %s19_s26, 1024  ;;  %p8388_p6 = scmp.lt.s32.totalorder %s19_s26, %s19_s26 }
  0x11   :  { %p8384_p5 = scmp.ne.s32.totalorder %s19_s26, %s8383_s27  ;;  %p8389_p7 = scmp.lt.s32.totalorder %s8383_s27, %s8383_s27 }
  0x13   :  { %p8390_p8 = por %p8389_p7, %p8388_p6 }
  0x15   :  { %p8391_p9 = pnand %p8390_p8, %p8384_p5 }
  0x17   :  { %8394 = shalt.err (!%p8391_p9)
}
  0x18   :  { %s8445_s28 = smov 128   ;;  %s8446_s29 = smov 8  }
  0x19   :  { %24 = dma.hbm_to_vmem [thread:$0]  %s10655_s0, 1024, %s19_s26, [#allocation3], %s8445_s28, %s8445_s28, %s8446_s29  }
  0x1a   :  { %s8447_s1 = smov [#allocation7]  }
  0x1b   :  { %s44_s7 = sshll.u32 %s8447_s1, 4  ;;  %s45_s7 = int_to_ptr.vmem [resolvable:$true] %s44_s7 }
  0x1c   :  { %s8403_s8 = scalar_lea.vmem %s45_s7, 2048  ;;  %p8408_p11 = scmp.lt.s32.totalorder %s45_s7, %s45_s7 }
  0x1d   :  { %p8404_p10 = scmp.ne.s32.totalorder %s45_s7, %s8403_s8  ;;  %p8409_p12 = scmp.lt.s32.totalorder %s8403_s8, %s8403_s8 }
  0x1f   :  { %p8410_p13 = por %p8409_p12, %p8408_p11 }
  0x21   :  { %p8411_p0 = pnand %p8410_p13, %p8404_p10 }
  0x23   :  { %8414 = shalt.err (!%p8411_p0)
}
  0x24   :  { %50 = dma.hbm_to_vmem [thread:$0]  %s10658_s3, 2048, %s45_s7, [#allocation6], %s8445_s28, %s8445_s28, %s8446_s29  }
  0x25   :  { %8435 = dma.done.wait [#allocation3], 1024  }
  0x26   :  { %8436 = vsyncadd [#allocation3], 4294966272 }
  0x27   :  { %8437 = dma.done.wait [#allocation6], 8192  }
  0x28   :  { %8438 = vsyncadd [#allocation6], 4294959104  ;;  %v8448_v0 = vmov 0.0   ;;  %v116_v1 = vld [vmem:[#allocation5 + $0x170] sm:$0xff]  ;;  %v115_v2 = vld [vmem:[#allocation5 + $0x168] sm:$0xff]  ;;  %v120_v57 = vlaneseq  ;;  %s8449_s11 = smov 64  }
  0x29   :  { %199 = vmatprep.mubr.f32.mxu0 %v8448_v0  ;;  %v113_v3 = vld [vmem:[#allocation5 + $0x158] sm:$0xff]  ;;  %135 = vmatprep.subr.mxu0 %v116_v1  ;;  %v112_v4 = vld [vmem:[#allocation5 + $0x150] sm:$0xff]  ;;  %v110_v5 = vld [vmem:[#allocation5 + $0x140] sm:$0xff]  ;;  %s8450_s12 = smov 96   ;;  %vm3857_vm0 = vcmask 261120   ;;  %vm5250_vm1 = vcmask 130048  }
  0x2a   :  { %136 = vmatpush1.msra.mxu0 %v115_v2  ;;  %v109_v6 = vld [vmem:[#allocation5 + $0x138] sm:$0xff]  ;;  %v107_v7 = vld [vmem:[#allocation5 + $0x128] sm:$0xff]  ;;  %v106_v8 = vld [vmem:[#allocation5 + $0x120] sm:$0xff]  ;;  %v8512_v58 = vshrl.u32 %v120_v57, 7 }
  0x2b   :  { %137 = vmatprep.subr.mxu0 %v113_v3  ;;  %v104_v9 = vld [vmem:[#allocation5 + $0x110] sm:$0xff]  ;;  %v103_v10 = vld [vmem:[#allocation5 + $0x108] sm:$0xff]  ;;  %v101_v11 = vld [vmem:[#allocation5 + $0xf8] sm:$0xff] }
  0x2c   :  { %138 = vmatpush1.msra.mxu0 %v112_v4  ;;  %v100_v12 = vld [vmem:[#allocation5 + $0xf0] sm:$0xff]  ;;  %v98_v13 = vld [vmem:[#allocation5 + $0xe0] sm:$0xff]  ;;  %v97_v15 = vld [vmem:[#allocation5 + $0xd8] sm:$0xff]  ;;  %v122_v59 = vsub.s32 0, %v8512_v58  ;;  %v126_v62 = vsub.s32 1, %v8512_v58 }
  0x2d   :  { %139 = vmatprep.subr.mxu0 %v110_v5  ;;  %v8501_v14 = vld [vmem:[#allocation2] sm:$0xff]  ;;  %v95_v16 = vld [vmem:[#allocation5 + $0xc8] sm:$0xff]  ;;  %v117_v18 = vld [vmem:[#allocation5 + $0x178] sm:$0xff] }
  0x2e   :  { %140 = vmatpush1.msra.mxu0 %v109_v6  ;;  %7897 = vmatprep.mubr.f32.mxu1 %v8501_v14  ;;  %v94_v17 = vld [vmem:[#allocation5 + $0xc0] sm:$0xff]  ;;  %v92_v20 = vld [vmem:[#allocation5 + $0xb0] sm:$0xff]  ;;  %v91_v21 = vld [vmem:[#allocation5 + $0xa8] sm:$0xff] }
  0x2f   :  { %141 = vmatprep.subr.mxu0 %v107_v7  ;;  %v114_v19 = vld [vmem:[#allocation5 + $0x160] sm:$0xff]  ;;  %7865 = vmatprep.subr.mxu1 %v117_v18  ;;  %v111_v22 = vld [vmem:[#allocation5 + $0x148] sm:$0xff]  ;;  %v89_v23 = vld [vmem:[#allocation5 + $0x98] sm:$0xff] }
  0x30   :  { %142 = vmatpush1.msra.mxu0 %v106_v8  ;;  %7866 = vmatpush3.msra.mxu1 %v117_v18  ;;  %v88_v24 = vld [vmem:[#allocation5 + $0x90] sm:$0xff]  ;;  %v86_v26 = vld [vmem:[#allocation5 + $0x80] sm:$0xff]  ;;  %v85_v27 = vld [vmem:[#allocation5 + $0x78] sm:$0xff] }
  0x31   :  { %143 = vmatprep.subr.mxu0 %v104_v9  ;;  %7867 = vmatprep.subr.mxu1 %v114_v19  ;;  %v108_v25 = vld [vmem:[#allocation5 + $0x130] sm:$0xff]  ;;  %v105_v28 = vld [vmem:[#allocation5 + $0x118] sm:$0xff]  ;;  %v83_v29 = vld [vmem:[#allocation5 + $0x68] sm:$0xff] }
  0x32   :  { %144 = vmatpush1.msra.mxu0 %v103_v10  ;;  %7868 = vmatpush3.msra.mxu1 %v114_v19  ;;  %v82_v30 = vld [vmem:[#allocation5 + $0x60] sm:$0xff]  ;;  %v80_v32 = vld [vmem:[#allocation5 + $0x50] sm:$0xff]  ;;  %v79_v33 = vld [vmem:[#allocation5 + $0x48] sm:$0xff] }
  0x33   :  { %145 = vmatprep.subr.mxu0 %v101_v11  ;;  %7869 = vmatprep.subr.mxu1 %v111_v22  ;;  %v102_v31 = vld [vmem:[#allocation5 + $0x100] sm:$0xff]  ;;  %v99_v34 = vld [vmem:[#allocation5 + $0xe8] sm:$0xff]  ;;  %v77_v35 = vld [vmem:[#allocation5 + $0x38] sm:$0xff] }
  0x34   :  { %146 = vmatpush1.msra.mxu0 %v100_v12  ;;  %7870 = vmatpush3.msra.mxu1 %v111_v22  ;;  %v76_v36 = vld [vmem:[#allocation5 + $0x30] sm:$0xff]  ;;  %v74_v38 = vld [vmem:[#allocation5 + $0x20] sm:$0xff]  ;;  %v73_v39 = vld [vmem:[#allocation5 + $0x18] sm:$0xff] }
  0x35   :  { %147 = vmatprep.subr.mxu0 %v98_v13  ;;  %7871 = vmatprep.subr.mxu1 %v108_v25  ;;  %v96_v37 = vld [vmem:[#allocation5 + $0xd0] sm:$0xff]  ;;  %v93_v40 = vld [vmem:[#allocation5 + $0xb8] sm:$0xff]  ;;  %v71_v41 = vld [vmem:[#allocation5 + $0x8] sm:$0xff] }
  0x36   :  { %148 = vmatpush1.msra.mxu0 %v97_v15  ;;  %7872 = vmatpush3.msra.mxu1 %v108_v25  ;;  %v70_v42 = vld [vmem:[#allocation5] sm:$0xff]  ;;  %v87_v44 = vld [vmem:[#allocation5 + $0x88] sm:$0xff]  ;;  %v84_v45 = vld [vmem:[#allocation5 + $0x70] sm:$0xff] }
  0x37   :  { %149 = vmatprep.subr.mxu0 %v95_v16  ;;  %7873 = vmatprep.subr.mxu1 %v105_v28  ;;  %v90_v43 = vld [vmem:[#allocation5 + $0xa0] sm:$0xff]  ;;  %v63_v46 = vld [vmem:[#allocation2 + $0x8] sm:$0xff]  ;;  %v81_v47 = vld [vmem:[#allocation5 + $0x58] sm:$0xff] }
  0x38   :  { %150 = vmatpush1.msra.mxu0 %v94_v17  ;;  %7874 = vmatpush3.msra.mxu1 %v105_v28  ;;  %v78_v48 = vld [vmem:[#allocation5 + $0x40] sm:$0xff]  ;;  %v64_v49 = vld [vmem:[#allocation2 + $0x10] sm:$0xff]  ;;  %v65_v50 = vld [vmem:[#allocation2 + $0x18] sm:$0xff] }
  0x39   :  { %151 = vmatprep.subr.mxu0 %v92_v20  ;;  %7875 = vmatprep.subr.mxu1 %v102_v31  ;;  %v66_v51 = vld [vmem:[#allocation2 + $0x20] sm:$0xff]  ;;  %v67_v52 = vld [vmem:[#allocation2 + $0x28] sm:$0xff]  ;;  %v68_v53 = vld [vmem:[#allocation2 + $0x30] sm:$0xff] }
  0x3a   :  { %152 = vmatpush1.msra.mxu0 %v91_v21  ;;  %7876 = vmatpush3.msra.mxu1 %v102_v31  ;;  %v69_v54 = vld [vmem:[#allocation2 + $0x38] sm:$0xff]  ;;  %v75_v55 = vld [vmem:[#allocation5 + $0x28] sm:$0xff]  ;;  %v72_v56 = vld [vmem:[#allocation5 + $0x10] sm:$0xff]  ;;  %v130_v31 = vsub.s32 2, %v8512_v58 }
  0x3b   :  { %153 = vmatprep.subr.mxu0 %v89_v23  ;;  %7877 = vmatprep.subr.mxu1 %v99_v34  ;;  %v8518_v60 = vld [vmem:[%s10657_s2] sm:$0x7]  ;;  %s8451_s2 = smov 32  }
  0x3c   :  { %154 = vmatpush1.msra.mxu0 %v88_v24  ;;  %7878 = vmatpush3.msra.mxu1 %v99_v34  ;;  %v8521_v61 = vrot.slane %v8518_v60, %v122_v59  ;;  %v8528_v1 = vrot.slane %v8518_v60, %v126_v62 }
  0x3d   :  { %155 = vmatprep.subr.mxu0 %v86_v26  ;;  %7879 = vmatprep.subr.mxu1 %v96_v37 }
  0x3e   :  { %156 = vmatpush1.msra.mxu0 %v85_v27  ;;  %7880 = vmatpush3.msra.mxu1 %v96_v37 }
  0x3f   :  { %157 = vmatprep.subr.mxu0 %v83_v29  ;;  %7881 = vmatprep.subr.mxu1 %v93_v40 }
  0x40   :  { %158 = vmatpush1.msra.mxu0 %v82_v30  ;;  %7882 = vmatpush3.msra.mxu1 %v93_v40  ;;  %v8452_v40 = vmov 1983009808  }
  0x41   :  { %159 = vmatprep.subr.mxu0 %v80_v32  ;;  %7883 = vmatprep.subr.mxu1 %v90_v43 }
  0x42   :  { %160 = vmatpush1.msra.mxu0 %v79_v33  ;;  %7884 = vmatpush3.msra.mxu1 %v90_v43  ;;  %v8669_v33 = vrot.slane %v8518_v60, %v130_v31 }
  0x43   :  { %161 = vmatprep.subr.mxu0 %v77_v35  ;;  %7885 = vmatprep.subr.mxu1 %v87_v44 }
  0x44   :  { %162 = vmatpush1.msra.mxu0 %v76_v36  ;;  %7886 = vmatpush3.msra.mxu1 %v87_v44  ;;  %v8453_v44 = vmov 1934713408  }
  0x45   :  { %163 = vmatprep.subr.mxu0 %v74_v38  ;;  %7887 = vmatprep.subr.mxu1 %v84_v45 }
  0x46   :  { %164 = vmatpush1.msra.mxu0 %v73_v39  ;;  %7888 = vmatpush3.msra.mxu1 %v84_v45  ;;  %v468_v45 = vunpack.c.l.s4 %v8453_v44 }
  0x47   :  { %165 = vmatprep.subr.mxu0 %v71_v41  ;;  %7889 = vmatprep.subr.mxu1 %v81_v47  ;;  %v436_v41 = vunpack.c.l.s4 %v8452_v40 }
  0x48   :  { %166 = vmatpush1.msra.mxu0 %v70_v42  ;;  %7890 = vmatpush3.msra.mxu1 %v81_v47 }
  0x49   :  { %200 = vmatmul.mubr.f32.vlgmr.msra.gmra.mxu0 %v8501_v14  ;;  %7891 = vmatprep.subr.mxu1 %v78_v48  ;;  %v437_v47 = vunpack.c.0.s8 %v436_v41 }
  0x4a   :  { %205 = vmatprep.mubr.f32.mxu0 %v8448_v0  ;;  %7892 = vmatpush3.msra.mxu1 %v78_v48 }
  0x4b   :  { %7893 = vmatprep.subr.mxu1 %v75_v55 }
  0x4c   :  { %7894 = vmatpush3.msra.mxu1 %v75_v55 }
  0x4d   :  { %206 = vmatmul.mubr.f32.gmra.mxu0 %v63_v46  ;;  %7895 = vmatprep.subr.mxu1 %v72_v56 }
  0x4e   :  { %211 = vmatprep.mubr.f32.mxu0 %v8448_v0  ;;  %7896 = vmatpush3.msra.mxu1 %v72_v56 }
  0x4f   :  { %7898 = vmatmul.mubr.f32.vlgmr.msra.gmra.mxu1 %v63_v46 }
  0x50   :  { %7900 = vmatprep.mubr.f32.mxu1 %v64_v49 }
  0x51   :  { %212 = vmatmul.mubr.f32.gmra.mxu0 %v64_v49 }
  0x52   :  { %217 = vmatprep.mubr.f32.mxu0 %v8448_v0 }
  0x53   :  { %7901 = vmatmul.mubr.f32.gmra.mxu1 %v65_v50 }
  0x54   :  { %7903 = vmatprep.mubr.f32.mxu1 %v66_v51 }
  0x55   :  { %218 = vmatmul.mubr.f32.gmra.mxu0 %v65_v50  ;;  %v469_v50 = vunpack.c.0.s8 %v468_v45 }
  0x56   :  { %223 = vmatprep.mubr.f32.mxu0 %v8448_v0 }
  0x57   :  { %7904 = vmatmul.mubr.f32.gmra.mxu1 %v67_v52  ;;  %v8715_v59 = vsub.s32 %v469_v50, %v8512_v58 }
  0x58   :  { %7906 = vmatprep.mubr.f32.mxu1 %v68_v53 }
  0x59   :  { %224 = vmatmul.mubr.f32.gmra.mxu0 %v66_v51  ;;  %v8708_v51 = vsub.s32 %v437_v47, %v8512_v58 }
  0x5a   :  { %229 = vmatprep.mubr.f32.mxu0 %v8448_v0 }
  0x5b   :  { %7907 = vmatmul.mubr.f32.gmra.mxu1 %v69_v54 }
  0x5d   :  { %230 = vmatmul.mubr.f32.gmra.mxu0 %v67_v52 }
  0x5e   :  { %235 = vmatprep.mubr.f32.mxu0 %v8448_v0 }
  0x61   :  { %236 = vmatmul.mubr.f32.gmra.mxu0 %v68_v53 }
  0x62   :  { %241 = vmatprep.mubr.f32.mxu0 %v8448_v0 }
  0x65   :  { %242 = vmatmul.mubr.f32.gmra.mxu0 %v69_v54 }
 0x109   :  { %v201_v63 = vpop.f32.mrf.mxu0 }
 0x10a   :  { %v8525_v0 = vadd.f32 %v201_v63, %v8521_v61 }
 0x10b   :  { %v203_v2 = vpop.f32.mrf.mxu0 }
 0x10c   :  { %385 = vrot.lane.b32.xlu1 %v8525_v0, %s8449_s11  ;;  %361 = vrot.lane.b32.xlu0 %v8525_v0, %s8450_s12  ;;  %v8535_v3 = vadd.f32 %v203_v2, %v8528_v1 }
 0x10d   :  { %v207_v4 = vpop.f32.mrf.mxu0 }
 0x10e   :  { %v8542_v5 = vadd.f32 %v207_v4, %v8521_v61 }
 0x10f   :  { %v209_v6 = vpop.f32.mrf.mxu0  ;;  %v7899_v34 = vpop.f32.mrf.mxu1 }
 0x110   :  { %1529 = vrot.lane.b32.xlu1 %v8535_v3, %s8450_s12  ;;  %409 = vrot.lane.b32.xlu0 %v8525_v0, %s8451_s2  ;;  %v8553_v7 = vadd.f32 %v209_v6, %v8528_v1  ;;  %v8676_v35 = vadd.f32 %v7899_v34, %v8669_v33 }
 0x111   :  { %v213_v8 = vpop.f32.mrf.mxu0  ;;  %v314_v36 = vpop.f32.mrf.mxu1 }
 0x112   :  { %v8560_v9 = vadd.f32 %v213_v8, %v8521_v61  ;;  %10722 = vst [vmem:[#allocation12_spill] sm:$0xff] %v8676_v35  ;;  %v8683_v37 = vadd.f32 %v314_v36, %v8669_v33 }
 0x113   :  { %v215_v10 = vpop.f32.mrf.mxu0  ;;  %v7902_v38 = vpop.f32.mrf.mxu1 }
 0x114   :  { %1577 = vrot.lane.b32.xlu1 %v8535_v3, %s8451_s2  ;;  %1553 = vrot.lane.b32.xlu0 %v8535_v3, %s8449_s11  ;;  %v8571_v11 = vadd.f32 %v215_v10, %v8528_v1  ;;  %10723 = vst [vmem:[#allocation13_spill] sm:$0xff] %v8683_v37  ;;  %v8690_v39 = vadd.f32 %v7902_v38, %v8669_v33 }
 0x115   :  { %v219_v12 = vpop.f32.mrf.mxu0  ;;  %v324_v42 = vpop.f32.mrf.mxu1 }
 0x116   :  { %v8574_v13 = vadd.f32 %v219_v12, %v8521_v61  ;;  %10724 = vst [vmem:[#allocation14_spill] sm:$0xff] %v8690_v39  ;;  %v8722_v2 = vadd.f32 %v324_v42, %v8669_v33 }
 0x117   :  { %v221_v14 = vpop.f32.mrf.mxu0  ;;  %v7905_v43 = vpop.f32.mrf.mxu1 }
 0x118   :  { %387 = vrot.lane.b32.xlu1 %v8542_v5, %s8449_s11  ;;  %363 = vrot.lane.b32.xlu0 %v8542_v5, %s8450_s12  ;;  %v8589_v15 = vadd.f32 %v221_v14, %v8528_v1  ;;  %v8701_v46 = vadd.f32 %v7905_v43, %v8669_v33  ;;  %10726 = vst [vmem:[#allocation16_spill] sm:$0xff] %v8722_v2 }
 0x119   :  { %v225_v16 = vpop.f32.mrf.mxu0 }
 0x11a   :  { %v8592_v17 = vadd.f32 %v225_v16, %v8521_v61  ;;  %10725 = vst [vmem:[#allocation15_spill] sm:$0xff] %v8701_v46 }
 0x11b   :  { %v227_v18 = vpop.f32.mrf.mxu0 }
 0x11c   :  { %1579 = vrot.lane.b32.xlu1 %v8553_v7, %s8451_s2  ;;  %411 = vrot.lane.b32.xlu0 %v8542_v5, %s8451_s2  ;;  %v8603_v19 = vadd.f32 %v227_v18, %v8528_v1 }
 0x11d   :  { %v231_v20 = vpop.f32.mrf.mxu0 }
 0x11e   :  { %v8614_v23 = vadd.f32 %v231_v20, %v8521_v61 }
 0x11f   :  { %v233_v21 = vpop.f32.mrf.mxu0 }
 0x120   :  { %365 = vrot.lane.b32.xlu1 %v8560_v9, %s8450_s12  ;;  %1531 = vrot.lane.b32.xlu0 %v8553_v7, %s8450_s12  ;;  %v8625_v25 = vadd.f32 %v233_v21, %v8528_v1 }
 0x121   :  { %v237_v22 = vpop.f32.mrf.mxu0 }
 0x122   :  { %v8646_v30 = vadd.f32 %v237_v22, %v8521_v61 }
 0x123   :  { %v239_v24 = vpop.f32.mrf.mxu0 }
 0x124   :  { %413 = vrot.lane.b32.xlu1 %v8560_v9, %s8451_s2  ;;  %1555 = vrot.lane.b32.xlu0 %v8553_v7, %s8449_s11  ;;  %v8632_v27 = vadd.f32 %v239_v24, %v8528_v1 }
 0x125   :  { %v243_v26 = vpop.f32.mrf.mxu0 }
 0x126   :  { %v8662_v32 = vadd.f32 %v243_v26, %v8521_v61 }
 0x127   :  { %v245_v28 = vpop.f32.mrf.mxu0 }
 0x128   :  { %1533 = vrot.lane.b32.xlu1 %v8571_v11, %s8450_s12  ;;  %389 = vrot.lane.b32.xlu0 %v8560_v9, %s8449_s11  ;;  %v8639_v29 = vadd.f32 %v245_v28, %v8528_v1 }
 0x12c   :  { %1557 = vrot.lane.b32.xlu1 %v8571_v11, %s8449_s11  ;;  %367 = vrot.lane.b32.xlu0 %v8574_v13, %s8450_s12 }
 0x130   :  { %1581 = vrot.lane.b32.xlu1 %v8571_v11, %s8451_s2  ;;  %415 = vrot.lane.b32.xlu0 %v8574_v13, %s8451_s2 }
 0x134   :  { %391 = vrot.lane.b32.xlu1 %v8574_v13, %s8449_s11  ;;  %1559 = vrot.lane.b32.xlu0 %v8589_v15, %s8449_s11 }
 0x138   :  { %1535 = vrot.lane.b32.xlu1 %v8589_v15, %s8450_s12  ;;  %393 = vrot.lane.b32.xlu0 %v8592_v17, %s8449_s11 }
 0x13c   :  { %1583 = vrot.lane.b32.xlu1 %v8589_v15, %s8451_s2  ;;  %1537 = vrot.lane.b32.xlu0 %v8603_v19, %s8450_s12 }
 0x140   :  { %369 = vrot.lane.b32.xlu1 %v8592_v17, %s8450_s12  ;;  %1561 = vrot.lane.b32.xlu0 %v8603_v19, %s8449_s11 }
 0x144   :  { %417 = vrot.lane.b32.xlu1 %v8592_v17, %s8451_s2  ;;  %1585 = vrot.lane.b32.xlu0 %v8603_v19, %s8451_s2 }
 0x148   :  { %371 = vrot.lane.b32.xlu1 %v8614_v23, %s8450_s12  ;;  %395 = vrot.lane.b32.xlu0 %v8614_v23, %s8449_s11 }
 0x14c   :  { %419 = vrot.lane.b32.xlu1 %v8614_v23, %s8451_s2  ;;  %1539 = vrot.lane.b32.xlu0 %v8625_v25, %s8450_s12 }
 0x150   :  { %1565 = vrot.lane.b32.xlu1 %v8632_v27, %s8449_s11  ;;  %1563 = vrot.lane.b32.xlu0 %v8625_v25, %s8449_s11 }
 0x154   :  { %1543 = vrot.lane.b32.xlu1 %v8639_v29, %s8450_s12  ;;  %1587 = vrot.lane.b32.xlu0 %v8625_v25, %s8451_s2 }
 0x158   :  { %1567 = vrot.lane.b32.xlu1 %v8639_v29, %s8449_s11  ;;  %373 = vrot.lane.b32.xlu0 %v8646_v30, %s8450_s12 }
 0x15c   :  { %1591 = vrot.lane.b32.xlu1 %v8639_v29, %s8451_s2  ;;  %1541 = vrot.lane.b32.xlu0 %v8632_v27, %s8450_s12 }
 0x160   :  { %397 = vrot.lane.b32.xlu1 %v8646_v30, %s8449_s11  ;;  %1589 = vrot.lane.b32.xlu0 %v8632_v27, %s8451_s2 }
 0x164   :  { %375 = vrot.lane.b32.xlu1 %v8662_v32, %s8450_s12  ;;  %421 = vrot.lane.b32.xlu0 %v8646_v30, %s8451_s2 }
 0x168   :  { %423 = vrot.lane.b32.xlu1 %v8662_v32, %s8451_s2  ;;  %399 = vrot.lane.b32.xlu0 %v8662_v32, %s8449_s11 }
 0x16c   :  { %2699 = vrot.lane.b32.xlu1 %v8676_v35, %s8450_s12  ;;  %2723 = vrot.lane.b32.xlu0 %v8676_v35, %s8449_s11 }
 0x170   :  { %2747 = vrot.lane.b32.xlu1 %v8676_v35, %s8451_s2  ;;  %2697 = vrot.lane.b32.xlu0 %v8683_v37, %s8450_s12 }
 0x174   :  { %2721 = vrot.lane.b32.xlu1 %v8683_v37, %s8449_s11  ;;  %2703 = vrot.lane.b32.xlu0 %v8690_v39, %s8450_s12 }
 0x178   :  { %2745 = vrot.lane.b32.xlu1 %v8683_v37, %s8451_s2  ;;  %2727 = vrot.lane.b32.xlu0 %v8690_v39, %s8449_s11 }
 0x17c   :  { %2751 = vrot.lane.b32.xlu0 %v8690_v39, %s8451_s2  ;;  %2707 = vrot.lane.b32.xlu1 %v8701_v46, %s8450_s12 }
 0x17e   :  { %v386_v48 = vpop.permute.xlu1 %385  ;;  %v362_v49 = vpop.permute.xlu0 %361 }
 0x17f   :  { %v433_v52 = vcombine.low %v8525_v0, %v386_v48  ;;  %v434_v53 = vcombine.high %v8525_v0, %v386_v48 }
 0x180   :  { %2731 = vrot.lane.b32.xlu1 %v8701_v46, %s8449_s11 }
 0x181   :  { %v441_v60 = vrot.slane %v433_v52, %v8708_v51  ;;  %v448_v61 = vrot.slane %v434_v53, %v8708_v51 }
 0x182   :  { %v1530_v54 = vpop.permute.xlu1 %1529  ;;  %v410_v55 = vpop.permute.xlu0 %409 }
 0x183   :  { %v449_v56 = vcombine.low %v362_v49, %v410_v55  ;;  %v450_v57 = vcombine.high %v362_v49, %v410_v55 }
 0x184   :  { %2755 = vrot.lane.b32.xlu1 %v8701_v46, %s8451_s2 }
 0x185   :  { %v457_v62 = vrot.slane %v449_v56, %v8708_v51  ;;  %v464_v63 = vrot.slane %v450_v57, %v8708_v51 }
 0x186   :  { %v1578_v1 = vpop.permute.xlu1 %1577  ;;  %v1554_v0 = vpop.permute.xlu0 %1553 }
 0x187   :  { %v465_v4 = vcombine.low %v441_v60, %v457_v62  ;;  %v466_v6 = vcombine.high %v441_v60, %v457_v62  ;;  %v481_v58 = vcombine.low %v448_v61, %v464_v63  ;;  %v482_v8 = vcombine.high %v448_v61, %v464_v63 }
 0x188   :  { %v1617_v10 = vcombine.low %v1530_v54, %v1578_v1  ;;  %v1618_v12 = vcombine.high %v1530_v54, %v1578_v1  ;;  %v1601_v14 = vcombine.low %v8535_v3, %v1554_v0  ;;  %v1602_v16 = vcombine.high %v8535_v3, %v1554_v0  ;;  %2701 = vrot.lane.b32.xlu1 %v8722_v2, %s8450_s12 }
 0x189   :  { %v473_v18 = vrot.slane %v465_v4, %v8715_v59  ;;  %v480_v20 = vrot.slane %v466_v6, %v8715_v59  ;;  %v489_v21 = vrot.slane %v481_v58, %v8715_v59  ;;  %v496_v22 = vrot.slane %v482_v8, %v8715_v59 }
 0x18a   :  { %v1625_v24 = vrot.slane %v1617_v10, %v8708_v51  ;;  %v1632_v26 = vrot.slane %v1618_v12, %v8708_v51  ;;  %v1609_v28 = vrot.slane %v1601_v14, %v8708_v51  ;;  %v1616_v31 = vrot.slane %v1602_v16, %v8708_v51  ;;  %v388_v34 = vpop.permute.xlu1 %387  ;;  %v364_v36 = vpop.permute.xlu0 %363 }
 0x18b   :  { %v977_v3 = vcombine.low %v473_v18, %v480_v20  ;;  %v7488_v38 = vcombine.high %v473_v18, %v480_v20  ;;  %v993_v40 = vcombine.low %v489_v21, %v496_v22  ;;  %v7489_v41 = vcombine.high %v489_v21, %v496_v22 }
 0x18c   :  { %v1633_v42 = vcombine.low %v1609_v28, %v1625_v24  ;;  %v1634_v43 = vcombine.high %v1609_v28, %v1625_v24  ;;  %v1649_v44 = vcombine.low %v1616_v31, %v1632_v26  ;;  %v1650_v45 = vcombine.high %v1616_v31, %v1632_v26 }
 0x18d   :  { %v501_v47 = vcombine.low %v8542_v5, %v388_v34  ;;  %v502_v48 = vcombine.high %v8542_v5, %v388_v34  ;;  %v8741_v49 = vrot.slane %v977_v3, %v8708_v51  ;;  %v8744_v50 = vrot.slane %v7488_v38, %v8708_v51 }
 0x18e   :  { %v1641_v52 = vrot.slane %v1633_v42, %v8715_v59  ;;  %v1648_v53 = vrot.slane %v1634_v43, %v8715_v59  ;;  %v1657_v54 = vrot.slane %v1649_v44, %v8715_v59  ;;  %v1664_v55 = vrot.slane %v1650_v45, %v8715_v59  ;;  %v1580_v56 = vpop.permute.xlu1 %1579  ;;  %v412_v57 = vpop.permute.xlu0 %411 }
 0x18f   :  { %v509_v60 = vrot.slane %v501_v47, %v8708_v51  ;;  %v517_v61 = vcombine.low %v364_v36, %v412_v57  ;;  %v518_v5 = vcombine.high %v364_v36, %v412_v57  ;;  %v516_v0 = vrot.slane %v502_v48, %v8708_v51 }
 0x190   :  { %v2145_v62 = vcombine.low %v1641_v52, %v1648_v53  ;;  %v7504_v63 = vcombine.high %v1641_v52, %v1648_v53  ;;  %v2161_v1 = vcombine.low %v1657_v54, %v1664_v55  ;;  %v8755_v58 = vrot.slane %v993_v40, %v8708_v51 }
 0x191   :  { %v525_v4 = vrot.slane %v517_v61, %v8708_v51  ;;  %v532_v6 = vrot.slane %v518_v5, %v8708_v51  ;;  %v8758_v8 = vrot.slane %v7489_v41, %v8708_v51  ;;  %v7505_v10 = vcombine.high %v1657_v54, %v1664_v55 }
 0x192   :  { %10727 = vst [vmem:[#allocation17_spill] sm:$0xff] %v8755_v58  ;;  %v366_v12 = vpop.permute.xlu1 %365  ;;  %v1532_v14 = vpop.permute.xlu0 %1531  ;;  %v1009_v16 = vcombine.low %v8741_v49, %v8744_v50  ;;  %v8763_v18 = vrot.slane %v2145_v62, %v8708_v51  ;;  %v8766_v20 = vrot.slane %v7504_v63, %v8708_v51  ;;  %v8783_v48 = vrot.slane %v2161_v1, %v8708_v51 }
 0x193   :  { %10728 = vst [vmem:[#allocation18_spill] sm:$0xff] %v8758_v8  ;;  %v533_v21 = vcombine.low %v509_v60, %v525_v4  ;;  %v534_v22 = vcombine.high %v509_v60, %v525_v4  ;;  %v549_v24 = vcombine.low %v516_v0, %v532_v6  ;;  %v550_v26 = vcombine.high %v516_v0, %v532_v6 }
 0x194   :  { %10729 = vst [vmem:[#allocation19_spill] sm:$0xff] %v8763_v18  ;;  %10730 = vst [vmem:[#allocation20_spill] sm:$0xff] %v8766_v20  ;;  %v1685_v28 = vcombine.low %v1532_v14, %v1580_v56  ;;  %v1686_v31 = vcombine.high %v1532_v14, %v1580_v56  ;;  %v8769_v34 = vrot.slane %v1009_v16, %v8715_v59 }
 0x195   :  { %v1025_v36 = vcombine.low %v8755_v58, %v8758_v8  ;;  %v541_v3 = vrot.slane %v533_v21, %v8715_v59  ;;  %v548_v38 = vrot.slane %v534_v22, %v8715_v59  ;;  %v557_v40 = vrot.slane %v549_v24, %v8715_v59  ;;  %10731 = vst [vmem:[#allocation21_spill] sm:$0xff] %v8783_v48 }
 0x196   :  { %v564_v41 = vrot.slane %v550_v26, %v8715_v59  ;;  %v1693_v42 = vrot.slane %v1685_v28, %v8708_v51  ;;  %v1700_v43 = vrot.slane %v1686_v31, %v8708_v51  ;;  %v414_v45 = vpop.permute.xlu1 %413  ;;  %v1556_v47 = vpop.permute.xlu0 %1555  ;;  %v8805_v16 = vrot.slane %v7505_v10, %v8708_v51 }
 0x197   :  { %v8780_v44 = vrot.slane %v1025_v36, %v8715_v59  ;;  %v1045_v52 = vcombine.low %v541_v3, %v548_v38  ;;  %v7490_v53 = vcombine.high %v541_v3, %v548_v38  ;;  %v585_v57 = vcombine.low %v366_v12, %v414_v45 }
 0x198   :  { %v1061_v54 = vcombine.low %v557_v40, %v564_v41  ;;  %v7491_v55 = vcombine.high %v557_v40, %v564_v41  ;;  %v586_v60 = vcombine.high %v366_v12, %v414_v45  ;;  %v1669_v61 = vcombine.low %v8553_v7, %v1556_v47  ;;  %10736 = vst [vmem:[#allocation26_spill] sm:$0xff] %v8805_v16 }
 0x199   :  { %v1041_v56 = vcombine.low %v8769_v34, %v8780_v44  ;;  %v8789_v5 = vrot.slane %v1045_v52, %v8708_v51  ;;  %v8792_v62 = vrot.slane %v7490_v53, %v8708_v51  ;;  %v593_v0 = vrot.slane %v585_v57, %v8708_v51 }
 0x19a   :  { %v8795_v63 = vrot.slane %v1061_v54, %v8708_v51  ;;  %v8798_v1 = vrot.slane %v7491_v55, %v8708_v51  ;;  %v1670_v4 = vcombine.high %v8553_v7, %v1556_v47  ;;  %v1677_v6 = vrot.slane %v1669_v61, %v8708_v51  ;;  %v1534_v12 = vpop.permute.xlu1 %1533  ;;  %v390_v14 = vpop.permute.xlu0 %389 }
 0x19b   :  { %10732 = vst [vmem:[#allocation22_spill] sm:$0xff] %v8789_v5  ;;  %10733 = vst [vmem:[#allocation23_spill] sm:$0xff] %v8792_v62  ;;  %7913 = vmatprep.mubr.msk.f32.mxu1 %vm3857_vm0, %v1041_v56  ;;  %v1077_v21 = vcombine.low %v8789_v5, %v8792_v62  ;;  %v569_v36 = vcombine.low %v8560_v9, %v390_v14  ;;  %v600_v38 = vrot.slane %v586_v60, %v8708_v51 }
 0x19c   :  { %10734 = vst [vmem:[#allocation24_spill] sm:$0xff] %v8795_v63  ;;  %10735 = vst [vmem:[#allocation25_spill] sm:$0xff] %v8798_v1  ;;  %v1093_v24 = vcombine.low %v8795_v63, %v8798_v1  ;;  %v1684_v7 = vrot.slane %v1670_v4, %v8708_v51  ;;  %v1701_v28 = vcombine.low %v1677_v6, %v1693_v42 }
 0x19d   :  { %v1702_v31 = vcombine.high %v1677_v6, %v1693_v42  ;;  %v8818_v10 = vrot.slane %v1077_v21, %v8715_v59  ;;  %v570_v40 = vcombine.high %v8560_v9, %v390_v14  ;;  %v577_v54 = vrot.slane %v569_v36, %v8708_v51 }
 0x19e   :  { %v8821_v3 = vrot.slane %v1093_v24, %v8715_v59  ;;  %v8826_v41 = vrot.slane %v1701_v28, %v8715_v59  ;;  %v1717_v47 = vcombine.low %v1684_v7, %v1700_v43  ;;  %v1718_v42 = vcombine.high %v1684_v7, %v1700_v43  ;;  %v1558_v52 = vpop.permute.xlu1 %1557  ;;  %v368_v53 = vpop.permute.xlu0 %367 }
 0x19f   :  { %v8829_v45 = vrot.slane %v1702_v31, %v8715_v59  ;;  %v584_v55 = vrot.slane %v570_v40, %v8708_v51  ;;  %v1737_v56 = vcombine.low %v8571_v11, %v1558_v52  ;;  %v1738_v61 = vcombine.high %v8571_v11, %v1558_v52 }
 0x1a0   :  { %v8837_v9 = vrot.slane %v1717_v47, %v8715_v59  ;;  %v8840_v60 = vrot.slane %v1718_v42, %v8715_v59  ;;  %v601_v4 = vcombine.low %v577_v54, %v593_v0  ;;  %v602_v6 = vcombine.high %v577_v54, %v593_v0 }
 0x1a1   :  { %v2213_v43 = vcombine.low %v8826_v41, %v8829_v45  ;;  %v617_v14 = vcombine.low %v584_v55, %v600_v38  ;;  %v618_v21 = vcombine.high %v584_v55, %v600_v38  ;;  %v7506_v24 = vcombine.high %v8826_v41, %v8829_v45 }
 0x1a2   :  { %v2229_v7 = vcombine.low %v8837_v9, %v8840_v60  ;;  %v7507_v28 = vcombine.high %v8837_v9, %v8840_v60  ;;  %v1745_v31 = vrot.slane %v1737_v56, %v8708_v51  ;;  %v1582_v36 = vpop.permute.xlu1 %1581  ;;  %v416_v40 = vpop.permute.xlu0 %415  ;;  %v8853_v47 = vrot.slane %v601_v4, %v8715_v59 }
 0x1a3   :  { %v8856_v11 = vrot.slane %v602_v6, %v8715_v59  ;;  %v8859_v0 = vrot.slane %v617_v14, %v8715_v59  ;;  %v8862_v38 = vrot.slane %v618_v21, %v8715_v59  ;;  %v1752_v41 = vrot.slane %v1738_v61, %v8708_v51 }
 0x1a4   :  { %v1753_v45 = vcombine.low %v1534_v12, %v1582_v36  ;;  %v1754_v42 = vcombine.high %v1534_v12, %v1582_v36  ;;  %v653_v52 = vcombine.low %v368_v53, %v416_v40  ;;  %v654_v9 = vcombine.high %v368_v53, %v416_v40 }
 0x1a5   :  { %v10744_v37 = vcombine.high %v8853_v47, %v8856_v11 }
 0x1a6   :  { %v1761_v4 = vrot.slane %v1753_v45, %v8708_v51  ;;  %v1768_v61 = vrot.slane %v1754_v42, %v8708_v51  ;;  %v661_v12 = vrot.slane %v653_v52, %v8708_v51  ;;  %v392_v6 = vpop.permute.xlu1 %391  ;;  %v1560_v14 = vpop.permute.xlu0 %1559  ;;  %v668_v45 = vrot.slane %v654_v9, %v8708_v51 }
 0x1a7   :  { %v637_v21 = vcombine.low %v8574_v13, %v392_v6  ;;  %v638_v36 = vcombine.high %v8574_v13, %v392_v6  ;;  %v1805_v26 = vcombine.low %v8589_v15, %v1560_v14  ;;  %v1806_v22 = vcombine.high %v8589_v15, %v1560_v14 }
 0x1a8   :  { %v1769_v53 = vcombine.low %v1745_v31, %v1761_v4  ;;  %v1770_v40 = vcombine.high %v1745_v31, %v1761_v4  ;;  %v1785_v56 = vcombine.low %v1752_v41, %v1768_v61  ;;  %v1786_v60 = vcombine.high %v1752_v41, %v1768_v61 }
 0x1a9   :  { %v645_v42 = vrot.slane %v637_v21, %v8708_v51  ;;  %v652_v52 = vrot.slane %v638_v36, %v8708_v51  ;;  %v8884_v55 = vrot.slane %v1805_v26, %v8708_v51 }
 0x1aa   :  { %v8887_v54 = vrot.slane %v1769_v53, %v8715_v59  ;;  %v8890_v13 = vrot.slane %v1770_v40, %v8715_v59  ;;  %v8893_v15 = vrot.slane %v1785_v56, %v8715_v59  ;;  %v8896_v31 = vrot.slane %v1786_v60, %v8715_v59  ;;  %v1536_v41 = vpop.permute.xlu1 %1535  ;;  %v394_v9 = vpop.permute.xlu0 %393 }
 0x1ab   :  { %v669_v4 = vcombine.low %v645_v42, %v661_v12  ;;  %v670_v61 = vcombine.high %v645_v42, %v661_v12  ;;  %v685_v6 = vcombine.low %v652_v52, %v668_v45  ;;  %v686_v14 = vcombine.high %v652_v52, %v668_v45 }
 0x1ac   :  { %v8905_v56 = vrot.slane %v1806_v22, %v8708_v51  ;;  %v8912_v45 = vrot.slane %v2213_v43, %v8708_v51  ;;  %v8915_v42 = vrot.slane %v7506_v24, %v8708_v51  ;;  %v8918_v52 = vrot.slane %v2229_v7, %v8708_v51 }
 0x1ad   :  { %v677_v60 = vrot.slane %v669_v4, %v8715_v59  ;;  %v684_v53 = vrot.slane %v670_v61, %v8715_v59  ;;  %v693_v12 = vrot.slane %v685_v6, %v8715_v59  ;;  %v700_v40 = vrot.slane %v686_v14, %v8715_v59 }
 0x1ae   :  { %v8921_v22 = vrot.slane %v7507_v28, %v8708_v51  ;;  %v1584_v36 = vpop.permute.xlu1 %1583  ;;  %v8923_v4 = vpop.permute.xlu0 %1537  ;;  %v2245_v43 = vcombine.low %v8912_v45, %v8915_v42  ;;  %v705_v14 = vcombine.low %v8592_v17, %v394_v9  ;;  %v706_v7 = vcombine.high %v8592_v17, %v394_v9 }
 0x1af   :  { %v1181_v61 = vcombine.low %v677_v60, %v684_v53  ;;  %v7494_v21 = vcombine.high %v677_v60, %v684_v53  ;;  %v1197_v6 = vcombine.low %v693_v12, %v700_v40  ;;  %v7495_v26 = vcombine.high %v693_v12, %v700_v40 }
 0x1b0   :  { %v2261_v24 = vcombine.low %v8918_v52, %v8921_v22  ;;  %v8946_v40 = vrot.slane %v2245_v43, %v8715_v59  ;;  %v8952_v9 = vrot.slane %v705_v14, %v8708_v51  ;;  %v8961_v43 = vrot.slane %v706_v7, %v8708_v51 }
 0x1b1   :  { %v8932_v28 = vrot.slane %v1181_v61, %v8708_v51  ;;  %v8935_v57 = vrot.slane %v7494_v21, %v8708_v51  ;;  %v8938_v60 = vrot.slane %v1197_v6, %v8708_v51  ;;  %v8941_v53 = vrot.slane %v7495_v26, %v8708_v51 }
 0x1b2   :  { %v8949_v17 = vrot.slane %v2261_v24, %v8715_v59  ;;  %v370_v21 = vpop.permute.xlu1 %369  ;;  %v1562_v61 = vpop.permute.xlu0 %1561  ;;  %v10741_v14 = vcombine.low %v8763_v18, %v8766_v20  ;;  %v2193_v6 = vcombine.low %v8783_v48, %v8805_v16  ;;  %v1821_v35 = vcombine.low %v1536_v41, %v1584_v36 }
 0x1b3   :  { %10737 = vst [vmem:[#allocation27_spill] sm:$0xff] %v8932_v28  ;;  %10738 = vst [vmem:[#allocation28_spill] sm:$0xff] %v8935_v57  ;;  %v1822_v12 = vcombine.high %v1536_v41, %v1584_v36  ;;  %v10742_v7 = vcombine.low %v8853_v47, %v8856_v11  ;;  %v10746_v41 = vcombine.low %v8859_v0, %v8862_v38 }
 0x1b4   :  { %10739 = vst [vmem:[#allocation29_spill] sm:$0xff] %v8938_v60  ;;  %10740 = vst [vmem:[#allocation30_spill] sm:$0xff] %v8941_v53  ;;  %v2277_v24 = vcombine.low %v8946_v40, %v8949_v17  ;;  %v8969_v39 = vrot.slane %v10741_v14, %v8715_v59  ;;  %v8985_v14 = vrot.slane %v10744_v37, %v8708_v51 }
 0x1b5   :  { %v8979_v46 = vrot.slane %v10742_v7, %v8708_v51  ;;  %v8989_v1 = vrot.slane %v2193_v6, %v8715_v59  ;;  %v1829_v26 = vrot.slane %v1821_v35, %v8708_v51  ;;  %v8996_v36 = vrot.slane %v10746_v41, %v8708_v51 }
 0x1b6   :  { %10745 = vst [vmem:[#allocation32_spill] sm:$0xff] %v8985_v14  ;;  %7909 = vmatprep.subr.msk.mxu1 %vm3857_vm0, %v2277_v24  ;;  %v10748_v7 = vcombine.high %v8859_v0, %v8862_v38  ;;  %v418_v37 = vpop.permute.xlu1 %417  ;;  %v1586_v11 = vpop.permute.xlu0 %1585  ;;  %v1836_v6 = vrot.slane %v1822_v12, %v8708_v51  ;;  %v1873_v63 = vcombine.low %v8603_v19, %v1562_v61 }
 0x1b7   :  { %10743 = vst [vmem:[#allocation31_spill] sm:$0xff] %v8979_v46  ;;  %10747 = vst [vmem:[#allocation33_spill] sm:$0xff] %v8996_v36  ;;  %7910 = vmatpush3.xpose.msk.msra.mxu1 %vm3857_vm0, %v2277_v24  ;;  %v1145_v35 = vcombine.low %v8979_v46, %v8985_v14  ;;  %v1874_v41 = vcombine.high %v8603_v19, %v1562_v61  ;;  %v2209_v62 = vcombine.low %v8969_v39, %v8989_v1 }
 0x1b8   :  { %v9002_v47 = vrot.slane %v10748_v7, %v8708_v51  ;;  %v1837_v0 = vcombine.low %v8884_v55, %v1829_v26  ;;  %v1838_v38 = vcombine.high %v8884_v55, %v1829_v26  ;;  %v1853_v24 = vcombine.low %v8905_v56, %v1836_v6 }
 0x1b9   :  { %v1854_v12 = vcombine.high %v8905_v56, %v1836_v6  ;;  %v1109_v46 = vcombine.low %v8818_v10, %v8821_v3  ;;  %v9021_v14 = vrot.slane %v1145_v35, %v8715_v59  ;;  %7911 = vmatprep.subr.msk.mxu1 %vm3857_vm0, %v2209_v62  ;;  %v1881_v26 = vrot.slane %v1873_v63, %v8708_v51 }
 0x1ba   :  { %10749 = vst [vmem:[#allocation34_spill] sm:$0xff] %v9002_v47  ;;  %v1161_v7 = vcombine.low %v8996_v36, %v9002_v47  ;;  %v1845_v19 = vrot.slane %v1837_v0, %v8715_v59  ;;  %v1852_v61 = vrot.slane %v1838_v38, %v8715_v59  ;;  %v372_v36 = vpop.permute.xlu1 %371  ;;  %v396_v47 = vpop.permute.xlu0 %395  ;;  %v1861_v56 = vrot.slane %v1853_v24, %v8715_v59 }
 0x1bb   :  { %v1868_v6 = vrot.slane %v1854_v12, %v8715_v59  ;;  %7912 = vmatpush3.xpose.msk.msra.mxu1 %vm3857_vm0, %v2209_v62  ;;  %v721_v35 = vcombine.low %v370_v21, %v418_v37  ;;  %v722_v5 = vcombine.high %v370_v21, %v418_v37  ;;  %v1888_v0 = vrot.slane %v1874_v41, %v8708_v51 }
 0x1bc   :  { %v9027_v55 = vrot.slane %v1161_v7, %v8715_v59  ;;  %v2349_v2 = vcombine.low %v1845_v19, %v1852_v61  ;;  %v7510_v48 = vcombine.high %v1845_v19, %v1852_v61  ;;  %v1889_v38 = vcombine.low %v8923_v4, %v1586_v11 }
 0x1bd   :  { %v2365_v7 = vcombine.low %v1861_v56, %v1868_v6  ;;  %v729_v16 = vrot.slane %v721_v35, %v8708_v51  ;;  %v736_v24 = vrot.slane %v722_v5, %v8708_v51  ;;  %v7511_v18 = vcombine.high %v1861_v56, %v1868_v6 }
 0x1be   :  { %v1177_v63 = vcombine.low %v9021_v14, %v9027_v55  ;;  %7914 = vmatmul.mubr.msk.f32.vlgmr.msra.gmra.mxu1 %vm3857_vm0, %v1109_v46  ;;  %v1890_v62 = vcombine.high %v8923_v4, %v1586_v11  ;;  %v1897_v21 = vrot.slane %v1889_v38, %v8708_v51  ;;  %v773_v37 = vcombine.low %v8614_v23, %v396_v47  ;;  %v420_v41 = vpop.permute.xlu1 %419  ;;  %v9043_v12 = vpop.permute.xlu0 %1539 }
 0x1bf   :  { %v737_v19 = vcombine.low %v8952_v9, %v729_v16  ;;  %v738_v61 = vcombine.high %v8952_v9, %v729_v16  ;;  %v753_v5 = vcombine.low %v8961_v43, %v736_v24  ;;  %v754_v56 = vcombine.high %v8961_v43, %v736_v24 }
 0x1c0   :  { %7920 = vmatprep.mubr.msk.f32.mxu1 %vm3857_vm0, %v1177_v63  ;;  %v1904_v46 = vrot.slane %v1890_v62, %v8708_v51  ;;  %v1905_v4 = vcombine.low %v1881_v26, %v1897_v21  ;;  %v1906_v11 = vcombine.high %v1881_v26, %v1897_v21  ;;  %v774_v6 = vcombine.high %v8614_v23, %v396_v47 }
 0x1c1   :  { %v9053_v35 = vrot.slane %v737_v19, %v8715_v59  ;;  %v9056_v38 = vrot.slane %v738_v61, %v8715_v59  ;;  %v9059_v63 = vrot.slane %v753_v5, %v8715_v59  ;;  %v9062_v16 = vrot.slane %v754_v56, %v8715_v59 }
 0x1c2   :  { %v9065_v9 = vrot.slane %v1905_v4, %v8715_v59  ;;  %v9068_v43 = vrot.slane %v1906_v11, %v8715_v59  ;;  %v1921_v26 = vcombine.low %v1888_v0, %v1904_v46  ;;  %v1922_v23 = vcombine.high %v1888_v0, %v1904_v46  ;;  %v1566_v47 = vpop.permute.xlu1 %1565  ;;  %v9070_v24 = vpop.permute.xlu0 %1563 }
 0x1c3   :  { %v781_v61 = vrot.slane %v773_v37, %v8708_v51  ;;  %v789_v11 = vcombine.low %v372_v36, %v420_v41  ;;  %v790_v21 = vcombine.high %v372_v36, %v420_v41  ;;  %v9092_v19 = vrot.slane %v2349_v2, %v8708_v51 }
 0x1c4   :  { %v9082_v56 = vrot.slane %v1921_v26, %v8715_v59  ;;  %v9085_v0 = vrot.slane %v1922_v23, %v8715_v59  ;;  %v788_v26 = vrot.slane %v774_v6, %v8708_v51  ;;  %v9098_v5 = vrot.slane %v7510_v48, %v8708_v51 }
 0x1c5   :  { %10750 = vst [vmem:[#allocation35_spill] sm:$0xff] %v9092_v19  ;;  %v9101_v23 = vrot.slane %v2365_v7, %v8708_v51  ;;  %v797_v4 = vrot.slane %v789_v11, %v8708_v51  ;;  %v804_v36 = vrot.slane %v790_v21, %v8708_v51  ;;  %v9108_v2 = vrot.slane %v7511_v18, %v8708_v51 }
 0x1c6   :  { %10751 = vst [vmem:[#allocation36_spill] sm:$0xff] %v9098_v5  ;;  %v9103_v46 = vpop.permute.xlu1 %1543  ;;  %v1588_v62 = vpop.permute.xlu0 %1587  ;;  %v2009_v41 = vcombine.low %v8632_v27, %v1566_v47  ;;  %v2381_v48 = vcombine.low %v9092_v19, %v9098_v5  ;;  %v2010_v7 = vcombine.high %v8632_v27, %v1566_v47  ;;  %v1941_v37 = vcombine.low %v8625_v25, %v9070_v24 }
 0x1c7   :  { %10752 = vst [vmem:[#allocation37_spill] sm:$0xff] %v9101_v23  ;;  %10753 = vst [vmem:[#allocation38_spill] sm:$0xff] %v9108_v2  ;;  %v805_v20 = vcombine.low %v781_v61, %v797_v4  ;;  %v806_v11 = vcombine.high %v781_v61, %v797_v4  ;;  %v821_v58 = vcombine.low %v788_v26, %v804_v36 }
 0x1c8   :  { %v822_v21 = vcombine.high %v788_v26, %v804_v36  ;;  %v9119_v18 = vrot.slane %v2381_v48, %v8715_v59  ;;  %v2397_v8 = vcombine.low %v9101_v23, %v9108_v2  ;;  %v9124_v6 = vrot.slane %v2009_v41, %v8708_v51 }
 0x1c9   :  { %v1942_v19 = vcombine.high %v8625_v25, %v9070_v24  ;;  %v813_v47 = vrot.slane %v805_v20, %v8715_v59  ;;  %v820_v61 = vrot.slane %v806_v11, %v8715_v59  ;;  %v829_v4 = vrot.slane %v821_v58, %v8715_v59 }
 0x1ca   :  { %v9128_v27 = vpop.permute.xlu0 %373  ;;  %v836_v26 = vrot.slane %v822_v21, %v8715_v59  ;;  %v9135_v36 = vrot.slane %v2397_v8, %v8715_v59  ;;  %v9138_v48 = vrot.slane %v2010_v7, %v8708_v51  ;;  %v1949_v41 = vrot.slane %v1941_v37, %v8708_v51  ;;  %v9147_v20 = vpop.permute.xlu1 %1567 }
 0x1cb   :  { %v10754_v25 = vcombine.low %v8887_v54, %v8890_v13  ;;  %v1317_v11 = vcombine.low %v813_v47, %v820_v61  ;;  %v7498_v58 = vcombine.high %v813_v47, %v820_v61  ;;  %v10756_v7 = vcombine.high %v8887_v54, %v8890_v13 }
 0x1cc   :  { %v1333_v23 = vcombine.low %v829_v4, %v836_v26  ;;  %v7499_v21 = vcombine.high %v829_v4, %v836_v26  ;;  %v2413_v8 = vcombine.low %v9119_v18, %v9135_v36  ;;  %v10760_v47 = vcombine.high %v8893_v15, %v8896_v31 }
 0x1cd   :  { %v9145_v24 = vrot.slane %v10754_v25, %v8708_v51  ;;  %v9155_v37 = vrot.slane %v10756_v7, %v8708_v51  ;;  %v10758_v25 = vcombine.low %v8893_v15, %v8896_v31  ;;  %v9170_v4 = vrot.slane %v1317_v11, %v8708_v51 }
 0x1ce   :  { %v9167_v61 = vrot.slane %v10760_v47, %v8708_v51  ;;  %v9173_v26 = vrot.slane %v7498_v58, %v8708_v51  ;;  %v9176_v54 = vrot.slane %v1333_v23, %v8708_v51  ;;  %v9179_v13 = vrot.slane %v7499_v21, %v8708_v51  ;;  %7916 = vmatprep.subr.msk.mxu1 %vm3857_vm0, %v2413_v8  ;;  %v9188_v58 = vpop.permute.xlu0 %1541 }
 0x1cf   :  { %10755 = vst [vmem:[#allocation39_spill] sm:$0xff] %v9145_v24  ;;  %10757 = vst [vmem:[#allocation40_spill] sm:$0xff] %v9155_v37  ;;  %v9161_v2 = vrot.slane %v10758_v25, %v8708_v51  ;;  %v2313_v7 = vcombine.low %v9145_v24, %v9155_v37  ;;  %v1957_v31 = vcombine.low %v9043_v12, %v1588_v62  ;;  %7917 = vmatpush3.xpose.msk.msra.mxu1 %vm3857_vm0, %v2413_v8  ;;  %v1592_v24 = vpop.permute.xlu1 %1591 }
 0x1d0   :  { %10761 = vst [vmem:[#allocation42_spill] sm:$0xff] %v9167_v61  ;;  %10762 = vst [vmem:[#allocation43_spill] sm:$0xff] %v9170_v4  ;;  %v1958_v11 = vcombine.high %v9043_v12, %v1588_v62  ;;  %v1349_v23 = vcombine.low %v9170_v4, %v9173_v26  ;;  %v1365_v25 = vcombine.low %v9176_v54, %v9179_v13 }
 0x1d1   :  { %10759 = vst [vmem:[#allocation41_spill] sm:$0xff] %v9161_v2  ;;  %10763 = vst [vmem:[#allocation44_spill] sm:$0xff] %v9173_v26  ;;  %v2329_v15 = vcombine.low %v9161_v2, %v9167_v61  ;;  %v1956_v47 = vrot.slane %v1942_v19, %v8708_v51  ;;  %v9199_v2 = vrot.slane %v2313_v7, %v8715_v59 }
 0x1d2   :  { %10764 = vst [vmem:[#allocation45_spill] sm:$0xff] %v9176_v54  ;;  %10765 = vst [vmem:[#allocation46_spill] sm:$0xff] %v9179_v13  ;;  %v1965_v62 = vrot.slane %v1957_v31, %v8708_v51  ;;  %v1972_v61 = vrot.slane %v1958_v11, %v8708_v51  ;;  %v9207_v21 = vrot.slane %v1349_v23, %v8715_v59 }
 0x1d3   :  { %v9202_v12 = vrot.slane %v2329_v15, %v8715_v59  ;;  %v10766_v19 = vcombine.low %v8932_v28, %v8935_v57  ;;  %v10768_v7 = vcombine.low %v8938_v60, %v8941_v53  ;;  %v9226_v26 = vrot.slane %v1365_v25, %v8715_v59 }
 0x1d4   :  { %v1973_v11 = vcombine.low %v1949_v41, %v1965_v62  ;;  %v1974_v23 = vcombine.high %v1949_v41, %v1965_v62  ;;  %v1989_v4 = vcombine.low %v1956_v47, %v1972_v61  ;;  %v1990_v13 = vcombine.high %v1956_v47, %v1972_v61 }
 0x1d5   :  { %v9215_v8 = vrot.slane %v10766_v19, %v8715_v59  ;;  %v9221_v15 = vrot.slane %v10768_v7, %v8715_v59  ;;  %v2345_v31 = vcombine.low %v9199_v2, %v9202_v12  ;;  %v10769_v19 = vcombine.low %v9053_v35, %v9056_v38 }
 0x1d6   :  { %v10771_v7 = vcombine.high %v9053_v35, %v9056_v38  ;;  %v9242_v41 = vrot.slane %v1973_v11, %v8715_v59  ;;  %v9245_v25 = vrot.slane %v1974_v23, %v8715_v59  ;;  %v9248_v61 = vrot.slane %v1989_v4, %v8715_v59  ;;  %v1590_v35 = vpop.permute.xlu0 %1589 }
 0x1d7   :  { %10767 = vst [vmem:[#allocation47_spill] sm:$0xff] %v9215_v8  ;;  %v9232_v57 = vrot.slane %v10769_v19, %v8708_v51  ;;  %7918 = vmatprep.subr.msk.mxu1 %vm3857_vm0, %v2345_v31  ;;  %v10773_v47 = vcombine.low %v9059_v63, %v9062_v16  ;;  %v9258_v38 = vrot.slane %v1990_v13, %v8715_v59 }
 0x1d8   :  { %v9238_v53 = vrot.slane %v10771_v7, %v8708_v51  ;;  %7919 = vmatpush3.xpose.msk.msra.mxu1 %vm3857_vm0, %v2345_v31  ;;  %v10775_v11 = vcombine.high %v9059_v63, %v9062_v16  ;;  %v2077_v19 = vcombine.low %v8639_v29, %v9147_v20  ;;  %v1245_v31 = vcombine.low %v9215_v8, %v9221_v15  ;;  %v398_v63 = vpop.permute.xlu1 %397 }
 0x1d9   :  { %10770 = vst [vmem:[#allocation48_spill] sm:$0xff] %v9232_v57  ;;  %v9254_v62 = vrot.slane %v10773_v47, %v8708_v51  ;;  %v2078_v13 = vcombine.high %v8639_v29, %v9147_v20  ;;  %v2093_v47 = vcombine.low %v9103_v46, %v1592_v24  ;;  %v2094_v20 = vcombine.high %v9103_v46, %v1592_v24 }
 0x1da   :  { %10772 = vst [vmem:[#allocation49_spill] sm:$0xff] %v9238_v53  ;;  %v9264_v23 = vrot.slane %v10775_v11, %v8708_v51  ;;  %v1281_v4 = vcombine.low %v9232_v57, %v9238_v53  ;;  %v2085_v29 = vrot.slane %v2077_v19, %v8708_v51  ;;  %v841_v11 = vcombine.low %v8646_v30, %v398_v63  ;;  %v422_v19 = vpop.permute.xlu0 %421 }
 0x1db   :  { %10774 = vst [vmem:[#allocation50_spill] sm:$0xff] %v9254_v62  ;;  %7921 = vmatmul.mubr.msk.f32.vlgmr.msra.gmra.mxu1 %vm3857_vm0, %v1245_v31  ;;  %v2101_v16 = vrot.slane %v2093_v47, %v8708_v51  ;;  %v2025_v37 = vcombine.low %v9188_v58, %v1590_v35  ;;  %v2026_v31 = vcombine.high %v9188_v58, %v1590_v35 }
 0x1dc   :  { %10776 = vst [vmem:[#allocation51_spill] sm:$0xff] %v9264_v23  ;;  %v9282_v60 = vrot.slane %v1281_v4, %v8715_v59  ;;  %v1297_v7 = vcombine.low %v9254_v62, %v9264_v23  ;;  %v2092_v4 = vrot.slane %v2078_v13, %v8708_v51  ;;  %v2108_v62 = vrot.slane %v2094_v20, %v8708_v51 }
 0x1dd   :  { %v2109_v28 = vcombine.low %v2085_v29, %v2101_v16  ;;  %v2110_v23 = vcombine.high %v2085_v29, %v2101_v16  ;;  %v842_v24 = vcombine.high %v8646_v30, %v398_v63  ;;  %v2033_v13 = vrot.slane %v2025_v37, %v8708_v51  ;;  %v376_v29 = vpop.permute.xlu1 %375 }
 0x1de   :  { %v9293_v54 = vrot.slane %v1297_v7, %v8715_v59  ;;  %v849_v7 = vrot.slane %v841_v11, %v8708_v51  ;;  %v2125_v53 = vcombine.low %v2092_v4, %v2108_v62  ;;  %v2126_v20 = vcombine.high %v2092_v4, %v2108_v62 }
 0x1df   :  { %v2117_v47 = vrot.slane %v2109_v28, %v8715_v59  ;;  %v2124_v57 = vrot.slane %v2110_v23, %v8715_v59  ;;  %v2040_v58 = vrot.slane %v2026_v31, %v8708_v51  ;;  %v2041_v35 = vcombine.low %v9124_v6, %v2033_v13 }
 0x1e0   :  { %v1313_v46 = vcombine.low %v9282_v60, %v9293_v54  ;;  %v2042_v16 = vcombine.high %v9124_v6, %v2033_v13  ;;  %v857_v30 = vcombine.low %v9128_v27, %v422_v19  ;;  %v2133_v63 = vrot.slane %v2125_v53, %v8715_v59 }
 0x1e1   :  { %v2140_v37 = vrot.slane %v2126_v20, %v8715_v59  ;;  %v2621_v11 = vcombine.low %v2117_v47, %v2124_v57  ;;  %v7518_v28 = vcombine.high %v2117_v47, %v2124_v57  ;;  %v2049_v23 = vrot.slane %v2041_v35, %v8715_v59 }
 0x1e2   :  { %7927 = vmatprep.mubr.msk.f32.mxu0 %vm3857_vm0, %v1313_v46  ;;  %v2056_v62 = vrot.slane %v2042_v16, %v8715_v59  ;;  %v2057_v4 = vcombine.low %v9138_v48, %v2040_v58  ;;  %v2058_v31 = vcombine.high %v9138_v48, %v2040_v58  ;;  %v856_v53 = vrot.slane %v842_v24, %v8708_v51 }
 0x1e3   :  { %v9319_v46 = vrot.slane %v2621_v11, %v8708_v51  ;;  %v2637_v6 = vcombine.low %v2133_v63, %v2140_v37  ;;  %v7519_v13 = vcombine.high %v2133_v63, %v2140_v37  ;;  %v9325_v35 = vrot.slane %v7518_v28, %v8708_v51 }
 0x1e4   :  { %v2065_v20 = vrot.slane %v2057_v4, %v8715_v59  ;;  %v2072_v57 = vrot.slane %v2058_v31, %v8715_v59  ;;  %v2553_v47 = vcombine.low %v2049_v23, %v2056_v62  ;;  %v7516_v5 = vcombine.high %v2049_v23, %v2056_v62 }
 0x1e5   :  { %10777 = vst [vmem:[#allocation52_spill] sm:$0xff] %v9319_v46  ;;  %10778 = vst [vmem:[#allocation53_spill] sm:$0xff] %v9325_v35  ;;  %v9328_v16 = vrot.slane %v2637_v6, %v8708_v51  ;;  %v858_v48 = vcombine.high %v9128_v27, %v422_v19  ;;  %v865_v58 = vrot.slane %v857_v30, %v8708_v51  ;;  %v424_v30 = vpop.permute.xlu1 %423 }
 0x1e6   :  { %v9333_v63 = vrot.slane %v7519_v13, %v8708_v51  ;;  %v9336_v24 = vrot.slane %v2553_v47, %v8708_v51  ;;  %v9339_v37 = vrot.slane %v7516_v5, %v8708_v51  ;;  %v2569_v11 = vcombine.low %v2065_v20, %v2072_v57 }
 0x1e7   :  { %10779 = vst [vmem:[#allocation54_spill] sm:$0xff] %v9328_v16  ;;  %v872_v28 = vrot.slane %v858_v48, %v8708_v51  ;;  %v873_v23 = vcombine.low %v849_v7, %v865_v58  ;;  %v874_v62 = vcombine.high %v849_v7, %v865_v58  ;;  %v10781_v27 = vcombine.low %v9242_v41, %v9245_v25 }
 0x1e8   :  { %10780 = vst [vmem:[#allocation55_spill] sm:$0xff] %v9333_v63  ;;  %v9349_v4 = vrot.slane %v2569_v11, %v8708_v51  ;;  %v7517_v31 = vcombine.high %v2065_v20, %v2072_v57  ;;  %v10782_v5 = vcombine.high %v9242_v41, %v9245_v25  ;;  %v10783_v7 = vcombine.low %v9248_v61, %v9258_v38 }
 0x1e9   :  { %v9346_v19 = vrot.slane %v10781_v27, %v8708_v51  ;;  %v881_v47 = vrot.slane %v873_v23, %v8715_v59  ;;  %v888_v48 = vrot.slane %v874_v62, %v8715_v59  ;;  %v889_v58 = vcombine.low %v856_v53, %v872_v28  ;;  %v400_v62 = vpop.permute.xlu0 %399 }
 0x1ea   :  { %v9355_v6 = vrot.slane %v10782_v5, %v8708_v51  ;;  %v9361_v13 = vrot.slane %v10783_v7, %v8708_v51  ;;  %v890_v11 = vcombine.high %v856_v53, %v872_v28  ;;  %v10785_v20 = vcombine.high %v9248_v61, %v9258_v38 }
 0x1eb   :  { %v925_v25 = vcombine.low %v376_v29, %v424_v30  ;;  %v926_v27 = vcombine.high %v376_v29, %v424_v30  ;;  %v897_v5 = vrot.slane %v889_v58, %v8715_v59  ;;  %v1385_v23 = vcombine.low %v881_v47, %v888_v48 }
 0x1ec   :  { %10784 = vst [vmem:[#allocation56_spill] sm:$0xff] %v9361_v13  ;;  %v9369_v57 = vrot.slane %v10785_v20, %v8708_v51  ;;  %v2517_v41 = vcombine.low %v9346_v19, %v9355_v6  ;;  %v904_v7 = vrot.slane %v890_v11, %v8715_v59  ;;  %v7500_v8 = vcombine.high %v881_v47, %v888_v48 }
 0x1ed   :  { %v9376_v53 = vrot.slane %v7517_v31, %v8708_v51  ;;  %v933_v38 = vrot.slane %v925_v25, %v8708_v51  ;;  %v9385_v29 = vrot.slane %v1385_v23, %v8708_v51  ;;  %v940_v11 = vrot.slane %v926_v27, %v8708_v51 }
 0x1ee   :  { %v9379_v28 = vrot.slane %v2517_v41, %v8715_v59  ;;  %v2533_v61 = vcombine.low %v9361_v13, %v9369_v57  ;;  %v1401_v30 = vcombine.low %v897_v5, %v904_v7  ;;  %v7501_v58 = vcombine.high %v897_v5, %v904_v7 }
 0x1ef   :  { %v909_v31 = vcombine.low %v8662_v32, %v400_v62  ;;  %v910_v48 = vcombine.high %v8662_v32, %v400_v62  ;;  %v10786_v20 = vcombine.low %v9065_v9, %v9068_v43  ;;  %v9400_v25 = vrot.slane %v7500_v8, %v8708_v51 }
 0x1f0   :  { %v9389_v47 = vrot.slane %v2533_v61, %v8715_v59  ;;  %v9403_v5 = vrot.slane %v1401_v30, %v8708_v51  ;;  %v10787_v27 = vcombine.high %v9065_v9, %v9068_v43  ;;  %v10788_v32 = vcombine.low %v9082_v56, %v9085_v0 }
 0x1f1   :  { %v9397_v41 = vrot.slane %v10786_v20, %v8708_v51  ;;  %v917_v8 = vrot.slane %v909_v31, %v8708_v51  ;;  %v924_v61 = vrot.slane %v910_v48, %v8708_v51  ;;  %v10789_v30 = vcombine.high %v9082_v56, %v9085_v0 }
 0x1f2   :  { %v9409_v7 = vrot.slane %v10787_v27, %v8708_v51  ;;  %v9415_v23 = vrot.slane %v10788_v32, %v8708_v51  ;;  %v2549_v62 = vcombine.low %v9379_v28, %v9389_v47  ;;  %v9428_v43 = vrot.slane %v7501_v58, %v8708_v51 }
 0x1f3   :  { %v9425_v9 = vrot.slane %v10789_v30, %v8708_v51  ;;  %v2278_v27 = vcombine.high %v8946_v40, %v8949_v17  ;;  %v2653_v31 = vcombine.low %v9319_v46, %v9325_v35  ;;  %v941_v48 = vcombine.low %v917_v8, %v933_v38 }
 0x1f4   :  { %v2449_v20 = vcombine.low %v9397_v41, %v9409_v7  ;;  %7923 = vmatprep.subr.msk.mxu0 %vm3857_vm0, %v2549_v62  ;;  %v942_v32 = vcombine.high %v917_v8, %v933_v38  ;;  %v957_v13 = vcombine.low %v924_v61, %v940_v11  ;;  %v958_v56 = vcombine.high %v924_v61, %v940_v11 }
 0x1f5   :  { %7924 = vmatpush3.xpose.msk.msra.mxu0 %vm3857_vm0, %v2549_v62  ;;  %v2465_v58 = vcombine.low %v9415_v23, %v9425_v9  ;;  %v9442_v30 = vrot.slane %v2653_v31, %v8715_v59  ;;  %v2669_v40 = vcombine.low %v9328_v16, %v9333_v63  ;;  %v949_v17 = vrot.slane %v941_v48, %v8715_v59 }
 0x1f6   :  { %v2457_v0 = vrot.slane %v2449_v20, %v8715_v59  ;;  %v956_v46 = vrot.slane %v942_v32, %v8715_v59  ;;  %v965_v38 = vrot.slane %v957_v13, %v8715_v59  ;;  %v972_v11 = vrot.slane %v958_v56, %v8715_v59 }
 0x1f7   :  { %v2473_v62 = vrot.slane %v2465_v58, %v8715_v59  ;;  %v1381_v8 = vcombine.low %v9207_v21, %v9226_v26  ;;  %v9454_v61 = vrot.slane %v2669_v40, %v8715_v59  ;;  %v2210_v20 = vcombine.high %v8969_v39, %v8989_v1 }
 0x1f8   :  { %v1453_v31 = vcombine.low %v949_v17, %v956_v46  ;;  %v7502_v16 = vcombine.high %v949_v17, %v956_v46  ;;  %v1469_v48 = vcombine.low %v965_v38, %v972_v11  ;;  %v7503_v63 = vcombine.high %v965_v38, %v972_v11 }
 0x1f9   :  { %v2481_v32 = vcombine.low %v2457_v0, %v2473_v62  ;;  %v2685_v13 = vcombine.low %v9442_v30, %v9454_v61  ;;  %v2585_v56 = vcombine.low %v9336_v24, %v9339_v37  ;;  %v2601_v58 = vcombine.low %v9349_v4, %v9376_v53 }
 0x1fa   :  { %v9465_v40 = vrot.slane %v1453_v31, %v8708_v51  ;;  %v9468_v35 = vrot.slane %v7502_v16, %v8708_v51  ;;  %v9471_v39 = vrot.slane %v1469_v48, %v8708_v51  ;;  %v9474_v1 = vrot.slane %v7503_v63, %v8708_v51 }
 0x1fb   :  { %7925 = vmatprep.subr.msk.mxu0 %vm3857_vm0, %v2481_v32  ;;  %7930 = vmatprep.subr.msk.mxu1 %vm3857_vm0, %v2685_v13  ;;  %v1042_v46 = vcombine.high %v8769_v34, %v8780_v44  ;;  %v9481_v17 = vrot.slane %v2585_v56, %v8715_v59  ;;  %v9484_v38 = vrot.slane %v2601_v58, %v8715_v59  ;;  %v334_v56 = vpop.f32.mrf.mxu1  ;;  %v9503_v58 = vpop.permute.xlu1 %2699 }
 0x1fc   :  { %v1485_v16 = vcombine.low %v9465_v40, %v9468_v35  ;;  %v1501_v11 = vcombine.low %v9471_v39, %v9474_v1  ;;  %7926 = vmatpush3.xpose.msk.msra.mxu0 %vm3857_vm0, %v2481_v32  ;;  %v2414_v34 = vcombine.high %v9119_v18, %v9135_v36  ;;  %7931 = vmatpush3.xpose.msk.msra.mxu1 %vm3857_vm0, %v2685_v13 }
 0x1fd   :  { %7937 = vmatprep.subr.msk.mxu0 %vm3857_vm0, %v2278_v27  ;;  %v2617_v31 = vcombine.low %v9481_v17, %v9484_v38  ;;  %v1417_v48 = vcombine.low %v9385_v29, %v9400_v25  ;;  %v2550_v32 = vcombine.high %v9379_v28, %v9389_v47  ;;  %v1433_v18 = vcombine.low %v9403_v5, %v9428_v43 }
 0x1fe   :  { %v1110_v36 = vcombine.high %v8818_v10, %v8821_v3  ;;  %v1314_v13 = vcombine.high %v9282_v60, %v9293_v54  ;;  %v9519_v63 = vrot.slane %v1485_v16, %v8715_v59  ;;  %v9522_v28 = vrot.slane %v1501_v11, %v8715_v59 }
 0x1ff   :  { %7928 = vmatmul.mubr.msk.f32.vlgmr.msra.gmra.mxu0 %vm3857_vm0, %v1381_v8  ;;  %7932 = vmatprep.subr.msk.mxu1 %vm3857_vm0, %v2617_v31  ;;  %v9516_v44 = vrot.slane %v1417_v48, %v8715_v59  ;;  %v9527_v10 = vrot.slane %v1433_v18, %v8715_v59  ;;  %v2482_v3 = vcombine.high %v2457_v0, %v2473_v62  ;;  %v9558_v11 = vpop.permute.xlu1 %2747  ;;  %v10796_v18 = vld [vmem:[#allocation47_spill] sm:$0xff] }
 0x200   :  { %7938 = vmatpush3.xpose.msk.msra.mxu0 %vm3857_vm0, %v2278_v27  ;;  %7941 = vmatprep.mubr.msk.f32.mxu0 %vm3857_vm0, %v1042_v46  ;;  %v9530_v60 = vadd.f32 %v334_v56, %v8669_v33  ;;  %v1517_v54 = vcombine.low %v9519_v63, %v9522_v28  ;;  %v2346_v47 = vcombine.high %v9199_v2, %v9202_v12  ;;  %v10790_v2 = vld [vmem:[#allocation18_spill] sm:$0xff]  ;;  %v10791_v12 = vld [vmem:[#allocation17_spill] sm:$0xff] }
 0x201   :  { %7939 = vmatprep.subr.msk.mxu0 %vm3857_vm0, %v2210_v20  ;;  %7933 = vmatpush3.xpose.msk.msra.mxu1 %vm3857_vm0, %v2617_v31  ;;  %v2246_v27 = vcombine.high %v8912_v45, %v8915_v42  ;;  %v1449_v0 = vcombine.low %v9516_v44, %v9527_v10  ;;  %v1178_v62 = vcombine.high %v9021_v14, %v9027_v55  ;;  %v10793_v14 = vld [vmem:[#allocation19_spill] sm:$0xff]  ;;  %v10794_v31 = vld [vmem:[#allocation26_spill] sm:$0xff] }
 0x202   :  { %7944 = vmatprep.subr.msk.mxu1 %vm3857_vm0, %v2414_v34  ;;  %v2262_v8 = vcombine.high %v8918_v52, %v8921_v22  ;;  %2705 = vrot.lane.b32.xlu1 %v9530_v60, %s8450_s12  ;;  %v1382_v45 = vcombine.high %v9207_v21, %v9226_v26  ;;  %v1010_v42 = vcombine.high %v8741_v49, %v8744_v50  ;;  %v10792_v22 = vld [vmem:[#allocation20_spill] sm:$0xff]  ;;  %v10795_v26 = vld [vmem:[#allocation21_spill] sm:$0xff] }
 0x203   :  { %v9550_v46 = vrot.slane %v2246_v27, %v8715_v59  ;;  %v1026_v16 = vcombine.high %v10791_v12, %v10790_v2  ;;  %7934 = vmatprep.mubr.msk.f32.mxu1 %vm3857_vm0, %v1449_v0  ;;  %v2178_v55 = vcombine.high %v10793_v14, %v10792_v22  ;;  %v2194_v21 = vcombine.high %v10795_v26, %v10794_v31  ;;  %v10797_v27 = vld [vmem:[#allocation56_spill] sm:$0xff]  ;;  %v9622_v2 = vpop.permute.xlu1 %2721  ;;  %v10807_v22 = vld [vmem:[#allocation38_spill] sm:$0xff]  ;;  %v10808_v14 = vld [vmem:[#allocation37_spill] sm:$0xff] }
 0x204   :  { %7940 = vmatpush3.xpose.msk.msra.mxu0 %vm3857_vm0, %v2210_v20  ;;  %v9563_v52 = vrot.slane %v2262_v8, %v8715_v59  ;;  %7935 = vmatmul.mubr.msk.f32.vlgmr.msra.gmra.mxu1 %vm3857_vm0, %v1517_v54  ;;  %v2686_v49 = vcombine.high %v9442_v30, %v9454_v61  ;;  %v9574_v50 = vrot.slane %v1010_v42, %v8715_v59  ;;  %v10809_v31 = vld [vmem:[#allocation49_spill] sm:$0xff]  ;;  %v10810_v26 = vld [vmem:[#allocation48_spill] sm:$0xff] }
 0x205   :  { %7951 = vmatprep.subr.msk.mxu0 %vm3857_vm0, %v2550_v32  ;;  %v9577_v20 = vrot.slane %v1026_v16, %v8715_v59  ;;  %7945 = vmatpush3.xpose.msk.msra.mxu1 %vm3857_vm0, %v2414_v34  ;;  %v9584_v56 = vrot.slane %v2178_v55, %v8715_v59  ;;  %v1246_v54 = vcombine.high %v10796_v18, %v9221_v15 }
 0x206   :  { %7948 = vmatprep.mubr.msk.f32.mxu1 %vm3857_vm0, %v1178_v62  ;;  %v2279_v48 = vcombine.low %v9550_v46, %v9563_v52  ;;  %7946 = vmatprep.subr.msk.mxu1 %vm3857_vm0, %v2346_v47  ;;  %v9593_v61 = vrot.slane %v2194_v21, %v8715_v59  ;;  %v1450_v34 = vcombine.high %v9516_v44, %v9527_v10  ;;  %v10798_v62 = vld [vmem:[#allocation16_spill] sm:$0xff]  ;;  %v10799_v44 = vld [vmem:[#allocation22_spill] sm:$0xff]  ;;  %v10800_v10 = vld [vmem:[#allocation23_spill] sm:$0xff] }
 0x207   :  { %7942 = vmatmul.mubr.msk.f32.vlgmr.msra.gmra.mxu0 %vm3857_vm0, %v1110_v36  ;;  %v1043_v30 = vcombine.low %v9574_v50, %v9577_v20  ;;  %v2618_v15 = vcombine.high %v9481_v17, %v9484_v38  ;;  %v2518_v36 = vcombine.high %v9346_v19, %v9355_v6  ;;  %v2534_v0 = vcombine.high %v10797_v27, %v9369_v57  ;;  %v10803_v17 = vld [vmem:[#allocation25_spill] sm:$0xff]  ;;  %v10805_v19 = vld [vmem:[#allocation36_spill] sm:$0xff]  ;;  %v10806_v6 = vld [vmem:[#allocation35_spill] sm:$0xff] }
 0x208   :  { %7952 = vmatpush3.xpose.msk.msra.mxu0 %vm3857_vm0, %v2550_v32  ;;  %7955 = vmatprep.mubr.msk.f32.mxu0 %vm3857_vm0, %v1314_v13  ;;  %v10801_v32 = vcombine.high %v10799_v44, %v10800_v10  ;;  %v10802_v13 = vld [vmem:[#allocation24_spill] sm:$0xff]  ;;  %v2382_v57 = vcombine.high %v10806_v6, %v10805_v19  ;;  %v2398_v55 = vcombine.high %v10808_v14, %v10807_v22  ;;  %v10818_v14 = vld [vmem:[#allocation39_spill] sm:$0xff] }
 0x209   :  { %7953 = vmatprep.subr.msk.mxu0 %vm3857_vm0, %v2482_v3  ;;  %2725 = vrot.lane.b32.xlu1 %v10798_v62, %s8449_s11  ;;  %v10804_v38 = vcombine.high %v10802_v13, %v10803_v17  ;;  %v9626_v12 = vrot.slane %v2518_v36, %v8715_v59  ;;  %v9629_v16 = vrot.slane %v2534_v0, %v8715_v59  ;;  %v10812_v36 = vld [vmem:[#allocation50_spill] sm:$0xff] }
 0x20a   :  { %v9612_v8 = vrot.slane %v10801_v32, %v8715_v59  ;;  %7947 = vmatpush3.xpose.msk.msra.mxu1 %vm3857_vm0, %v2346_v47  ;;  %v1282_v21 = vcombine.high %v10810_v26, %v10809_v31  ;;  %v9639_v27 = vrot.slane %v2382_v57, %v8715_v59  ;;  %v10811_v47 = vld [vmem:[#allocation51_spill] sm:$0xff]  ;;  %v2450_v0 = vcombine.high %v9397_v41, %v9409_v7  ;;  %v10815_v57 = vld [vmem:[#allocation34_spill] sm:$0xff]  ;;  %v9683_v31 = vpop.permute.xlu1 %2745 }
 0x20b   :  { %v9618_v42 = vrot.slane %v10804_v38, %v8715_v59  ;;  %7958 = vmatprep.subr.msk.mxu1 %vm3857_vm0, %v2686_v49  ;;  %v1298_v44 = vcombine.high %v10812_v36, %v10811_v47  ;;  %v2211_v10 = vcombine.low %v9584_v56, %v9593_v61  ;;  %v9649_v32 = vrot.slane %v2398_v55, %v8715_v59  ;;  %v10814_v38 = vld [vmem:[#allocation31_spill] sm:$0xff]  ;;  %v9703_v36 = vpop.permute.xlu0 %2723 }
 0x20c   :  { %7954 = vmatpush3.xpose.msk.msra.mxu0 %vm3857_vm0, %v2482_v3  ;;  %v9652_v13 = vrot.slane %v1282_v21, %v8715_v59  ;;  %v2466_v17 = vcombine.high %v9415_v23, %v9425_v9  ;;  %v2551_v41 = vcombine.low %v9626_v12, %v9629_v16  ;;  %v9664_v3 = vrot.slane %v2450_v0, %v8715_v59  ;;  %v10819_v21 = vld [vmem:[#allocation42_spill] sm:$0xff] }
 0x20d   :  { %v1111_v18 = vcombine.low %v9612_v8, %v9618_v42  ;;  %7965 = vmatprep.subr.msk.mxu0 %vm3857_vm0, %v2279_v48  ;;  %7949 = vmatmul.mubr.msk.f32.vlgmr.msra.gmra.mxu1 %vm3857_vm0, %v1246_v54  ;;  %v9661_v7 = vrot.slane %v1298_v44, %v8715_v59  ;;  %v2415_v23 = vcombine.low %v9639_v27, %v9649_v32  ;;  %v10813_v54 = vld [vmem:[#allocation32_spill] sm:$0xff] }
 0x20e   :  { %7959 = vmatpush3.xpose.msk.msra.mxu1 %vm3857_vm0, %v2686_v49  ;;  %7962 = vmatprep.mubr.msk.f32.mxu1 %vm3857_vm0, %v1450_v34  ;;  %v9671_v9 = vrot.slane %v2466_v17, %v8715_v59  ;;  %v1146_v19 = vcombine.high %v10814_v38, %v10813_v54  ;;  %v1518_v6 = vcombine.high %v9519_v63, %v9522_v28  ;;  %v10816_v49 = vld [vmem:[#allocation33_spill] sm:$0xff]  ;;  %v10817_v34 = vld [vmem:[#allocation40_spill] sm:$0xff]  ;;  %v10821_v17 = vld [vmem:[#allocation43_spill] sm:$0xff] }
 0x20f   :  { %7956 = vmatmul.mubr.msk.f32.vlgmr.msra.gmra.mxu0 %vm3857_vm0, %v1382_v45  ;;  %7960 = vmatprep.subr.msk.mxu1 %vm3857_vm0, %v2618_v15  ;;  %v1162_v22 = vcombine.high %v10816_v49, %v10815_v57  ;;  %v2314_v55 = vcombine.high %v10818_v14, %v10817_v34  ;;  %v1315_v45 = vcombine.low %v9652_v13, %v9661_v7  ;;  %v10820_v63 = vld [vmem:[#allocation41_spill] sm:$0xff]  ;;  %v10822_v54 = vld [vmem:[#allocation44_spill] sm:$0xff]  ;;  %v10827_v14 = vld [vmem:[#allocation46_spill] sm:$0xff] }
 0x210   :  { %7966 = vmatpush3.xpose.msk.msra.mxu0 %vm3857_vm0, %v2279_v48  ;;  %7969 = vmatprep.mubr.msk.f32.mxu0 %vm3857_vm0, %v1043_v30  ;;  %v9690_v26 = vrot.slane %v1146_v19, %v8715_v59  ;;  %v2330_v28 = vcombine.high %v10820_v63, %v10819_v21  ;;  %v2483_v47 = vcombine.low %v9664_v3, %v9671_v9  ;;  %v10824_v57 = vld [vmem:[#allocation53_spill] sm:$0xff]  ;;  %v10825_v49 = vld [vmem:[#allocation52_spill] sm:$0xff]  ;;  %v10830_v21 = vld [vmem:[#allocation54_spill] sm:$0xff] }
 0x211   :  { %7967 = vmatprep.subr.msk.mxu0 %vm3857_vm0, %v2211_v10  ;;  %2729 = vrot.lane.b32.xlu1 %v9530_v60, %s8449_s11  ;;  %v9700_v48 = vrot.slane %v1162_v22, %v8715_v59  ;;  %v2328_v30 = vrot.slane %v2314_v55, %v8715_v59  ;;  %v9709_v0 = vcombine.high %v9550_v46, %v9563_v52  ;;  %v10826_v34 = vld [vmem:[#allocation45_spill] sm:$0xff]  ;;  %v10829_v52 = vld [vmem:[#allocation55_spill] sm:$0xff] }
 0x212   :  { %7961 = vmatpush3.xpose.msk.msra.mxu1 %vm3857_vm0, %v2618_v15  ;;  %v2344_v44 = vrot.slane %v2330_v28, %v8715_v59  ;;  %v10823_v38 = vcombine.high %v10821_v17, %v10822_v54  ;;  %v2654_v22 = vcombine.high %v10825_v49, %v10824_v57  ;;  %v10828_v55 = vcombine.high %v10826_v34, %v10827_v14  ;;  %v10831_v57 = vld [vmem:[#allocation27_spill] sm:$0xff]  ;;  %v10832_v49 = vld [vmem:[#allocation28_spill] sm:$0xff] }
 0x213   :  { %7972 = vmatprep.subr.msk.mxu1 %vm3857_vm0, %v2415_v23  ;;  %v1179_v15 = vcombine.low %v9690_v26, %v9700_v48  ;;  %v2670_v63 = vcombine.high %v10830_v21, %v10829_v52  ;;  %v1044_v28 = vcombine.high %v9574_v50, %v9577_v20  ;;  %v10833_v34 = vcombine.high %v10831_v57, %v10832_v49  ;;  %v10835_v52 = vld [vmem:[#allocation30_spill] sm:$0xff] }
 0x214   :  { %v9715_v19 = vrot.slane %v10823_v38, %v8715_v59  ;;  %v9726_v46 = vrot.slane %v10828_v55, %v8715_v59  ;;  %7968 = vmatpush3.xpose.msk.msra.mxu0 %vm3857_vm0, %v2211_v10  ;;  %v2347_v17 = vcombine.low %v2328_v30, %v2344_v44  ;;  %v2668_v54 = vrot.slane %v2654_v22, %v8715_v59  ;;  %v10834_v10 = vld [vmem:[#allocation29_spill] sm:$0xff] }
 0x215   :  { %v9736_v38 = vcombine.high %v9584_v56, %v9593_v61  ;;  %v9742_v14 = vrot.slane %v10833_v34, %v8715_v59  ;;  %7979 = vmatprep.subr.msk.mxu0 %vm3857_vm0, %v2551_v41  ;;  %7963 = vmatmul.mubr.msk.f32.vlgmr.msra.gmra.mxu1 %vm3857_vm0, %v1518_v6  ;;  %v2684_v55 = vrot.slane %v2670_v63, %v8715_v59  ;;  %v9755_v61 = vpop.permute.xlu1 %2707 }
 0x216   :  { %v10836_v22 = vcombine.high %v10834_v10, %v10835_v52  ;;  %v1418_v56 = vcombine.high %v9385_v29, %v9400_v25  ;;  %2749 = vrot.lane.b32.xlu1 %v10798_v62, %s8451_s2  ;;  %7973 = vmatpush3.xpose.msk.msra.mxu1 %vm3857_vm0, %v2415_v23  ;;  %v1434_v6 = vcombine.high %v9403_v5, %v9428_v43  ;;  %v9775_v5 = vpop.permute.xlu0 %2697 }
 0x217   :  { %v2586_v63 = vcombine.high %v9336_v24, %v9339_v37  ;;  %v2602_v57 = vcombine.high %v9349_v4, %v9376_v53  ;;  %7970 = vmatmul.mubr.msk.f32.vlgmr.msra.gmra.mxu0 %vm3857_vm0, %v1111_v18  ;;  %7976 = vmatprep.mubr.msk.f32.mxu1 %vm3857_vm0, %v1179_v15  ;;  %v1383_v29 = vcombine.low %v9715_v19, %v9726_v46 }
 0x218   :  { %v9751_v21 = vrot.slane %v10836_v22, %v8715_v59  ;;  %v9773_v23 = vrot.slane %v1418_v56, %v8715_v59  ;;  %7980 = vmatpush3.xpose.msk.msra.mxu0 %vm3857_vm0, %v2551_v41  ;;  %7983 = vmatprep.mubr.msk.f32.mxu0 %vm3857_vm0, %v1315_v45  ;;  %v9780_v24 = vrot.slane %v1434_v6, %v8715_v59  ;;  %v10840_v56 = vld [vmem:[#allocation15_spill] sm:$0xff] }
 0x219   :  { %v2600_v37 = vrot.slane %v2586_v63, %v8715_v59  ;;  %v2616_v4 = vrot.slane %v2602_v57, %v8715_v59  ;;  %7981 = vmatprep.subr.msk.mxu0 %vm3857_vm0, %v2483_v47  ;;  %7974 = vmatprep.subr.msk.mxu1 %vm3857_vm0, %v2347_v17  ;;  %v2687_v53 = vcombine.low %v2668_v54, %v2684_v55  ;;  %v2732_v34 = vpop.permute.xlu1 %2731 }
 0x21a   :  { %v1247_v25 = vcombine.low %v9742_v14, %v9751_v21  ;;  %v1112_v43 = vcombine.high %v9612_v8, %v9618_v42  ;;  %v9790_v18 = vcombine.high %v9639_v27, %v9649_v32  ;;  %7975 = vmatpush3.xpose.msk.msra.mxu1 %vm3857_vm0, %v2347_v17  ;;  %2753 = vrot.lane.b32.xlu1 %v9530_v60, %s8451_s2 }
 0x21b   :  { %v1451_v41 = vcombine.low %v9773_v23, %v9780_v24  ;;  %v2619_v45 = vcombine.low %v2600_v37, %v2616_v4  ;;  %v9799_v15 = vcombine.high %v9626_v12, %v9629_v16  ;;  %7986 = vmatprep.subr.msk.mxu1 %vm3857_vm0, %v2687_v53  ;;  %v1316_v49 = vcombine.high %v9652_v13, %v9661_v7 }
 0x21c   :  { %v9806_v27 = vcombine.high %v9664_v3, %v9671_v9  ;;  %v10837_v32 = vcombine.high %v9465_v40, %v9468_v35  ;;  %v10838_v12 = vcombine.high %v9471_v39, %v9474_v1  ;;  %7982 = vmatpush3.xpose.msk.msra.mxu0 %vm3857_vm0, %v2483_v47  ;;  %v1180_v10 = vcombine.high %v9690_v26, %v9700_v48  ;;  %v7908_v40 = vpop.f32.mrf.mxu1  ;;  %v9838_v47 = vpop.permute.xlu0 %2703 }
 0x21d   :  { %v9823_v3 = vcombine.high %v2328_v30, %v2344_v44  ;;  %v1384_v9 = vcombine.high %v9715_v19, %v9726_v46  ;;  %v1248_v35 = vcombine.high %v9742_v14, %v9751_v21  ;;  %7993 = vmatprep.subr.msk.mxu0 %vm3857_vm0, %v9709_v0  ;;  %7977 = vmatmul.mubr.msk.f32.vlgmr.msra.gmra.mxu1 %vm3857_vm0, %v1247_v25  ;;  %v2756_v20 = vpop.permute.xlu1 %2755 }
 0x21e   :  { %v9812_v17 = vrot.slane %v10837_v32, %v8715_v59  ;;  %v9818_v16 = vrot.slane %v10838_v12, %v8715_v59  ;;  %v9834_v1 = vcombine.high %v2668_v54, %v2684_v55  ;;  %v1452_v26 = vcombine.high %v9773_v23, %v9780_v24  ;;  %7987 = vmatpush3.xpose.msk.msra.mxu1 %vm3857_vm0, %v2687_v53  ;;  %v10839_v54 = vld [vmem:[#allocation13_spill] sm:$0xff] }
 0x21f   :  { %7990 = vmatprep.mubr.msk.f32.mxu1 %vm3857_vm0, %v1451_v41  ;;  %v9842_v48 = vcombine.high %v2600_v37, %v2616_v4  ;;  %v2853_v30 = vcombine.low %v9503_v58, %v9558_v11  ;;  %v2854_v44 = vcombine.high %v9503_v58, %v9558_v11  ;;  %7984 = vmatmul.mubr.msk.f32.vlgmr.msra.gmra.mxu0 %vm3857_vm0, %v1383_v29  ;;  %v10841_v29 = vld [vmem:[#allocation12_spill] sm:$0xff] }
 0x220   :  { %v1519_v39 = vcombine.low %v9812_v17, %v9818_v16  ;;  %7988 = vmatprep.subr.msk.mxu1 %vm3857_vm0, %v2619_v45  ;;  %v2769_v55 = vcombine.low %v10839_v54, %v9622_v2  ;;  %v2770_v52 = vcombine.high %v10839_v54, %v9622_v2  ;;  %v9855_v22 = vadd.f32 %v7908_v40, %v8669_v33 }
 0x221   :  { %7994 = vmatpush3.xpose.msk.msra.mxu0 %vm3857_vm0, %v9709_v0  ;;  %7997 = vmatprep.mubr.msk.f32.mxu0 %vm3857_vm0, %v1044_v28  ;;  %v2861_v58 = vrot.slane %v2853_v30, %v8708_v51  ;;  %v2868_v11 = vrot.slane %v2854_v44, %v8708_v51  ;;  %v3109_v6 = vcombine.low %v10840_v56, %v2732_v34 }
 0x222   :  { %7995 = vmatprep.subr.msk.mxu0 %vm3857_vm0, %v9736_v38  ;;  %v9869_v2 = vrot.slane %v2769_v55, %v8708_v51  ;;  %v9872_v63 = vrot.slane %v2770_v52, %v8708_v51  ;;  %2711 = vrot.lane.b32.xlu0 %v9855_v22, %s8450_s12  ;;  %v3110_v50 = vcombine.high %v10840_v56, %v2732_v34  ;;  %v10842_v34 = vld [vmem:[#allocation14_spill] sm:$0xff] }
 0x223   :  { %7989 = vmatpush3.xpose.msk.msra.mxu1 %vm3857_vm0, %v2619_v45  ;;  %v3117_v0 = vrot.slane %v3109_v6, %v8708_v51  ;;  %v3125_v28 = vcombine.low %v9755_v61, %v2756_v20  ;;  %v3126_v57 = vcombine.high %v9755_v61, %v2756_v20  ;;  %v2837_v25 = vcombine.low %v10841_v29, %v9703_v36  ;;  %v2728_v45 = vpop.permute.xlu0 %2727 }
 0x224   :  { %8000 = vmatprep.subr.msk.mxu1 %vm3857_vm0, %v9790_v18  ;;  %v3124_v37 = vrot.slane %v3110_v50, %v8708_v51  ;;  %v2838_v4 = vcombine.high %v10841_v29, %v9703_v36  ;;  %v2785_v53 = vcombine.low %v9775_v5, %v9683_v31  ;;  %v2786_v41 = vcombine.high %v9775_v5, %v9683_v31 }
 0x225   :  { %7996 = vmatpush3.xpose.msk.msra.mxu0 %vm3857_vm0, %v9736_v38  ;;  %v3133_v61 = vrot.slane %v3125_v28, %v8708_v51  ;;  %v3140_v32 = vrot.slane %v3126_v57, %v8708_v51  ;;  %v2845_v12 = vrot.slane %v2837_v25, %v8708_v51  ;;  %v2973_v40 = vcombine.low %v10842_v34, %v2728_v45 }
 0x226   :  { %8007 = vmatprep.subr.msk.mxu0 %vm3857_vm0, %v9799_v15  ;;  %7991 = vmatmul.mubr.msk.f32.vlgmr.msra.gmra.mxu1 %vm3857_vm0, %v1519_v39  ;;  %v2852_v36 = vrot.slane %v2838_v4, %v8708_v51  ;;  %v2793_v31 = vrot.slane %v2785_v53, %v8708_v51  ;;  %v2800_v5 = vrot.slane %v2786_v41, %v8708_v51 }
 0x227   :  { %8001 = vmatpush3.xpose.msk.msra.mxu1 %vm3857_vm0, %v9790_v18  ;;  %8004 = vmatprep.mubr.msk.f32.mxu1 %vm3857_vm0, %v1180_v10  ;;  %v3141_v38 = vcombine.low %v3117_v0, %v3133_v61  ;;  %v3142_v30 = vcombine.high %v3117_v0, %v3133_v61  ;;  %v3157_v44 = vcombine.low %v3124_v37, %v3140_v32  ;;  %v2752_v29 = vpop.permute.xlu0 %2751 }
 0x228   :  { %7998 = vmatmul.mubr.msk.f32.vlgmr.msra.gmra.mxu0 %vm3857_vm0, %v1112_v43  ;;  %8002 = vmatprep.subr.msk.mxu1 %vm3857_vm0, %v9823_v3  ;;  %v3158_v39 = vcombine.high %v3124_v37, %v3140_v32  ;;  %v2869_v54 = vcombine.low %v2845_v12, %v2861_v58  ;;  %v2870_v55 = vcombine.high %v2845_v12, %v2861_v58 }
 0x229   :  { %8008 = vmatpush3.xpose.msk.msra.mxu0 %vm3857_vm0, %v9799_v15  ;;  %8011 = vmatprep.mubr.msk.f32.mxu0 %vm3857_vm0, %v1316_v49  ;;  %v9920_v18 = vrot.slane %v3141_v38, %v8715_v59  ;;  %v9923_v8 = vrot.slane %v3142_v30, %v8715_v59  ;;  %v9926_v42 = vrot.slane %v3157_v44, %v8715_v59 }
 0x22a   :  { %8009 = vmatprep.subr.msk.mxu0 %vm3857_vm0, %v9806_v27  ;;  %v9931_v43 = vrot.slane %v3158_v39, %v8715_v59  ;;  %v2877_v15 = vrot.slane %v2869_v54, %v8715_v59  ;;  %v2884_v13 = vrot.slane %v2870_v55, %v8715_v59  ;;  %v2885_v7 = vcombine.low %v2852_v36, %v2868_v11 }
 0x22b   :  { %8003 = vmatpush3.xpose.msk.msra.mxu1 %vm3857_vm0, %v9823_v3  ;;  %v1520_v49 = vcombine.high %v9812_v17, %v9818_v16  ;;  %v3653_v10 = vcombine.low %v9920_v18, %v9923_v8  ;;  %v2886_v52 = vcombine.high %v2852_v36, %v2868_v11  ;;  %v2801_v58 = vcombine.low %v9869_v2, %v2793_v31 }
 0x22c   :  { %8014 = vmatprep.subr.msk.mxu1 %vm3857_vm0, %v9834_v1  ;;  %v7530_v56 = vcombine.high %v9920_v18, %v9923_v8  ;;  %v3669_v6 = vcombine.low %v9926_v42, %v9931_v43  ;;  %v2893_v3 = vrot.slane %v2885_v7, %v8715_v59  ;;  %v3381_v50 = vcombine.low %v2877_v15, %v2884_v13 }
 0x22d   :  { %8010 = vmatpush3.xpose.msk.msra.mxu0 %vm3857_vm0, %v9806_v27  ;;  %v2900_v17 = vrot.slane %v2886_v52, %v8715_v59  ;;  %v7522_v16 = vcombine.high %v2877_v15, %v2884_v13  ;;  %v2802_v11 = vcombine.high %v9869_v2, %v2793_v31  ;;  %v2809_v20 = vrot.slane %v2801_v58, %v8715_v59 }
 0x22e   :  { %8005 = vmatmul.mubr.msk.f32.vlgmr.msra.gmra.mxu1 %vm3857_vm0, %v1248_v35  ;;  %v2817_v0 = vcombine.low %v9872_v63, %v2800_v5  ;;  %v2818_v28 = vcombine.high %v9872_v63, %v2800_v5  ;;  %v2974_v57 = vcombine.high %v10842_v34, %v2728_v45  ;;  %v2981_v27 = vrot.slane %v2973_v40, %v8708_v51 }
 0x22f   :  { %8015 = vmatpush3.xpose.msk.msra.mxu1 %vm3857_vm0, %v9834_v1  ;;  %8018 = vmatprep.mubr.msk.f32.mxu1 %vm3857_vm0, %v1452_v26  ;;  %v3397_v14 = vcombine.low %v2893_v3, %v2900_v17  ;;  %v7523_v21 = vcombine.high %v2893_v3, %v2900_v17  ;;  %v2816_v35 = vrot.slane %v2802_v11, %v8715_v59 }
 0x230   :  { %8012 = vmatmul.mubr.msk.f32.vlgmr.msra.gmra.mxu0 %vm3857_vm0, %v1384_v9  ;;  %8016 = vmatprep.subr.msk.mxu1 %vm3857_vm0, %v9842_v48  ;;  %v2825_v2 = vrot.slane %v2817_v0, %v8715_v59  ;;  %v2832_v1 = vrot.slane %v2818_v28, %v8715_v59  ;;  %v2988_v23 = vrot.slane %v2974_v57, %v8708_v51 }
 0x231   :  { %v3313_v24 = vcombine.low %v2809_v20, %v2816_v35  ;;  %v7520_v26 = vcombine.high %v2809_v20, %v2816_v35  ;;  %v2989_v63 = vcombine.low %v9838_v47, %v2752_v29  ;;  %v2990_v25 = vcombine.high %v9838_v47, %v2752_v29 }
 0x232   :  { %v7531_v19 = vcombine.high %v9926_v42, %v9931_v43  ;;  %v3329_v46 = vcombine.low %v2825_v2, %v2832_v1  ;;  %v7521_v9 = vcombine.high %v2825_v2, %v2832_v1  ;;  %v9983_v37 = vrot.slane %v3381_v50, %v8708_v51 }
 0x233   :  { %8017 = vmatpush3.xpose.msk.msra.mxu1 %vm3857_vm0, %v9842_v48  ;;  %v2997_v4 = vrot.slane %v2989_v63, %v8708_v51  ;;  %v3004_v53 = vrot.slane %v2990_v25, %v8708_v51  ;;  %v3396_v41 = vrot.slane %v7522_v16, %v8708_v51  ;;  %v3404_v45 = vrot.slane %v3397_v14, %v8708_v51 }
 0x234   :  { %v3412_v47 = vrot.slane %v7523_v21, %v8708_v51  ;;  %v3320_v61 = vrot.slane %v3313_v24, %v8708_v51  ;;  %v3328_v32 = vrot.slane %v7520_v26, %v8708_v51  ;;  %v3336_v12 = vrot.slane %v3329_v46, %v8708_v51 }
 0x235   :  { %v3005_v34 = vcombine.low %v2981_v27, %v2997_v4  ;;  %v3006_v40 = vcombine.high %v2981_v27, %v2997_v4  ;;  %v3021_v36 = vcombine.low %v2988_v23, %v3004_v53  ;;  %v3022_v48 = vcombine.high %v2988_v23, %v3004_v53 }
 0x236   :  { %8019 = vmatmul.mubr.msk.f32.vlgmr.msra.gmra.mxu1 %vm3857_vm0, %v1520_v49  ;;  %v3413_v31 = vcombine.low %v9983_v37, %v3396_v41  ;;  %v3429_v5 = vcombine.low %v3404_v45, %v3412_v47  ;;  %v3344_v38 = vrot.slane %v7521_v9, %v8708_v51  ;;  %v3345_v30 = vcombine.low %v3320_v61, %v3328_v32 }
 0x237   :  { %v3013_v44 = vrot.slane %v3005_v34, %v8715_v59  ;;  %v3020_v39 = vrot.slane %v3006_v40, %v8715_v59  ;;  %v3029_v54 = vrot.slane %v3021_v36, %v8715_v59  ;;  %v3036_v55 = vrot.slane %v3022_v48, %v8715_v59 }
 0x238   :  { %v3421_v15 = vrot.slane %v3413_v31, %v8715_v59  ;;  %v3437_v13 = vrot.slane %v3429_v5, %v8715_v59  ;;  %v3353_v7 = vrot.slane %v3345_v30, %v8715_v59  ;;  %v3361_v49 = vcombine.low %v3336_v12, %v3344_v38  ;;  %v2702_v5 = vpop.permute.xlu1 %2701 }
 0x239   :  { %v3517_v52 = vcombine.low %v3013_v44, %v3020_v39  ;;  %v7526_v58 = vcombine.high %v3013_v44, %v3020_v39  ;;  %v3533_v3 = vcombine.low %v3029_v54, %v3036_v55  ;;  %v7527_v50 = vcombine.high %v3029_v54, %v3036_v55 }
 0x23a   :  { %v3445_v17 = vcombine.low %v3421_v15, %v3437_v13  ;;  %v3369_v16 = vrot.slane %v3361_v49, %v8715_v59  ;;  %v3660_v11 = vrot.slane %v3653_v10, %v8708_v51  ;;  %v3668_v20 = vrot.slane %v7530_v56, %v8708_v51 }
 0x23b   :  { %v3524_v0 = vrot.slane %v3517_v52, %v8708_v51  ;;  %v3532_v28 = vrot.slane %v7526_v58, %v8708_v51  ;;  %v3540_v57 = vrot.slane %v3533_v3, %v8708_v51  ;;  %v3548_v27 = vrot.slane %v7527_v50, %v8708_v51 }
 0x23c   :  { %8021 = vmatprep.subr.mxu0 %v3445_v17  ;;  %v3377_v29 = vcombine.low %v3353_v7, %v3369_v16  ;;  %v3676_v10 = vrot.slane %v3669_v6, %v8708_v51  ;;  %v3684_v14 = vrot.slane %v7531_v19, %v8708_v51  ;;  %v3685_v21 = vcombine.low %v3660_v11, %v3668_v20 }
 0x23d   :  { %8022 = vmatpush3.msra.mxu0 %v3445_v17  ;;  %v3549_v18 = vcombine.low %v3524_v0, %v3532_v28  ;;  %v3565_v8 = vcombine.low %v3540_v57, %v3548_v27  ;;  %v3414_v43 = vcombine.high %v9983_v37, %v3396_v41  ;;  %v3430_v6 = vcombine.high %v3404_v45, %v3412_v47 }
 0x23e   :  { %8023 = vmatprep.subr.mxu0 %v3377_v29  ;;  %v3693_v56 = vrot.slane %v3685_v21, %v8715_v59  ;;  %v3701_v35 = vcombine.low %v3676_v10, %v3684_v14  ;;  %v3346_v26 = vcombine.high %v3320_v61, %v3328_v32  ;;  %v3362_v63 = vcombine.high %v3336_v12, %v3344_v38 }
 0x23f   :  { %8024 = vmatpush3.msra.mxu0 %v3377_v29  ;;  %v3557_v2 = vrot.slane %v3549_v18, %v8715_v59  ;;  %v3573_v1 = vrot.slane %v3565_v8, %v8715_v59  ;;  %v3428_v25 = vrot.slane %v3414_v43, %v8715_v59  ;;  %v3444_v19 = vrot.slane %v3430_v6, %v8715_v59 }
 0x240   :  { %v3709_v23 = vrot.slane %v3701_v35, %v8715_v59  ;;  %v3360_v46 = vrot.slane %v3346_v26, %v8715_v59  ;;  %v3376_v9 = vrot.slane %v3362_v63, %v8715_v59  ;;  %v10035_v4 = vcombine.high %v3421_v15, %v3437_v13 }
 0x241   :  { %v3581_v24 = vcombine.low %v3557_v2, %v3573_v1  ;;  %v10037_v53 = vcombine.high %v3353_v7, %v3369_v16  ;;  %v10039_v34 = vcombine.low %v3428_v25, %v3444_v19  ;;  %v10043_v37 = vcombine.high %v3428_v25, %v3444_v19  ;;  %v10063_v7 = vpop.f32.mrf.mxu1 }
 0x242   :  { %v10027_v42 = vcombine.low %v3693_v56, %v3709_v23  ;;  %v10041_v40 = vcombine.low %v3360_v46, %v3376_v9  ;;  %v10045_v41 = vcombine.high %v3360_v46, %v3376_v9  ;;  %v3550_v45 = vcombine.high %v3524_v0, %v3532_v28 }
 0x243   :  { %8028 = vmatprep.subr.mxu1 %v3581_v24  ;;  %10843 = vst [vmem:[#allocation18_spill] sm:$0xff] %v10043_v37  ;;  %v3566_v47 = vcombine.high %v3540_v57, %v3548_v27  ;;  %v10049_v12 = vcombine.high %v3557_v2, %v3573_v1  ;;  %v3686_v36 = vcombine.high %v3660_v11, %v3668_v20 }
 0x244   :  { %8029 = vmatpush3.msra.mxu1 %v3581_v24  ;;  %8035 = vmatprep.subr.mxu0 %v10027_v42  ;;  %10844 = vst [vmem:[#allocation17_spill] sm:$0xff] %v10045_v41  ;;  %v3564_v61 = vrot.slane %v3550_v45, %v8715_v59  ;;  %v3702_v48 = vcombine.high %v3676_v10, %v3684_v14 }
 0x245   :  { %v3580_v32 = vrot.slane %v3566_v47, %v8715_v59  ;;  %v3700_v30 = vrot.slane %v3686_v36, %v8715_v59  ;;  %v10057_v39 = vcombine.high %v3693_v56, %v3709_v23 }
 0x246   :  { %v3716_v44 = vrot.slane %v3702_v48, %v8715_v59 }
 0x247   :  { %v10051_v31 = vcombine.low %v3564_v61, %v3580_v32  ;;  %v10053_v38 = vcombine.high %v3564_v61, %v3580_v32 }
 0x248   :  { %v10059_v54 = vcombine.low %v3700_v30, %v3716_v44  ;;  %v10061_v55 = vcombine.high %v3700_v30, %v3716_v44 }
 0x249   :  { %10845 = vst [vmem:[#allocation20_spill] sm:$0xff] %v10053_v38 }
 0x24a   :  { %10846 = vst [vmem:[#allocation19_spill] sm:$0xff] %v10061_v55 }
 0x274   :  { %v2706_v15 = vpop.permute.xlu1 %2705 }
 0x27b   :  { %v2726_v13 = vpop.permute.xlu1 %2725 }
 0x27c   :  { %v2905_v17 = vcombine.low %v10798_v62, %v2726_v13  ;;  %v2906_v16 = vcombine.high %v10798_v62, %v2726_v13 }
 0x27e   :  { %v10065_v49 = vpop.f32.mrf.mxu1  ;;  %v2913_v20 = vrot.slane %v2905_v17, %v8708_v51  ;;  %v2920_v0 = vrot.slane %v2906_v16, %v8708_v51 }
 0x27f   :  { %v5254_v52 = vsel %vm5250_vm1, %v10065_v49, -inf }
 0x280   :  { %5255 = vmax.xlane.f32.xlu1 %v5254_v52  ;;  %v10069_v3 = vpop.f32.mrf.mxu1 }
 0x281   :  { %v5251_v50 = vsel %vm5250_vm1, %v10069_v3, -inf }
 0x282   :  { %5252 = vmax.xlane.f32.xlu0 %v5251_v50 }
 0x283   :  { %v2730_v58 = vpop.permute.xlu1 %2729 }
 0x284   :  { %v3041_v27 = vcombine.low %v9530_v60, %v2730_v58  ;;  %v3042_v29 = vcombine.high %v9530_v60, %v2730_v58 }
 0x286   :  { %v3049_v35 = vrot.slane %v3041_v27, %v8708_v51  ;;  %v3056_v2 = vrot.slane %v3042_v29, %v8708_v51 }
 0x288   :  { %v2750_v11 = vpop.permute.xlu1 %2749 }
 0x289   :  { %v2921_v28 = vcombine.low %v2702_v5, %v2750_v11  ;;  %v2922_v57 = vcombine.high %v2702_v5, %v2750_v11 }
 0x28b   :  { %v2929_v10 = vrot.slane %v2921_v28, %v8708_v51  ;;  %v2936_v14 = vrot.slane %v2922_v57, %v8708_v51 }
 0x28c   :  { %v2754_v21 = vpop.permute.xlu1 %2753 }
 0x28d   :  { %v2937_v18 = vcombine.low %v2913_v20, %v2929_v10  ;;  %v2938_v8 = vcombine.high %v2913_v20, %v2929_v10  ;;  %v2953_v62 = vcombine.low %v2920_v0, %v2936_v14  ;;  %v2954_v56 = vcombine.high %v2920_v0, %v2936_v14 }
 0x28e   :  { %v3057_v1 = vcombine.low %v2706_v15, %v2754_v21  ;;  %v3058_v23 = vcombine.high %v2706_v15, %v2754_v21 }
 0x28f   :  { %v2945_v24 = vrot.slane %v2937_v18, %v8715_v59  ;;  %v2952_v43 = vrot.slane %v2938_v8, %v8715_v59  ;;  %v2961_v60 = vrot.slane %v2953_v62, %v8715_v59  ;;  %v2968_v6 = vrot.slane %v2954_v56, %v8715_v59 }
 0x290   :  { %v3065_v26 = vrot.slane %v3057_v1, %v8708_v51  ;;  %v3072_v63 = vrot.slane %v3058_v23, %v8708_v51 }
 0x291   :  { %v3449_v25 = vcombine.low %v2945_v24, %v2952_v43  ;;  %v7524_v19 = vcombine.high %v2945_v24, %v2952_v43  ;;  %v3465_v46 = vcombine.low %v2961_v60, %v2968_v6  ;;  %v7525_v9 = vcombine.high %v2961_v60, %v2968_v6 }
 0x292   :  { %v3073_v45 = vcombine.low %v3049_v35, %v3065_v26  ;;  %v3074_v47 = vcombine.high %v3049_v35, %v3065_v26  ;;  %v3089_v61 = vcombine.low %v3056_v2, %v3072_v63  ;;  %v3090_v32 = vcombine.high %v3056_v2, %v3072_v63 }
 0x293   :  { %v3456_v36 = vrot.slane %v3449_v25, %v8708_v51  ;;  %v3464_v48 = vrot.slane %v7524_v19, %v8708_v51  ;;  %v3472_v5 = vrot.slane %v3465_v46, %v8708_v51  ;;  %v3480_v30 = vrot.slane %v7525_v9, %v8708_v51 }
 0x294   :  { %v3081_v44 = vrot.slane %v3073_v45, %v8715_v59  ;;  %v3088_v15 = vrot.slane %v3074_v47, %v8715_v59  ;;  %v3097_v13 = vrot.slane %v3089_v61, %v8715_v59  ;;  %v3104_v52 = vrot.slane %v3090_v32, %v8715_v59 }
 0x295   :  { %v3481_v58 = vcombine.low %v3456_v36, %v3464_v48  ;;  %v3497_v50 = vcombine.low %v3472_v5, %v3480_v30  ;;  %v3482_v17 = vcombine.high %v3456_v36, %v3464_v48  ;;  %v3498_v16 = vcombine.high %v3472_v5, %v3480_v30 }
 0x296   :  { %v3585_v11 = vcombine.low %v3081_v44, %v3088_v15  ;;  %v7528_v20 = vcombine.high %v3081_v44, %v3088_v15  ;;  %v3601_v0 = vcombine.low %v3097_v13, %v3104_v52  ;;  %v7529_v28 = vcombine.high %v3097_v13, %v3104_v52 }
 0x297   :  { %v3489_v57 = vrot.slane %v3481_v58, %v8715_v59  ;;  %v3505_v27 = vrot.slane %v3497_v50, %v8715_v59  ;;  %v3496_v29 = vrot.slane %v3482_v17, %v8715_v59  ;;  %v3512_v10 = vrot.slane %v3498_v16, %v8715_v59 }
 0x298   :  { %v3592_v14 = vrot.slane %v3585_v11, %v8708_v51  ;;  %v3600_v21 = vrot.slane %v7528_v20, %v8708_v51  ;;  %v3608_v18 = vrot.slane %v3601_v0, %v8708_v51  ;;  %v3616_v8 = vrot.slane %v7529_v28, %v8708_v51 }
 0x299   :  { %v3513_v62 = vcombine.low %v3489_v57, %v3505_v27  ;;  %v10105_v56 = vcombine.high %v3489_v57, %v3505_v27  ;;  %v10107_v35 = vcombine.low %v3496_v29, %v3512_v10  ;;  %v10109_v2 = vcombine.high %v3496_v29, %v3512_v10 }
 0x29a   :  { %v3617_v1 = vcombine.low %v3592_v14, %v3600_v21  ;;  %v3633_v23 = vcombine.low %v3608_v18, %v3616_v8  ;;  %v3618_v24 = vcombine.high %v3592_v14, %v3600_v21  ;;  %v3634_v43 = vcombine.high %v3608_v18, %v3616_v8 }
 0x29b   :  { %10847 = vst [vmem:[#allocation26_spill] sm:$0xff] %v10107_v35  ;;  %10848 = vst [vmem:[#allocation21_spill] sm:$0xff] %v10109_v2  ;;  %8030 = vmatprep.subr.mxu1 %v3513_v62  ;;  %v10115_v25 = vpop.f32.mrf.mxu1 }
 0x29c   :  { %8031 = vmatpush3.msra.mxu1 %v3513_v62  ;;  %v3625_v60 = vrot.slane %v3617_v1, %v8715_v59  ;;  %v3641_v6 = vrot.slane %v3633_v23, %v8715_v59  ;;  %v3632_v26 = vrot.slane %v3618_v24, %v8715_v59  ;;  %v3648_v63 = vrot.slane %v3634_v43, %v8715_v59 }
 0x29d   :  { %v5260_v19 = vsel %vm5250_vm1, %v10115_v25, -inf  ;;  %v10125_v47 = vpop.f32.mrf.mxu1 }
 0x29e   :  { %v10119_v46 = vcombine.low %v3625_v60, %v3641_v6  ;;  %v10121_v9 = vcombine.high %v3625_v60, %v3641_v6  ;;  %v10123_v45 = vcombine.low %v3632_v26, %v3648_v63  ;;  %5261 = vmax.xlane.f32.xlu1 %v5260_v19  ;;  %v10127_v61 = vcombine.high %v3632_v26, %v3648_v63 }
 0x29f   :  { %v5257_v32 = vsel %vm5250_vm1, %v10125_v47, -inf }
 0x2a0   :  { %10849 = vst [vmem:[#allocation47_spill] sm:$0xff] %v10123_v45  ;;  %10850 = vst [vmem:[#allocation56_spill] sm:$0xff] %v10127_v61  ;;  %5258 = vmax.xlane.f32.xlu0 %v5257_v32 }
 0x2bf   :  { %v10131_v36 = vpop.f32.mrf.mxu0 }
 0x2c0   :  { %v5266_v48 = vsel %vm5250_vm1, %v10131_v36, -inf }
 0x2c1   :  { %5267 = vmax.xlane.f32.xlu0 %v5266_v48  ;;  %v10135_v5 = vpop.f32.mrf.mxu0 }
 0x2c2   :  { %v5263_v30 = vsel %vm5250_vm1, %v10135_v5, -inf }
 0x2c4   :  { %v10139_v44 = vpop.f32.mrf.mxu1 }
 0x2c5   :  { %5264 = vmax.xlane.f32.xlu0 %v5263_v30  ;;  %v5272_v15 = vsel %vm5250_vm1, %v10139_v44, -inf }
 0x2c6   :  { %5273 = vmax.xlane.f32.xlu1 %v5272_v15  ;;  %v10145_v52 = vpop.f32.mrf.mxu1 }
 0x2c7   :  { %v10143_v13 = vpop.f32.mrf.mxu0  ;;  %v5269_v17 = vsel %vm5250_vm1, %v10145_v52, -inf }
 0x2c8   :  { %v5278_v58 = vsel %vm5250_vm1, %v10143_v13, -inf }
 0x2c9   :  { %5279 = vmax.xlane.f32.xlu0 %v5278_v58  ;;  %v10149_v50 = vpop.f32.mrf.mxu0 }
 0x2ca   :  { %5270 = vmax.xlane.f32.xlu1 %v5269_v17  ;;  %v5275_v16 = vsel %vm5250_vm1, %v10149_v50, -inf }
 0x2cd   :  { %5276 = vmax.xlane.f32.xlu0 %v5275_v16  ;;  %v10155_v11 = vpop.f32.mrf.mxu1 }
 0x2ce   :  { %v5284_v20 = vsel %vm5250_vm1, %v10155_v11, -inf }
 0x2cf   :  { %v10159_v0 = vpop.f32.mrf.mxu0  ;;  %v10161_v28 = vpop.f32.mrf.mxu1 }
 0x2d0   :  { %v5281_v57 = vsel %vm5250_vm1, %v10161_v28, -inf  ;;  %v5290_v29 = vsel %vm5250_vm1, %v10159_v0, -inf }
 0x2d1   :  { %v10165_v27 = vpop.f32.mrf.mxu0  ;;  %5285 = vmax.xlane.f32.xlu0 %v5284_v20  ;;  %5282 = vmax.xlane.f32.xlu1 %v5281_v57 }
 0x2d2   :  { %v5287_v10 = vsel %vm5250_vm1, %v10165_v27, -inf }
 0x2d5   :  { %5291 = vmax.xlane.f32.xlu0 %v5290_v29  ;;  %5288 = vmax.xlane.f32.xlu1 %v5287_v10  ;;  %v10171_v14 = vpop.f32.mrf.mxu1 }
 0x2d6   :  { %v5296_v8 = vsel %vm5250_vm1, %v10171_v14, -inf }
 0x2d7   :  { %v10173_v21 = vpop.f32.mrf.mxu0  ;;  %v10181_v1 = vpop.f32.mrf.mxu1 }
 0x2d8   :  { %v5302_v18 = vsel %vm5250_vm1, %v10173_v21, -inf  ;;  %v5293_v24 = vsel %vm5250_vm1, %v10181_v1, -inf }
 0x2d9   :  { %v10179_v62 = vpop.f32.mrf.mxu0  ;;  %5303 = vmax.xlane.f32.xlu0 %v5302_v18  ;;  %5297 = vmax.xlane.f32.xlu1 %v5296_v8 }
 0x2da   :  { %v5299_v23 = vsel %vm5250_vm1, %v10179_v62, -inf }
 0x2dd   :  { %5300 = vmax.xlane.f32.xlu0 %v5299_v23  ;;  %5294 = vmax.xlane.f32.xlu1 %v5293_v24  ;;  %v10187_v43 = vpop.f32.mrf.mxu1 }
 0x2de   :  { %v5308_v26 = vsel %vm5250_vm1, %v10187_v43, -inf }
 0x2df   :  { %v10189_v60 = vpop.f32.mrf.mxu0  ;;  %v10197_v19 = vpop.f32.mrf.mxu1 }
 0x2e0   :  { %v5314_v6 = vsel %vm5250_vm1, %v10189_v60, -inf  ;;  %v5305_v48 = vsel %vm5250_vm1, %v10197_v19, -inf }
 0x2e1   :  { %v10195_v63 = vpop.f32.mrf.mxu0  ;;  %5315 = vmax.xlane.f32.xlu0 %v5314_v6  ;;  %5309 = vmax.xlane.f32.xlu1 %v5308_v26 }
 0x2e2   :  { %v5311_v32 = vsel %vm5250_vm1, %v10195_v63, -inf }
 0x2e5   :  { %5312 = vmax.xlane.f32.xlu0 %v5311_v32  ;;  %5306 = vmax.xlane.f32.xlu1 %v5305_v48 }
 0x2e6   :  { %v10203_v30 = vpop.f32.mrf.mxu1 }
 0x2e7   :  { %v5320_v17 = vsel %vm5250_vm1, %v10203_v30, -inf }
 0x2e8   :  { %v10205_v15 = vpop.f32.mrf.mxu0  ;;  %v10213_v20 = vpop.f32.mrf.mxu1 }
 0x2e9   :  { %v5326_v58 = vsel %vm5250_vm1, %v10205_v15, -inf  ;;  %5321 = vmax.xlane.f32.xlu1 %v5320_v17  ;;  %v5317_v29 = vsel %vm5250_vm1, %v10213_v20, -inf  ;;  %v10243_v17 = vadd.f32 %v10063_v7, %v8669_v33 }
 0x2ea   :  { %v10211_v16 = vpop.f32.mrf.mxu0  ;;  %5327 = vmax.xlane.f32.xlu0 %v5326_v58 }
 0x2eb   :  { %v5323_v57 = vsel %vm5250_vm1, %v10211_v16, -inf }
 0x2ed   :  { %5318 = vmax.xlane.f32.xlu1 %v5317_v29  ;;  %v10251_v29 = vpop.permute.xlu0 %2711 }
 0x2ee   :  { %5324 = vmax.xlane.f32.xlu0 %v5323_v57  ;;  %v10219_v10 = vpop.f32.mrf.mxu1 }
 0x2ef   :  { %v5332_v18 = vsel %vm5250_vm1, %v10219_v10, -inf }
 0x2f0   :  { %v10223_v8 = vpop.f32.mrf.mxu0  ;;  %v10225_v23 = vpop.f32.mrf.mxu1 }
 0x2f1   :  { %v5329_v24 = vsel %vm5250_vm1, %v10225_v23, -inf  ;;  %v5338_v26 = vsel %vm5250_vm1, %v10223_v8, -inf }
 0x2f2   :  { %v10229_v6 = vpop.f32.mrf.mxu0  ;;  %5333 = vmax.xlane.f32.xlu0 %v5332_v18  ;;  %5330 = vmax.xlane.f32.xlu1 %v5329_v24 }
 0x2f3   :  { %v5335_v32 = vsel %vm5250_vm1, %v10229_v6, -inf }
 0x2f6   :  { %5339 = vmax.xlane.f32.xlu0 %v5338_v26  ;;  %5336 = vmax.xlane.f32.xlu1 %v5335_v32  ;;  %v10235_v48 = vpop.f32.mrf.mxu1 }
 0x2f7   :  { %v5344_v58 = vsel %vm5250_vm1, %v10235_v48, -inf }
 0x2fa   :  { %5345 = vmax.xlane.f32.xlu0 %v5344_v58 }
 0x307   :  { %2759 = vrot.lane.b32.xlu1 %v9855_v22, %s8451_s2 }
 0x309   :  { %v5256_v57 = vpop.xlane.xlu1 %5255 }
 0x30a   :  { %v5348_v18 = vsub.f32 %v10065_v49, %v5256_v57  ;;  %v10261_v57 = vpop.f32.mrf.mxu1 }
 0x30b   :  { %2709 = vrot.lane.b32.xlu1 %v10243_v17, %s8450_s12  ;;  %v5253_v26 = vpop.xlane.xlu0 %5252 }
 0x30c   :  { %v5381_v24 = vmul.f32 1.442695, %v5348_v18  ;;  %v5347_v33 = vsub.f32 %v10069_v3, %v5253_v26  ;;  %v5341_v3 = vsel %vm5250_vm1, %v10261_v57, -inf }
 0x30e   :  { %8227 = vpow2.f32 %v5381_v24  ;;  %v5379_v7 = vmul.f32 1.442695, %v5347_v33 }
 0x30f   :  { %2733 = vrot.lane.b32.xlu1 %v10243_v17, %s8449_s11 }
 0x310   :  { %2735 = vrot.lane.b32.xlu0 %v9855_v22, %s8449_s11  ;;  %8229 = vpow2.f32 %v5379_v7 }
 0x31b   :  { %v10256_v2 = vpop.eup %8227 }
 0x31c   :  { %v5446_v55 = vsel %vm5250_vm1, %v10256_v2, 0.0 }
 0x31d   :  { %v10265_v18 = vpop.eup %8229 }
 0x327   :  { %v5262_v32 = vpop.xlane.xlu1 %5261 }
 0x328   :  { %v5350_v58 = vsub.f32 %v10115_v25, %v5262_v32  ;;  %v5443_v25 = vsel %vm5250_vm1, %v10265_v18, 0.0 }
 0x329   :  { %v5259_v38 = vpop.xlane.xlu0 %5258 }
 0x32a   :  { %v5385_v35 = vmul.f32 1.442695, %v5350_v58  ;;  %v5349_v61 = vsub.f32 %v10125_v47, %v5259_v38 }
 0x32c   :  { %8231 = vpow2.f32 %v5385_v35  ;;  %v5383_v49 = vmul.f32 1.442695, %v5349_v61 }
 0x32e   :  { %8233 = vpow2.f32 %v5383_v49 }
 0x32f   :  { %5447 = vadd.xlane.f32.xlu0 %v5446_v55 }
 0x333   :  { %5342 = vmax.xlane.f32.xlu1 %v5341_v3 }
 0x337   :  { %5444 = vadd.xlane.f32.xlu1 %v5443_v25 }
 0x339   :  { %v10269_v38 = vpop.eup %8231 }
 0x33a   :  { %v5452_v35 = vsel %vm5250_vm1, %v10269_v38, 0.0 }
 0x33b   :  { %v10273_v47 = vpop.eup %8233  ;;  %5453 = vadd.xlane.f32.xlu1 %v5452_v35 }
 0x33c   :  { %v5449_v55 = vsel %vm5250_vm1, %v10273_v47, 0.0 }
 0x33f   :  { %5450 = vadd.xlane.f32.xlu1 %v5449_v55 }
 0x34a   :  { %v5268_v61 = vpop.xlane.xlu0 %5267 }
 0x34b   :  { %v5352_v24 = vsub.f32 %v10131_v36, %v5268_v61 }
 0x34d   :  { %v5389_v26 = vmul.f32 1.442695, %v5352_v24 }
 0x34e   :  { %v5265_v33 = vpop.xlane.xlu0 %5264 }
 0x34f   :  { %8235 = vpow2.f32 %v5389_v26  ;;  %v5351_v7 = vsub.f32 %v10135_v5, %v5265_v33  ;;  %v5274_v32 = vpop.xlane.xlu1 %5273 }
 0x350   :  { %v5354_v49 = vsub.f32 %v10139_v44, %v5274_v32 }
 0x351   :  { %v5387_v58 = vmul.f32 1.442695, %v5351_v7 }
 0x352   :  { %v5280_v3 = vpop.xlane.xlu0 %5279  ;;  %v5393_v35 = vmul.f32 1.442695, %v5354_v49 }
 0x353   :  { %8237 = vpow2.f32 %v5387_v58  ;;  %v5356_v25 = vsub.f32 %v10143_v13, %v5280_v3  ;;  %v5271_v41 = vpop.xlane.xlu1 %5270 }
 0x354   :  { %8239 = vpow2.f32 %v5393_v35  ;;  %v5353_v55 = vsub.f32 %v10145_v52, %v5271_v41 }
 0x355   :  { %v5397_v37 = vmul.f32 1.442695, %v5356_v25 }
 0x356   :  { %v5277_v36 = vpop.xlane.xlu0 %5276  ;;  %v5391_v24 = vmul.f32 1.442695, %v5353_v55 }
 0x357   :  { %8241 = vpow2.f32 %v5397_v37  ;;  %v5355_v61 = vsub.f32 %v10149_v50, %v5277_v36 }
 0x358   :  { %8243 = vpow2.f32 %v5391_v24 }
 0x359   :  { %v5395_v5 = vmul.f32 1.442695, %v5355_v61 }
 0x35a   :  { %v5286_v26 = vpop.xlane.xlu0 %5285  ;;  %v5283_v33 = vpop.xlane.xlu1 %5282 }
 0x35b   :  { %8245 = vpow2.f32 %v5395_v5  ;;  %v5358_v44 = vsub.f32 %v10155_v11, %v5286_v26  ;;  %v5357_v41 = vsub.f32 %v10161_v28, %v5283_v33 }
 0x35c   :  { %v10284_v7 = vpop.eup %8235 }
 0x35d   :  { %v5401_v13 = vmul.f32 1.442695, %v5358_v44  ;;  %v5458_v32 = vsel %vm5250_vm1, %v10284_v7, 0.0  ;;  %v5399_v49 = vmul.f32 1.442695, %v5357_v41 }
 0x35e   :  { %5459 = vadd.xlane.f32.xlu0 %v5458_v32  ;;  %v5292_v37 = vpop.xlane.xlu0 %5291  ;;  %v5289_v52 = vpop.xlane.xlu1 %5288 }
 0x35f   :  { %8247 = vpow2.f32 %v5401_v13  ;;  %v5360_v50 = vsub.f32 %v10159_v0, %v5292_v37  ;;  %v5359_v25 = vsub.f32 %v10165_v27, %v5289_v52 }
 0x360   :  { %v10290_v58 = vpop.eup %8237 }
 0x361   :  { %v5405_v3 = vmul.f32 1.442695, %v5360_v50  ;;  %v5455_v11 = vsel %vm5250_vm1, %v10290_v58, 0.0  ;;  %v10295_v35 = vpop.eup %8239  ;;  %v5403_v0 = vmul.f32 1.442695, %v5359_v25 }
 0x362   :  { %5456 = vadd.xlane.f32.xlu0 %v5455_v11  ;;  %v5304_v55 = vpop.xlane.xlu0 %5303  ;;  %v5298_v28 = vpop.xlane.xlu1 %5297  ;;  %v5464_v36 = vsel %vm5250_vm1, %v10295_v35, 0.0 }
 0x363   :  { %8249 = vpow2.f32 %v5405_v3  ;;  %v5362_v5 = vsub.f32 %v10171_v14, %v5298_v28  ;;  %v5364_v32 = vsub.f32 %v10173_v21, %v5304_v55 }
 0x364   :  { %v10299_v61 = vpop.eup %8241  ;;  %8251 = vpow2.f32 %v5399_v49 }
 0x365   :  { %v5470_v24 = vsel %vm5250_vm1, %v10299_v61, 0.0  ;;  %v10304_v26 = vpop.eup %8243  ;;  %8253 = vpow2.f32 %v5403_v0  ;;  %v5409_v41 = vmul.f32 1.442695, %v5362_v5  ;;  %v5413_v49 = vmul.f32 1.442695, %v5364_v32 }
 0x366   :  { %5471 = vadd.xlane.f32.xlu1 %v5470_v24  ;;  %v5301_v27 = vpop.xlane.xlu0 %5300  ;;  %5465 = vadd.xlane.f32.xlu0 %v5464_v36  ;;  %v10306_v33 = vpop.xlane.xlu1 %5294  ;;  %v5461_v44 = vsel %vm5250_vm1, %v10304_v26, 0.0 }
 0x367   :  { %8255 = vpow2.f32 %v5409_v41  ;;  %v5363_v3 = vsub.f32 %v10179_v62, %v5301_v27 }
 0x368   :  { %v10310_v13 = vpop.eup %8245  ;;  %8257 = vpow2.f32 %v5413_v49 }
 0x369   :  { %v5467_v37 = vsel %vm5250_vm1, %v10310_v13, 0.0  ;;  %v5411_v36 = vmul.f32 1.442695, %v5363_v3 }
 0x36a   :  { %v5316_v14 = vpop.xlane.xlu0 %5315  ;;  %5462 = vadd.xlane.f32.xlu1 %v5461_v44  ;;  %5468 = vadd.xlane.f32.xlu0 %v5467_v37  ;;  %v5310_v52 = vpop.xlane.xlu1 %5309 }
 0x36b   :  { %v5366_v28 = vsub.f32 %v10187_v43, %v5310_v52  ;;  %v5368_v27 = vsub.f32 %v10189_v60, %v5316_v14  ;;  %8259 = vpow2.f32 %v5411_v36 }
 0x36c   :  { %v10315_v50 = vpop.eup %8247 }
 0x36d   :  { %v5476_v11 = vsel %vm5250_vm1, %v10315_v50, 0.0  ;;  %v5417_v44 = vmul.f32 1.442695, %v5366_v28  ;;  %v5421_v52 = vmul.f32 1.442695, %v5368_v27 }
 0x36e   :  { %v5313_v25 = vpop.xlane.xlu0 %5312  ;;  %5477 = vadd.xlane.f32.xlu1 %v5476_v11  ;;  %v5307_v21 = vpop.xlane.xlu1 %5306 }
 0x36f   :  { %8261 = vpow2.f32 %v5417_v44  ;;  %v5365_v49 = vsub.f32 %v10197_v19, %v5307_v21  ;;  %v5367_v28 = vsub.f32 %v10195_v63, %v5313_v25 }
 0x370   :  { %v10320_v55 = vpop.eup %8249  ;;  %8263 = vpow2.f32 %v5421_v52 }
 0x371   :  { %v5482_v0 = vsel %vm5250_vm1, %v10320_v55, 0.0  ;;  %v10325_v24 = vpop.eup %8251  ;;  %v5415_v36 = vmul.f32 1.442695, %v5365_v49  ;;  %v5419_v44 = vmul.f32 1.442695, %v5367_v28 }
 0x372   :  { %5483 = vadd.xlane.f32.xlu0 %v5482_v0  ;;  %v10327_v62 = vpop.xlane.xlu1 %5321  ;;  %v5473_v32 = vsel %vm5250_vm1, %v10325_v24, 0.0  ;;  %v10332_v41 = vpop.eup %8253 }
 0x373   :  { %v5328_v5 = vpop.xlane.xlu0 %5327  ;;  %v5479_v3 = vsel %vm5250_vm1, %v10332_v41, 0.0  ;;  %8265 = vpow2.f32 %v5415_v36 }
 0x374   :  { %v10337_v11 = vpop.eup %8255  ;;  %8267 = vpow2.f32 %v5419_v44  ;;  %v5372_v44 = vsub.f32 %v10205_v15, %v5328_v5 }
 0x375   :  { %10851 = vst [vmem:[#allocation16_spill] sm:$0xff] %v10337_v11  ;;  %v5488_v0 = vsel %vm5250_vm1, %v10337_v11, 0.0  ;;  %v10344_v27 = vpop.eup %8257 }
 0x376   :  { %5474 = vadd.xlane.f32.xlu0 %v5473_v32  ;;  %v5319_v37 = vpop.xlane.xlu1 %5318  ;;  %10852 = vst [vmem:[#allocation22_spill] sm:$0xff] %v10344_v27  ;;  %v5494_v63 = vsel %vm5250_vm1, %v10344_v27, 0.0 }
 0x377   :  { %v5325_v43 = vpop.xlane.xlu0 %5324  ;;  %v5369_v32 = vsub.f32 %v10213_v20, %v5319_v37 }
 0x378   :  { %v10355_v25 = vpop.eup %8259 }
 0x379   :  { %v5491_v20 = vsel %vm5250_vm1, %v10355_v25, 0.0 }
 0x37a   :  { %5480 = vadd.xlane.f32.xlu0 %v5479_v3  ;;  %v5371_v3 = vsub.f32 %v10211_v16, %v5325_v43 }
 0x37b   :  { %v5334_v60 = vpop.xlane.xlu0 %5333  ;;  %v10339_v14 = vpop.xlane.xlu1 %5330 }
 0x37c   :  { %v10360_v11 = vpop.eup %8261  ;;  %v5427_v27 = vmul.f32 1.442695, %v5371_v3 }
 0x37d   :  { %10853 = vst [vmem:[#allocation23_spill] sm:$0xff] %v10360_v11  ;;  %v5500_v16 = vsel %vm5250_vm1, %v10360_v11, 0.0  ;;  %v10371_v43 = vpop.eup %8263  ;;  %v5374_v11 = vsub.f32 %v10219_v10, %v5334_v60 }
 0x37e   :  { %5489 = vadd.xlane.f32.xlu0 %v5488_v0  ;;  %v5423_v0 = vmul.f32 1.442695, %v5369_v32 }
 0x37f   :  { %v10346_v19 = vpop.xlane.xlu0 %5339  ;;  %v10348_v21 = vpop.xlane.xlu1 %5336  ;;  %2757 = vrot.lane.b32.xlu1 %v10243_v17, %s8451_s2 }
 0x380   :  { %8269 = vpow2.f32 %v5423_v0 }
 0x381   :  { %8271 = vpow2.f32 %v5427_v27 }
 0x382   :  { %5495 = vadd.xlane.f32.xlu0 %v5494_v63 }
 0x383   :  { %v10357_v52 = vpop.xlane.xlu0 %5345  ;;  %v2760_v49 = vpop.permute.xlu1 %2759 }
 0x384   :  { %v3261_v28 = vcombine.low %v10251_v29, %v2760_v49  ;;  %v3262_v36 = vcombine.high %v10251_v29, %v2760_v49 }
 0x386   :  { %5492 = vadd.xlane.f32.xlu0 %v5491_v20  ;;  %v3269_v29 = vrot.slane %v3261_v28, %v8708_v51  ;;  %v3276_v32 = vrot.slane %v3262_v36, %v8708_v51  ;;  %v5506_v28 = vsel %vm5250_vm1, %v10371_v43, 0.0  ;;  %v10382_v36 = vpop.eup %8265 }
 0x387   :  { %v2736_v37 = vpop.permute.xlu0 %2735 }
 0x388   :  { %v3245_v63 = vcombine.low %v9855_v22, %v2736_v37  ;;  %v3246_v45 = vcombine.high %v9855_v22, %v2736_v37  ;;  %v5361_v22 = vsub.f32 %v10181_v1, %v10306_v33  ;;  %v5429_v37 = vmul.f32 1.442695, %v5372_v44 }
 0x389   :  { %v5370_v44 = vsub.f32 %v10203_v30, %v10327_v62 }
 0x38a   :  { %v3253_v49 = vrot.slane %v3245_v63, %v8708_v51  ;;  %v3260_v20 = vrot.slane %v3246_v45, %v8708_v51  ;;  %5501 = vadd.xlane.f32.xlu0 %v5500_v16  ;;  %v5407_v16 = vmul.f32 1.442695, %v5361_v22  ;;  %8273 = vpow2.f32 %v5429_v37 }
 0x38c   :  { %v3277_v15 = vcombine.low %v3253_v49, %v3269_v29  ;;  %v3278_v5 = vcombine.high %v3253_v49, %v3269_v29  ;;  %v3293_v3 = vcombine.low %v3260_v20, %v3276_v32  ;;  %v3294_v0 = vcombine.high %v3260_v20, %v3276_v32 }
 0x38d   :  { %v5433_v32 = vmul.f32 1.442695, %v5374_v11  ;;  %v5376_v49 = vsub.f32 %v10223_v8, %v10346_v19  ;;  %v5497_v20 = vsel %vm5250_vm1, %v10382_v36, 0.0  ;;  %8275 = vpow2.f32 %v5407_v16 }
 0x38e   :  { %v3285_v63 = vrot.slane %v3277_v15, %v8715_v59  ;;  %v3292_v45 = vrot.slane %v3278_v5, %v8715_v59  ;;  %v3301_v1 = vrot.slane %v3293_v3, %v8715_v59  ;;  %v3308_v33 = vrot.slane %v3294_v0, %v8715_v59  ;;  %5507 = vadd.xlane.f32.xlu0 %v5506_v28  ;;  %v10394_v15 = vpop.eup %8267 }
 0x38f   :  { %v5425_v3 = vmul.f32 1.442695, %v5370_v44  ;;  %v5373_v11 = vsub.f32 %v10225_v23, %v10339_v14  ;;  %8277 = vpow2.f32 %v5433_v32  ;;  %v5437_v28 = vmul.f32 1.442695, %v5376_v49 }
 0x390   :  { %v3789_v27 = vcombine.low %v3285_v63, %v3292_v45  ;;  %v7534_v10 = vcombine.high %v3285_v63, %v3292_v45  ;;  %v3805_v60 = vcombine.low %v3301_v1, %v3308_v33  ;;  %v7535_v29 = vcombine.high %v3301_v1, %v3308_v33  ;;  %v10404_v45 = vpop.eup %8269 }
 0x391   :  { %v5503_v63 = vsel %vm5250_vm1, %v10394_v15, 0.0  ;;  %v5378_v1 = vsub.f32 %v10235_v48, %v10357_v52  ;;  %8279 = vpow2.f32 %v5425_v3  ;;  %v5431_v14 = vmul.f32 1.442695, %v5373_v11  ;;  %v10422_v52 = vpop.eup %8271 }
 0x392   :  { %v3796_v22 = vrot.slane %v3789_v27, %v8708_v51  ;;  %v3804_v5 = vrot.slane %v7534_v10, %v8708_v51  ;;  %v3812_v30 = vrot.slane %v3805_v60, %v8708_v51  ;;  %v3820_v62 = vrot.slane %v7535_v29, %v8708_v51  ;;  %5498 = vadd.xlane.f32.xlu0 %v5497_v20 }
 0x393   :  { %v5375_v44 = vsub.f32 %v10229_v6, %v10348_v21  ;;  %8281 = vpow2.f32 %v5437_v28  ;;  %v5441_v32 = vmul.f32 1.442695, %v5378_v1  ;;  %v5509_v6 = vsel %vm5250_vm1, %v10404_v45, 0.0 }
 0x394   :  { %v3821_v8 = vcombine.low %v3796_v22, %v3804_v5  ;;  %v3837_v19 = vcombine.low %v3812_v30, %v3820_v62  ;;  %v3822_v0 = vcombine.high %v3796_v22, %v3804_v5  ;;  %v3838_v37 = vcombine.high %v3812_v30, %v3820_v62 }
 0x395   :  { %8283 = vpow2.f32 %v5431_v14  ;;  %v5435_v21 = vmul.f32 1.442695, %v5375_v44  ;;  %v5515_v20 = vsel %vm5250_vm1, %v10422_v52, 0.0 }
 0x396   :  { %v3829_v33 = vrot.slane %v3821_v8, %v8715_v59  ;;  %v3845_v16 = vrot.slane %v3837_v19, %v8715_v59  ;;  %v3836_v23 = vrot.slane %v3822_v0, %v8715_v59  ;;  %5504 = vadd.xlane.f32.xlu0 %v5503_v63  ;;  %v3852_v27 = vrot.slane %v3838_v37, %v8715_v59 }
 0x397   :  { %v10427_v49 = vpop.eup %8273  ;;  %8285 = vpow2.f32 %v5441_v32 }
 0x398   :  { %v10414_v10 = vcombine.low %v3829_v33, %v3845_v16  ;;  %v10416_v60 = vcombine.high %v3829_v33, %v3845_v16  ;;  %v10418_v29 = vcombine.low %v3836_v23, %v3852_v27  ;;  %v10420_v48 = vcombine.high %v3836_v23, %v3852_v27  ;;  %v10461_v23 = vpop.permute.xlu1 %2709 }
 0x399   :  { %8287 = vpow2.f32 %v5435_v21  ;;  %v5518_v30 = vsel %vm5250_vm1, %v10427_v49, 0.0 }
 0x39a   :  { %8042 = vmatprep.subr.mxu1 %v10414_v10  ;;  %5510 = vadd.xlane.f32.xlu0 %v5509_v6  ;;  %v10431_v22 = vpop.eup %8275 }
 0x39b   :  { %v5485_v62 = vsel %vm5250_vm1, %v10431_v22, 0.0 }
 0x39c   :  { %v10433_v5 = vpop.eup %8277  ;;  %v2734_v14 = vpop.permute.xlu1 %2733 }
 0x39d   :  { %v5524_v11 = vsel %vm5250_vm1, %v10433_v5, 0.0 }
 0x39e   :  { %5516 = vadd.xlane.f32.xlu0 %v5515_v20  ;;  %v10439_v3 = vpop.eup %8279 }
 0x39f   :  { %v5512_v19 = vsel %vm5250_vm1, %v10439_v3, 0.0 }
 0x3a0   :  { %v10443_v8 = vpop.eup %8281 }
 0x3a1   :  { %v5530_v37 = vsel %vm5250_vm1, %v10443_v8, 0.0 }
 0x3a2   :  { %5519 = vadd.xlane.f32.xlu0 %v5518_v30  ;;  %v10447_v0 = vpop.eup %8283 }
 0x3a3   :  { %5486 = vadd.xlane.f32.xlu1 %v5485_v62  ;;  %v5521_v63 = vsel %vm5250_vm1, %v10447_v0, 0.0 }
 0x3a4   :  { %v10451_v28 = vpop.eup %8285 }
 0x3a5   :  { %v5536_v33 = vsel %vm5250_vm1, %v10451_v28, 0.0 }
 0x3a6   :  { %5525 = vadd.xlane.f32.xlu0 %v5524_v11  ;;  %v10455_v1 = vpop.eup %8287 }
 0x3a7   :  { %5513 = vadd.xlane.f32.xlu1 %v5512_v19  ;;  %v5527_v16 = vsel %vm5250_vm1, %v10455_v1, 0.0 }
 0x3aa   :  { %5531 = vadd.xlane.f32.xlu0 %v5530_v37 }
 0x3ab   :  { %5522 = vadd.xlane.f32.xlu1 %v5521_v63 }
 0x3ae   :  { %5537 = vadd.xlane.f32.xlu0 %v5536_v33 }
 0x3af   :  { %5528 = vadd.xlane.f32.xlu1 %v5527_v16 }
 0x3b8   :  { %v5448_v27 = vpop.xlane.xlu0 %5447 }
 0x3b9   :  { %8289 = vrcp.f32 %v5448_v27 }
 0x3bc   :  { %v5343_v44 = vpop.xlane.xlu1 %5342 }
 0x3bd   :  { %v5377_v32 = vsub.f32 %v10261_v57, %v5343_v44 }
 0x3bf   :  { %v5439_v6 = vmul.f32 1.442695, %v5377_v32 }
 0x3c0   :  { %v5445_v21 = vpop.xlane.xlu1 %5444 }
 0x3c1   :  { %8291 = vpow2.f32 %v5439_v6 }
 0x3c2   :  { %8293 = vrcp.f32 %v5445_v21 }
 0x3c4   :  { %v5454_v20 = vpop.xlane.xlu1 %5453 }
 0x3c5   :  { %8295 = vrcp.f32 %v5454_v20  ;;  %v3177_v20 = vcombine.low %v10243_v17, %v2734_v14 }
 0x3c6   :  { %v8290_v62 = vpop.eup %8289 }
 0x3c7   :  { %v5542_v57 = vmul.f32 %v8290_v62, %v10256_v2 }
 0x3c8   :  { %v5451_v30 = vpop.xlane.xlu1 %5450 }
 0x3c9   :  { %8297 = vrcp.f32 %v5451_v30  ;;  %v3178_v30 = vcombine.high %v10243_v17, %v2734_v14 }
 0x3ce   :  { %v10464_v11 = vpop.eup %8291 }
 0x3cf   :  { %v8294_v19 = vpop.eup %8293  ;;  %v5533_v37 = vsel %vm5250_vm1, %v10464_v11, 0.0 }
 0x3d0   :  { %5534 = vadd.xlane.f32.xlu1 %v5533_v37  ;;  %v5540_v63 = vmul.f32 %v8294_v19, %v10265_v18 }
 0x3d2   :  { %8025 = vmatprep.mubr.msk.f32.mxu0 %vm5250_vm1, %v5540_v63  ;;  %v8296_v33 = vpop.eup %8295 }
 0x3d3   :  { %8026 = vmatmul.mubr.msk.f32.vlgmr.msra.gmra.mxu0 %vm5250_vm1, %v5542_v57  ;;  %v5546_v18 = vmul.f32 %v8296_v33, %v10269_v38  ;;  %v3185_v33 = vrot.slane %v3177_v20, %v8708_v51 }
 0x3d4   :  { %8036 = vmatpush3.msra.mxu0 %v10027_v42 }
 0x3d5   :  { %8037 = vmatprep.subr.mxu0 %v10119_v46 }
 0x3d6   :  { %8038 = vmatpush3.msra.mxu0 %v10119_v46  ;;  %v8298_v16 = vpop.eup %8297 }
 0x3d7   :  { %8049 = vmatprep.subr.mxu0 %v10035_v4  ;;  %v5544_v44 = vmul.f32 %v8298_v16, %v10273_v47  ;;  %v3192_v16 = vrot.slane %v3178_v30, %v8708_v51 }
 0x3d9   :  { %8032 = vmatprep.mubr.msk.f32.mxu1 %vm5250_vm1, %v5544_v44 }
 0x3da   :  { %8033 = vmatmul.mubr.msk.f32.vlgmr.msra.gmra.mxu1 %vm5250_vm1, %v5546_v18 }
 0x3db   :  { %8043 = vmatpush3.msra.mxu1 %v10414_v10 }
 0x3e7   :  { %v5460_v2 = vpop.xlane.xlu0 %5459 }
 0x3e8   :  { %8299 = vrcp.f32 %v5460_v2 }
 0x3eb   :  { %v5457_v42 = vpop.xlane.xlu0 %5456 }
 0x3ec   :  { %8301 = vrcp.f32 %v5457_v42 }
 0x3ef   :  { %v5472_v27 = vpop.xlane.xlu1 %5471  ;;  %v5466_v46 = vpop.xlane.xlu0 %5465 }
 0x3f0   :  { %8303 = vrcp.f32 %v5472_v27 }
 0x3f3   :  { %v5463_v32 = vpop.xlane.xlu1 %5462  ;;  %v5469_v6 = vpop.xlane.xlu0 %5468 }
 0x3f4   :  { %8305 = vrcp.f32 %v5463_v32 }
 0x3f5   :  { %8307 = vrcp.f32 %v5469_v6  ;;  %v8300_v21 = vpop.eup %8299 }
 0x3f6   :  { %v5550_v62 = vmul.f32 %v8300_v21, %v10284_v7  ;;  %8309 = vrcp.f32 %v5466_v46 }
 0x3f7   :  { %v5478_v47 = vpop.xlane.xlu1 %5477 }
 0x3f8   :  { %8311 = vrcp.f32 %v5478_v47 }
 0x3f9   :  { %v8302_v38 = vpop.eup %8301 }
 0x3fa   :  { %v5548_v10 = vmul.f32 %v8302_v38, %v10290_v58 }
 0x3fb   :  { %v5484_v19 = vpop.xlane.xlu0 %5483  ;;  %v2758_v37 = vpop.permute.xlu1 %2757 }
 0x3fc   :  { %8039 = vmatprep.mubr.msk.f32.mxu0 %vm5250_vm1, %v5548_v10  ;;  %v3193_v63 = vcombine.low %v10461_v23, %v2758_v37  ;;  %v3194_v57 = vcombine.high %v10461_v23, %v2758_v37 }
 0x3fd   :  { %8040 = vmatmul.mubr.msk.f32.vlgmr.msra.gmra.mxu0 %vm5250_vm1, %v5550_v62  ;;  %v8304_v14 = vpop.eup %8303 }
 0x3fe   :  { %8050 = vmatpush3.msra.mxu0 %v10035_v4  ;;  %v3201_v17 = vrot.slane %v3193_v63, %v8708_v51  ;;  %v3208_v7 = vrot.slane %v3194_v57, %v8708_v51 }
 0x3ff   :  { %8051 = vmatprep.subr.mxu0 %v10037_v53  ;;  %v5475_v58 = vpop.xlane.xlu0 %5474 }
 0x400   :  { %v3209_v44 = vcombine.low %v3185_v33, %v3201_v17  ;;  %v3210_v23 = vcombine.high %v3185_v33, %v3201_v17  ;;  %v3225_v18 = vcombine.low %v3192_v16, %v3208_v7  ;;  %v3226_v2 = vcombine.high %v3192_v16, %v3208_v7  ;;  %8052 = vmatpush3.msra.mxu0 %v10037_v53 }
 0x401   :  { %v8306_v42 = vpop.eup %8305  ;;  %8063 = vmatprep.subr.mxu0 %v10057_v39  ;;  %8313 = vrcp.f32 %v5475_v58  ;;  %v5558_v53 = vmul.f32 %v8304_v14, %v10299_v61 }
 0x402   :  { %v8308_v4 = vpop.eup %8307  ;;  %v3217_v27 = vrot.slane %v3209_v44, %v8715_v59  ;;  %v3224_v46 = vrot.slane %v3210_v23, %v8715_v59  ;;  %v3233_v32 = vrot.slane %v3225_v18, %v8715_v59  ;;  %v3240_v6 = vrot.slane %v3226_v2, %v8715_v59 }
 0x403   :  { %8315 = vrcp.f32 %v5484_v19  ;;  %v5481_v47 = vpop.xlane.xlu0 %5480  ;;  %v5552_v21 = vmul.f32 %v8306_v42, %v10304_v26  ;;  %v5556_v38 = vmul.f32 %v8308_v4, %v10310_v13  ;;  %v8310_v16 = vpop.eup %8309 }
 0x404   :  { %v3721_v20 = vcombine.low %v3217_v27, %v3224_v46  ;;  %v7532_v30 = vcombine.high %v3217_v27, %v3224_v46  ;;  %v3737_v10 = vcombine.low %v3233_v32, %v3240_v6  ;;  %v7533_v62 = vcombine.high %v3233_v32, %v3240_v6  ;;  %v10854_v27 = vld [vmem:[#allocation22_spill] sm:$0xff] }
 0x405   :  { %8317 = vrcp.f32 %v5481_v47  ;;  %8046 = vmatprep.mubr.msk.f32.mxu1 %vm5250_vm1, %v5552_v21  ;;  %8053 = vmatprep.mubr.msk.f32.mxu0 %vm5250_vm1, %v5556_v38  ;;  %v5554_v14 = vmul.f32 %v8310_v16, %v10295_v35  ;;  %v10856_v32 = vld [vmem:[#allocation18_spill] sm:$0xff] }
 0x406   :  { %8054 = vmatmul.mubr.msk.f32.vlgmr.msra.gmra.mxu0 %vm5250_vm1, %v5558_v53  ;;  %v10508_v19 = vrot.slane %v3721_v20, %v8708_v51  ;;  %v10511_v26 = vrot.slane %v7532_v30, %v8708_v51  ;;  %v10514_v13 = vrot.slane %v3737_v10, %v8708_v51  ;;  %v10517_v61 = vrot.slane %v7533_v62, %v8708_v51  ;;  %v10857_v10 = vld [vmem:[#allocation17_spill] sm:$0xff] }
 0x407   :  { %8064 = vmatpush3.msra.mxu0 %v10057_v39  ;;  %v5490_v37 = vpop.xlane.xlu0 %5489  ;;  %v8312_v39 = vpop.eup %8311 }
 0x408   :  { %8065 = vmatprep.subr.mxu0 %v10121_v9  ;;  %v3753_v63 = vcombine.low %v10508_v19, %v10511_v26  ;;  %v3769_v57 = vcombine.low %v10514_v13, %v10517_v61  ;;  %v5562_v35 = vmul.f32 %v8312_v39, %v10315_v50  ;;  %v3754_v39 = vcombine.high %v10508_v19, %v10511_v26 }
 0x409   :  { %8066 = vmatpush3.msra.mxu0 %v10121_v9 }
 0x40a   :  { %8077 = vmatprep.subr.mxu0 %v10039_v34  ;;  %v3761_v33 = vrot.slane %v3753_v63, %v8715_v59  ;;  %v3777_v51 = vrot.slane %v3769_v57, %v8715_v59  ;;  %v10858_v63 = vld [vmem:[#allocation19_spill] sm:$0xff]  ;;  %v3768_v26 = vrot.slane %v3754_v39, %v8715_v59 }
 0x40b   :  { %v5496_v17 = vpop.xlane.xlu0 %5495 }
 0x40c   :  { %v3785_v7 = vcombine.low %v3761_v33, %v3777_v51  ;;  %8319 = vrcp.f32 %v5496_v17  ;;  %v3786_v4 = vcombine.high %v3761_v33, %v3777_v51 }
 0x40e   :  { %v8314_v58 = vpop.eup %8313  ;;  %8044 = vmatprep.subr.mxu1 %v3785_v7 }
 0x40f   :  { %v5493_v44 = vpop.xlane.xlu0 %5492  ;;  %8045 = vmatpush3.msra.mxu1 %v3785_v7  ;;  %v5560_v23 = vmul.f32 %v8314_v58, %v10325_v24  ;;  %v3770_v7 = vcombine.high %v10514_v13, %v10517_v61  ;;  %v10861_v13 = vld [vmem:[#allocation26_spill] sm:$0xff]  ;;  %v10862_v61 = vld [vmem:[#allocation23_spill] sm:$0xff] }
 0x410   :  { %v8316_v9 = vpop.eup %8315  ;;  %8321 = vrcp.f32 %v5493_v44  ;;  %8047 = vmatmul.mubr.msk.f32.vlgmr.msra.gmra.mxu1 %vm5250_vm1, %v5554_v14  ;;  %8056 = vmatprep.subr.mxu1 %v10049_v12  ;;  %v10859_v14 = vld [vmem:[#allocation16_spill] sm:$0xff] }
 0x411   :  { %8057 = vmatpush3.msra.mxu1 %v10049_v12  ;;  %8060 = vmatprep.mubr.msk.f32.mxu1 %vm5250_vm1, %v5560_v23  ;;  %v5566_v42 = vmul.f32 %v8316_v9, %v10320_v55 }
 0x412   :  { %v8318_v18 = vpop.eup %8317  ;;  %8058 = vmatprep.subr.mxu1 %v10105_v56 }
 0x413   :  { %v5502_v2 = vpop.xlane.xlu0 %5501  ;;  %8059 = vmatpush3.msra.mxu1 %v10105_v56  ;;  %v5564_v24 = vmul.f32 %v8318_v18, %v10332_v41 }
 0x414   :  { %8061 = vmatmul.mubr.msk.f32.vlgmr.msra.gmra.mxu1 %vm5250_vm1, %v5562_v35  ;;  %8070 = vmatprep.subr.mxu1 %v10416_v60 }
 0x415   :  { %8067 = vmatprep.mubr.msk.f32.mxu0 %vm5250_vm1, %v5564_v24  ;;  %8071 = vmatpush3.msra.mxu1 %v10416_v60 }
 0x416   :  { %8068 = vmatmul.mubr.msk.f32.vlgmr.msra.gmra.mxu0 %vm5250_vm1, %v5566_v42  ;;  %8072 = vmatprep.subr.mxu1 %v3786_v4 }
 0x417   :  { %8078 = vmatpush3.msra.mxu0 %v10039_v34  ;;  %v5508_v12 = vpop.xlane.xlu0 %5507  ;;  %8073 = vmatpush3.msra.mxu1 %v3786_v4  ;;  %v10855_v34 = vld [vmem:[#allocation47_spill] sm:$0xff] }
 0x418   :  { %8079 = vmatprep.subr.mxu0 %v10041_v40  ;;  %8084 = vmatprep.subr.mxu1 %v10051_v31  ;;  %8323 = vrcp.f32 %v5508_v12 }
 0x419   :  { %8080 = vmatpush3.msra.mxu0 %v10041_v40  ;;  %v8320_v50 = vpop.eup %8319 }
 0x41a   :  { %8091 = vmatprep.subr.mxu0 %v10059_v54  ;;  %v5574_v46 = vmul.f32 %v8320_v50, %v10854_v27  ;;  %v10864_v50 = vld [vmem:[#allocation21_spill] sm:$0xff] }
 0x41b   :  { %v5499_v56 = vpop.xlane.xlu0 %5498 }
 0x41d   :  { %v8322_v55 = vpop.eup %8321 }
 0x41e   :  { %v5572_v41 = vmul.f32 %v8322_v55, %v10355_v25 }
 0x41f   :  { %v5505_v60 = vpop.xlane.xlu0 %5504 }
 0x420   :  { %8325 = vrcp.f32 %v5505_v60  ;;  %8081 = vmatprep.mubr.msk.f32.mxu0 %vm5250_vm1, %v5572_v41  ;;  %v6905_v41 = vld [vmem:[#allocation7 + $0x30] sm:$0xff]  ;;  %v6903_v60 = vld [vmem:[#allocation7 + $0x20] sm:$0xff] }
 0x421   :  { %8082 = vmatmul.mubr.msk.f32.vlgmr.msra.gmra.mxu0 %vm5250_vm1, %v5574_v46 }
 0x422   :  { %8092 = vmatpush3.msra.mxu0 %v10059_v54 }
 0x423   :  { %8093 = vmatprep.subr.mxu0 %v10855_v34  ;;  %v5511_v40 = vpop.xlane.xlu0 %5510 }
 0x424   :  { %8094 = vmatpush3.msra.mxu0 %v10855_v34 }
 0x425   :  { %8105 = vmatprep.subr.mxu0 %v10856_v32  ;;  %v8324_v47 = vpop.eup %8323 }
 0x426   :  { %v5582_v20 = vmul.f32 %v8324_v47, %v10371_v43  ;;  %v6914_v47 = vld [vmem:[#allocation7 + $0x78] sm:$0xff] }
 0x427   :  { %v5517_v6 = vpop.xlane.xlu0 %5516 }
 0x428   :  { %8327 = vrcp.f32 %v5517_v6  ;;  %v6900_v6 = vld [vmem:[#allocation7 + $0x8] sm:$0xff] }
 0x429   :  { %8329 = vrcp.f32 %v5490_v37 }
 0x42b   :  { %v5520_v25 = vpop.xlane.xlu0 %5519 }
 0x42c   :  { %8331 = vrcp.f32 %v5520_v25  ;;  %v5487_v21 = vpop.xlane.xlu1 %5486  ;;  %v6899_v25 = vld [vmem:[#allocation7] sm:$0xff] }
 0x42d   :  { %v8326_v38 = vpop.eup %8325  ;;  %8333 = vrcp.f32 %v5487_v21  ;;  %v6910_v21 = vld [vmem:[#allocation7 + $0x58] sm:$0xff] }
 0x42e   :  { %8335 = vrcp.f32 %v5499_v56  ;;  %v5580_v53 = vmul.f32 %v8326_v38, %v10394_v15  ;;  %v10863_v56 = vld [vmem:[#allocation20_spill] sm:$0xff]  ;;  %v6913_v38 = vld [vmem:[#allocation7 + $0x70] sm:$0xff] }
 0x42f   :  { %v5526_v54 = vpop.xlane.xlu0 %5525  ;;  %8337 = vrcp.f32 %v5502_v2 }
 0x430   :  { %8095 = vmatprep.mubr.msk.f32.mxu0 %vm5250_vm1, %v5580_v53  ;;  %v5514_v30 = vpop.xlane.xlu1 %5513  ;;  %8339 = vrcp.f32 %v5511_v40  ;;  %v6912_v53 = vld [vmem:[#allocation7 + $0x68] sm:$0xff] }
 0x431   :  { %8096 = vmatmul.mubr.msk.f32.vlgmr.msra.gmra.mxu0 %vm5250_vm1, %v5582_v20  ;;  %8341 = vrcp.f32 %v5514_v30 }
 0x432   :  { %8106 = vmatpush3.msra.mxu0 %v10856_v32  ;;  %v6901_v32 = vld [vmem:[#allocation7 + $0x10] sm:$0xff] }
 0x433   :  { %8107 = vmatprep.subr.mxu0 %v10857_v10  ;;  %v5532_v15 = vpop.xlane.xlu0 %5531 }
 0x434   :  { %8108 = vmatpush3.msra.mxu0 %v10857_v10  ;;  %v5523_v62 = vpop.xlane.xlu1 %5522 }
 0x435   :  { %v8328_v37 = vpop.eup %8327  ;;  %8119 = vmatprep.subr.mxu0 %v10858_v63  ;;  %8343 = vrcp.f32 %v5523_v62 }
 0x436   :  { %v5588_v43 = vmul.f32 %v8328_v37, %v10422_v52  ;;  %8345 = vrcp.f32 %v5526_v54  ;;  %v8330_v57 = vpop.eup %8329  ;;  %v6911_v54 = vld [vmem:[#allocation7 + $0x60] sm:$0xff] }
 0x437   :  { %8347 = vrcp.f32 %v5532_v15  ;;  %v5570_v44 = vmul.f32 %v8330_v57, %v10859_v14  ;;  %v6907_v57 = vld [vmem:[#allocation7 + $0x40] sm:$0xff] }
 0x438   :  { %8109 = vmatprep.mubr.msk.f32.mxu0 %vm5250_vm1, %v5588_v43  ;;  %v5529_v33 = vpop.xlane.xlu1 %5528  ;;  %v6908_v43 = vld [vmem:[#allocation7 + $0x48] sm:$0xff] }
 0x439   :  { %v8332_v51 = vpop.eup %8331  ;;  %8349 = vrcp.f32 %v5529_v33 }
 0x43a   :  { %v8334_v16 = vpop.eup %8333  ;;  %v5590_v17 = vmul.f32 %v8332_v51, %v10427_v49  ;;  %v10860_v49 = vld [vmem:[#allocation56_spill] sm:$0xff] }
 0x43b   :  { %v8336_v58 = vpop.eup %8335  ;;  %v5568_v52 = vmul.f32 %v8334_v16, %v10431_v22  ;;  %v3784_v22 = vrot.slane %v3770_v7, %v8715_v59 }
 0x43c   :  { %8110 = vmatmul.mubr.msk.f32.vlgmr.msra.gmra.mxu0 %vm5250_vm1, %v5590_v17  ;;  %v8338_v23 = vpop.eup %8337  ;;  %v5576_v19 = vmul.f32 %v8336_v58, %v10382_v36  ;;  %v6906_v36 = vld [vmem:[#allocation7 + $0x38] sm:$0xff] }
 0x43d   :  { %8120 = vmatpush3.msra.mxu0 %v10858_v63  ;;  %8074 = vmatprep.mubr.msk.f32.mxu1 %vm5250_vm1, %v5568_v52  ;;  %v8340_v9 = vpop.eup %8339  ;;  %v5578_v18 = vmul.f32 %v8338_v23, %v10862_v61  ;;  %v3787_v59 = vcombine.low %v3768_v26, %v3784_v22  ;;  %v3788_v55 = vcombine.high %v3768_v26, %v3784_v22  ;;  %v6909_v63 = vld [vmem:[#allocation7 + $0x50] sm:$0xff] }
 0x43e   :  { %8121 = vmatprep.subr.mxu0 %v10860_v49  ;;  %8075 = vmatmul.mubr.msk.f32.vlgmr.msra.gmra.mxu1 %vm5250_vm1, %v5570_v44  ;;  %v8342_v35 = vpop.eup %8341  ;;  %v5584_v2 = vmul.f32 %v8340_v9, %v10404_v45 }
 0x43f   :  { %8122 = vmatpush3.msra.mxu0 %v10860_v49  ;;  %8085 = vmatpush3.msra.mxu1 %v10051_v31  ;;  %v5586_v42 = vmul.f32 %v8342_v35, %v10439_v3 }
 0x440   :  { %8086 = vmatprep.subr.mxu1 %v10861_v13  ;;  %8088 = vmatprep.mubr.msk.f32.mxu1 %vm5250_vm1, %v5576_v19 }
 0x441   :  { %8087 = vmatpush3.msra.mxu1 %v10861_v13  ;;  %8133 = vmatprep.subr.mxu0 %v6906_v36 }
 0x442   :  { %v8344_v24 = vpop.eup %8343  ;;  %8098 = vmatprep.subr.mxu1 %v10418_v29  ;;  %8089 = vmatmul.mubr.msk.f32.vlgmr.msra.gmra.mxu1 %vm5250_vm1, %v5578_v18 }
 0x443   :  { %8099 = vmatpush3.msra.mxu1 %v10418_v29  ;;  %8102 = vmatprep.mubr.msk.f32.mxu1 %vm5250_vm1, %v5584_v2  ;;  %v8346_v31 = vpop.eup %8345  ;;  %v5592_v45 = vmul.f32 %v8344_v24, %v10447_v0 }
 0x444   :  { %8100 = vmatprep.subr.mxu1 %v3787_v59  ;;  %v8348_v4 = vpop.eup %8347  ;;  %v5594_v3 = vmul.f32 %v8346_v31, %v10433_v5  ;;  %v6904_v5 = vld [vmem:[#allocation7 + $0x28] sm:$0xff] }
 0x445   :  { %8101 = vmatpush3.msra.mxu1 %v3787_v59  ;;  %v5598_v0 = vmul.f32 %v8348_v4, %v10443_v8  ;;  %v5538_v8 = vpop.xlane.xlu0 %5537 }
 0x446   :  { %v8350_v12 = vpop.eup %8349  ;;  %8112 = vmatprep.subr.mxu1 %v10863_v56  ;;  %8103 = vmatmul.mubr.msk.f32.vlgmr.msra.gmra.mxu1 %vm5250_vm1, %v5586_v42  ;;  %8351 = vrcp.f32 %v5538_v8 }
 0x447   :  { %8113 = vmatpush3.msra.mxu1 %v10863_v56  ;;  %8116 = vmatprep.mubr.msk.f32.mxu1 %vm5250_vm1, %v5592_v45  ;;  %v5596_v29 = vmul.f32 %v8350_v12, %v10455_v1  ;;  %v6902_v1 = vld [vmem:[#allocation7 + $0x18] sm:$0xff] }
 0x448   :  { %8114 = vmatprep.subr.mxu1 %v10864_v50 }
 0x449   :  { %8115 = vmatpush3.msra.mxu1 %v10864_v50  ;;  %8123 = vmatprep.mubr.msk.f32.mxu0 %vm5250_vm1, %v5596_v29 }
 0x44a   :  { %8126 = vmatprep.subr.mxu1 %v10420_v48  ;;  %8117 = vmatmul.mubr.msk.f32.vlgmr.msra.gmra.mxu1 %vm5250_vm1, %v5594_v3 }
 0x44b   :  { %8124 = vmatmul.mubr.msk.f32.vlgmr.msra.gmra.mxu0 %vm5250_vm1, %v5598_v0  ;;  %8127 = vmatpush3.msra.mxu1 %v10420_v48 }
 0x44c   :  { %8128 = vmatprep.subr.mxu1 %v3788_v55  ;;  %8134 = vmatpush3.msra.mxu0 %v6906_v36 }
 0x44d   :  { %8129 = vmatpush3.msra.mxu1 %v3788_v55  ;;  %8135 = vmatprep.subr.mxu0 %v6905_v41 }
 0x44e   :  { %8153 = vmatprep.subr.mxu1 %v6902_v1  ;;  %8136 = vmatpush3.msra.mxu0 %v6905_v41 }
 0x44f   :  { %8137 = vmatprep.subr.mxu0 %v6904_v5 }
 0x450   :  { %8138 = vmatpush3.msra.mxu0 %v6904_v5 }
 0x451   :  { %8139 = vmatprep.subr.mxu0 %v6903_v60 }
 0x452   :  { %8140 = vmatpush3.msra.mxu0 %v6903_v60 }
 0x453   :  { %v8352_v46 = vpop.eup %8351  ;;  %8173 = vmatprep.subr.mxu0 %v6910_v21 }
 0x454   :  { %v5602_v40 = vmul.f32 %v8352_v46, %v10451_v28 }
 0x459   :  { %v5535_v27 = vpop.xlane.xlu1 %5534 }
 0x45a   :  { %8353 = vrcp.f32 %v5535_v27 }
 0x467   :  { %v8354_v34 = vpop.eup %8353 }
 0x468   :  { %v5600_v48 = vmul.f32 %v8354_v34, %v10464_v11 }
 0x46a   :  { %8130 = vmatprep.mubr.msk.f32.mxu1 %vm5250_vm1, %v5600_v48 }
 0x46b   :  { %8131 = vmatmul.mubr.msk.f32.vlgmr.msra.gmra.mxu1 %vm5250_vm1, %v5602_v40 }
 0x46c   :  { %8154 = vmatpush3.msra.mxu1 %v6902_v1 }
 0x46d   :  { %8155 = vmatprep.subr.mxu1 %v6901_v32 }
 0x46e   :  { %8156 = vmatpush3.msra.mxu1 %v6901_v32  ;;  %v7664_v32 = vld [vmem:[%s10659_s4] ss:$0 sm:$0xff]  ;;  %s8454_s4 = smov [#allocation8]  }
 0x46f   :  { %8157 = vmatprep.subr.mxu1 %v6900_v6  ;;  %s7475_s15 = sshll.u32 %s8454_s4, 4  ;;  %s7476_s15 = int_to_ptr.vmem [resolvable:$true] %s7475_s15 }
 0x470   :  { %8158 = vmatpush3.msra.mxu1 %v6900_v6  ;;  %s8415_s16 = scalar_lea.vmem %s7476_s15, 1024  ;;  %p8420_p2 = scmp.lt.s32.totalorder %s7476_s15, %s7476_s15 }
 0x471   :  { %8159 = vmatprep.subr.mxu1 %v6899_v25  ;;  %p8416_p1 = scmp.ne.s32.totalorder %s7476_s15, %s8415_s16  ;;  %p8421_p3 = scmp.lt.s32.totalorder %s8415_s16, %s8415_s16 }
 0x472   :  { %8160 = vmatpush3.msra.mxu1 %v6899_v25 }
 0x473   :  { %8193 = vmatprep.subr.mxu1 %v6914_v47  ;;  %p8422_p4 = por %p8421_p3, %p8420_p2 }
 0x475   :  { %p8423_p5 = pnand %p8422_p4, %p8416_p1 }
 0x493   :  { %v8027_v11 = vpop.f32.mrf.mxu0 }
 0x495   :  { %v5675_v28 = vpop.f32.mrf.mxu0 }
 0x496   :  { %8161 = vmatprep.mubr.msk.f32.mxu1 %vm3857_vm0, %v5675_v28 }
 0x497   :  { %8162 = vmatmul.mubr.msk.f32.vlgmr.msra.gmra.mxu1 %vm3857_vm0, %v8027_v11 }
 0x498   :  { %8194 = vmatpush3.msra.mxu1 %v6914_v47 }
 0x499   :  { %8195 = vmatprep.subr.mxu1 %v6913_v38 }
 0x49a   :  { %8196 = vmatpush3.msra.mxu1 %v6913_v38  ;;  %v8034_v20 = vpop.f32.mrf.mxu1 }
 0x49b   :  { %8197 = vmatprep.subr.mxu1 %v6912_v53 }
 0x49c   :  { %8198 = vmatpush3.msra.mxu1 %v6912_v53  ;;  %v5756_v30 = vpop.f32.mrf.mxu1 }
 0x49d   :  { %8199 = vmatprep.subr.mxu1 %v6911_v54  ;;  %8164 = vmatprep.mubr.msk.f32.mxu1 %vm3857_vm0, %v5756_v30 }
 0x49e   :  { %8200 = vmatpush3.msra.mxu1 %v6911_v54 }
 0x49f   :  { %8165 = vmatmul.mubr.msk.f32.gmra.mxu1 %vm3857_vm0, %v8034_v20 }
 0x4bd   :  { %v8041_v10 = vpop.f32.mrf.mxu0 }
 0x4bf   :  { %v5837_v62 = vpop.f32.mrf.mxu0 }
 0x4c0   :  { %8167 = vmatprep.mubr.msk.f32.mxu1 %vm3857_vm0, %v5837_v62 }
 0x4c1   :  { %8168 = vmatmul.mubr.msk.f32.gmra.mxu1 %vm3857_vm0, %v8041_v10 }
 0x4c6   :  { %v8055_v37 = vpop.f32.mrf.mxu0 }
 0x4c8   :  { %v5999_v15 = vpop.f32.mrf.mxu0 }
 0x4c9   :  { %8141 = vmatprep.mubr.msk.f32.mxu0 %vm3857_vm0, %v5999_v15 }
 0x4ca   :  { %8142 = vmatmul.mubr.msk.f32.vlgmr.msra.gmra.mxu0 %vm3857_vm0, %v8055_v37 }
 0x4cb   :  { %8174 = vmatpush3.msra.mxu0 %v6910_v21 }
 0x4cc   :  { %8175 = vmatprep.subr.mxu0 %v6909_v63 }
 0x4cd   :  { %8176 = vmatpush3.msra.mxu0 %v6909_v63 }
 0x4ce   :  { %8177 = vmatprep.subr.mxu0 %v6908_v43 }
 0x4cf   :  { %8178 = vmatpush3.msra.mxu0 %v6908_v43 }
 0x4d0   :  { %v8048_v33 = vpop.f32.mrf.mxu1  ;;  %8179 = vmatprep.subr.mxu0 %v6907_v57 }
 0x4d1   :  { %8180 = vmatpush3.msra.mxu0 %v6907_v57 }
 0x4d2   :  { %v5918_v51 = vpop.f32.mrf.mxu1 }
 0x4d3   :  { %8170 = vmatprep.mubr.msk.f32.mxu1 %vm3857_vm0, %v5918_v51 }
 0x4d4   :  { %v8062_v16 = vpop.f32.mrf.mxu1  ;;  %8171 = vmatmul.mubr.msk.f32.gmra.mxu1 %vm3857_vm0, %v8048_v33 }
 0x4d6   :  { %v8069_v17 = vpop.f32.mrf.mxu0  ;;  %v6080_v39 = vpop.f32.mrf.mxu1 }
 0x4d7   :  { %8144 = vmatprep.mubr.msk.f32.mxu0 %vm3857_vm0, %v6080_v39 }
 0x4d8   :  { %v6161_v7 = vpop.f32.mrf.mxu0  ;;  %8145 = vmatmul.mubr.msk.f32.gmra.mxu0 %vm3857_vm0, %v8062_v16 }
 0x4d9   :  { %8147 = vmatprep.mubr.msk.f32.mxu0 %vm3857_vm0, %v6161_v7 }
 0x4dc   :  { %8148 = vmatmul.mubr.msk.f32.gmra.mxu0 %vm3857_vm0, %v8069_v17 }
 0x4e1   :  { %v8083_v58 = vpop.f32.mrf.mxu0 }
 0x4e3   :  { %v6323_v52 = vpop.f32.mrf.mxu0 }
 0x4f1   :  { %v8097_v14 = vpop.f32.mrf.mxu0 }
 0x4f3   :  { %v6485_v44 = vpop.f32.mrf.mxu0 }
 0x4fc   :  { %v8111_v23 = vpop.f32.mrf.mxu0 }
 0x4fe   :  { %v6647_v9 = vpop.f32.mrf.mxu0  ;;  %v8076_v49 = vpop.f32.mrf.mxu1 }
 0x4ff   :  { %8201 = vmatprep.mubr.msk.f32.mxu1 %vm3857_vm0, %v6647_v9 }
 0x500   :  { %8202 = vmatmul.mubr.msk.f32.vlgmr.msra.gmra.mxu1 %vm3857_vm0, %v8111_v23  ;;  %v6242_v19 = vpop.f32.mrf.mxu1 }
 0x501   :  { %8150 = vmatprep.mubr.msk.f32.mxu0 %vm3857_vm0, %v6242_v19 }
 0x502   :  { %v8090_v26 = vpop.f32.mrf.mxu1  ;;  %8151 = vmatmul.mubr.msk.f32.gmra.mxu0 %vm3857_vm0, %v8076_v49 }
 0x503   :  { %8181 = vmatprep.mubr.msk.f32.mxu0 %vm3857_vm0, %v6323_v52 }
 0x504   :  { %v6404_v22 = vpop.f32.mrf.mxu1 }
 0x506   :  { %v8104_v13 = vpop.f32.mrf.mxu1  ;;  %8182 = vmatmul.mubr.msk.f32.vlgmr.msra.gmra.mxu0 %vm3857_vm0, %v8083_v58 }
 0x507   :  { %8184 = vmatprep.mubr.msk.f32.mxu0 %vm3857_vm0, %v6404_v22 }
 0x508   :  { %v6566_v61 = vpop.f32.mrf.mxu1 }
 0x50a   :  { %v8118_v18 = vpop.f32.mrf.mxu1  ;;  %8185 = vmatmul.mubr.msk.f32.gmra.mxu0 %vm3857_vm0, %v8090_v26 }
 0x50b   :  { %v8125_v35 = vpop.f32.mrf.mxu0  ;;  %8187 = vmatprep.mubr.msk.f32.mxu0 %vm3857_vm0, %v6485_v44 }
 0x50c   :  { %v6728_v2 = vpop.f32.mrf.mxu1 }
 0x50d   :  { %8204 = vmatprep.mubr.msk.f32.mxu1 %vm3857_vm0, %v6728_v2  ;;  %v6809_v36 = vpop.f32.mrf.mxu0 }
 0x50e   :  { %8188 = vmatmul.mubr.msk.f32.gmra.mxu0 %vm3857_vm0, %v8097_v14  ;;  %8205 = vmatmul.mubr.msk.f32.gmra.mxu1 %vm3857_vm0, %v8118_v18 }
 0x50f   :  { %8190 = vmatprep.mubr.msk.f32.mxu0 %vm3857_vm0, %v6566_v61  ;;  %8207 = vmatprep.mubr.msk.f32.mxu1 %vm3857_vm0, %v6809_v36 }
 0x512   :  { %8191 = vmatmul.mubr.msk.f32.gmra.mxu0 %vm3857_vm0, %v8104_v13  ;;  %8208 = vmatmul.mubr.msk.f32.gmra.mxu1 %vm3857_vm0, %v8125_v35 }
 0x52b   :  { %v8132_v24 = vpop.f32.mrf.mxu1 }
 0x52d   :  { %v6890_v59 = vpop.f32.mrf.mxu1 }
 0x52e   :  { %8210 = vmatprep.mubr.msk.f32.mxu1 %vm3857_vm0, %v6890_v59 }
 0x52f   :  { %8211 = vmatmul.mubr.msk.f32.gmra.mxu1 %vm3857_vm0, %v8132_v24 }
 0x557   :  { %v8163_v31 = vpop.f32.mrf.mxu1 }
 0x559   :  { %v7134_v4 = vpop.f32.mrf.mxu1 }
 0x55f   :  { %v8166_v12 = vpop.f32.mrf.mxu1 }
 0x561   :  { %v7144_v29 = vpop.f32.mrf.mxu1 }
 0x581   :  { %v8169_v3 = vpop.f32.mrf.mxu1 }
 0x583   :  { %v7154_v55 = vpop.f32.mrf.mxu1 }
 0x58a   :  { %v8143_v42 = vpop.f32.mrf.mxu0 }
 0x58b   :  { %v7140_v27 = vadd.f32 %v8163_v31, %v8143_v42 }
 0x58c   :  { %v7005_v45 = vpop.f32.mrf.mxu0 }
 0x58d   :  { %v7135_v48 = vadd.f32 %v7134_v4, %v7005_v45 }
 0x594   :  { %v8172_v41 = vpop.f32.mrf.mxu1 }
 0x596   :  { %v7164_v60 = vpop.f32.mrf.mxu1 }
 0x598   :  { %v8146_v56 = vpop.f32.mrf.mxu0 }
 0x599   :  { %v7150_v28 = vadd.f32 %v8166_v12, %v8146_v56 }
 0x59a   :  { %v7015_v50 = vpop.f32.mrf.mxu0 }
 0x59b   :  { %v7145_v20 = vadd.f32 %v7144_v29, %v7015_v50 }
 0x59c   :  { %v8149_v0 = vpop.f32.mrf.mxu0 }
 0x59d   :  { %v7160_v15 = vadd.f32 %v8169_v3, %v8149_v0 }
 0x59e   :  { %v7025_v1 = vpop.f32.mrf.mxu0 }
 0x59f   :  { %v7155_v51 = vadd.f32 %v7154_v55, %v7025_v1 }
 0x5c0   :  { %v8203_v46 = vpop.f32.mrf.mxu1 }
 0x5c2   :  { %v8152_v5 = vpop.f32.mrf.mxu0  ;;  %v7400_v21 = vpop.f32.mrf.mxu1 }
 0x5c3   :  { %v7170_v26 = vadd.f32 %v8172_v41, %v8152_v5 }
 0x5c4   :  { %v7035_v8 = vpop.f32.mrf.mxu0 }
 0x5c5   :  { %v7165_v13 = vadd.f32 %v7164_v60, %v7035_v8 }
 0x5c6   :  { %v8183_v34 = vpop.f32.mrf.mxu0 }
 0x5c7   :  { %v7303_v40 = vadd.f32 %v8183_v34, %v7140_v27 }
 0x5c8   :  { %v7263_v6 = vpop.f32.mrf.mxu0 }
 0x5c9   :  { %v7440_v25 = vadd.f32 %v8203_v46, %v7303_v40  ;;  %v7302_v47 = vadd.f32 %v7263_v6, %v7135_v48 }
 0x5ca   :  { %v8186_v11 = vpop.f32.mrf.mxu0 }
 0x5cb   :  { %v7455_v38 = vadd.f32 %v7664_v32, %v7440_v25  ;;  %v7439_v53 = vadd.f32 %v7400_v21, %v7302_v47  ;;  %v7305_v10 = vadd.f32 %v8186_v11, %v7150_v28 }
 0x5cc   :  { %v7273_v54 = vpop.f32.mrf.mxu0 }
 0x5cd   :  { %7463 = vst [vmem:[#allocation8 + $0x8] sm:$0xff] %v7455_v38  ;;  %v7454_v30 = vadd.f32 %v7664_v32, %v7439_v53  ;;  %v7304_v63 = vadd.f32 %v7273_v54, %v7145_v20 }
 0x5ce   :  { %v8189_v62 = vpop.f32.mrf.mxu0  ;;  %v8206_v37 = vpop.f32.mrf.mxu1 }
 0x5cf   :  { %7462 = vst [vmem:[#allocation8] sm:$0xff] %v7454_v30  ;;  %v7442_v43 = vadd.f32 %v8206_v37, %v7305_v10  ;;  %v7307_v16 = vadd.f32 %v8189_v62, %v7160_v15 }
 0x5d0   :  { %v7283_v57 = vpop.f32.mrf.mxu0  ;;  %v7410_v33 = vpop.f32.mrf.mxu1 }
 0x5d1   :  { %v7457_v17 = vadd.f32 %v7664_v32, %v7442_v43  ;;  %v7441_v39 = vadd.f32 %v7410_v33, %v7304_v63  ;;  %v7306_v58 = vadd.f32 %v7283_v57, %v7155_v51 }
 0x5d2   :  { %v8209_v7 = vpop.f32.mrf.mxu1  ;;  %v8192_v19 = vpop.f32.mrf.mxu0 }
 0x5d3   :  { %7465 = vst [vmem:[#allocation8 + $0x18] sm:$0xff] %v7457_v17  ;;  %v7456_v52 = vadd.f32 %v7664_v32, %v7441_v39  ;;  %v7444_v14 = vadd.f32 %v8209_v7, %v7307_v16  ;;  %v7309_v61 = vadd.f32 %v8192_v19, %v7170_v26 }
 0x5d4   :  { %v7420_v44 = vpop.f32.mrf.mxu1  ;;  %v7293_v22 = vpop.f32.mrf.mxu0 }
 0x5d5   :  { %7464 = vst [vmem:[#allocation8 + $0x10] sm:$0xff] %v7456_v52  ;;  %v7459_v23 = vadd.f32 %v7664_v32, %v7444_v14  ;;  %v7443_v9 = vadd.f32 %v7420_v44, %v7306_v58  ;;  %v7308_v35 = vadd.f32 %v7293_v22, %v7165_v13 }
 0x5d7   :  { %7467 = vst [vmem:[#allocation8 + $0x28] sm:$0xff] %v7459_v23  ;;  %v7458_v49 = vadd.f32 %v7664_v32, %v7443_v9 }
 0x5d9   :  { %7466 = vst [vmem:[#allocation8 + $0x20] sm:$0xff] %v7458_v49 }
 0x5ef   :  { %v8212_v18 = vpop.f32.mrf.mxu1 }
 0x5f0   :  { %v7446_v2 = vadd.f32 %v8212_v18, %v7309_v61 }
 0x5f1   :  { %v7430_v36 = vpop.f32.mrf.mxu1 }
 0x5f2   :  { %v7461_v24 = vadd.f32 %v7664_v32, %v7446_v2  ;;  %v7445_v59 = vadd.f32 %v7430_v36, %v7308_v35 }
 0x5f4   :  { %7469 = vst [vmem:[#allocation8 + $0x38] sm:$0xff] %v7461_v24  ;;  %v7460_v31 = vadd.f32 %v7664_v32, %v7445_v59 }
 0x5f6   :  { %7468 = vst [vmem:[#allocation8 + $0x30] sm:$0xff] %v7460_v31 }
 0x5f7   :  { %8426 = shalt.err (!%p8423_p5)
}
 0x5f8   :  { %7481 = dma.vmem_to_hbm [thread:$0]  %s7476_s15, 1024, %s10660_s5, [#allocation4], %s8445_s28, %s8445_s28, %s8446_s29  }
 0x5f9   :  { %8439 = dma.done.wait [#allocation4], 1024  }
 0x5fa   :  { %8440 = vsyncadd [#allocation4], 4294966272 }
 0x5fb   :  { %7485 = vsyncpa [#allocation3], 1 }
 0x5fc   :  { %7486 = vsyncpa [#allocation6], 1 }
 0x5fd   :  { %7487 = vsyncpa [#allocation4], 1 }

// kernel: tpu_custom_call.1
= control target key start
LH: loop header
LB: loop body
LE: loop exit
PB: predicated region body
PF: predicated region fallthrough
CT: control target
= control target key end

     0   :  { %10 = vsyncpa [#allocation3], 0  ;;  %s10655_s0 = inlined_call_operand.hbm [shape: f32[4,16,128], index: 0, kind: input, shape index: {}]   ;;  %s10656_s1 = inlined_call_operand.hbm [shape: f32[128,384], index: 1, kind: input, shape index: {}]   ;;  %s10657_s2 = inlined_call_operand.vmem [shape: f32[1,384], index: 2, kind: input, shape index: {}]   ;;  %s10658_s3 = inlined_call_operand.hbm [shape: f32[4,32,128], index: 3, kind: input, shape index: {}]   ;;  %s10659_s4 = inlined_call_operand.vmem [shape: f32[1,128], index: 4, kind: input, shape index: {}]   ;;  %s10660_s5 = inlined_call_operand.hbm [shape: f32[4,16,128], index: 5, kind: output, shape index: {}]  }
   0x1   :  { %11 = vsyncpa [#allocation6], 0 }
   0x2   :  { %12 = vsyncpa [#allocation4], 0  ;;  %s8441_s18 = smov [#allocation5]  }
   0x3   :  { %s30_s19 = sshll.u32 %s8441_s18, 4  ;;  %s31_s19 = int_to_ptr.vmem [resolvable:$true] %s30_s19 }
   0x4   :  { %s8363_s20 = scalar_lea.vmem %s31_s19, 6144  ;;  %p8368_p1 = scmp.lt.s32.totalorder %s31_s19, %s31_s19 }
   0x5   :  { %p8364_p0 = scmp.ne.s32.totalorder %s31_s19, %s8363_s20  ;;  %p8369_p2 = scmp.lt.s32.totalorder %s8363_s20, %s8363_s20 }
   0x7   :  { %p8370_p3 = por %p8369_p2, %p8368_p1 }
   0x9   :  { %p8371_p4 = pnand %p8370_p3, %p8364_p0 }
   0xb   :  { %8374 = shalt.err (!%p8371_p4)
}
   0xc   :  { %s8442_s21 = smov 384   ;;  %s8443_s22 = smov 24  }
   0xd   :  { %36 = dma.hbm_to_vmem [thread:$0]  %s10656_s1, 6144, %s31_s19, [#allocation6], %s8442_s21, %s8442_s21, %s8443_s22  }
   0xe   :  { %s8444_s25 = smov [#allocation2]  }
   0xf   :  { %s18_s26 = sshll.u32 %s8444_s25, 4  ;;  %s19_s26 = int_to_ptr.vmem [resolvable:$true] %s18_s26 }
  0x10   :  { %s8383_s27 = scalar_lea.vmem %s19_s26, 1024  ;;  %p8388_p6 = scmp.lt.s32.totalorder %s19_s26, %s19_s26 }
  0x11   :  { %p8384_p5 = scmp.ne.s32.totalorder %s19_s26, %s8383_s27  ;;  %p8389_p7 = scmp.lt.s32.totalorder %s8383_s27, %s8383_s27 }
  0x13   :  { %p8390_p8 = por %p8389_p7, %p8388_p6 }
  0x15   :  { %p8391_p9 = pnand %p8390_p8, %p8384_p5 }
  0x17   :  { %8394 = shalt.err (!%p8391_p9)
}
  0x18   :  { %s8445_s28 = smov 128   ;;  %s8446_s29 = smov 8  }
  0x19   :  { %24 = dma.hbm_to_vmem [thread:$0]  %s10655_s0, 1024, %s19_s26, [#allocation3], %s8445_s28, %s8445_s28, %s8446_s29  }
  0x1a   :  { %s8447_s1 = smov [#allocation7]  }
  0x1b   :  { %s44_s7 = sshll.u32 %s8447_s1, 4  ;;  %s45_s7 = int_to_ptr.vmem [resolvable:$true] %s44_s7 }
  0x1c   :  { %s8403_s8 = scalar_lea.vmem %s45_s7, 2048  ;;  %p8408_p11 = scmp.lt.s32.totalorder %s45_s7, %s45_s7 }
  0x1d   :  { %p8404_p10 = scmp.ne.s32.totalorder %s45_s7, %s8403_s8  ;;  %p8409_p12 = scmp.lt.s32.totalorder %s8403_s8, %s8403_s8 }
  0x1f   :  { %p8410_p13 = por %p8409_p12, %p8408_p11 }
  0x21   :  { %p8411_p0 = pnand %p8410_p13, %p8404_p10 }
  0x23   :  { %8414 = shalt.err (!%p8411_p0)
}
  0x24   :  { %50 = dma.hbm_to_vmem [thread:$0]  %s10658_s3, 2048, %s45_s7, [#allocation6], %s8445_s28, %s8445_s28, %s8446_s29  }
  0x25   :  { %8435 = dma.done.wait [#allocation3], 1024  }
  0x26   :  { %8436 = vsyncadd [#allocation3], 4294966272 }
  0x27   :  { %8437 = dma.done.wait [#allocation6], 8192  }
  0x28   :  { %8438 = vsyncadd [#allocation6], 4294959104  ;;  %v8448_v0 = vmov 0.0   ;;  %v116_v1 = vld [vmem:[#allocation5 + $0x170] sm:$0xff]  ;;  %v115_v2 = vld [vmem:[#allocation5 + $0x168] sm:$0xff]  ;;  %v120_v57 = vlaneseq  ;;  %s8449_s11 = smov 64  }
  0x29   :  { %199 = vmatprep.mubr.f32.mxu0 %v8448_v0  ;;  %v113_v3 = vld [vmem:[#allocation5 + $0x158] sm:$0xff]  ;;  %135 = vmatprep.subr.mxu0 %v116_v1  ;;  %v112_v4 = vld [vmem:[#allocation5 + $0x150] sm:$0xff]  ;;  %v110_v5 = vld [vmem:[#allocation5 + $0x140] sm:$0xff]  ;;  %s8450_s12 = smov 96   ;;  %vm3857_vm0 = vcmask 261120   ;;  %vm5250_vm1 = vcmask 130048  }
  0x2a   :  { %136 = vmatpush1.msra.mxu0 %v115_v2  ;;  %v109_v6 = vld [vmem:[#allocation5 + $0x138] sm:$0xff]  ;;  %v107_v7 = vld [vmem:[#allocation5 + $0x128] sm:$0xff]  ;;  %v106_v8 = vld [vmem:[#allocation5 + $0x120] sm:$0xff]  ;;  %v8512_v58 = vshrl.u32 %v120_v57, 7 }
  0x2b   :  { %137 = vmatprep.subr.mxu0 %v113_v3  ;;  %v104_v9 = vld [vmem:[#allocation5 + $0x110] sm:$0xff]  ;;  %v103_v10 = vld [vmem:[#allocation5 + $0x108] sm:$0xff]  ;;  %v101_v11 = vld [vmem:[#allocation5 + $0xf8] sm:$0xff] }
  0x2c   :  { %138 = vmatpush1.msra.mxu0 %v112_v4  ;;  %v100_v12 = vld [vmem:[#allocation5 + $0xf0] sm:$0xff]  ;;  %v98_v13 = vld [vmem:[#allocation5 + $0xe0] sm:$0xff]  ;;  %v97_v15 = vld [vmem:[#allocation5 + $0xd8] sm:$0xff]  ;;  %v122_v59 = vsub.s32 0, %v8512_v58  ;;  %v126_v62 = vsub.s32 1, %v8512_v58 }
  0x2d   :  { %139 = vmatprep.subr.mxu0 %v110_v5  ;;  %v8501_v14 = vld [vmem:[#allocation2] sm:$0xff]  ;;  %v95_v16 = vld [vmem:[#allocation5 + $0xc8] sm:$0xff]  ;;  %v117_v18 = vld [vmem:[#allocation5 + $0x178] sm:$0xff] }
  0x2e   :  { %140 = vmatpush1.msra.mxu0 %v109_v6  ;;  %7897 = vmatprep.mubr.f32.mxu1 %v8501_v14  ;;  %v94_v17 = vld [vmem:[#allocation5 + $0xc0] sm:$0xff]  ;;  %v92_v20 = vld [vmem:[#allocation5 + $0xb0] sm:$0xff]  ;;  %v91_v21 = vld [vmem:[#allocation5 + $0xa8] sm:$0xff] }
  0x2f   :  { %141 = vmatprep.subr.mxu0 %v107_v7  ;;  %v114_v19 = vld [vmem:[#allocation5 + $0x160] sm:$0xff]  ;;  %7865 = vmatprep.subr.mxu1 %v117_v18  ;;  %v111_v22 = vld [vmem:[#allocation5 + $0x148] sm:$0xff]  ;;  %v89_v23 = vld [vmem:[#allocation5 + $0x98] sm:$0xff] }
  0x30   :  { %142 = vmatpush1.msra.mxu0 %v106_v8  ;;  %7866 = vmatpush3.msra.mxu1 %v117_v18  ;;  %v88_v24 = vld [vmem:[#allocation5 + $0x90] sm:$0xff]  ;;  %v86_v26 = vld [vmem:[#allocation5 + $0x80] sm:$0xff]  ;;  %v85_v27 = vld [vmem:[#allocation5 + $0x78] sm:$0xff] }
  0x31   :  { %143 = vmatprep.subr.mxu0 %v104_v9  ;;  %7867 = vmatprep.subr.mxu1 %v114_v19  ;;  %v108_v25 = vld [vmem:[#allocation5 + $0x130] sm:$0xff]  ;;  %v105_v28 = vld [vmem:[#allocation5 + $0x118] sm:$0xff]  ;;  %v83_v29 = vld [vmem:[#allocation5 + $0x68] sm:$0xff] }
  0x32   :  { %144 = vmatpush1.msra.mxu0 %v103_v10  ;;  %7868 = vmatpush3.msra.mxu1 %v114_v19  ;;  %v82_v30 = vld [vmem:[#allocation5 + $0x60] sm:$0xff]  ;;  %v80_v32 = vld [vmem:[#allocation5 + $0x50] sm:$0xff]  ;;  %v79_v33 = vld [vmem:[#allocation5 + $0x48] sm:$0xff] }
  0x33   :  { %145 = vmatprep.subr.mxu0 %v101_v11  ;;  %7869 = vmatprep.subr.mxu1 %v111_v22  ;;  %v102_v31 = vld [vmem:[#allocation5 + $0x100] sm:$0xff]  ;;  %v99_v34 = vld [vmem:[#allocation5 + $0xe8] sm:$0xff]  ;;  %v77_v35 = vld [vmem:[#allocation5 + $0x38] sm:$0xff] }
  0x34   :  { %146 = vmatpush1.msra.mxu0 %v100_v12  ;;  %7870 = vmatpush3.msra.mxu1 %v111_v22  ;;  %v76_v36 = vld [vmem:[#allocation5 + $0x30] sm:$0xff]  ;;  %v74_v38 = vld [vmem:[#allocation5 + $0x20] sm:$0xff]  ;;  %v73_v39 = vld [vmem:[#allocation5 + $0x18] sm:$0xff] }
  0x35   :  { %147 = vmatprep.subr.mxu0 %v98_v13  ;;  %7871 = vmatprep.subr.mxu1 %v108_v25  ;;  %v96_v37 = vld [vmem:[#allocation5 + $0xd0] sm:$0xff]  ;;  %v93_v40 = vld [vmem:[#allocation5 + $0xb8] sm:$0xff]  ;;  %v71_v41 = vld [vmem:[#allocation5 + $0x8] sm:$0xff] }
  0x36   :  { %148 = vmatpush1.msra.mxu0 %v97_v15  ;;  %7872 = vmatpush3.msra.mxu1 %v108_v25  ;;  %v70_v42 = vld [vmem:[#allocation5] sm:$0xff]  ;;  %v87_v44 = vld [vmem:[#allocation5 + $0x88] sm:$0xff]  ;;  %v84_v45 = vld [vmem:[#allocation5 + $0x70] sm:$0xff] }
  0x37   :  { %149 = vmatprep.subr.mxu0 %v95_v16  ;;  %7873 = vmatprep.subr.mxu1 %v105_v28  ;;  %v90_v43 = vld [vmem:[#allocation5 + $0xa0] sm:$0xff]  ;;  %v63_v46 = vld [vmem:[#allocation2 + $0x8] sm:$0xff]  ;;  %v81_v47 = vld [vmem:[#allocation5 + $0x58] sm:$0xff] }
  0x38   :  { %150 = vmatpush1.msra.mxu0 %v94_v17  ;;  %7874 = vmatpush3.msra.mxu1 %v105_v28  ;;  %v78_v48 = vld [vmem:[#allocation5 + $0x40] sm:$0xff]  ;;  %v64_v49 = vld [vmem:[#allocation2 + $0x10] sm:$0xff]  ;;  %v65_v50 = vld [vmem:[#allocation2 + $0x18] sm:$0xff] }
  0x39   :  { %151 = vmatprep.subr.mxu0 %v92_v20  ;;  %7875 = vmatprep.subr.mxu1 %v102_v31  ;;  %v66_v51 = vld [vmem:[#allocation2 + $0x20] sm:$0xff]  ;;  %v67_v52 = vld [vmem:[#allocation2 + $0x28] sm:$0xff]  ;;  %v68_v53 = vld [vmem:[#allocation2 + $0x30] sm:$0xff] }
  0x3a   :  { %152 = vmatpush1.msra.mxu0 %v91_v21  ;;  %7876 = vmatpush3.msra.mxu1 %v102_v31  ;;  %v69_v54 = vld [vmem:[#allocation2 + $0x38] sm:$0xff]  ;;  %v75_v55 = vld [vmem:[#allocation5 + $0x28] sm:$0xff]  ;;  %v72_v56 = vld [vmem:[#allocation5 + $0x10] sm:$0xff]  ;;  %v130_v31 = vsub.s32 2, %v8512_v58 }
  0x3b   :  { %153 = vmatprep.subr.mxu0 %v89_v23  ;;  %7877 = vmatprep.subr.mxu1 %v99_v34  ;;  %v8518_v60 = vld [vmem:[%s10657_s2] sm:$0x7]  ;;  %s8451_s2 = smov 32  }
  0x3c   :  { %154 = vmatpush1.msra.mxu0 %v88_v24  ;;  %7878 = vmatpush3.msra.mxu1 %v99_v34  ;;  %v8521_v61 = vrot.slane %v8518_v60, %v122_v59  ;;  %v8528_v1 = vrot.slane %v8518_v60, %v126_v62 }
  0x3d   :  { %155 = vmatprep.subr.mxu0 %v86_v26  ;;  %7879 = vmatprep.subr.mxu1 %v96_v37 }
  0x3e   :  { %156 = vmatpush1.msra.mxu0 %v85_v27  ;;  %7880 = vmatpush3.msra.mxu1 %v96_v37 }
  0x3f   :  { %157 = vmatprep.subr.mxu0 %v83_v29  ;;  %7881 = vmatprep.subr.mxu1 %v93_v40 }
  0x40   :  { %158 = vmatpush1.msra.mxu0 %v82_v30  ;;  %7882 = vmatpush3.msra.mxu1 %v93_v40  ;;  %v8452_v40 = vmov 1983009808  }
  0x41   :  { %159 = vmatprep.subr.mxu0 %v80_v32  ;;  %7883 = vmatprep.subr.mxu1 %v90_v43 }
  0x42   :  { %160 = vmatpush1.msra.mxu0 %v79_v33  ;;  %7884 = vmatpush3.msra.mxu1 %v90_v43  ;;  %v8669_v33 = vrot.slane %v8518_v60, %v130_v31 }
  0x43   :  { %161 = vmatprep.subr.mxu0 %v77_v35  ;;  %7885 = vmatprep.subr.mxu1 %v87_v44 }
  0x44   :  { %162 = vmatpush1.msra.mxu0 %v76_v36  ;;  %7886 = vmatpush3.msra.mxu1 %v87_v44  ;;  %v8453_v44 = vmov 1934713408  }
  0x45   :  { %163 = vmatprep.subr.mxu0 %v74_v38  ;;  %7887 = vmatprep.subr.mxu1 %v84_v45 }
  0x46   :  { %164 = vmatpush1.msra.mxu0 %v73_v39  ;;  %7888 = vmatpush3.msra.mxu1 %v84_v45  ;;  %v468_v45 = vunpack.c.l.s4 %v8453_v44 }
  0x47   :  { %165 = vmatprep.subr.mxu0 %v71_v41  ;;  %7889 = vmatprep.subr.mxu1 %v81_v47  ;;  %v436_v41 = vunpack.c.l.s4 %v8452_v40 }
  0x48   :  { %166 = vmatpush1.msra.mxu0 %v70_v42  ;;  %7890 = vmatpush3.msra.mxu1 %v81_v47 }
  0x49   :  { %200 = vmatmul.mubr.f32.vlgmr.msra.gmra.mxu0 %v8501_v14  ;;  %7891 = vmatprep.subr.mxu1 %v78_v48  ;;  %v437_v47 = vunpack.c.0.s8 %v436_v41 }
  0x4a   :  { %205 = vmatprep.mubr.f32.mxu0 %v8448_v0  ;;  %7892 = vmatpush3.msra.mxu1 %v78_v48 }
  0x4b   :  { %7893 = vmatprep.subr.mxu1 %v75_v55 }
  0x4c   :  { %7894 = vmatpush3.msra.mxu1 %v75_v55 }
  0x4d   :  { %206 = vmatmul.mubr.f32.gmra.mxu0 %v63_v46  ;;  %7895 = vmatprep.subr.mxu1 %v72_v56 }
  0x4e   :  { %211 = vmatprep.mubr.f32.mxu0 %v8448_v0  ;;  %7896 = vmatpush3.msra.mxu1 %v72_v56 }
  0x4f   :  { %7898 = vmatmul.mubr.f32.vlgmr.msra.gmra.mxu1 %v63_v46 }
  0x50   :  { %7900 = vmatprep.mubr.f32.mxu1 %v64_v49 }
  0x51   :  { %212 = vmatmul.mubr.f32.gmra.mxu0 %v64_v49 }
  0x52   :  { %217 = vmatprep.mubr.f32.mxu0 %v8448_v0 }
  0x53   :  { %7901 = vmatmul.mubr.f32.gmra.mxu1 %v65_v50 }
  0x54   :  { %7903 = vmatprep.mubr.f32.mxu1 %v66_v51 }
  0x55   :  { %218 = vmatmul.mubr.f32.gmra.mxu0 %v65_v50  ;;  %v469_v50 = vunpack.c.0.s8 %v468_v45 }
  0x56   :  { %223 = vmatprep.mubr.f32.mxu0 %v8448_v0 }
  0x57   :  { %7904 = vmatmul.mubr.f32.gmra.mxu1 %v67_v52  ;;  %v8715_v59 = vsub.s32 %v469_v50, %v8512_v58 }
  0x58   :  { %7906 = vmatprep.mubr.f32.mxu1 %v68_v53 }
  0x59   :  { %224 = vmatmul.mubr.f32.gmra.mxu0 %v66_v51  ;;  %v8708_v51 = vsub.s32 %v437_v47, %v8512_v58 }
  0x5a   :  { %229 = vmatprep.mubr.f32.mxu0 %v8448_v0 }
  0x5b   :  { %7907 = vmatmul.mubr.f32.gmra.mxu1 %v69_v54 }
  0x5d   :  { %230 = vmatmul.mubr.f32.gmra.mxu0 %v67_v52 }
  0x5e   :  { %235 = vmatprep.mubr.f32.mxu0 %v8448_v0 }
  0x61   :  { %236 = vmatmul.mubr.f32.gmra.mxu0 %v68_v53 }
  0x62   :  { %241 = vmatprep.mubr.f32.mxu0 %v8448_v0 }
  0x65   :  { %242 = vmatmul.mubr.f32.gmra.mxu0 %v69_v54 }
 0x109   :  { %v201_v63 = vpop.f32.mrf.mxu0 }
 0x10a   :  { %v8525_v0 = vadd.f32 %v201_v63, %v8521_v61 }
 0x10b   :  { %v203_v2 = vpop.f32.mrf.mxu0 }
 0x10c   :  { %385 = vrot.lane.b32.xlu1 %v8525_v0, %s8449_s11  ;;  %361 = vrot.lane.b32.xlu0 %v8525_v0, %s8450_s12  ;;  %v8535_v3 = vadd.f32 %v203_v2, %v8528_v1 }
 0x10d   :  { %v207_v4 = vpop.f32.mrf.mxu0 }
 0x10e   :  { %v8542_v5 = vadd.f32 %v207_v4, %v8521_v61 }
 0x10f   :  { %v209_v6 = vpop.f32.mrf.mxu0  ;;  %v7899_v34 = vpop.f32.mrf.mxu1 }
 0x110   :  { %1529 = vrot.lane.b32.xlu1 %v8535_v3, %s8450_s12  ;;  %409 = vrot.lane.b32.xlu0 %v8525_v0, %s8451_s2  ;;  %v8553_v7 = vadd.f32 %v209_v6, %v8528_v1  ;;  %v8676_v35 = vadd.f32 %v7899_v34, %v8669_v33 }
 0x111   :  { %v213_v8 = vpop.f32.mrf.mxu0  ;;  %v314_v36 = vpop.f32.mrf.mxu1 }
 0x112   :  { %v8560_v9 = vadd.f32 %v213_v8, %v8521_v61  ;;  %10722 = vst [vmem:[#allocation12_spill] sm:$0xff] %v8676_v35  ;;  %v8683_v37 = vadd.f32 %v314_v36, %v8669_v33 }
 0x113   :  { %v215_v10 = vpop.f32.mrf.mxu0  ;;  %v7902_v38 = vpop.f32.mrf.mxu1 }
 0x114   :  { %1577 = vrot.lane.b32.xlu1 %v8535_v3, %s8451_s2  ;;  %1553 = vrot.lane.b32.xlu0 %v8535_v3, %s8449_s11  ;;  %v8571_v11 = vadd.f32 %v215_v10, %v8528_v1  ;;  %10723 = vst [vmem:[#allocation13_spill] sm:$0xff] %v8683_v37  ;;  %v8690_v39 = vadd.f32 %v7902_v38, %v8669_v33 }
 0x115   :  { %v219_v12 = vpop.f32.mrf.mxu0  ;;  %v324_v42 = vpop.f32.mrf.mxu1 }
 0x116   :  { %v8574_v13 = vadd.f32 %v219_v12, %v8521_v61  ;;  %10724 = vst [vmem:[#allocation14_spill] sm:$0xff] %v8690_v39  ;;  %v8722_v2 = vadd.f32 %v324_v42, %v8669_v33 }
 0x117   :  { %v221_v14 = vpop.f32.mrf.mxu0  ;;  %v7905_v43 = vpop.f32.mrf.mxu1 }
 0x118   :  { %387 = vrot.lane.b32.xlu1 %v8542_v5, %s8449_s11  ;;  %363 = vrot.lane.b32.xlu0 %v8542_v5, %s8450_s12  ;;  %v8589_v15 = vadd.f32 %v221_v14, %v8528_v1  ;;  %v8701_v46 = vadd.f32 %v7905_v43, %v8669_v33  ;;  %10726 = vst [vmem:[#allocation16_spill] sm:$0xff] %v8722_v2 }
 0x119   :  { %v225_v16 = vpop.f32.mrf.mxu0 }
 0x11a   :  { %v8592_v17 = vadd.f32 %v225_v16, %v8521_v61  ;;  %10725 = vst [vmem:[#allocation15_spill] sm:$0xff] %v8701_v46 }
 0x11b   :  { %v227_v18 = vpop.f32.mrf.mxu0 }
 0x11c   :  { %1579 = vrot.lane.b32.xlu1 %v8553_v7, %s8451_s2  ;;  %411 = vrot.lane.b32.xlu0 %v8542_v5, %s8451_s2  ;;  %v8603_v19 = vadd.f32 %v227_v18, %v8528_v1 }
 0x11d   :  { %v231_v20 = vpop.f32.mrf.mxu0 }
 0x11e   :  { %v8614_v23 = vadd.f32 %v231_v20, %v8521_v61 }
 0x11f   :  { %v233_v21 = vpop.f32.mrf.mxu0 }
 0x120   :  { %365 = vrot.lane.b32.xlu1 %v8560_v9, %s8450_s12  ;;  %1531 = vrot.lane.b32.xlu0 %v8553_v7, %s8450_s12  ;;  %v8625_v25 = vadd.f32 %v233_v21, %v8528_v1 }
 0x121   :  { %v237_v22 = vpop.f32.mrf.mxu0 }
 0x122   :  { %v8646_v30 = vadd.f32 %v237_v22, %v8521_v61 }
 0x123   :  { %v239_v24 = vpop.f32.mrf.mxu0 }
 0x124   :  { %413 = vrot.lane.b32.xlu1 %v8560_v9, %s8451_s2  ;;  %1555 = vrot.lane.b32.xlu0 %v8553_v7, %s8449_s11  ;;  %v8632_v27 = vadd.f32 %v239_v24, %v8528_v1 }
 0x125   :  { %v243_v26 = vpop.f32.mrf.mxu0 }
 0x126   :  { %v8662_v32 = vadd.f32 %v243_v26, %v8521_v61 }
 0x127   :  { %v245_v28 = vpop.f32.mrf.mxu0 }
 0x128   :  { %1533 = vrot.lane.b32.xlu1 %v8571_v11, %s8450_s12  ;;  %389 = vrot.lane.b32.xlu0 %v8560_v9, %s8449_s11  ;;  %v8639_v29 = vadd.f32 %v245_v28, %v8528_v1 }
 0x12c   :  { %1557 = vrot.lane.b32.xlu1 %v8571_v11, %s8449_s11  ;;  %367 = vrot.lane.b32.xlu0 %v8574_v13, %s8450_s12 }
 0x130   :  { %1581 = vrot.lane.b32.xlu1 %v8571_v11, %s8451_s2  ;;  %415 = vrot.lane.b32.xlu0 %v8574_v13, %s8451_s2 }
 0x134   :  { %391 = vrot.lane.b32.xlu1 %v8574_v13, %s8449_s11  ;;  %1559 = vrot.lane.b32.xlu0 %v8589_v15, %s8449_s11 }
 0x138   :  { %1535 = vrot.lane.b32.xlu1 %v8589_v15, %s8450_s12  ;;  %393 = vrot.lane.b32.xlu0 %v8592_v17, %s8449_s11 }
 0x13c   :  { %1583 = vrot.lane.b32.xlu1 %v8589_v15, %s8451_s2  ;;  %1537 = vrot.lane.b32.xlu0 %v8603_v19, %s8450_s12 }
 0x140   :  { %369 = vrot.lane.b32.xlu1 %v8592_v17, %s8450_s12  ;;  %1561 = vrot.lane.b32.xlu0 %v8603_v19, %s8449_s11 }
 0x144   :  { %417 = vrot.lane.b32.xlu1 %v8592_v17, %s8451_s2  ;;  %1585 = vrot.lane.b32.xlu0 %v8603_v19, %s8451_s2 }
 0x148   :  { %371 = vrot.lane.b32.xlu1 %v8614_v23, %s8450_s12  ;;  %395 = vrot.lane.b32.xlu0 %v8614_v23, %s8449_s11 }
 0x14c   :  { %419 = vrot.lane.b32.xlu1 %v8614_v23, %s8451_s2  ;;  %1539 = vrot.lane.b32.xlu0 %v8625_v25, %s8450_s12 }
 0x150   :  { %1565 = vrot.lane.b32.xlu1 %v8632_v27, %s8449_s11  ;;  %1563 = vrot.lane.b32.xlu0 %v8625_v25, %s8449_s11 }
 0x154   :  { %1543 = vrot.lane.b32.xlu1 %v8639_v29, %s8450_s12  ;;  %1587 = vrot.lane.b32.xlu0 %v8625_v25, %s8451_s2 }
 0x158   :  { %1567 = vrot.lane.b32.xlu1 %v8639_v29, %s8449_s11  ;;  %373 = vrot.lane.b32.xlu0 %v8646_v30, %s8450_s12 }
 0x15c   :  { %1591 = vrot.lane.b32.xlu1 %v8639_v29, %s8451_s2  ;;  %1541 = vrot.lane.b32.xlu0 %v8632_v27, %s8450_s12 }
 0x160   :  { %397 = vrot.lane.b32.xlu1 %v8646_v30, %s8449_s11  ;;  %1589 = vrot.lane.b32.xlu0 %v8632_v27, %s8451_s2 }
 0x164   :  { %375 = vrot.lane.b32.xlu1 %v8662_v32, %s8450_s12  ;;  %421 = vrot.lane.b32.xlu0 %v8646_v30, %s8451_s2 }
 0x168   :  { %423 = vrot.lane.b32.xlu1 %v8662_v32, %s8451_s2  ;;  %399 = vrot.lane.b32.xlu0 %v8662_v32, %s8449_s11 }
 0x16c   :  { %2699 = vrot.lane.b32.xlu1 %v8676_v35, %s8450_s12  ;;  %2723 = vrot.lane.b32.xlu0 %v8676_v35, %s8449_s11 }
 0x170   :  { %2747 = vrot.lane.b32.xlu1 %v8676_v35, %s8451_s2  ;;  %2697 = vrot.lane.b32.xlu0 %v8683_v37, %s8450_s12 }
 0x174   :  { %2721 = vrot.lane.b32.xlu1 %v8683_v37, %s8449_s11  ;;  %2703 = vrot.lane.b32.xlu0 %v8690_v39, %s8450_s12 }
 0x178   :  { %2745 = vrot.lane.b32.xlu1 %v8683_v37, %s8451_s2  ;;  %2727 = vrot.lane.b32.xlu0 %v8690_v39, %s8449_s11 }
 0x17c   :  { %2751 = vrot.lane.b32.xlu0 %v8690_v39, %s8451_s2  ;;  %2707 = vrot.lane.b32.xlu1 %v8701_v46, %s8450_s12 }
 0x17e   :  { %v386_v48 = vpop.permute.xlu1 %385  ;;  %v362_v49 = vpop.permute.xlu0 %361 }
 0x17f   :  { %v433_v52 = vcombine.low %v8525_v0, %v386_v48  ;;  %v434_v53 = vcombine.high %v8525_v0, %v386_v48 }
 0x180   :  { %2731 = vrot.lane.b32.xlu1 %v8701_v46, %s8449_s11 }
 0x181   :  { %v441_v60 = vrot.slane %v433_v52, %v8708_v51  ;;  %v448_v61 = vrot.slane %v434_v53, %v8708_v51 }
 0x182   :  { %v1530_v54 = vpop.permute.xlu1 %1529  ;;  %v410_v55 = vpop.permute.xlu0 %409 }
 0x183   :  { %v449_v56 = vcombine.low %v362_v49, %v410_v55  ;;  %v450_v57 = vcombine.high %v362_v49, %v410_v55 }
 0x184   :  { %2755 = vrot.lane.b32.xlu1 %v8701_v46, %s8451_s2 }
 0x185   :  { %v457_v62 = vrot.slane %v449_v56, %v8708_v51  ;;  %v464_v63 = vrot.slane %v450_v57, %v8708_v51 }
 0x186   :  { %v1578_v1 = vpop.permute.xlu1 %1577  ;;  %v1554_v0 = vpop.permute.xlu0 %1553 }
 0x187   :  { %v465_v4 = vcombine.low %v441_v60, %v457_v62  ;;  %v466_v6 = vcombine.high %v441_v60, %v457_v62  ;;  %v481_v58 = vcombine.low %v448_v61, %v464_v63  ;;  %v482_v8 = vcombine.high %v448_v61, %v464_v63 }
 0x188   :  { %v1617_v10 = vcombine.low %v1530_v54, %v1578_v1  ;;  %v1618_v12 = vcombine.high %v1530_v54, %v1578_v1  ;;  %v1601_v14 = vcombine.low %v8535_v3, %v1554_v0  ;;  %v1602_v16 = vcombine.high %v8535_v3, %v1554_v0  ;;  %2701 = vrot.lane.b32.xlu1 %v8722_v2, %s8450_s12 }
 0x189   :  { %v473_v18 = vrot.slane %v465_v4, %v8715_v59  ;;  %v480_v20 = vrot.slane %v466_v6, %v8715_v59  ;;  %v489_v21 = vrot.slane %v481_v58, %v8715_v59  ;;  %v496_v22 = vrot.slane %v482_v8, %v8715_v59 }
 0x18a   :  { %v1625_v24 = vrot.slane %v1617_v10, %v8708_v51  ;;  %v1632_v26 = vrot.slane %v1618_v12, %v8708_v51  ;;  %v1609_v28 = vrot.slane %v1601_v14, %v8708_v51  ;;  %v1616_v31 = vrot.slane %v1602_v16, %v8708_v51  ;;  %v388_v34 = vpop.permute.xlu1 %387  ;;  %v364_v36 = vpop.permute.xlu0 %363 }
 0x18b   :  { %v977_v3 = vcombine.low %v473_v18, %v480_v20  ;;  %v7488_v38 = vcombine.high %v473_v18, %v480_v20  ;;  %v993_v40 = vcombine.low %v489_v21, %v496_v22  ;;  %v7489_v41 = vcombine.high %v489_v21, %v496_v22 }
 0x18c   :  { %v1633_v42 = vcombine.low %v1609_v28, %v1625_v24  ;;  %v1634_v43 = vcombine.high %v1609_v28, %v1625_v24  ;;  %v1649_v44 = vcombine.low %v1616_v31, %v1632_v26  ;;  %v1650_v45 = vcombine.high %v1616_v31, %v1632_v26 }
 0x18d   :  { %v501_v47 = vcombine.low %v8542_v5, %v388_v34  ;;  %v502_v48 = vcombine.high %v8542_v5, %v388_v34  ;;  %v8741_v49 = vrot.slane %v977_v3, %v8708_v51  ;;  %v8744_v50 = vrot.slane %v7488_v38, %v8708_v51 }
 0x18e   :  { %v1641_v52 = vrot.slane %v1633_v42, %v8715_v59  ;;  %v1648_v53 = vrot.slane %v1634_v43, %v8715_v59  ;;  %v1657_v54 = vrot.slane %v1649_v44, %v8715_v59  ;;  %v1664_v55 = vrot.slane %v1650_v45, %v8715_v59  ;;  %v1580_v56 = vpop.permute.xlu1 %1579  ;;  %v412_v57 = vpop.permute.xlu0 %411 }
 0x18f   :  { %v509_v60 = vrot.slane %v501_v47, %v8708_v51  ;;  %v517_v61 = vcombine.low %v364_v36, %v412_v57  ;;  %v518_v5 = vcombine.high %v364_v36, %v412_v57  ;;  %v516_v0 = vrot.slane %v502_v48, %v8708_v51 }
 0x190   :  { %v2145_v62 = vcombine.low %v1641_v52, %v1648_v53  ;;  %v7504_v63 = vcombine.high %v1641_v52, %v1648_v53  ;;  %v2161_v1 = vcombine.low %v1657_v54, %v1664_v55  ;;  %v8755_v58 = vrot.slane %v993_v40, %v8708_v51 }
 0x191   :  { %v525_v4 = vrot.slane %v517_v61, %v8708_v51  ;;  %v532_v6 = vrot.slane %v518_v5, %v8708_v51  ;;  %v8758_v8 = vrot.slane %v7489_v41, %v8708_v51  ;;  %v7505_v10 = vcombine.high %v1657_v54, %v1664_v55 }
 0x192   :  { %10727 = vst [vmem:[#allocation17_spill] sm:$0xff] %v8755_v58  ;;  %v366_v12 = vpop.permute.xlu1 %365  ;;  %v1532_v14 = vpop.permute.xlu0 %1531  ;;  %v1009_v16 = vcombine.low %v8741_v49, %v8744_v50  ;;  %v8763_v18 = vrot.slane %v2145_v62, %v8708_v51  ;;  %v8766_v20 = vrot.slane %v7504_v63, %v8708_v51  ;;  %v8783_v48 = vrot.slane %v2161_v1, %v8708_v51 }
 0x193   :  { %10728 = vst [vmem:[#allocation18_spill] sm:$0xff] %v8758_v8  ;;  %v533_v21 = vcombine.low %v509_v60, %v525_v4  ;;  %v534_v22 = vcombine.high %v509_v60, %v525_v4  ;;  %v549_v24 = vcombine.low %v516_v0, %v532_v6  ;;  %v550_v26 = vcombine.high %v516_v0, %v532_v6 }
 0x194   :  { %10729 = vst [vmem:[#allocation19_spill] sm:$0xff] %v8763_v18  ;;  %10730 = vst [vmem:[#allocation20_spill] sm:$0xff] %v8766_v20  ;;  %v1685_v28 = vcombine.low %v1532_v14, %v1580_v56  ;;  %v1686_v31 = vcombine.high %v1532_v14, %v1580_v56  ;;  %v8769_v34 = vrot.slane %v1009_v16, %v8715_v59 }
 0x195   :  { %v1025_v36 = vcombine.low %v8755_v58, %v8758_v8  ;;  %v541_v3 = vrot.slane %v533_v21, %v8715_v59  ;;  %v548_v38 = vrot.slane %v534_v22, %v8715_v59  ;;  %v557_v40 = vrot.slane %v549_v24, %v8715_v59  ;;  %10731 = vst [vmem:[#allocation21_spill] sm:$0xff] %v8783_v48 }
 0x196   :  { %v564_v41 = vrot.slane %v550_v26, %v8715_v59  ;;  %v1693_v42 = vrot.slane %v1685_v28, %v8708_v51  ;;  %v1700_v43 = vrot.slane %v1686_v31, %v8708_v51  ;;  %v414_v45 = vpop.permute.xlu1 %413  ;;  %v1556_v47 = vpop.permute.xlu0 %1555  ;;  %v8805_v16 = vrot.slane %v7505_v10, %v8708_v51 }
 0x197   :  { %v8780_v44 = vrot.slane %v1025_v36, %v8715_v59  ;;  %v1045_v52 = vcombine.low %v541_v3, %v548_v38  ;;  %v7490_v53 = vcombine.high %v541_v3, %v548_v38  ;;  %v585_v57 = vcombine.low %v366_v12, %v414_v45 }
 0x198   :  { %v1061_v54 = vcombine.low %v557_v40, %v564_v41  ;;  %v7491_v55 = vcombine.high %v557_v40, %v564_v41  ;;  %v586_v60 = vcombine.high %v366_v12, %v414_v45  ;;  %v1669_v61 = vcombine.low %v8553_v7, %v1556_v47  ;;  %10736 = vst [vmem:[#allocation26_spill] sm:$0xff] %v8805_v16 }
 0x199   :  { %v1041_v56 = vcombine.low %v8769_v34, %v8780_v44  ;;  %v8789_v5 = vrot.slane %v1045_v52, %v8708_v51  ;;  %v8792_v62 = vrot.slane %v7490_v53, %v8708_v51  ;;  %v593_v0 = vrot.slane %v585_v57, %v8708_v51 }
 0x19a   :  { %v8795_v63 = vrot.slane %v1061_v54, %v8708_v51  ;;  %v8798_v1 = vrot.slane %v7491_v55, %v8708_v51  ;;  %v1670_v4 = vcombine.high %v8553_v7, %v1556_v47  ;;  %v1677_v6 = vrot.slane %v1669_v61, %v8708_v51  ;;  %v1534_v12 = vpop.permute.xlu1 %1533  ;;  %v390_v14 = vpop.permute.xlu0 %389 }
 0x19b   :  { %10732 = vst [vmem:[#allocation22_spill] sm:$0xff] %v8789_v5  ;;  %10733 = vst [vmem:[#allocation23_spill] sm:$0xff] %v8792_v62  ;;  %7913 = vmatprep.mubr.msk.f32.mxu1 %vm3857_vm0, %v1041_v56  ;;  %v1077_v21 = vcombine.low %v8789_v5, %v8792_v62  ;;  %v569_v36 = vcombine.low %v8560_v9, %v390_v14  ;;  %v600_v38 = vrot.slane %v586_v60, %v8708_v51 }
 0x19c   :  { %10734 = vst [vmem:[#allocation24_spill] sm:$0xff] %v8795_v63  ;;  %10735 = vst [vmem:[#allocation25_spill] sm:$0xff] %v8798_v1  ;;  %v1093_v24 = vcombine.low %v8795_v63, %v8798_v1  ;;  %v1684_v7 = vrot.slane %v1670_v4, %v8708_v51  ;;  %v1701_v28 = vcombine.low %v1677_v6, %v1693_v42 }
 0x19d   :  { %v1702_v31 = vcombine.high %v1677_v6, %v1693_v42  ;;  %v8818_v10 = vrot.slane %v1077_v21, %v8715_v59  ;;  %v570_v40 = vcombine.high %v8560_v9, %v390_v14  ;;  %v577_v54 = vrot.slane %v569_v36, %v8708_v51 }
 0x19e   :  { %v8821_v3 = vrot.slane %v1093_v24, %v8715_v59  ;;  %v8826_v41 = vrot.slane %v1701_v28, %v8715_v59  ;;  %v1717_v47 = vcombine.low %v1684_v7, %v1700_v43  ;;  %v1718_v42 = vcombine.high %v1684_v7, %v1700_v43  ;;  %v1558_v52 = vpop.permute.xlu1 %1557  ;;  %v368_v53 = vpop.permute.xlu0 %367 }
 0x19f   :  { %v8829_v45 = vrot.slane %v1702_v31, %v8715_v59  ;;  %v584_v55 = vrot.slane %v570_v40, %v8708_v51  ;;  %v1737_v56 = vcombine.low %v8571_v11, %v1558_v52  ;;  %v1738_v61 = vcombine.high %v8571_v11, %v1558_v52 }
 0x1a0   :  { %v8837_v9 = vrot.slane %v1717_v47, %v8715_v59  ;;  %v8840_v60 = vrot.slane %v1718_v42, %v8715_v59  ;;  %v601_v4 = vcombine.low %v577_v54, %v593_v0  ;;  %v602_v6 = vcombine.high %v577_v54, %v593_v0 }
 0x1a1   :  { %v2213_v43 = vcombine.low %v8826_v41, %v8829_v45  ;;  %v617_v14 = vcombine.low %v584_v55, %v600_v38  ;;  %v618_v21 = vcombine.high %v584_v55, %v600_v38  ;;  %v7506_v24 = vcombine.high %v8826_v41, %v8829_v45 }
 0x1a2   :  { %v2229_v7 = vcombine.low %v8837_v9, %v8840_v60  ;;  %v7507_v28 = vcombine.high %v8837_v9, %v8840_v60  ;;  %v1745_v31 = vrot.slane %v1737_v56, %v8708_v51  ;;  %v1582_v36 = vpop.permute.xlu1 %1581  ;;  %v416_v40 = vpop.permute.xlu0 %415  ;;  %v8853_v47 = vrot.slane %v601_v4, %v8715_v59 }
 0x1a3   :  { %v8856_v11 = vrot.slane %v602_v6, %v8715_v59  ;;  %v8859_v0 = vrot.slane %v617_v14, %v8715_v59  ;;  %v8862_v38 = vrot.slane %v618_v21, %v8715_v59  ;;  %v1752_v41 = vrot.slane %v1738_v61, %v8708_v51 }
 0x1a4   :  { %v1753_v45 = vcombine.low %v1534_v12, %v1582_v36  ;;  %v1754_v42 = vcombine.high %v1534_v12, %v1582_v36  ;;  %v653_v52 = vcombine.low %v368_v53, %v416_v40  ;;  %v654_v9 = vcombine.high %v368_v53, %v416_v40 }
 0x1a5   :  { %v10744_v37 = vcombine.high %v8853_v47, %v8856_v11 }
 0x1a6   :  { %v1761_v4 = vrot.slane %v1753_v45, %v8708_v51  ;;  %v1768_v61 = vrot.slane %v1754_v42, %v8708_v51  ;;  %v661_v12 = vrot.slane %v653_v52, %v8708_v51  ;;  %v392_v6 = vpop.permute.xlu1 %391  ;;  %v1560_v14 = vpop.permute.xlu0 %1559  ;;  %v668_v45 = vrot.slane %v654_v9, %v8708_v51 }
 0x1a7   :  { %v637_v21 = vcombine.low %v8574_v13, %v392_v6  ;;  %v638_v36 = vcombine.high %v8574_v13, %v392_v6  ;;  %v1805_v26 = vcombine.low %v8589_v15, %v1560_v14  ;;  %v1806_v22 = vcombine.high %v8589_v15, %v1560_v14 }
 0x1a8   :  { %v1769_v53 = vcombine.low %v1745_v31, %v1761_v4  ;;  %v1770_v40 = vcombine.high %v1745_v31, %v1761_v4  ;;  %v1785_v56 = vcombine.low %v1752_v41, %v1768_v61  ;;  %v1786_v60 = vcombine.high %v1752_v41, %v1768_v61 }
 0x1a9   :  { %v645_v42 = vrot.slane %v637_v21, %v8708_v51  ;;  %v652_v52 = vrot.slane %v638_v36, %v8708_v51  ;;  %v8884_v55 = vrot.slane %v1805_v26, %v8708_v51 }
 0x1aa   :  { %v8887_v54 = vrot.slane %v1769_v53, %v8715_v59  ;;  %v8890_v13 = vrot.slane %v1770_v40, %v8715_v59  ;;  %v8893_v15 = vrot.slane %v1785_v56, %v8715_v59  ;;  %v8896_v31 = vrot.slane %v1786_v60, %v8715_v59  ;;  %v1536_v41 = vpop.permute.xlu1 %1535  ;;  %v394_v9 = vpop.permute.xlu0 %393 }
 0x1ab   :  { %v669_v4 = vcombine.low %v645_v42, %v661_v12  ;;  %v670_v61 = vcombine.high %v645_v42, %v661_v12  ;;  %v685_v6 = vcombine.low %v652_v52, %v668_v45  ;;  %v686_v14 = vcombine.high %v652_v52, %v668_v45 }
 0x1ac   :  { %v8905_v56 = vrot.slane %v1806_v22, %v8708_v51  ;;  %v8912_v45 = vrot.slane %v2213_v43, %v8708_v51  ;;  %v8915_v42 = vrot.slane %v7506_v24, %v8708_v51  ;;  %v8918_v52 = vrot.slane %v2229_v7, %v8708_v51 }
 0x1ad   :  { %v677_v60 = vrot.slane %v669_v4, %v8715_v59  ;;  %v684_v53 = vrot.slane %v670_v61, %v8715_v59  ;;  %v693_v12 = vrot.slane %v685_v6, %v8715_v59  ;;  %v700_v40 = vrot.slane %v686_v14, %v8715_v59 }
 0x1ae   :  { %v8921_v22 = vrot.slane %v7507_v28, %v8708_v51  ;;  %v1584_v36 = vpop.permute.xlu1 %1583  ;;  %v8923_v4 = vpop.permute.xlu0 %1537  ;;  %v2245_v43 = vcombine.low %v8912_v45, %v8915_v42  ;;  %v705_v14 = vcombine.low %v8592_v17, %v394_v9  ;;  %v706_v7 = vcombine.high %v8592_v17, %v394_v9 }
 0x1af   :  { %v1181_v61 = vcombine.low %v677_v60, %v684_v53  ;;  %v7494_v21 = vcombine.high %v677_v60, %v684_v53  ;;  %v1197_v6 = vcombine.low %v693_v12, %v700_v40  ;;  %v7495_v26 = vcombine.high %v693_v12, %v700_v40 }
 0x1b0   :  { %v2261_v24 = vcombine.low %v8918_v52, %v8921_v22  ;;  %v8946_v40 = vrot.slane %v2245_v43, %v8715_v59  ;;  %v8952_v9 = vrot.slane %v705_v14, %v8708_v51  ;;  %v8961_v43 = vrot.slane %v706_v7, %v8708_v51 }
 0x1b1   :  { %v8932_v28 = vrot.slane %v1181_v61, %v8708_v51  ;;  %v8935_v57 = vrot.slane %v7494_v21, %v8708_v51  ;;  %v8938_v60 = vrot.slane %v1197_v6, %v8708_v51  ;;  %v8941_v53 = vrot.slane %v7495_v26, %v8708_v51 }
 0x1b2   :  { %v8949_v17 = vrot.slane %v2261_v24, %v8715_v59  ;;  %v370_v21 = vpop.permute.xlu1 %369  ;;  %v1562_v61 = vpop.permute.xlu0 %1561  ;;  %v10741_v14 = vcombine.low %v8763_v18, %v8766_v20  ;;  %v2193_v6 = vcombine.low %v8783_v48, %v8805_v16  ;;  %v1821_v35 = vcombine.low %v1536_v41, %v1584_v36 }
 0x1b3   :  { %10737 = vst [vmem:[#allocation27_spill] sm:$0xff] %v8932_v28  ;;  %10738 = vst [vmem:[#allocation28_spill] sm:$0xff] %v8935_v57  ;;  %v1822_v12 = vcombine.high %v1536_v41, %v1584_v36  ;;  %v10742_v7 = vcombine.low %v8853_v47, %v8856_v11  ;;  %v10746_v41 = vcombine.low %v8859_v0, %v8862_v38 }
 0x1b4   :  { %10739 = vst [vmem:[#allocation29_spill] sm:$0xff] %v8938_v60  ;;  %10740 = vst [vmem:[#allocation30_spill] sm:$0xff] %v8941_v53  ;;  %v2277_v24 = vcombine.low %v8946_v40, %v8949_v17  ;;  %v8969_v39 = vrot.slane %v10741_v14, %v8715_v59  ;;  %v8985_v14 = vrot.slane %v10744_v37, %v8708_v51 }
 0x1b5   :  { %v8979_v46 = vrot.slane %v10742_v7, %v8708_v51  ;;  %v8989_v1 = vrot.slane %v2193_v6, %v8715_v59  ;;  %v1829_v26 = vrot.slane %v1821_v35, %v8708_v51  ;;  %v8996_v36 = vrot.slane %v10746_v41, %v8708_v51 }
 0x1b6   :  { %10745 = vst [vmem:[#allocation32_spill] sm:$0xff] %v8985_v14  ;;  %7909 = vmatprep.subr.msk.mxu1 %vm3857_vm0, %v2277_v24  ;;  %v10748_v7 = vcombine.high %v8859_v0, %v8862_v38  ;;  %v418_v37 = vpop.permute.xlu1 %417  ;;  %v1586_v11 = vpop.permute.xlu0 %1585  ;;  %v1836_v6 = vrot.slane %v1822_v12, %v8708_v51  ;;  %v1873_v63 = vcombine.low %v8603_v19, %v1562_v61 }
 0x1b7   :  { %10743 = vst [vmem:[#allocation31_spill] sm:$0xff] %v8979_v46  ;;  %10747 = vst [vmem:[#allocation33_spill] sm:$0xff] %v8996_v36  ;;  %7910 = vmatpush3.xpose.msk.msra.mxu1 %vm3857_vm0, %v2277_v24  ;;  %v1145_v35 = vcombine.low %v8979_v46, %v8985_v14  ;;  %v1874_v41 = vcombine.high %v8603_v19, %v1562_v61  ;;  %v2209_v62 = vcombine.low %v8969_v39, %v8989_v1 }
 0x1b8   :  { %v9002_v47 = vrot.slane %v10748_v7, %v8708_v51  ;;  %v1837_v0 = vcombine.low %v8884_v55, %v1829_v26  ;;  %v1838_v38 = vcombine.high %v8884_v55, %v1829_v26  ;;  %v1853_v24 = vcombine.low %v8905_v56, %v1836_v6 }
 0x1b9   :  { %v1854_v12 = vcombine.high %v8905_v56, %v1836_v6  ;;  %v1109_v46 = vcombine.low %v8818_v10, %v8821_v3  ;;  %v9021_v14 = vrot.slane %v1145_v35, %v8715_v59  ;;  %7911 = vmatprep.subr.msk.mxu1 %vm3857_vm0, %v2209_v62  ;;  %v1881_v26 = vrot.slane %v1873_v63, %v8708_v51 }
 0x1ba   :  { %10749 = vst [vmem:[#allocation34_spill] sm:$0xff] %v9002_v47  ;;  %v1161_v7 = vcombine.low %v8996_v36, %v9002_v47  ;;  %v1845_v19 = vrot.slane %v1837_v0, %v8715_v59  ;;  %v1852_v61 = vrot.slane %v1838_v38, %v8715_v59  ;;  %v372_v36 = vpop.permute.xlu1 %371  ;;  %v396_v47 = vpop.permute.xlu0 %395  ;;  %v1861_v56 = vrot.slane %v1853_v24, %v8715_v59 }
 0x1bb   :  { %v1868_v6 = vrot.slane %v1854_v12, %v8715_v59  ;;  %7912 = vmatpush3.xpose.msk.msra.mxu1 %vm3857_vm0, %v2209_v62  ;;  %v721_v35 = vcombine.low %v370_v21, %v418_v37  ;;  %v722_v5 = vcombine.high %v370_v21, %v418_v37  ;;  %v1888_v0 = vrot.slane %v1874_v41, %v8708_v51 }
 0x1bc   :  { %v9027_v55 = vrot.slane %v1161_v7, %v8715_v59  ;;  %v2349_v2 = vcombine.low %v1845_v19, %v1852_v61  ;;  %v7510_v48 = vcombine.high %v1845_v19, %v1852_v61  ;;  %v1889_v38 = vcombine.low %v8923_v4, %v1586_v11 }
 0x1bd   :  { %v2365_v7 = vcombine.low %v1861_v56, %v1868_v6  ;;  %v729_v16 = vrot.slane %v721_v35, %v8708_v51  ;;  %v736_v24 = vrot.slane %v722_v5, %v8708_v51  ;;  %v7511_v18 = vcombine.high %v1861_v56, %v1868_v6 }
 0x1be   :  { %v1177_v63 = vcombine.low %v9021_v14, %v9027_v55  ;;  %7914 = vmatmul.mubr.msk.f32.vlgmr.msra.gmra.mxu1 %vm3857_vm0, %v1109_v46  ;;  %v1890_v62 = vcombine.high %v8923_v4, %v1586_v11  ;;  %v1897_v21 = vrot.slane %v1889_v38, %v8708_v51  ;;  %v773_v37 = vcombine.low %v8614_v23, %v396_v47  ;;  %v420_v41 = vpop.permute.xlu1 %419  ;;  %v9043_v12 = vpop.permute.xlu0 %1539 }
 0x1bf   :  { %v737_v19 = vcombine.low %v8952_v9, %v729_v16  ;;  %v738_v61 = vcombine.high %v8952_v9, %v729_v16  ;;  %v753_v5 = vcombine.low %v8961_v43, %v736_v24  ;;  %v754_v56 = vcombine.high %v8961_v43, %v736_v24 }
 0x1c0   :  { %7920 = vmatprep.mubr.msk.f32.mxu1 %vm3857_vm0, %v1177_v63  ;;  %v1904_v46 = vrot.slane %v1890_v62, %v8708_v51  ;;  %v1905_v4 = vcombine.low %v1881_v26, %v1897_v21  ;;  %v1906_v11 = vcombine.high %v1881_v26, %v1897_v21  ;;  %v774_v6 = vcombine.high %v8614_v23, %v396_v47 }
 0x1c1   :  { %v9053_v35 = vrot.slane %v737_v19, %v8715_v59  ;;  %v9056_v38 = vrot.slane %v738_v61, %v8715_v59  ;;  %v9059_v63 = vrot.slane %v753_v5, %v8715_v59  ;;  %v9062_v16 = vrot.slane %v754_v56, %v8715_v59 }
 0x1c2   :  { %v9065_v9 = vrot.slane %v1905_v4, %v8715_v59  ;;  %v9068_v43 = vrot.slane %v1906_v11, %v8715_v59  ;;  %v1921_v26 = vcombine.low %v1888_v0, %v1904_v46  ;;  %v1922_v23 = vcombine.high %v1888_v0, %v1904_v46  ;;  %v1566_v47 = vpop.permute.xlu1 %1565  ;;  %v9070_v24 = vpop.permute.xlu0 %1563 }
 0x1c3   :  { %v781_v61 = vrot.slane %v773_v37, %v8708_v51  ;;  %v789_v11 = vcombine.low %v372_v36, %v420_v41  ;;  %v790_v21 = vcombine.high %v372_v36, %v420_v41  ;;  %v9092_v19 = vrot.slane %v2349_v2, %v8708_v51 }
 0x1c4   :  { %v9082_v56 = vrot.slane %v1921_v26, %v8715_v59  ;;  %v9085_v0 = vrot.slane %v1922_v23, %v8715_v59  ;;  %v788_v26 = vrot.slane %v774_v6, %v8708_v51  ;;  %v9098_v5 = vrot.slane %v7510_v48, %v8708_v51 }
 0x1c5   :  { %10750 = vst [vmem:[#allocation35_spill] sm:$0xff] %v9092_v19  ;;  %v9101_v23 = vrot.slane %v2365_v7, %v8708_v51  ;;  %v797_v4 = vrot.slane %v789_v11, %v8708_v51  ;;  %v804_v36 = vrot.slane %v790_v21, %v8708_v51  ;;  %v9108_v2 = vrot.slane %v7511_v18, %v8708_v51 }
 0x1c6   :  { %10751 = vst [vmem:[#allocation36_spill] sm:$0xff] %v9098_v5  ;;  %v9103_v46 = vpop.permute.xlu1 %1543  ;;  %v1588_v62 = vpop.permute.xlu0 %1587  ;;  %v2009_v41 = vcombine.low %v8632_v27, %v1566_v47  ;;  %v2381_v48 = vcombine.low %v9092_v19, %v9098_v5  ;;  %v2010_v7 = vcombine.high %v8632_v27, %v1566_v47  ;;  %v1941_v37 = vcombine.low %v8625_v25, %v9070_v24 }
 0x1c7   :  { %10752 = vst [vmem:[#allocation37_spill] sm:$0xff] %v9101_v23  ;;  %10753 = vst [vmem:[#allocation38_spill] sm:$0xff] %v9108_v2  ;;  %v805_v20 = vcombine.low %v781_v61, %v797_v4  ;;  %v806_v11 = vcombine.high %v781_v61, %v797_v4  ;;  %v821_v58 = vcombine.low %v788_v26, %v804_v36 }
 0x1c8   :  { %v822_v21 = vcombine.high %v788_v26, %v804_v36  ;;  %v9119_v18 = vrot.slane %v2381_v48, %v8715_v59  ;;  %v2397_v8 = vcombine.low %v9101_v23, %v9108_v2  ;;  %v9124_v6 = vrot.slane %v2009_v41, %v8708_v51 }
 0x1c9   :  { %v1942_v19 = vcombine.high %v8625_v25, %v9070_v24  ;;  %v813_v47 = vrot.slane %v805_v20, %v8715_v59  ;;  %v820_v61 = vrot.slane %v806_v11, %v8715_v59  ;;  %v829_v4 = vrot.slane %v821_v58, %v8715_v59 }
 0x1ca   :  { %v9128_v27 = vpop.permute.xlu0 %373  ;;  %v836_v26 = vrot.slane %v822_v21, %v8715_v59  ;;  %v9135_v36 = vrot.slane %v2397_v8, %v8715_v59  ;;  %v9138_v48 = vrot.slane %v2010_v7, %v8708_v51  ;;  %v1949_v41 = vrot.slane %v1941_v37, %v8708_v51  ;;  %v9147_v20 = vpop.permute.xlu1 %1567 }
 0x1cb   :  { %v10754_v25 = vcombine.low %v8887_v54, %v8890_v13  ;;  %v1317_v11 = vcombine.low %v813_v47, %v820_v61  ;;  %v7498_v58 = vcombine.high %v813_v47, %v820_v61  ;;  %v10756_v7 = vcombine.high %v8887_v54, %v8890_v13 }
 0x1cc   :  { %v1333_v23 = vcombine.low %v829_v4, %v836_v26  ;;  %v7499_v21 = vcombine.high %v829_v4, %v836_v26  ;;  %v2413_v8 = vcombine.low %v9119_v18, %v9135_v36  ;;  %v10760_v47 = vcombine.high %v8893_v15, %v8896_v31 }
 0x1cd   :  { %v9145_v24 = vrot.slane %v10754_v25, %v8708_v51  ;;  %v9155_v37 = vrot.slane %v10756_v7, %v8708_v51  ;;  %v10758_v25 = vcombine.low %v8893_v15, %v8896_v31  ;;  %v9170_v4 = vrot.slane %v1317_v11, %v8708_v51 }
 0x1ce   :  { %v9167_v61 = vrot.slane %v10760_v47, %v8708_v51  ;;  %v9173_v26 = vrot.slane %v7498_v58, %v8708_v51  ;;  %v9176_v54 = vrot.slane %v1333_v23, %v8708_v51  ;;  %v9179_v13 = vrot.slane %v7499_v21, %v8708_v51  ;;  %7916 = vmatprep.subr.msk.mxu1 %vm3857_vm0, %v2413_v8  ;;  %v9188_v58 = vpop.permute.xlu0 %1541 }
 0x1cf   :  { %10755 = vst [vmem:[#allocation39_spill] sm:$0xff] %v9145_v24  ;;  %10757 = vst [vmem:[#allocation40_spill] sm:$0xff] %v9155_v37  ;;  %v9161_v2 = vrot.slane %v10758_v25, %v8708_v51  ;;  %v2313_v7 = vcombine.low %v9145_v24, %v9155_v37  ;;  %v1957_v31 = vcombine.low %v9043_v12, %v1588_v62  ;;  %7917 = vmatpush3.xpose.msk.msra.mxu1 %vm3857_vm0, %v2413_v8  ;;  %v1592_v24 = vpop.permute.xlu1 %1591 }
 0x1d0   :  { %10761 = vst [vmem:[#allocation42_spill] sm:$0xff] %v9167_v61  ;;  %10762 = vst [vmem:[#allocation43_spill] sm:$0xff] %v9170_v4  ;;  %v1958_v11 = vcombine.high %v9043_v12, %v1588_v62  ;;  %v1349_v23 = vcombine.low %v9170_v4, %v9173_v26  ;;  %v1365_v25 = vcombine.low %v9176_v54, %v9179_v13 }
 0x1d1   :  { %10759 = vst [vmem:[#allocation41_spill] sm:$0xff] %v9161_v2  ;;  %10763 = vst [vmem:[#allocation44_spill] sm:$0xff] %v9173_v26  ;;  %v2329_v15 = vcombine.low %v9161_v2, %v9167_v61  ;;  %v1956_v47 = vrot.slane %v1942_v19, %v8708_v51  ;;  %v9199_v2 = vrot.slane %v2313_v7, %v8715_v59 }
 0x1d2   :  { %10764 = vst [vmem:[#allocation45_spill] sm:$0xff] %v9176_v54  ;;  %10765 = vst [vmem:[#allocation46_spill] sm:$0xff] %v9179_v13  ;;  %v1965_v62 = vrot.slane %v1957_v31, %v8708_v51  ;;  %v1972_v61 = vrot.slane %v1958_v11, %v8708_v51  ;;  %v9207_v21 = vrot.slane %v1349_v23, %v8715_v59 }
 0x1d3   :  { %v9202_v12 = vrot.slane %v2329_v15, %v8715_v59  ;;  %v10766_v19 = vcombine.low %v8932_v28, %v8935_v57  ;;  %v10768_v7 = vcombine.low %v8938_v60, %v8941_v53  ;;  %v9226_v26 = vrot.slane %v1365_v25, %v8715_v59 }
 0x1d4   :  { %v1973_v11 = vcombine.low %v1949_v41, %v1965_v62  ;;  %v1974_v23 = vcombine.high %v1949_v41, %v1965_v62  ;;  %v1989_v4 = vcombine.low %v1956_v47, %v1972_v61  ;;  %v1990_v13 = vcombine.high %v1956_v47, %v1972_v61 }
 0x1d5   :  { %v9215_v8 = vrot.slane %v10766_v19, %v8715_v59  ;;  %v9221_v15 = vrot.slane %v10768_v7, %v8715_v59  ;;  %v2345_v31 = vcombine.low %v9199_v2, %v9202_v12  ;;  %v10769_v19 = vcombine.low %v9053_v35, %v9056_v38 }
 0x1d6   :  { %v10771_v7 = vcombine.high %v9053_v35, %v9056_v38  ;;  %v9242_v41 = vrot.slane %v1973_v11, %v8715_v59  ;;  %v9245_v25 = vrot.slane %v1974_v23, %v8715_v59  ;;  %v9248_v61 = vrot.slane %v1989_v4, %v8715_v59  ;;  %v1590_v35 = vpop.permute.xlu0 %1589 }
 0x1d7   :  { %10767 = vst [vmem:[#allocation47_spill] sm:$0xff] %v9215_v8  ;;  %v9232_v57 = vrot.slane %v10769_v19, %v8708_v51  ;;  %7918 = vmatprep.subr.msk.mxu1 %vm3857_vm0, %v2345_v31  ;;  %v10773_v47 = vcombine.low %v9059_v63, %v9062_v16  ;;  %v9258_v38 = vrot.slane %v1990_v13, %v8715_v59 }
 0x1d8   :  { %v9238_v53 = vrot.slane %v10771_v7, %v8708_v51  ;;  %7919 = vmatpush3.xpose.msk.msra.mxu1 %vm3857_vm0, %v2345_v31  ;;  %v10775_v11 = vcombine.high %v9059_v63, %v9062_v16  ;;  %v2077_v19 = vcombine.low %v8639_v29, %v9147_v20  ;;  %v1245_v31 = vcombine.low %v9215_v8, %v9221_v15  ;;  %v398_v63 = vpop.permute.xlu1 %397 }
 0x1d9   :  { %10770 = vst [vmem:[#allocation48_spill] sm:$0xff] %v9232_v57  ;;  %v9254_v62 = vrot.slane %v10773_v47, %v8708_v51  ;;  %v2078_v13 = vcombine.high %v8639_v29, %v9147_v20  ;;  %v2093_v47 = vcombine.low %v9103_v46, %v1592_v24  ;;  %v2094_v20 = vcombine.high %v9103_v46, %v1592_v24 }
 0x1da   :  { %10772 = vst [vmem:[#allocation49_spill] sm:$0xff] %v9238_v53  ;;  %v9264_v23 = vrot.slane %v10775_v11, %v8708_v51  ;;  %v1281_v4 = vcombine.low %v9232_v57, %v9238_v53  ;;  %v2085_v29 = vrot.slane %v2077_v19, %v8708_v51  ;;  %v841_v11 = vcombine.low %v8646_v30, %v398_v63  ;;  %v422_v19 = vpop.permute.xlu0 %421 }
 0x1db   :  { %10774 = vst [vmem:[#allocation50_spill] sm:$0xff] %v9254_v62  ;;  %7921 = vmatmul.mubr.msk.f32.vlgmr.msra.gmra.mxu1 %vm3857_vm0, %v1245_v31  ;;  %v2101_v16 = vrot.slane %v2093_v47, %v8708_v51  ;;  %v2025_v37 = vcombine.low %v9188_v58, %v1590_v35  ;;  %v2026_v31 = vcombine.high %v9188_v58, %v1590_v35 }
 0x1dc   :  { %10776 = vst [vmem:[#allocation51_spill] sm:$0xff] %v9264_v23  ;;  %v9282_v60 = vrot.slane %v1281_v4, %v8715_v59  ;;  %v1297_v7 = vcombine.low %v9254_v62, %v9264_v23  ;;  %v2092_v4 = vrot.slane %v2078_v13, %v8708_v51  ;;  %v2108_v62 = vrot.slane %v2094_v20, %v8708_v51 }
 0x1dd   :  { %v2109_v28 = vcombine.low %v2085_v29, %v2101_v16  ;;  %v2110_v23 = vcombine.high %v2085_v29, %v2101_v16  ;;  %v842_v24 = vcombine.high %v8646_v30, %v398_v63  ;;  %v2033_v13 = vrot.slane %v2025_v37, %v8708_v51  ;;  %v376_v29 = vpop.permute.xlu1 %375 }
 0x1de   :  { %v9293_v54 = vrot.slane %v1297_v7, %v8715_v59  ;;  %v849_v7 = vrot.slane %v841_v11, %v8708_v51  ;;  %v2125_v53 = vcombine.low %v2092_v4, %v2108_v62  ;;  %v2126_v20 = vcombine.high %v2092_v4, %v2108_v62 }
 0x1df   :  { %v2117_v47 = vrot.slane %v2109_v28, %v8715_v59  ;;  %v2124_v57 = vrot.slane %v2110_v23, %v8715_v59  ;;  %v2040_v58 = vrot.slane %v2026_v31, %v8708_v51  ;;  %v2041_v35 = vcombine.low %v9124_v6, %v2033_v13 }
 0x1e0   :  { %v1313_v46 = vcombine.low %v9282_v60, %v9293_v54  ;;  %v2042_v16 = vcombine.high %v9124_v6, %v2033_v13  ;;  %v857_v30 = vcombine.low %v9128_v27, %v422_v19  ;;  %v2133_v63 = vrot.slane %v2125_v53, %v8715_v59 }
 0x1e1   :  { %v2140_v37 = vrot.slane %v2126_v20, %v8715_v59  ;;  %v2621_v11 = vcombine.low %v2117_v47, %v2124_v57  ;;  %v7518_v28 = vcombine.high %v2117_v47, %v2124_v57  ;;  %v2049_v23 = vrot.slane %v2041_v35, %v8715_v59 }
 0x1e2   :  { %7927 = vmatprep.mubr.msk.f32.mxu0 %vm3857_vm0, %v1313_v46  ;;  %v2056_v62 = vrot.slane %v2042_v16, %v8715_v59  ;;  %v2057_v4 = vcombine.low %v9138_v48, %v2040_v58  ;;  %v2058_v31 = vcombine.high %v9138_v48, %v2040_v58  ;;  %v856_v53 = vrot.slane %v842_v24, %v8708_v51 }
 0x1e3   :  { %v9319_v46 = vrot.slane %v2621_v11, %v8708_v51  ;;  %v2637_v6 = vcombine.low %v2133_v63, %v2140_v37  ;;  %v7519_v13 = vcombine.high %v2133_v63, %v2140_v37  ;;  %v9325_v35 = vrot.slane %v7518_v28, %v8708_v51 }
 0x1e4   :  { %v2065_v20 = vrot.slane %v2057_v4, %v8715_v59  ;;  %v2072_v57 = vrot.slane %v2058_v31, %v8715_v59  ;;  %v2553_v47 = vcombine.low %v2049_v23, %v2056_v62  ;;  %v7516_v5 = vcombine.high %v2049_v23, %v2056_v62 }
 0x1e5   :  { %10777 = vst [vmem:[#allocation52_spill] sm:$0xff] %v9319_v46  ;;  %10778 = vst [vmem:[#allocation53_spill] sm:$0xff] %v9325_v35  ;;  %v9328_v16 = vrot.slane %v2637_v6, %v8708_v51  ;;  %v858_v48 = vcombine.high %v9128_v27, %v422_v19  ;;  %v865_v58 = vrot.slane %v857_v30, %v8708_v51  ;;  %v424_v30 = vpop.permute.xlu1 %423 }
 0x1e6   :  { %v9333_v63 = vrot.slane %v7519_v13, %v8708_v51  ;;  %v9336_v24 = vrot.slane %v2553_v47, %v8708_v51  ;;  %v9339_v37 = vrot.slane %v7516_v5, %v8708_v51  ;;  %v2569_v11 = vcombine.low %v2065_v20, %v2072_v57 }
 0x1e7   :  { %10779 = vst [vmem:[#allocation54_spill] sm:$0xff] %v9328_v16  ;;  %v872_v28 = vrot.slane %v858_v48, %v8708_v51  ;;  %v873_v23 = vcombine.low %v849_v7, %v865_v58  ;;  %v874_v62 = vcombine.high %v849_v7, %v865_v58  ;;  %v10781_v27 = vcombine.low %v9242_v41, %v9245_v25 }
 0x1e8   :  { %10780 = vst [vmem:[#allocation55_spill] sm:$0xff] %v9333_v63  ;;  %v9349_v4 = vrot.slane %v2569_v11, %v8708_v51  ;;  %v7517_v31 = vcombine.high %v2065_v20, %v2072_v57  ;;  %v10782_v5 = vcombine.high %v9242_v41, %v9245_v25  ;;  %v10783_v7 = vcombine.low %v9248_v61, %v9258_v38 }
 0x1e9   :  { %v9346_v19 = vrot.slane %v10781_v27, %v8708_v51  ;;  %v881_v47 = vrot.slane %v873_v23, %v8715_v59  ;;  %v888_v48 = vrot.slane %v874_v62, %v8715_v59  ;;  %v889_v58 = vcombine.low %v856_v53, %v872_v28  ;;  %v400_v62 = vpop.permute.xlu0 %399 }
 0x1ea   :  { %v9355_v6 = vrot.slane %v10782_v5, %v8708_v51  ;;  %v9361_v13 = vrot.slane %v10783_v7, %v8708_v51  ;;  %v890_v11 = vcombine.high %v856_v53, %v872_v28  ;;  %v10785_v20 = vcombine.high %v9248_v61, %v9258_v38 }
 0x1eb   :  { %v925_v25 = vcombine.low %v376_v29, %v424_v30  ;;  %v926_v27 = vcombine.high %v376_v29, %v424_v30  ;;  %v897_v5 = vrot.slane %v889_v58, %v8715_v59  ;;  %v1385_v23 = vcombine.low %v881_v47, %v888_v48 }
 0x1ec   :  { %10784 = vst [vmem:[#allocation56_spill] sm:$0xff] %v9361_v13  ;;  %v9369_v57 = vrot.slane %v10785_v20, %v8708_v51  ;;  %v2517_v41 = vcombine.low %v9346_v19, %v9355_v6  ;;  %v904_v7 = vrot.slane %v890_v11, %v8715_v59  ;;  %v7500_v8 = vcombine.high %v881_v47, %v888_v48 }
 0x1ed   :  { %v9376_v53 = vrot.slane %v7517_v31, %v8708_v51  ;;  %v933_v38 = vrot.slane %v925_v25, %v8708_v51  ;;  %v9385_v29 = vrot.slane %v1385_v23, %v8708_v51  ;;  %v940_v11 = vrot.slane %v926_v27, %v8708_v51 }
 0x1ee   :  { %v9379_v28 = vrot.slane %v2517_v41, %v8715_v59  ;;  %v2533_v61 = vcombine.low %v9361_v13, %v9369_v57  ;;  %v1401_v30 = vcombine.low %v897_v5, %v904_v7  ;;  %v7501_v58 = vcombine.high %v897_v5, %v904_v7 }
 0x1ef   :  { %v909_v31 = vcombine.low %v8662_v32, %v400_v62  ;;  %v910_v48 = vcombine.high %v8662_v32, %v400_v62  ;;  %v10786_v20 = vcombine.low %v9065_v9, %v9068_v43  ;;  %v9400_v25 = vrot.slane %v7500_v8, %v8708_v51 }
 0x1f0   :  { %v9389_v47 = vrot.slane %v2533_v61, %v8715_v59  ;;  %v9403_v5 = vrot.slane %v1401_v30, %v8708_v51  ;;  %v10787_v27 = vcombine.high %v9065_v9, %v9068_v43  ;;  %v10788_v32 = vcombine.low %v9082_v56, %v9085_v0 }
 0x1f1   :  { %v9397_v41 = vrot.slane %v10786_v20, %v8708_v51  ;;  %v917_v8 = vrot.slane %v909_v31, %v8708_v51  ;;  %v924_v61 = vrot.slane %v910_v48, %v8708_v51  ;;  %v10789_v30 = vcombine.high %v9082_v56, %v9085_v0 }
 0x1f2   :  { %v9409_v7 = vrot.slane %v10787_v27, %v8708_v51  ;;  %v9415_v23 = vrot.slane %v10788_v32, %v8708_v51  ;;  %v2549_v62 = vcombine.low %v9379_v28, %v9389_v47  ;;  %v9428_v43 = vrot.slane %v7501_v58, %v8708_v51 }
 0x1f3   :  { %v9425_v9 = vrot.slane %v10789_v30, %v8708_v51  ;;  %v2278_v27 = vcombine.high %v8946_v40, %v8949_v17  ;;  %v2653_v31 = vcombine.low %v9319_v46, %v9325_v35  ;;  %v941_v48 = vcombine.low %v917_v8, %v933_v38 }
 0x1f4   :  { %v2449_v20 = vcombine.low %v9397_v41, %v9409_v7  ;;  %7923 = vmatprep.subr.msk.mxu0 %vm3857_vm0, %v2549_v62  ;;  %v942_v32 = vcombine.high %v917_v8, %v933_v38  ;;  %v957_v13 = vcombine.low %v924_v61, %v940_v11  ;;  %v958_v56 = vcombine.high %v924_v61, %v940_v11 }
 0x1f5   :  { %7924 = vmatpush3.xpose.msk.msra.mxu0 %vm3857_vm0, %v2549_v62  ;;  %v2465_v58 = vcombine.low %v9415_v23, %v9425_v9  ;;  %v9442_v30 = vrot.slane %v2653_v31, %v8715_v59  ;;  %v2669_v40 = vcombine.low %v9328_v16, %v9333_v63  ;;  %v949_v17 = vrot.slane %v941_v48, %v8715_v59 }
 0x1f6   :  { %v2457_v0 = vrot.slane %v2449_v20, %v8715_v59  ;;  %v956_v46 = vrot.slane %v942_v32, %v8715_v59  ;;  %v965_v38 = vrot.slane %v957_v13, %v8715_v59  ;;  %v972_v11 = vrot.slane %v958_v56, %v8715_v59 }
 0x1f7   :  { %v2473_v62 = vrot.slane %v2465_v58, %v8715_v59  ;;  %v1381_v8 = vcombine.low %v9207_v21, %v9226_v26  ;;  %v9454_v61 = vrot.slane %v2669_v40, %v8715_v59  ;;  %v2210_v20 = vcombine.high %v8969_v39, %v8989_v1 }
 0x1f8   :  { %v1453_v31 = vcombine.low %v949_v17, %v956_v46  ;;  %v7502_v16 = vcombine.high %v949_v17, %v956_v46  ;;  %v1469_v48 = vcombine.low %v965_v38, %v972_v11  ;;  %v7503_v63 = vcombine.high %v965_v38, %v972_v11 }
 0x1f9   :  { %v2481_v32 = vcombine.low %v2457_v0, %v2473_v62  ;;  %v2685_v13 = vcombine.low %v9442_v30, %v9454_v61  ;;  %v2585_v56 = vcombine.low %v9336_v24, %v9339_v37  ;;  %v2601_v58 = vcombine.low %v9349_v4, %v9376_v53 }
 0x1fa   :  { %v9465_v40 = vrot.slane %v1453_v31, %v8708_v51  ;;  %v9468_v35 = vrot.slane %v7502_v16, %v8708_v51  ;;  %v9471_v39 = vrot.slane %v1469_v48, %v8708_v51  ;;  %v9474_v1 = vrot.slane %v7503_v63, %v8708_v51 }
 0x1fb   :  { %7925 = vmatprep.subr.msk.mxu0 %vm3857_vm0, %v2481_v32  ;;  %7930 = vmatprep.subr.msk.mxu1 %vm3857_vm0, %v2685_v13  ;;  %v1042_v46 = vcombine.high %v8769_v34, %v8780_v44  ;;  %v9481_v17 = vrot.slane %v2585_v56, %v8715_v59  ;;  %v9484_v38 = vrot.slane %v2601_v58, %v8715_v59  ;;  %v334_v56 = vpop.f32.mrf.mxu1  ;;  %v9503_v58 = vpop.permute.xlu1 %2699 }
 0x1fc   :  { %v1485_v16 = vcombine.low %v9465_v40, %v9468_v35  ;;  %v1501_v11 = vcombine.low %v9471_v39, %v9474_v1  ;;  %7926 = vmatpush3.xpose.msk.msra.mxu0 %vm3857_vm0, %v2481_v32  ;;  %v2414_v34 = vcombine.high %v9119_v18, %v9135_v36  ;;  %7931 = vmatpush3.xpose.msk.msra.mxu1 %vm3857_vm0, %v2685_v13 }
 0x1fd   :  { %7937 = vmatprep.subr.msk.mxu0 %vm3857_vm0, %v2278_v27  ;;  %v2617_v31 = vcombine.low %v9481_v17, %v9484_v38  ;;  %v1417_v48 = vcombine.low %v9385_v29, %v9400_v25  ;;  %v2550_v32 = vcombine.high %v9379_v28, %v9389_v47  ;;  %v1433_v18 = vcombine.low %v9403_v5, %v9428_v43 }
 0x1fe   :  { %v1110_v36 = vcombine.high %v8818_v10, %v8821_v3  ;;  %v1314_v13 = vcombine.high %v9282_v60, %v9293_v54  ;;  %v9519_v63 = vrot.slane %v1485_v16, %v8715_v59  ;;  %v9522_v28 = vrot.slane %v1501_v11, %v8715_v59 }
 0x1ff   :  { %7928 = vmatmul.mubr.msk.f32.vlgmr.msra.gmra.mxu0 %vm3857_vm0, %v1381_v8  ;;  %7932 = vmatprep.subr.msk.mxu1 %vm3857_vm0, %v2617_v31  ;;  %v9516_v44 = vrot.slane %v1417_v48, %v8715_v59  ;;  %v9527_v10 = vrot.slane %v1433_v18, %v8715_v59  ;;  %v2482_v3 = vcombine.high %v2457_v0, %v2473_v62  ;;  %v9558_v11 = vpop.permute.xlu1 %2747  ;;  %v10796_v18 = vld [vmem:[#allocation47_spill] sm:$0xff] }
 0x200   :  { %7938 = vmatpush3.xpose.msk.msra.mxu0 %vm3857_vm0, %v2278_v27  ;;  %7941 = vmatprep.mubr.msk.f32.mxu0 %vm3857_vm0, %v1042_v46  ;;  %v9530_v60 = vadd.f32 %v334_v56, %v8669_v33  ;;  %v1517_v54 = vcombine.low %v9519_v63, %v9522_v28  ;;  %v2346_v47 = vcombine.high %v9199_v2, %v9202_v12  ;;  %v10790_v2 = vld [vmem:[#allocation18_spill] sm:$0xff]  ;;  %v10791_v12 = vld [vmem:[#allocation17_spill] sm:$0xff] }
 0x201   :  { %7939 = vmatprep.subr.msk.mxu0 %vm3857_vm0, %v2210_v20  ;;  %7933 = vmatpush3.xpose.msk.msra.mxu1 %vm3857_vm0, %v2617_v31  ;;  %v2246_v27 = vcombine.high %v8912_v45, %v8915_v42  ;;  %v1449_v0 = vcombine.low %v9516_v44, %v9527_v10  ;;  %v1178_v62 = vcombine.high %v9021_v14, %v9027_v55  ;;  %v10793_v14 = vld [vmem:[#allocation19_spill] sm:$0xff]  ;;  %v10794_v31 = vld [vmem:[#allocation26_spill] sm:$0xff] }
 0x202   :  { %7944 = vmatprep.subr.msk.mxu1 %vm3857_vm0, %v2414_v34  ;;  %v2262_v8 = vcombine.high %v8918_v52, %v8921_v22  ;;  %2705 = vrot.lane.b32.xlu1 %v9530_v60, %s8450_s12  ;;  %v1382_v45 = vcombine.high %v9207_v21, %v9226_v26  ;;  %v1010_v42 = vcombine.high %v8741_v49, %v8744_v50  ;;  %v10792_v22 = vld [vmem:[#allocation20_spill] sm:$0xff]  ;;  %v10795_v26 = vld [vmem:[#allocation21_spill] sm:$0xff] }
 0x203   :  { %v9550_v46 = vrot.slane %v2246_v27, %v8715_v59  ;;  %v1026_v16 = vcombine.high %v10791_v12, %v10790_v2  ;;  %7934 = vmatprep.mubr.msk.f32.mxu1 %vm3857_vm0, %v1449_v0  ;;  %v2178_v55 = vcombine.high %v10793_v14, %v10792_v22  ;;  %v2194_v21 = vcombine.high %v10795_v26, %v10794_v31  ;;  %v10797_v27 = vld [vmem:[#allocation56_spill] sm:$0xff]  ;;  %v9622_v2 = vpop.permute.xlu1 %2721  ;;  %v10807_v22 = vld [vmem:[#allocation38_spill] sm:$0xff]  ;;  %v10808_v14 = vld [vmem:[#allocation37_spill] sm:$0xff] }
 0x204   :  { %7940 = vmatpush3.xpose.msk.msra.mxu0 %vm3857_vm0, %v2210_v20  ;;  %v9563_v52 = vrot.slane %v2262_v8, %v8715_v59  ;;  %7935 = vmatmul.mubr.msk.f32.vlgmr.msra.gmra.mxu1 %vm3857_vm0, %v1517_v54  ;;  %v2686_v49 = vcombine.high %v9442_v30, %v9454_v61  ;;  %v9574_v50 = vrot.slane %v1010_v42, %v8715_v59  ;;  %v10809_v31 = vld [vmem:[#allocation49_spill] sm:$0xff]  ;;  %v10810_v26 = vld [vmem:[#allocation48_spill] sm:$0xff] }
 0x205   :  { %7951 = vmatprep.subr.msk.mxu0 %vm3857_vm0, %v2550_v32  ;;  %v9577_v20 = vrot.slane %v1026_v16, %v8715_v59  ;;  %7945 = vmatpush3.xpose.msk.msra.mxu1 %vm3857_vm0, %v2414_v34  ;;  %v9584_v56 = vrot.slane %v2178_v55, %v8715_v59  ;;  %v1246_v54 = vcombine.high %v10796_v18, %v9221_v15 }
 0x206   :  { %7948 = vmatprep.mubr.msk.f32.mxu1 %vm3857_vm0, %v1178_v62  ;;  %v2279_v48 = vcombine.low %v9550_v46, %v9563_v52  ;;  %7946 = vmatprep.subr.msk.mxu1 %vm3857_vm0, %v2346_v47  ;;  %v9593_v61 = vrot.slane %v2194_v21, %v8715_v59  ;;  %v1450_v34 = vcombine.high %v9516_v44, %v9527_v10  ;;  %v10798_v62 = vld [vmem:[#allocation16_spill] sm:$0xff]  ;;  %v10799_v44 = vld [vmem:[#allocation22_spill] sm:$0xff]  ;;  %v10800_v10 = vld [vmem:[#allocation23_spill] sm:$0xff] }
 0x207   :  { %7942 = vmatmul.mubr.msk.f32.vlgmr.msra.gmra.mxu0 %vm3857_vm0, %v1110_v36  ;;  %v1043_v30 = vcombine.low %v9574_v50, %v9577_v20  ;;  %v2618_v15 = vcombine.high %v9481_v17, %v9484_v38  ;;  %v2518_v36 = vcombine.high %v9346_v19, %v9355_v6  ;;  %v2534_v0 = vcombine.high %v10797_v27, %v9369_v57  ;;  %v10803_v17 = vld [vmem:[#allocation25_spill] sm:$0xff]  ;;  %v10805_v19 = vld [vmem:[#allocation36_spill] sm:$0xff]  ;;  %v10806_v6 = vld [vmem:[#allocation35_spill] sm:$0xff] }
 0x208   :  { %7952 = vmatpush3.xpose.msk.msra.mxu0 %vm3857_vm0, %v2550_v32  ;;  %7955 = vmatprep.mubr.msk.f32.mxu0 %vm3857_vm0, %v1314_v13  ;;  %v10801_v32 = vcombine.high %v10799_v44, %v10800_v10  ;;  %v10802_v13 = vld [vmem:[#allocation24_spill] sm:$0xff]  ;;  %v2382_v57 = vcombine.high %v10806_v6, %v10805_v19  ;;  %v2398_v55 = vcombine.high %v10808_v14, %v10807_v22  ;;  %v10818_v14 = vld [vmem:[#allocation39_spill] sm:$0xff] }
 0x209   :  { %7953 = vmatprep.subr.msk.mxu0 %vm3857_vm0, %v2482_v3  ;;  %2725 = vrot.lane.b32.xlu1 %v10798_v62, %s8449_s11  ;;  %v10804_v38 = vcombine.high %v10802_v13, %v10803_v17  ;;  %v9626_v12 = vrot.slane %v2518_v36, %v8715_v59  ;;  %v9629_v16 = vrot.slane %v2534_v0, %v8715_v59  ;;  %v10812_v36 = vld [vmem:[#allocation50_spill] sm:$0xff] }
 0x20a   :  { %v9612_v8 = vrot.slane %v10801_v32, %v8715_v59  ;;  %7947 = vmatpush3.xpose.msk.msra.mxu1 %vm3857_vm0, %v2346_v47  ;;  %v1282_v21 = vcombine.high %v10810_v26, %v10809_v31  ;;  %v9639_v27 = vrot.slane %v2382_v57, %v8715_v59  ;;  %v10811_v47 = vld [vmem:[#allocation51_spill] sm:$0xff]  ;;  %v2450_v0 = vcombine.high %v9397_v41, %v9409_v7  ;;  %v10815_v57 = vld [vmem:[#allocation34_spill] sm:$0xff]  ;;  %v9683_v31 = vpop.permute.xlu1 %2745 }
 0x20b   :  { %v9618_v42 = vrot.slane %v10804_v38, %v8715_v59  ;;  %7958 = vmatprep.subr.msk.mxu1 %vm3857_vm0, %v2686_v49  ;;  %v1298_v44 = vcombine.high %v10812_v36, %v10811_v47  ;;  %v2211_v10 = vcombine.low %v9584_v56, %v9593_v61  ;;  %v9649_v32 = vrot.slane %v2398_v55, %v8715_v59  ;;  %v10814_v38 = vld [vmem:[#allocation31_spill] sm:$0xff]  ;;  %v9703_v36 = vpop.permute.xlu0 %2723 }
 0x20c   :  { %7954 = vmatpush3.xpose.msk.msra.mxu0 %vm3857_vm0, %v2482_v3  ;;  %v9652_v13 = vrot.slane %v1282_v21, %v8715_v59  ;;  %v2466_v17 = vcombine.high %v9415_v23, %v9425_v9  ;;  %v2551_v41 = vcombine.low %v9626_v12, %v9629_v16  ;;  %v9664_v3 = vrot.slane %v2450_v0, %v8715_v59  ;;  %v10819_v21 = vld [vmem:[#allocation42_spill] sm:$0xff] }
 0x20d   :  { %v1111_v18 = vcombine.low %v9612_v8, %v9618_v42  ;;  %7965 = vmatprep.subr.msk.mxu0 %vm3857_vm0, %v2279_v48  ;;  %7949 = vmatmul.mubr.msk.f32.vlgmr.msra.gmra.mxu1 %vm3857_vm0, %v1246_v54  ;;  %v9661_v7 = vrot.slane %v1298_v44, %v8715_v59  ;;  %v2415_v23 = vcombine.low %v9639_v27, %v9649_v32  ;;  %v10813_v54 = vld [vmem:[#allocation32_spill] sm:$0xff] }
 0x20e   :  { %7959 = vmatpush3.xpose.msk.msra.mxu1 %vm3857_vm0, %v2686_v49  ;;  %7962 = vmatprep.mubr.msk.f32.mxu1 %vm3857_vm0, %v1450_v34  ;;  %v9671_v9 = vrot.slane %v2466_v17, %v8715_v59  ;;  %v1146_v19 = vcombine.high %v10814_v38, %v10813_v54  ;;  %v1518_v6 = vcombine.high %v9519_v63, %v9522_v28  ;;  %v10816_v49 = vld [vmem:[#allocation33_spill] sm:$0xff]  ;;  %v10817_v34 = vld [vmem:[#allocation40_spill] sm:$0xff]  ;;  %v10821_v17 = vld [vmem:[#allocation43_spill] sm:$0xff] }
 0x20f   :  { %7956 = vmatmul.mubr.msk.f32.vlgmr.msra.gmra.mxu0 %vm3857_vm0, %v1382_v45  ;;  %7960 = vmatprep.subr.msk.mxu1 %vm3857_vm0, %v2618_v15  ;;  %v1162_v22 = vcombine.high %v10816_v49, %v10815_v57  ;;  %v2314_v55 = vcombine.high %v10818_v14, %v10817_v34  ;;  %v1315_v45 = vcombine.low %v9652_v13, %v9661_v7  ;;  %v10820_v63 = vld [vmem:[#allocation41_spill] sm:$0xff]  ;;  %v10822_v54 = vld [vmem:[#allocation44_spill] sm:$0xff]  ;;  %v10827_v14 = vld [vmem:[#allocation46_spill] sm:$0xff] }
 0x210   :  { %7966 = vmatpush3.xpose.msk.msra.mxu0 %vm3857_vm0, %v2279_v48  ;;  %7969 = vmatprep.mubr.msk.f32.mxu0 %vm3857_vm0, %v1043_v30  ;;  %v9690_v26 = vrot.slane %v1146_v19, %v8715_v59  ;;  %v2330_v28 = vcombine.high %v10820_v63, %v10819_v21  ;;  %v2483_v47 = vcombine.low %v9664_v3, %v9671_v9  ;;  %v10824_v57 = vld [vmem:[#allocation53_spill] sm:$0xff]  ;;  %v10825_v49 = vld [vmem:[#allocation52_spill] sm:$0xff]  ;;  %v10830_v21 = vld [vmem:[#allocation54_spill] sm:$0xff] }
 0x211   :  { %7967 = vmatprep.subr.msk.mxu0 %vm3857_vm0, %v2211_v10  ;;  %2729 = vrot.lane.b32.xlu1 %v9530_v60, %s8449_s11  ;;  %v9700_v48 = vrot.slane %v1162_v22, %v8715_v59  ;;  %v2328_v30 = vrot.slane %v2314_v55, %v8715_v59  ;;  %v9709_v0 = vcombine.high %v9550_v46, %v9563_v52  ;;  %v10826_v34 = vld [vmem:[#allocation45_spill] sm:$0xff]  ;;  %v10829_v52 = vld [vmem:[#allocation55_spill] sm:$0xff] }
 0x212   :  { %7961 = vmatpush3.xpose.msk.msra.mxu1 %vm3857_vm0, %v2618_v15  ;;  %v2344_v44 = vrot.slane %v2330_v28, %v8715_v59  ;;  %v10823_v38 = vcombine.high %v10821_v17, %v10822_v54  ;;  %v2654_v22 = vcombine.high %v10825_v49, %v10824_v57  ;;  %v10828_v55 = vcombine.high %v10826_v34, %v10827_v14  ;;  %v10831_v57 = vld [vmem:[#allocation27_spill] sm:$0xff]  ;;  %v10832_v49 = vld [vmem:[#allocation28_spill] sm:$0xff] }
 0x213   :  { %7972 = vmatprep.subr.msk.mxu1 %vm3857_vm0, %v2415_v23  ;;  %v1179_v15 = vcombine.low %v9690_v26, %v9700_v48  ;;  %v2670_v63 = vcombine.high %v10830_v21, %v10829_v52  ;;  %v1044_v28 = vcombine.high %v9574_v50, %v9577_v20  ;;  %v10833_v34 = vcombine.high %v10831_v57, %v10832_v49  ;;  %v10835_v52 = vld [vmem:[#allocation30_spill] sm:$0xff] }
 0x214   :  { %v9715_v19 = vrot.slane %v10823_v38, %v8715_v59  ;;  %v9726_v46 = vrot.slane %v10828_v55, %v8715_v59  ;;  %7968 = vmatpush3.xpose.msk.msra.mxu0 %vm3857_vm0, %v2211_v10  ;;  %v2347_v17 = vcombine.low %v2328_v30, %v2344_v44  ;;  %v2668_v54 = vrot.slane %v2654_v22, %v8715_v59  ;;  %v10834_v10 = vld [vmem:[#allocation29_spill] sm:$0xff] }
 0x215   :  { %v9736_v38 = vcombine.high %v9584_v56, %v9593_v61  ;;  %v9742_v14 = vrot.slane %v10833_v34, %v8715_v59  ;;  %7979 = vmatprep.subr.msk.mxu0 %vm3857_vm0, %v2551_v41  ;;  %7963 = vmatmul.mubr.msk.f32.vlgmr.msra.gmra.mxu1 %vm3857_vm0, %v1518_v6  ;;  %v2684_v55 = vrot.slane %v2670_v63, %v8715_v59  ;;  %v9755_v61 = vpop.permute.xlu1 %2707 }
 0x216   :  { %v10836_v22 = vcombine.high %v10834_v10, %v10835_v52  ;;  %v1418_v56 = vcombine.high %v9385_v29, %v9400_v25  ;;  %2749 = vrot.lane.b32.xlu1 %v10798_v62, %s8451_s2  ;;  %7973 = vmatpush3.xpose.msk.msra.mxu1 %vm3857_vm0, %v2415_v23  ;;  %v1434_v6 = vcombine.high %v9403_v5, %v9428_v43  ;;  %v9775_v5 = vpop.permute.xlu0 %2697 }
 0x217   :  { %v2586_v63 = vcombine.high %v9336_v24, %v9339_v37  ;;  %v2602_v57 = vcombine.high %v9349_v4, %v9376_v53  ;;  %7970 = vmatmul.mubr.msk.f32.vlgmr.msra.gmra.mxu0 %vm3857_vm0, %v1111_v18  ;;  %7976 = vmatprep.mubr.msk.f32.mxu1 %vm3857_vm0, %v1179_v15  ;;  %v1383_v29 = vcombine.low %v9715_v19, %v9726_v46 }
 0x218   :  { %v9751_v21 = vrot.slane %v10836_v22, %v8715_v59  ;;  %v9773_v23 = vrot.slane %v1418_v56, %v8715_v59  ;;  %7980 = vmatpush3.xpose.msk.msra.mxu0 %vm3857_vm0, %v2551_v41  ;;  %7983 = vmatprep.mubr.msk.f32.mxu0 %vm3857_vm0, %v1315_v45  ;;  %v9780_v24 = vrot.slane %v1434_v6, %v8715_v59  ;;  %v10840_v56 = vld [vmem:[#allocation15_spill] sm:$0xff] }
 0x219   :  { %v2600_v37 = vrot.slane %v2586_v63, %v8715_v59  ;;  %v2616_v4 = vrot.slane %v2602_v57, %v8715_v59  ;;  %7981 = vmatprep.subr.msk.mxu0 %vm3857_vm0, %v2483_v47  ;;  %7974 = vmatprep.subr.msk.mxu1 %vm3857_vm0, %v2347_v17  ;;  %v2687_v53 = vcombine.low %v2668_v54, %v2684_v55  ;;  %v2732_v34 = vpop.permute.xlu1 %2731 }
 0x21a   :  { %v1247_v25 = vcombine.low %v9742_v14, %v9751_v21  ;;  %v1112_v43 = vcombine.high %v9612_v8, %v9618_v42  ;;  %v9790_v18 = vcombine.high %v9639_v27, %v9649_v32  ;;  %7975 = vmatpush3.xpose.msk.msra.mxu1 %vm3857_vm0, %v2347_v17  ;;  %2753 = vrot.lane.b32.xlu1 %v9530_v60, %s8451_s2 }
 0x21b   :  { %v1451_v41 = vcombine.low %v9773_v23, %v9780_v24  ;;  %v2619_v45 = vcombine.low %v2600_v37, %v2616_v4  ;;  %v9799_v15 = vcombine.high %v9626_v12, %v9629_v16  ;;  %7986 = vmatprep.subr.msk.mxu1 %vm3857_vm0, %v2687_v53  ;;  %v1316_v49 = vcombine.high %v9652_v13, %v9661_v7 }
 0x21c   :  { %v9806_v27 = vcombine.high %v9664_v3, %v9671_v9  ;;  %v10837_v32 = vcombine.high %v9465_v40, %v9468_v35  ;;  %v10838_v12 = vcombine.high %v9471_v39, %v9474_v1  ;;  %7982 = vmatpush3.xpose.msk.msra.mxu0 %vm3857_vm0, %v2483_v47  ;;  %v1180_v10 = vcombine.high %v9690_v26, %v9700_v48  ;;  %v7908_v40 = vpop.f32.mrf.mxu1  ;;  %v9838_v47 = vpop.permute.xlu0 %2703 }
 0x21d   :  { %v9823_v3 = vcombine.high %v2328_v30, %v2344_v44  ;;  %v1384_v9 = vcombine.high %v9715_v19, %v9726_v46  ;;  %v1248_v35 = vcombine.high %v9742_v14, %v9751_v21  ;;  %7993 = vmatprep.subr.msk.mxu0 %vm3857_vm0, %v9709_v0  ;;  %7977 = vmatmul.mubr.msk.f32.vlgmr.msra.gmra.mxu1 %vm3857_vm0, %v1247_v25  ;;  %v2756_v20 = vpop.permute.xlu1 %2755 }
 0x21e   :  { %v9812_v17 = vrot.slane %v10837_v32, %v8715_v59  ;;  %v9818_v16 = vrot.slane %v10838_v12, %v8715_v59  ;;  %v9834_v1 = vcombine.high %v2668_v54, %v2684_v55  ;;  %v1452_v26 = vcombine.high %v9773_v23, %v9780_v24  ;;  %7987 = vmatpush3.xpose.msk.msra.mxu1 %vm3857_vm0, %v2687_v53  ;;  %v10839_v54 = vld [vmem:[#allocation13_spill] sm:$0xff] }
 0x21f   :  { %7990 = vmatprep.mubr.msk.f32.mxu1 %vm3857_vm0, %v1451_v41  ;;  %v9842_v48 = vcombine.high %v2600_v37, %v2616_v4  ;;  %v2853_v30 = vcombine.low %v9503_v58, %v9558_v11  ;;  %v2854_v44 = vcombine.high %v9503_v58, %v9558_v11  ;;  %7984 = vmatmul.mubr.msk.f32.vlgmr.msra.gmra.mxu0 %vm3857_vm0, %v1383_v29  ;;  %v10841_v29 = vld [vmem:[#allocation12_spill] sm:$0xff] }
 0x220   :  { %v1519_v39 = vcombine.low %v9812_v17, %v9818_v16  ;;  %7988 = vmatprep.subr.msk.mxu1 %vm3857_vm0, %v2619_v45  ;;  %v2769_v55 = vcombine.low %v10839_v54, %v9622_v2  ;;  %v2770_v52 = vcombine.high %v10839_v54, %v9622_v2  ;;  %v9855_v22 = vadd.f32 %v7908_v40, %v8669_v33 }
 0x221   :  { %7994 = vmatpush3.xpose.msk.msra.mxu0 %vm3857_vm0, %v9709_v0  ;;  %7997 = vmatprep.mubr.msk.f32.mxu0 %vm3857_vm0, %v1044_v28  ;;  %v2861_v58 = vrot.slane %v2853_v30, %v8708_v51  ;;  %v2868_v11 = vrot.slane %v2854_v44, %v8708_v51  ;;  %v3109_v6 = vcombine.low %v10840_v56, %v2732_v34 }
 0x222   :  { %7995 = vmatprep.subr.msk.mxu0 %vm3857_vm0, %v9736_v38  ;;  %v9869_v2 = vrot.slane %v2769_v55, %v8708_v51  ;;  %v9872_v63 = vrot.slane %v2770_v52, %v8708_v51  ;;  %2711 = vrot.lane.b32.xlu0 %v9855_v22, %s8450_s12  ;;  %v3110_v50 = vcombine.high %v10840_v56, %v2732_v34  ;;  %v10842_v34 = vld [vmem:[#allocation14_spill] sm:$0xff] }
 0x223   :  { %7989 = vmatpush3.xpose.msk.msra.mxu1 %vm3857_vm0, %v2619_v45  ;;  %v3117_v0 = vrot.slane %v3109_v6, %v8708_v51  ;;  %v3125_v28 = vcombine.low %v9755_v61, %v2756_v20  ;;  %v3126_v57 = vcombine.high %v9755_v61, %v2756_v20  ;;  %v2837_v25 = vcombine.low %v10841_v29, %v9703_v36  ;;  %v2728_v45 = vpop.permute.xlu0 %2727 }
 0x224   :  { %8000 = vmatprep.subr.msk.mxu1 %vm3857_vm0, %v9790_v18  ;;  %v3124_v37 = vrot.slane %v3110_v50, %v8708_v51  ;;  %v2838_v4 = vcombine.high %v10841_v29, %v9703_v36  ;;  %v2785_v53 = vcombine.low %v9775_v5, %v9683_v31  ;;  %v2786_v41 = vcombine.high %v9775_v5, %v9683_v31 }
 0x225   :  { %7996 = vmatpush3.xpose.msk.msra.mxu0 %vm3857_vm0, %v9736_v38  ;;  %v3133_v61 = vrot.slane %v3125_v28, %v8708_v51  ;;  %v3140_v32 = vrot.slane %v3126_v57, %v8708_v51  ;;  %v2845_v12 = vrot.slane %v2837_v25, %v8708_v51  ;;  %v2973_v40 = vcombine.low %v10842_v34, %v2728_v45 }
 0x226   :  { %8007 = vmatprep.subr.msk.mxu0 %vm3857_vm0, %v9799_v15  ;;  %7991 = vmatmul.mubr.msk.f32.vlgmr.msra.gmra.mxu1 %vm3857_vm0, %v1519_v39  ;;  %v2852_v36 = vrot.slane %v2838_v4, %v8708_v51  ;;  %v2793_v31 = vrot.slane %v2785_v53, %v8708_v51  ;;  %v2800_v5 = vrot.slane %v2786_v41, %v8708_v51 }
 0x227   :  { %8001 = vmatpush3.xpose.msk.msra.mxu1 %vm3857_vm0, %v9790_v18  ;;  %8004 = vmatprep.mubr.msk.f32.mxu1 %vm3857_vm0, %v1180_v10  ;;  %v3141_v38 = vcombine.low %v3117_v0, %v3133_v61  ;;  %v3142_v30 = vcombine.high %v3117_v0, %v3133_v61  ;;  %v3157_v44 = vcombine.low %v3124_v37, %v3140_v32  ;;  %v2752_v29 = vpop.permute.xlu0 %2751 }
 0x228   :  { %7998 = vmatmul.mubr.msk.f32.vlgmr.msra.gmra.mxu0 %vm3857_vm0, %v1112_v43  ;;  %8002 = vmatprep.subr.msk.mxu1 %vm3857_vm0, %v9823_v3  ;;  %v3158_v39 = vcombine.high %v3124_v37, %v3140_v32  ;;  %v2869_v54 = vcombine.low %v2845_v12, %v2861_v58  ;;  %v2870_v55 = vcombine.high %v2845_v12, %v2861_v58 }
 0x229   :  { %8008 = vmatpush3.xpose.msk.msra.mxu0 %vm3857_vm0, %v9799_v15  ;;  %8011 = vmatprep.mubr.msk.f32.mxu0 %vm3857_vm0, %v1316_v49  ;;  %v9920_v18 = vrot.slane %v3141_v38, %v8715_v59  ;;  %v9923_v8 = vrot.slane %v3142_v30, %v8715_v59  ;;  %v9926_v42 = vrot.slane %v3157_v44, %v8715_v59 }
 0x22a   :  { %8009 = vmatprep.subr.msk.mxu0 %vm3857_vm0, %v9806_v27  ;;  %v9931_v43 = vrot.slane %v3158_v39, %v8715_v59  ;;  %v2877_v15 = vrot.slane %v2869_v54, %v8715_v59  ;;  %v2884_v13 = vrot.slane %v2870_v55, %v8715_v59  ;;  %v2885_v7 = vcombine.low %v2852_v36, %v2868_v11 }
 0x22b   :  { %8003 = vmatpush3.xpose.msk.msra.mxu1 %vm3857_vm0, %v9823_v3  ;;  %v1520_v49 = vcombine.high %v9812_v17, %v9818_v16  ;;  %v3653_v10 = vcombine.low %v9920_v18, %v9923_v8  ;;  %v2886_v52 = vcombine.high %v2852_v36, %v2868_v11  ;;  %v2801_v58 = vcombine.low %v9869_v2, %v2793_v31 }
 0x22c   :  { %8014 = vmatprep.subr.msk.mxu1 %vm3857_vm0, %v9834_v1  ;;  %v7530_v56 = vcombine.high %v9920_v18, %v9923_v8  ;;  %v3669_v6 = vcombine.low %v9926_v42, %v9931_v43  ;;  %v2893_v3 = vrot.slane %v2885_v7, %v8715_v59  ;;  %v3381_v50 = vcombine.low %v2877_v15, %v2884_v13 }
 0x22d   :  { %8010 = vmatpush3.xpose.msk.msra.mxu0 %vm3857_vm0, %v9806_v27  ;;  %v2900_v17 = vrot.slane %v2886_v52, %v8715_v59  ;;  %v7522_v16 = vcombine.high %v2877_v15, %v2884_v13  ;;  %v2802_v11 = vcombine.high %v9869_v2, %v2793_v31  ;;  %v2809_v20 = vrot.slane %v2801_v58, %v8715_v59 }
 0x22e   :  { %8005 = vmatmul.mubr.msk.f32.vlgmr.msra.gmra.mxu1 %vm3857_vm0, %v1248_v35  ;;  %v2817_v0 = vcombine.low %v9872_v63, %v2800_v5  ;;  %v2818_v28 = vcombine.high %v9872_v63, %v2800_v5  ;;  %v2974_v57 = vcombine.high %v10842_v34, %v2728_v45  ;;  %v2981_v27 = vrot.slane %v2973_v40, %v8708_v51 }
 0x22f   :  { %8015 = vmatpush3.xpose.msk.msra.mxu1 %vm3857_vm0, %v9834_v1  ;;  %8018 = vmatprep.mubr.msk.f32.mxu1 %vm3857_vm0, %v1452_v26  ;;  %v3397_v14 = vcombine.low %v2893_v3, %v2900_v17  ;;  %v7523_v21 = vcombine.high %v2893_v3, %v2900_v17  ;;  %v2816_v35 = vrot.slane %v2802_v11, %v8715_v59 }
 0x230   :  { %8012 = vmatmul.mubr.msk.f32.vlgmr.msra.gmra.mxu0 %vm3857_vm0, %v1384_v9  ;;  %8016 = vmatprep.subr.msk.mxu1 %vm3857_vm0, %v9842_v48  ;;  %v2825_v2 = vrot.slane %v2817_v0, %v8715_v59  ;;  %v2832_v1 = vrot.slane %v2818_v28, %v8715_v59  ;;  %v2988_v23 = vrot.slane %v2974_v57, %v8708_v51 }
 0x231   :  { %v3313_v24 = vcombine.low %v2809_v20, %v2816_v35  ;;  %v7520_v26 = vcombine.high %v2809_v20, %v2816_v35  ;;  %v2989_v63 = vcombine.low %v9838_v47, %v2752_v29  ;;  %v2990_v25 = vcombine.high %v9838_v47, %v2752_v29 }
 0x232   :  { %v7531_v19 = vcombine.high %v9926_v42, %v9931_v43  ;;  %v3329_v46 = vcombine.low %v2825_v2, %v2832_v1  ;;  %v7521_v9 = vcombine.high %v2825_v2, %v2832_v1  ;;  %v9983_v37 = vrot.slane %v3381_v50, %v8708_v51 }
 0x233   :  { %8017 = vmatpush3.xpose.msk.msra.mxu1 %vm3857_vm0, %v9842_v48  ;;  %v2997_v4 = vrot.slane %v2989_v63, %v8708_v51  ;;  %v3004_v53 = vrot.slane %v2990_v25, %v8708_v51  ;;  %v3396_v41 = vrot.slane %v7522_v16, %v8708_v51  ;;  %v3404_v45 = vrot.slane %v3397_v14, %v8708_v51 }
 0x234   :  { %v3412_v47 = vrot.slane %v7523_v21, %v8708_v51  ;;  %v3320_v61 = vrot.slane %v3313_v24, %v8708_v51  ;;  %v3328_v32 = vrot.slane %v7520_v26, %v8708_v51  ;;  %v3336_v12 = vrot.slane %v3329_v46, %v8708_v51 }
 0x235   :  { %v3005_v34 = vcombine.low %v2981_v27, %v2997_v4  ;;  %v3006_v40 = vcombine.high %v2981_v27, %v2997_v4  ;;  %v3021_v36 = vcombine.low %v2988_v23, %v3004_v53  ;;  %v3022_v48 = vcombine.high %v2988_v23, %v3004_v53 }
 0x236   :  { %8019 = vmatmul.mubr.msk.f32.vlgmr.msra.gmra.mxu1 %vm3857_vm0, %v1520_v49  ;;  %v3413_v31 = vcombine.low %v9983_v37, %v3396_v41  ;;  %v3429_v5 = vcombine.low %v3404_v45, %v3412_v47  ;;  %v3344_v38 = vrot.slane %v7521_v9, %v8708_v51  ;;  %v3345_v30 = vcombine.low %v3320_v61, %v3328_v32 }
 0x237   :  { %v3013_v44 = vrot.slane %v3005_v34, %v8715_v59  ;;  %v3020_v39 = vrot.slane %v3006_v40, %v8715_v59  ;;  %v3029_v54 = vrot.slane %v3021_v36, %v8715_v59  ;;  %v3036_v55 = vrot.slane %v3022_v48, %v8715_v59 }
 0x238   :  { %v3421_v15 = vrot.slane %v3413_v31, %v8715_v59  ;;  %v3437_v13 = vrot.slane %v3429_v5, %v8715_v59  ;;  %v3353_v7 = vrot.slane %v3345_v30, %v8715_v59  ;;  %v3361_v49 = vcombine.low %v3336_v12, %v3344_v38  ;;  %v2702_v5 = vpop.permute.xlu1 %2701 }
 0x239   :  { %v3517_v52 = vcombine.low %v3013_v44, %v3020_v39  ;;  %v7526_v58 = vcombine.high %v3013_v44, %v3020_v39  ;;  %v3533_v3 = vcombine.low %v3029_v54, %v3036_v55  ;;  %v7527_v50 = vcombine.high %v3029_v54, %v3036_v55 }
 0x23a   :  { %v3445_v17 = vcombine.low %v3421_v15, %v3437_v13  ;;  %v3369_v16 = vrot.slane %v3361_v49, %v8715_v59  ;;  %v3660_v11 = vrot.slane %v3653_v10, %v8708_v51  ;;  %v3668_v20 = vrot.slane %v7530_v56, %v8708_v51 }
 0x23b   :  { %v3524_v0 = vrot.slane %v3517_v52, %v8708_v51  ;;  %v3532_v28 = vrot.slane %v7526_v58, %v8708_v51  ;;  %v3540_v57 = vrot.slane %v3533_v3, %v8708_v51  ;;  %v3548_v27 = vrot.slane %v7527_v50, %v8708_v51 }
 0x23c   :  { %8021 = vmatprep.subr.mxu0 %v3445_v17  ;;  %v3377_v29 = vcombine.low %v3353_v7, %v3369_v16  ;;  %v3676_v10 = vrot.slane %v3669_v6, %v8708_v51  ;;  %v3684_v14 = vrot.slane %v7531_v19, %v8708_v51  ;;  %v3685_v21 = vcombine.low %v3660_v11, %v3668_v20 }
 0x23d   :  { %8022 = vmatpush3.msra.mxu0 %v3445_v17  ;;  %v3549_v18 = vcombine.low %v3524_v0, %v3532_v28  ;;  %v3565_v8 = vcombine.low %v3540_v57, %v3548_v27  ;;  %v3414_v43 = vcombine.high %v9983_v37, %v3396_v41  ;;  %v3430_v6 = vcombine.high %v3404_v45, %v3412_v47 }
 0x23e   :  { %8023 = vmatprep.subr.mxu0 %v3377_v29  ;;  %v3693_v56 = vrot.slane %v3685_v21, %v8715_v59  ;;  %v3701_v35 = vcombine.low %v3676_v10, %v3684_v14  ;;  %v3346_v26 = vcombine.high %v3320_v61, %v3328_v32  ;;  %v3362_v63 = vcombine.high %v3336_v12, %v3344_v38 }
 0x23f   :  { %8024 = vmatpush3.msra.mxu0 %v3377_v29  ;;  %v3557_v2 = vrot.slane %v3549_v18, %v8715_v59  ;;  %v3573_v1 = vrot.slane %v3565_v8, %v8715_v59  ;;  %v3428_v25 = vrot.slane %v3414_v43, %v8715_v59  ;;  %v3444_v19 = vrot.slane %v3430_v6, %v8715_v59 }
 0x240   :  { %v3709_v23 = vrot.slane %v3701_v35, %v8715_v59  ;;  %v3360_v46 = vrot.slane %v3346_v26, %v8715_v59  ;;  %v3376_v9 = vrot.slane %v3362_v63, %v8715_v59  ;;  %v10035_v4 = vcombine.high %v3421_v15, %v3437_v13 }
 0x241   :  { %v3581_v24 = vcombine.low %v3557_v2, %v3573_v1  ;;  %v10037_v53 = vcombine.high %v3353_v7, %v3369_v16  ;;  %v10039_v34 = vcombine.low %v3428_v25, %v3444_v19  ;;  %v10043_v37 = vcombine.high %v3428_v25, %v3444_v19  ;;  %v10063_v7 = vpop.f32.mrf.mxu1 }
 0x242   :  { %v10027_v42 = vcombine.low %v3693_v56, %v3709_v23  ;;  %v10041_v40 = vcombine.low %v3360_v46, %v3376_v9  ;;  %v10045_v41 = vcombine.high %v3360_v46, %v3376_v9  ;;  %v3550_v45 = vcombine.high %v3524_v0, %v3532_v28 }
 0x243   :  { %8028 = vmatprep.subr.mxu1 %v3581_v24  ;;  %10843 = vst [vmem:[#allocation18_spill] sm:$0xff] %v10043_v37  ;;  %v3566_v47 = vcombine.high %v3540_v57, %v3548_v27  ;;  %v10049_v12 = vcombine.high %v3557_v2, %v3573_v1  ;;  %v3686_v36 = vcombine.high %v3660_v11, %v3668_v20 }
 0x244   :  { %8029 = vmatpush3.msra.mxu1 %v3581_v24  ;;  %8035 = vmatprep.subr.mxu0 %v10027_v42  ;;  %10844 = vst [vmem:[#allocation17_spill] sm:$0xff] %v10045_v41  ;;  %v3564_v61 = vrot.slane %v3550_v45, %v8715_v59  ;;  %v3702_v48 = vcombine.high %v3676_v10, %v3684_v14 }
 0x245   :  { %v3580_v32 = vrot.slane %v3566_v47, %v8715_v59  ;;  %v3700_v30 = vrot.slane %v3686_v36, %v8715_v59  ;;  %v10057_v39 = vcombine.high %v3693_v56, %v3709_v23 }
 0x246   :  { %v3716_v44 = vrot.slane %v3702_v48, %v8715_v59 }
 0x247   :  { %v10051_v31 = vcombine.low %v3564_v61, %v3580_v32  ;;  %v10053_v38 = vcombine.high %v3564_v61, %v3580_v32 }
 0x248   :  { %v10059_v54 = vcombine.low %v3700_v30, %v3716_v44  ;;  %v10061_v55 = vcombine.high %v3700_v30, %v3716_v44 }
 0x249   :  { %10845 = vst [vmem:[#allocation20_spill] sm:$0xff] %v10053_v38 }
 0x24a   :  { %10846 = vst [vmem:[#allocation19_spill] sm:$0xff] %v10061_v55 }
 0x274   :  { %v2706_v15 = vpop.permute.xlu1 %2705 }
 0x27b   :  { %v2726_v13 = vpop.permute.xlu1 %2725 }
 0x27c   :  { %v2905_v17 = vcombine.low %v10798_v62, %v2726_v13  ;;  %v2906_v16 = vcombine.high %v10798_v62, %v2726_v13 }
 0x27e   :  { %v10065_v49 = vpop.f32.mrf.mxu1  ;;  %v2913_v20 = vrot.slane %v2905_v17, %v8708_v51  ;;  %v2920_v0 = vrot.slane %v2906_v16, %v8708_v51 }
 0x27f   :  { %v5254_v52 = vsel %vm5250_vm1, %v10065_v49, -inf }
 0x280   :  { %5255 = vmax.xlane.f32.xlu1 %v5254_v52  ;;  %v10069_v3 = vpop.f32.mrf.mxu1 }
 0x281   :  { %v5251_v50 = vsel %vm5250_vm1, %v10069_v3, -inf }
 0x282   :  { %5252 = vmax.xlane.f32.xlu0 %v5251_v50 }
 0x283   :  { %v2730_v58 = vpop.permute.xlu1 %2729 }
 0x284   :  { %v3041_v27 = vcombine.low %v9530_v60, %v2730_v58  ;;  %v3042_v29 = vcombine.high %v9530_v60, %v2730_v58 }
 0x286   :  { %v3049_v35 = vrot.slane %v3041_v27, %v8708_v51  ;;  %v3056_v2 = vrot.slane %v3042_v29, %v8708_v51 }
 0x288   :  { %v2750_v11 = vpop.permute.xlu1 %2749 }
 0x289   :  { %v2921_v28 = vcombine.low %v2702_v5, %v2750_v11  ;;  %v2922_v57 = vcombine.high %v2702_v5, %v2750_v11 }
 0x28b   :  { %v2929_v10 = vrot.slane %v2921_v28, %v8708_v51  ;;  %v2936_v14 = vrot.slane %v2922_v57, %v8708_v51 }
 0x28c   :  { %v2754_v21 = vpop.permute.xlu1 %2753 }
 0x28d   :  { %v2937_v18 = vcombine.low %v2913_v20, %v2929_v10  ;;  %v2938_v8 = vcombine.high %v2913_v20, %v2929_v10  ;;  %v2953_v62 = vcombine.low %v2920_v0, %v2936_v14  ;;  %v2954_v56 = vcombine.high %v2920_v0, %v2936_v14 }
 0x28e   :  { %v3057_v1 = vcombine.low %v2706_v15, %v2754_v21  ;;  %v3058_v23 = vcombine.high %v2706_v15, %v2754_v21 }
 0x28f   :  { %v2945_v24 = vrot.slane %v2937_v18, %v8715_v59  ;;  %v2952_v43 = vrot.slane %v2938_v8, %v8715_v59  ;;  %v2961_v60 = vrot.slane %v2953_v62, %v8715_v59  ;;  %v2968_v6 = vrot.slane %v2954_v56, %v8715_v59 }
 0x290   :  { %v3065_v26 = vrot.slane %v3057_v1, %v8708_v51  ;;  %v3072_v63 = vrot.slane %v3058_v23, %v8708_v51 }
 0x291   :  { %v3449_v25 = vcombine.low %v2945_v24, %v2952_v43  ;;  %v7524_v19 = vcombine.high %v2945_v24, %v2952_v43  ;;  %v3465_v46 = vcombine.low %v2961_v60, %v2968_v6  ;;  %v7525_v9 = vcombine.high %v2961_v60, %v2968_v6 }
 0x292   :  { %v3073_v45 = vcombine.low %v3049_v35, %v3065_v26  ;;  %v3074_v47 = vcombine.high %v3049_v35, %v3065_v26  ;;  %v3089_v61 = vcombine.low %v3056_v2, %v3072_v63  ;;  %v3090_v32 = vcombine.high %v3056_v2, %v3072_v63 }
 0x293   :  { %v3456_v36 = vrot.slane %v3449_v25, %v8708_v51  ;;  %v3464_v48 = vrot.slane %v7524_v19, %v8708_v51  ;;  %v3472_v5 = vrot.slane %v3465_v46, %v8708_v51  ;;  %v3480_v30 = vrot.slane %v7525_v9, %v8708_v51 }
 0x294   :  { %v3081_v44 = vrot.slane %v3073_v45, %v8715_v59  ;;  %v3088_v15 = vrot.slane %v3074_v47, %v8715_v59  ;;  %v3097_v13 = vrot.slane %v3089_v61, %v8715_v59  ;;  %v3104_v52 = vrot.slane %v3090_v32, %v8715_v59 }
 0x295   :  { %v3481_v58 = vcombine.low %v3456_v36, %v3464_v48  ;;  %v3497_v50 = vcombine.low %v3472_v5, %v3480_v30  ;;  %v3482_v17 = vcombine.high %v3456_v36, %v3464_v48  ;;  %v3498_v16 = vcombine.high %v3472_v5, %v3480_v30 }
 0x296   :  { %v3585_v11 = vcombine.low %v3081_v44, %v3088_v15  ;;  %v7528_v20 = vcombine.high %v3081_v44, %v3088_v15  ;;  %v3601_v0 = vcombine.low %v3097_v13, %v3104_v52  ;;  %v7529_v28 = vcombine.high %v3097_v13, %v3104_v52 }
 0x297   :  { %v3489_v57 = vrot.slane %v3481_v58, %v8715_v59  ;;  %v3505_v27 = vrot.slane %v3497_v50, %v8715_v59  ;;  %v3496_v29 = vrot.slane %v3482_v17, %v8715_v59  ;;  %v3512_v10 = vrot.slane %v3498_v16, %v8715_v59 }
 0x298   :  { %v3592_v14 = vrot.slane %v3585_v11, %v8708_v51  ;;  %v3600_v21 = vrot.slane %v7528_v20, %v8708_v51  ;;  %v3608_v18 = vrot.slane %v3601_v0, %v8708_v51  ;;  %v3616_v8 = vrot.slane %v7529_v28, %v8708_v51 }
 0x299   :  { %v3513_v62 = vcombine.low %v3489_v57, %v3505_v27  ;;  %v10105_v56 = vcombine.high %v3489_v57, %v3505_v27  ;;  %v10107_v35 = vcombine.low %v3496_v29, %v3512_v10  ;;  %v10109_v2 = vcombine.high %v3496_v29, %v3512_v10 }
 0x29a   :  { %v3617_v1 = vcombine.low %v3592_v14, %v3600_v21  ;;  %v3633_v23 = vcombine.low %v3608_v18, %v3616_v8  ;;  %v3618_v24 = vcombine.high %v3592_v14, %v3600_v21  ;;  %v3634_v43 = vcombine.high %v3608_v18, %v3616_v8 }
 0x29b   :  { %10847 = vst [vmem:[#allocation26_spill] sm:$0xff] %v10107_v35  ;;  %10848 = vst [vmem:[#allocation21_spill] sm:$0xff] %v10109_v2  ;;  %8030 = vmatprep.subr.mxu1 %v3513_v62  ;;  %v10115_v25 = vpop.f32.mrf.mxu1 }
 0x29c   :  { %8031 = vmatpush3.msra.mxu1 %v3513_v62  ;;  %v3625_v60 = vrot.slane %v3617_v1, %v8715_v59  ;;  %v3641_v6 = vrot.slane %v3633_v23, %v8715_v59  ;;  %v3632_v26 = vrot.slane %v3618_v24, %v8715_v59  ;;  %v3648_v63 = vrot.slane %v3634_v43, %v8715_v59 }
 0x29d   :  { %v5260_v19 = vsel %vm5250_vm1, %v10115_v25, -inf  ;;  %v10125_v47 = vpop.f32.mrf.mxu1 }
 0x29e   :  { %v10119_v46 = vcombine.low %v3625_v60, %v3641_v6  ;;  %v10121_v9 = vcombine.high %v3625_v60, %v3641_v6  ;;  %v10123_v45 = vcombine.low %v3632_v26, %v3648_v63  ;;  %5261 = vmax.xlane.f32.xlu1 %v5260_v19  ;;  %v10127_v61 = vcombine.high %v3632_v26, %v3648_v63 }
 0x29f   :  { %v5257_v32 = vsel %vm5250_vm1, %v10125_v47, -inf }
 0x2a0   :  { %10849 = vst [vmem:[#allocation47_spill] sm:$0xff] %v10123_v45  ;;  %10850 = vst [vmem:[#allocation56_spill] sm:$0xff] %v10127_v61  ;;  %5258 = vmax.xlane.f32.xlu0 %v5257_v32 }
 0x2bf   :  { %v10131_v36 = vpop.f32.mrf.mxu0 }
 0x2c0   :  { %v5266_v48 = vsel %vm5250_vm1, %v10131_v36, -inf }
 0x2c1   :  { %5267 = vmax.xlane.f32.xlu0 %v5266_v48  ;;  %v10135_v5 = vpop.f32.mrf.mxu0 }
 0x2c2   :  { %v5263_v30 = vsel %vm5250_vm1, %v10135_v5, -inf }
 0x2c4   :  { %v10139_v44 = vpop.f32.mrf.mxu1 }
 0x2c5   :  { %5264 = vmax.xlane.f32.xlu0 %v5263_v30  ;;  %v5272_v15 = vsel %vm5250_vm1, %v10139_v44, -inf }
 0x2c6   :  { %5273 = vmax.xlane.f32.xlu1 %v5272_v15  ;;  %v10145_v52 = vpop.f32.mrf.mxu1 }
 0x2c7   :  { %v10143_v13 = vpop.f32.mrf.mxu0  ;;  %v5269_v17 = vsel %vm5250_vm1, %v10145_v52, -inf }
 0x2c8   :  { %v5278_v58 = vsel %vm5250_vm1, %v10143_v13, -inf }
 0x2c9   :  { %5279 = vmax.xlane.f32.xlu0 %v5278_v58  ;;  %v10149_v50 = vpop.f32.mrf.mxu0 }
 0x2ca   :  { %5270 = vmax.xlane.f32.xlu1 %v5269_v17  ;;  %v5275_v16 = vsel %vm5250_vm1, %v10149_v50, -inf }
 0x2cd   :  { %5276 = vmax.xlane.f32.xlu0 %v5275_v16  ;;  %v10155_v11 = vpop.f32.mrf.mxu1 }
 0x2ce   :  { %v5284_v20 = vsel %vm5250_vm1, %v10155_v11, -inf }
 0x2cf   :  { %v10159_v0 = vpop.f32.mrf.mxu0  ;;  %v10161_v28 = vpop.f32.mrf.mxu1 }
 0x2d0   :  { %v5281_v57 = vsel %vm5250_vm1, %v10161_v28, -inf  ;;  %v5290_v29 = vsel %vm5250_vm1, %v10159_v0, -inf }
 0x2d1   :  { %v10165_v27 = vpop.f32.mrf.mxu0  ;;  %5285 = vmax.xlane.f32.xlu0 %v5284_v20  ;;  %5282 = vmax.xlane.f32.xlu1 %v5281_v57 }
 0x2d2   :  { %v5287_v10 = vsel %vm5250_vm1, %v10165_v27, -inf }
 0x2d5   :  { %5291 = vmax.xlane.f32.xlu0 %v5290_v29  ;;  %5288 = vmax.xlane.f32.xlu1 %v5287_v10  ;;  %v10171_v14 = vpop.f32.mrf.mxu1 }
 0x2d6   :  { %v5296_v8 = vsel %vm5250_vm1, %v10171_v14, -inf }
 0x2d7   :  { %v10173_v21 = vpop.f32.mrf.mxu0  ;;  %v10181_v1 = vpop.f32.mrf.mxu1 }
 0x2d8   :  { %v5302_v18 = vsel %vm5250_vm1, %v10173_v21, -inf  ;;  %v5293_v24 = vsel %vm5250_vm1, %v10181_v1, -inf }
 0x2d9   :  { %v10179_v62 = vpop.f32.mrf.mxu0  ;;  %5303 = vmax.xlane.f32.xlu0 %v5302_v18  ;;  %5297 = vmax.xlane.f32.xlu1 %v5296_v8 }
 0x2da   :  { %v5299_v23 = vsel %vm5250_vm1, %v10179_v62, -inf }
 0x2dd   :  { %5300 = vmax.xlane.f32.xlu0 %v5299_v23  ;;  %5294 = vmax.xlane.f32.xlu1 %v5293_v24  ;;  %v10187_v43 = vpop.f32.mrf.mxu1 }
 0x2de   :  { %v5308_v26 = vsel %vm5250_vm1, %v10187_v43, -inf }
 0x2df   :  { %v10189_v60 = vpop.f32.mrf.mxu0  ;;  %v10197_v19 = vpop.f32.mrf.mxu1 }
 0x2e0   :  { %v5314_v6 = vsel %vm5250_vm1, %v10189_v60, -inf  ;;  %v5305_v48 = vsel %vm5250_vm1, %v10197_v19, -inf }
 0x2e1   :  { %v10195_v63 = vpop.f32.mrf.mxu0  ;;  %5315 = vmax.xlane.f32.xlu0 %v5314_v6  ;;  %5309 = vmax.xlane.f32.xlu1 %v5308_v26 }
 0x2e2   :  { %v5311_v32 = vsel %vm5250_vm1, %v10195_v63, -inf }
 0x2e5   :  { %5312 = vmax.xlane.f32.xlu0 %v5311_v32  ;;  %5306 = vmax.xlane.f32.xlu1 %v5305_v48 }
 0x2e6   :  { %v10203_v30 = vpop.f32.mrf.mxu1 }
 0x2e7   :  { %v5320_v17 = vsel %vm5250_vm1, %v10203_v30, -inf }
 0x2e8   :  { %v10205_v15 = vpop.f32.mrf.mxu0  ;;  %v10213_v20 = vpop.f32.mrf.mxu1 }
 0x2e9   :  { %v5326_v58 = vsel %vm5250_vm1, %v10205_v15, -inf  ;;  %5321 = vmax.xlane.f32.xlu1 %v5320_v17  ;;  %v5317_v29 = vsel %vm5250_vm1, %v10213_v20, -inf  ;;  %v10243_v17 = vadd.f32 %v10063_v7, %v8669_v33 }
 0x2ea   :  { %v10211_v16 = vpop.f32.mrf.mxu0  ;;  %5327 = vmax.xlane.f32.xlu0 %v5326_v58 }
 0x2eb   :  { %v5323_v57 = vsel %vm5250_vm1, %v10211_v16, -inf }
 0x2ed   :  { %5318 = vmax.xlane.f32.xlu1 %v5317_v29  ;;  %v10251_v29 = vpop.permute.xlu0 %2711 }
 0x2ee   :  { %5324 = vmax.xlane.f32.xlu0 %v5323_v57  ;;  %v10219_v10 = vpop.f32.mrf.mxu1 }
 0x2ef   :  { %v5332_v18 = vsel %vm5250_vm1, %v10219_v10, -inf }
 0x2f0   :  { %v10223_v8 = vpop.f32.mrf.mxu0  ;;  %v10225_v23 = vpop.f32.mrf.mxu1 }
 0x2f1   :  { %v5329_v24 = vsel %vm5250_vm1, %v10225_v23, -inf  ;;  %v5338_v26 = vsel %vm5250_vm1, %v10223_v8, -inf }
 0x2f2   :  { %v10229_v6 = vpop.f32.mrf.mxu0  ;;  %5333 = vmax.xlane.f32.xlu0 %v5332_v18  ;;  %5330 = vmax.xlane.f32.xlu1 %v5329_v24 }
 0x2f3   :  { %v5335_v32 = vsel %vm5250_vm1, %v10229_v6, -inf }
 0x2f6   :  { %5339 = vmax.xlane.f32.xlu0 %v5338_v26  ;;  %5336 = vmax.xlane.f32.xlu1 %v5335_v32  ;;  %v10235_v48 = vpop.f32.mrf.mxu1 }
 0x2f7   :  { %v5344_v58 = vsel %vm5250_vm1, %v10235_v48, -inf }
 0x2fa   :  { %5345 = vmax.xlane.f32.xlu0 %v5344_v58 }
 0x307   :  { %2759 = vrot.lane.b32.xlu1 %v9855_v22, %s8451_s2 }
 0x309   :  { %v5256_v57 = vpop.xlane.xlu1 %5255 }
 0x30a   :  { %v5348_v18 = vsub.f32 %v10065_v49, %v5256_v57  ;;  %v10261_v57 = vpop.f32.mrf.mxu1 }
 0x30b   :  { %2709 = vrot.lane.b32.xlu1 %v10243_v17, %s8450_s12  ;;  %v5253_v26 = vpop.xlane.xlu0 %5252 }
 0x30c   :  { %v5381_v24 = vmul.f32 1.442695, %v5348_v18  ;;  %v5347_v33 = vsub.f32 %v10069_v3, %v5253_v26  ;;  %v5341_v3 = vsel %vm5250_vm1, %v10261_v57, -inf }
 0x30e   :  { %8227 = vpow2.f32 %v5381_v24  ;;  %v5379_v7 = vmul.f32 1.442695, %v5347_v33 }
 0x30f   :  { %2733 = vrot.lane.b32.xlu1 %v10243_v17, %s8449_s11 }
 0x310   :  { %2735 = vrot.lane.b32.xlu0 %v9855_v22, %s8449_s11  ;;  %8229 = vpow2.f32 %v5379_v7 }
 0x31b   :  { %v10256_v2 = vpop.eup %8227 }
 0x31c   :  { %v5446_v55 = vsel %vm5250_vm1, %v10256_v2, 0.0 }
 0x31d   :  { %v10265_v18 = vpop.eup %8229 }
 0x327   :  { %v5262_v32 = vpop.xlane.xlu1 %5261 }
 0x328   :  { %v5350_v58 = vsub.f32 %v10115_v25, %v5262_v32  ;;  %v5443_v25 = vsel %vm5250_vm1, %v10265_v18, 0.0 }
 0x329   :  { %v5259_v38 = vpop.xlane.xlu0 %5258 }
 0x32a   :  { %v5385_v35 = vmul.f32 1.442695, %v5350_v58  ;;  %v5349_v61 = vsub.f32 %v10125_v47, %v5259_v38 }
 0x32c   :  { %8231 = vpow2.f32 %v5385_v35  ;;  %v5383_v49 = vmul.f32 1.442695, %v5349_v61 }
 0x32e   :  { %8233 = vpow2.f32 %v5383_v49 }
 0x32f   :  { %5447 = vadd.xlane.f32.xlu0 %v5446_v55 }
 0x333   :  { %5342 = vmax.xlane.f32.xlu1 %v5341_v3 }
 0x337   :  { %5444 = vadd.xlane.f32.xlu1 %v5443_v25 }
 0x339   :  { %v10269_v38 = vpop.eup %8231 }
 0x33a   :  { %v5452_v35 = vsel %vm5250_vm1, %v10269_v38, 0.0 }
 0x33b   :  { %v10273_v47 = vpop.eup %8233  ;;  %5453 = vadd.xlane.f32.xlu1 %v5452_v35 }
 0x33c   :  { %v5449_v55 = vsel %vm5250_vm1, %v10273_v47, 0.0 }
 0x33f   :  { %5450 = vadd.xlane.f32.xlu1 %v5449_v55 }
 0x34a   :  { %v5268_v61 = vpop.xlane.xlu0 %5267 }
 0x34b   :  { %v5352_v24 = vsub.f32 %v10131_v36, %v5268_v61 }
 0x34d   :  { %v5389_v26 = vmul.f32 1.442695, %v5352_v24 }
 0x34e   :  { %v5265_v33 = vpop.xlane.xlu0 %5264 }
 0x34f   :  { %8235 = vpow2.f32 %v5389_v26  ;;  %v5351_v7 = vsub.f32 %v10135_v5, %v5265_v33  ;;  %v5274_v32 = vpop.xlane.xlu1 %5273 }
 0x350   :  { %v5354_v49 = vsub.f32 %v10139_v44, %v5274_v32 }
 0x351   :  { %v5387_v58 = vmul.f32 1.442695, %v5351_v7 }
 0x352   :  { %v5280_v3 = vpop.xlane.xlu0 %5279  ;;  %v5393_v35 = vmul.f32 1.442695, %v5354_v49 }
 0x353   :  { %8237 = vpow2.f32 %v5387_v58  ;;  %v5356_v25 = vsub.f32 %v10143_v13, %v5280_v3  ;;  %v5271_v41 = vpop.xlane.xlu1 %5270 }
 0x354   :  { %8239 = vpow2.f32 %v5393_v35  ;;  %v5353_v55 = vsub.f32 %v10145_v52, %v5271_v41 }
 0x355   :  { %v5397_v37 = vmul.f32 1.442695, %v5356_v25 }
 0x356   :  { %v5277_v36 = vpop.xlane.xlu0 %5276  ;;  %v5391_v24 = vmul.f32 1.442695, %v5353_v55 }
 0x357   :  { %8241 = vpow2.f32 %v5397_v37  ;;  %v5355_v61 = vsub.f32 %v10149_v50, %v5277_v36 }
 0x358   :  { %8243 = vpow2.f32 %v5391_v24 }
 0x359   :  { %v5395_v5 = vmul.f32 1.442695, %v5355_v61 }
 0x35a   :  { %v5286_v26 = vpop.xlane.xlu0 %5285  ;;  %v5283_v33 = vpop.xlane.xlu1 %5282 }
 0x35b   :  { %8245 = vpow2.f32 %v5395_v5  ;;  %v5358_v44 = vsub.f32 %v10155_v11, %v5286_v26  ;;  %v5357_v41 = vsub.f32 %v10161_v28, %v5283_v33 }
 0x35c   :  { %v10284_v7 = vpop.eup %8235 }
 0x35d   :  { %v5401_v13 = vmul.f32 1.442695, %v5358_v44  ;;  %v5458_v32 = vsel %vm5250_vm1, %v10284_v7, 0.0  ;;  %v5399_v49 = vmul.f32 1.442695, %v5357_v41 }
 0x35e   :  { %5459 = vadd.xlane.f32.xlu0 %v5458_v32  ;;  %v5292_v37 = vpop.xlane.xlu0 %5291  ;;  %v5289_v52 = vpop.xlane.xlu1 %5288 }
 0x35f   :  { %8247 = vpow2.f32 %v5401_v13  ;;  %v5360_v50 = vsub.f32 %v10159_v0, %v5292_v37  ;;  %v5359_v25 = vsub.f32 %v10165_v27, %v5289_v52 }
 0x360   :  { %v10290_v58 = vpop.eup %8237 }
 0x361   :  { %v5405_v3 = vmul.f32 1.442695, %v5360_v50  ;;  %v5455_v11 = vsel %vm5250_vm1, %v10290_v58, 0.0  ;;  %v10295_v35 = vpop.eup %8239  ;;  %v5403_v0 = vmul.f32 1.442695, %v5359_v25 }
 0x362   :  { %5456 = vadd.xlane.f32.xlu0 %v5455_v11  ;;  %v5304_v55 = vpop.xlane.xlu0 %5303  ;;  %v5298_v28 = vpop.xlane.xlu1 %5297  ;;  %v5464_v36 = vsel %vm5250_vm1, %v10295_v35, 0.0 }
 0x363   :  { %8249 = vpow2.f32 %v5405_v3  ;;  %v5362_v5 = vsub.f32 %v10171_v14, %v5298_v28  ;;  %v5364_v32 = vsub.f32 %v10173_v21, %v5304_v55 }
 0x364   :  { %v10299_v61 = vpop.eup %8241  ;;  %8251 = vpow2.f32 %v5399_v49 }
 0x365   :  { %v5470_v24 = vsel %vm5250_vm1, %v10299_v61, 0.0  ;;  %v10304_v26 = vpop.eup %8243  ;;  %8253 = vpow2.f32 %v5403_v0  ;;  %v5409_v41 = vmul.f32 1.442695, %v5362_v5  ;;  %v5413_v49 = vmul.f32 1.442695, %v5364_v32 }
 0x366   :  { %5471 = vadd.xlane.f32.xlu1 %v5470_v24  ;;  %v5301_v27 = vpop.xlane.xlu0 %5300  ;;  %5465 = vadd.xlane.f32.xlu0 %v5464_v36  ;;  %v10306_v33 = vpop.xlane.xlu1 %5294  ;;  %v5461_v44 = vsel %vm5250_vm1, %v10304_v26, 0.0 }
 0x367   :  { %8255 = vpow2.f32 %v5409_v41  ;;  %v5363_v3 = vsub.f32 %v10179_v62, %v5301_v27 }
 0x368   :  { %v10310_v13 = vpop.eup %8245  ;;  %8257 = vpow2.f32 %v5413_v49 }
 0x369   :  { %v5467_v37 = vsel %vm5250_vm1, %v10310_v13, 0.0  ;;  %v5411_v36 = vmul.f32 1.442695, %v5363_v3 }
 0x36a   :  { %v5316_v14 = vpop.xlane.xlu0 %5315  ;;  %5462 = vadd.xlane.f32.xlu1 %v5461_v44  ;;  %5468 = vadd.xlane.f32.xlu0 %v5467_v37  ;;  %v5310_v52 = vpop.xlane.xlu1 %5309 }
 0x36b   :  { %v5366_v28 = vsub.f32 %v10187_v43, %v5310_v52  ;;  %v5368_v27 = vsub.f32 %v10189_v60, %v5316_v14  ;;  %8259 = vpow2.f32 %v5411_v36 }
 0x36c   :  { %v10315_v50 = vpop.eup %8247 }
 0x36d   :  { %v5476_v11 = vsel %vm5250_vm1, %v10315_v50, 0.0  ;;  %v5417_v44 = vmul.f32 1.442695, %v5366_v28  ;;  %v5421_v52 = vmul.f32 1.442695, %v5368_v27 }
 0x36e   :  { %v5313_v25 = vpop.xlane.xlu0 %5312  ;;  %5477 = vadd.xlane.f32.xlu1 %v5476_v11  ;;  %v5307_v21 = vpop.xlane.xlu1 %5306 }
 0x36f   :  { %8261 = vpow2.f32 %v5417_v44  ;;  %v5365_v49 = vsub.f32 %v10197_v19, %v5307_v21  ;;  %v5367_v28 = vsub.f32 %v10195_v63, %v5313_v25 }
 0x370   :  { %v10320_v55 = vpop.eup %8249  ;;  %8263 = vpow2.f32 %v5421_v52 }
 0x371   :  { %v5482_v0 = vsel %vm5250_vm1, %v10320_v55, 0.0  ;;  %v10325_v24 = vpop.eup %8251  ;;  %v5415_v36 = vmul.f32 1.442695, %v5365_v49  ;;  %v5419_v44 = vmul.f32 1.442695, %v5367_v28 }
 0x372   :  { %5483 = vadd.xlane.f32.xlu0 %v5482_v0  ;;  %v10327_v62 = vpop.xlane.xlu1 %5321  ;;  %v5473_v32 = vsel %vm5250_vm1, %v10325_v24, 0.0  ;;  %v10332_v41 = vpop.eup %8253 }
 0x373   :  { %v5328_v5 = vpop.xlane.xlu0 %5327  ;;  %v5479_v3 = vsel %vm5250_vm1, %v10332_v41, 0.0  ;;  %8265 = vpow2.f32 %v5415_v36 }
 0x374   :  { %v10337_v11 = vpop.eup %8255  ;;  %8267 = vpow2.f32 %v5419_v44  ;;  %v5372_v44 = vsub.f32 %v10205_v15, %v5328_v5 }
 0x375   :  { %10851 = vst [vmem:[#allocation16_spill] sm:$0xff] %v10337_v11  ;;  %v5488_v0 = vsel %vm5250_vm1, %v10337_v11, 0.0  ;;  %v10344_v27 = vpop.eup %8257 }
 0x376   :  { %5474 = vadd.xlane.f32.xlu0 %v5473_v32  ;;  %v5319_v37 = vpop.xlane.xlu1 %5318  ;;  %10852 = vst [vmem:[#allocation22_spill] sm:$0xff] %v10344_v27  ;;  %v5494_v63 = vsel %vm5250_vm1, %v10344_v27, 0.0 }
 0x377   :  { %v5325_v43 = vpop.xlane.xlu0 %5324  ;;  %v5369_v32 = vsub.f32 %v10213_v20, %v5319_v37 }
 0x378   :  { %v10355_v25 = vpop.eup %8259 }
 0x379   :  { %v5491_v20 = vsel %vm5250_vm1, %v10355_v25, 0.0 }
 0x37a   :  { %5480 = vadd.xlane.f32.xlu0 %v5479_v3  ;;  %v5371_v3 = vsub.f32 %v10211_v16, %v5325_v43 }
 0x37b   :  { %v5334_v60 = vpop.xlane.xlu0 %5333  ;;  %v10339_v14 = vpop.xlane.xlu1 %5330 }
 0x37c   :  { %v10360_v11 = vpop.eup %8261  ;;  %v5427_v27 = vmul.f32 1.442695, %v5371_v3 }
 0x37d   :  { %10853 = vst [vmem:[#allocation23_spill] sm:$0xff] %v10360_v11  ;;  %v5500_v16 = vsel %vm5250_vm1, %v10360_v11, 0.0  ;;  %v10371_v43 = vpop.eup %8263  ;;  %v5374_v11 = vsub.f32 %v10219_v10, %v5334_v60 }
 0x37e   :  { %5489 = vadd.xlane.f32.xlu0 %v5488_v0  ;;  %v5423_v0 = vmul.f32 1.442695, %v5369_v32 }
 0x37f   :  { %v10346_v19 = vpop.xlane.xlu0 %5339  ;;  %v10348_v21 = vpop.xlane.xlu1 %5336  ;;  %2757 = vrot.lane.b32.xlu1 %v10243_v17, %s8451_s2 }
 0x380   :  { %8269 = vpow2.f32 %v5423_v0 }
 0x381   :  { %8271 = vpow2.f32 %v5427_v27 }
 0x382   :  { %5495 = vadd.xlane.f32.xlu0 %v5494_v63 }
 0x383   :  { %v10357_v52 = vpop.xlane.xlu0 %5345  ;;  %v2760_v49 = vpop.permute.xlu1 %2759 }
 0x384   :  { %v3261_v28 = vcombine.low %v10251_v29, %v2760_v49  ;;  %v3262_v36 = vcombine.high %v10251_v29, %v2760_v49 }
 0x386   :  { %5492 = vadd.xlane.f32.xlu0 %v5491_v20  ;;  %v3269_v29 = vrot.slane %v3261_v28, %v8708_v51  ;;  %v3276_v32 = vrot.slane %v3262_v36, %v8708_v51  ;;  %v5506_v28 = vsel %vm5250_vm1, %v10371_v43, 0.0  ;;  %v10382_v36 = vpop.eup %8265 }
 0x387   :  { %v2736_v37 = vpop.permute.xlu0 %2735 }
 0x388   :  { %v3245_v63 = vcombine.low %v9855_v22, %v2736_v37  ;;  %v3246_v45 = vcombine.high %v9855_v22, %v2736_v37  ;;  %v5361_v22 = vsub.f32 %v10181_v1, %v10306_v33  ;;  %v5429_v37 = vmul.f32 1.442695, %v5372_v44 }
 0x389   :  { %v5370_v44 = vsub.f32 %v10203_v30, %v10327_v62 }
 0x38a   :  { %v3253_v49 = vrot.slane %v3245_v63, %v8708_v51  ;;  %v3260_v20 = vrot.slane %v3246_v45, %v8708_v51  ;;  %5501 = vadd.xlane.f32.xlu0 %v5500_v16  ;;  %v5407_v16 = vmul.f32 1.442695, %v5361_v22  ;;  %8273 = vpow2.f32 %v5429_v37 }
 0x38c   :  { %v3277_v15 = vcombine.low %v3253_v49, %v3269_v29  ;;  %v3278_v5 = vcombine.high %v3253_v49, %v3269_v29  ;;  %v3293_v3 = vcombine.low %v3260_v20, %v3276_v32  ;;  %v3294_v0 = vcombine.high %v3260_v20, %v3276_v32 }
 0x38d   :  { %v5433_v32 = vmul.f32 1.442695, %v5374_v11  ;;  %v5376_v49 = vsub.f32 %v10223_v8, %v10346_v19  ;;  %v5497_v20 = vsel %vm5250_vm1, %v10382_v36, 0.0  ;;  %8275 = vpow2.f32 %v5407_v16 }
 0x38e   :  { %v3285_v63 = vrot.slane %v3277_v15, %v8715_v59  ;;  %v3292_v45 = vrot.slane %v3278_v5, %v8715_v59  ;;  %v3301_v1 = vrot.slane %v3293_v3, %v8715_v59  ;;  %v3308_v33 = vrot.slane %v3294_v0, %v8715_v59  ;;  %5507 = vadd.xlane.f32.xlu0 %v5506_v28  ;;  %v10394_v15 = vpop.eup %8267 }
 0x38f   :  { %v5425_v3 = vmul.f32 1.442695, %v5370_v44  ;;  %v5373_v11 = vsub.f32 %v10225_v23, %v10339_v14  ;;  %8277 = vpow2.f32 %v5433_v32  ;;  %v5437_v28 = vmul.f32 1.442695, %v5376_v49 }
 0x390   :  { %v3789_v27 = vcombine.low %v3285_v63, %v3292_v45  ;;  %v7534_v10 = vcombine.high %v3285_v63, %v3292_v45  ;;  %v3805_v60 = vcombine.low %v3301_v1, %v3308_v33  ;;  %v7535_v29 = vcombine.high %v3301_v1, %v3308_v33  ;;  %v10404_v45 = vpop.eup %8269 }
 0x391   :  { %v5503_v63 = vsel %vm5250_vm1, %v10394_v15, 0.0  ;;  %v5378_v1 = vsub.f32 %v10235_v48, %v10357_v52  ;;  %8279 = vpow2.f32 %v5425_v3  ;;  %v5431_v14 = vmul.f32 1.442695, %v5373_v11  ;;  %v10422_v52 = vpop.eup %8271 }
 0x392   :  { %v3796_v22 = vrot.slane %v3789_v27, %v8708_v51  ;;  %v3804_v5 = vrot.slane %v7534_v10, %v8708_v51  ;;  %v3812_v30 = vrot.slane %v3805_v60, %v8708_v51  ;;  %v3820_v62 = vrot.slane %v7535_v29, %v8708_v51  ;;  %5498 = vadd.xlane.f32.xlu0 %v5497_v20 }
 0x393   :  { %v5375_v44 = vsub.f32 %v10229_v6, %v10348_v21  ;;  %8281 = vpow2.f32 %v5437_v28  ;;  %v5441_v32 = vmul.f32 1.442695, %v5378_v1  ;;  %v5509_v6 = vsel %vm5250_vm1, %v10404_v45, 0.0 }
 0x394   :  { %v3821_v8 = vcombine.low %v3796_v22, %v3804_v5  ;;  %v3837_v19 = vcombine.low %v3812_v30, %v3820_v62  ;;  %v3822_v0 = vcombine.high %v3796_v22, %v3804_v5  ;;  %v3838_v37 = vcombine.high %v3812_v30, %v3820_v62 }
 0x395   :  { %8283 = vpow2.f32 %v5431_v14  ;;  %v5435_v21 = vmul.f32 1.442695, %v5375_v44  ;;  %v5515_v20 = vsel %vm5250_vm1, %v10422_v52, 0.0 }
 0x396   :  { %v3829_v33 = vrot.slane %v3821_v8, %v8715_v59  ;;  %v3845_v16 = vrot.slane %v3837_v19, %v8715_v59  ;;  %v3836_v23 = vrot.slane %v3822_v0, %v8715_v59  ;;  %5504 = vadd.xlane.f32.xlu0 %v5503_v63  ;;  %v3852_v27 = vrot.slane %v3838_v37, %v8715_v59 }
 0x397   :  { %v10427_v49 = vpop.eup %8273  ;;  %8285 = vpow2.f32 %v5441_v32 }
 0x398   :  { %v10414_v10 = vcombine.low %v3829_v33, %v3845_v16  ;;  %v10416_v60 = vcombine.high %v3829_v33, %v3845_v16  ;;  %v10418_v29 = vcombine.low %v3836_v23, %v3852_v27  ;;  %v10420_v48 = vcombine.high %v3836_v23, %v3852_v27  ;;  %v10461_v23 = vpop.permute.xlu1 %2709 }
 0x399   :  { %8287 = vpow2.f32 %v5435_v21  ;;  %v5518_v30 = vsel %vm5250_vm1, %v10427_v49, 0.0 }
 0x39a   :  { %8042 = vmatprep.subr.mxu1 %v10414_v10  ;;  %5510 = vadd.xlane.f32.xlu0 %v5509_v6  ;;  %v10431_v22 = vpop.eup %8275 }
 0x39b   :  { %v5485_v62 = vsel %vm5250_vm1, %v10431_v22, 0.0 }
 0x39c   :  { %v10433_v5 = vpop.eup %8277  ;;  %v2734_v14 = vpop.permute.xlu1 %2733 }
 0x39d   :  { %v5524_v11 = vsel %vm5250_vm1, %v10433_v5, 0.0 }
 0x39e   :  { %5516 = vadd.xlane.f32.xlu0 %v5515_v20  ;;  %v10439_v3 = vpop.eup %8279 }
 0x39f   :  { %v5512_v19 = vsel %vm5250_vm1, %v10439_v3, 0.0 }
 0x3a0   :  { %v10443_v8 = vpop.eup %8281 }
 0x3a1   :  { %v5530_v37 = vsel %vm5250_vm1, %v10443_v8, 0.0 }
 0x3a2   :  { %5519 = vadd.xlane.f32.xlu0 %v5518_v30  ;;  %v10447_v0 = vpop.eup %8283 }
 0x3a3   :  { %5486 = vadd.xlane.f32.xlu1 %v5485_v62  ;;  %v5521_v63 = vsel %vm5250_vm1, %v10447_v0, 0.0 }
 0x3a4   :  { %v10451_v28 = vpop.eup %8285 }
 0x3a5   :  { %v5536_v33 = vsel %vm5250_vm1, %v10451_v28, 0.0 }
 0x3a6   :  { %5525 = vadd.xlane.f32.xlu0 %v5524_v11  ;;  %v10455_v1 = vpop.eup %8287 }
 0x3a7   :  { %5513 = vadd.xlane.f32.xlu1 %v5512_v19  ;;  %v5527_v16 = vsel %vm5250_vm1, %v10455_v1, 0.0 }
 0x3aa   :  { %5531 = vadd.xlane.f32.xlu0 %v5530_v37 }
 0x3ab   :  { %5522 = vadd.xlane.f32.xlu1 %v5521_v63 }
 0x3ae   :  { %5537 = vadd.xlane.f32.xlu0 %v5536_v33 }
 0x3af   :  { %5528 = vadd.xlane.f32.xlu1 %v5527_v16 }
 0x3b8   :  { %v5448_v27 = vpop.xlane.xlu0 %5447 }
 0x3b9   :  { %8289 = vrcp.f32 %v5448_v27 }
 0x3bc   :  { %v5343_v44 = vpop.xlane.xlu1 %5342 }
 0x3bd   :  { %v5377_v32 = vsub.f32 %v10261_v57, %v5343_v44 }
 0x3bf   :  { %v5439_v6 = vmul.f32 1.442695, %v5377_v32 }
 0x3c0   :  { %v5445_v21 = vpop.xlane.xlu1 %5444 }
 0x3c1   :  { %8291 = vpow2.f32 %v5439_v6 }
 0x3c2   :  { %8293 = vrcp.f32 %v5445_v21 }
 0x3c4   :  { %v5454_v20 = vpop.xlane.xlu1 %5453 }
 0x3c5   :  { %8295 = vrcp.f32 %v5454_v20  ;;  %v3177_v20 = vcombine.low %v10243_v17, %v2734_v14 }
 0x3c6   :  { %v8290_v62 = vpop.eup %8289 }
 0x3c7   :  { %v5542_v57 = vmul.f32 %v8290_v62, %v10256_v2 }
 0x3c8   :  { %v5451_v30 = vpop.xlane.xlu1 %5450 }
 0x3c9   :  { %8297 = vrcp.f32 %v5451_v30  ;;  %v3178_v30 = vcombine.high %v10243_v17, %v2734_v14 }
 0x3ce   :  { %v10464_v11 = vpop.eup %8291 }
 0x3cf   :  { %v8294_v19 = vpop.eup %8293  ;;  %v5533_v37 = vsel %vm5250_vm1, %v10464_v11, 0.0 }
 0x3d0   :  { %5534 = vadd.xlane.f32.xlu1 %v5533_v37  ;;  %v5540_v63 = vmul.f32 %v8294_v19, %v10265_v18 }
 0x3d2   :  { %8025 = vmatprep.mubr.msk.f32.mxu0 %vm5250_vm1, %v5540_v63  ;;  %v8296_v33 = vpop.eup %8295 }
 0x3d3   :  { %8026 = vmatmul.mubr.msk.f32.vlgmr.msra.gmra.mxu0 %vm5250_vm1, %v5542_v57  ;;  %v5546_v18 = vmul.f32 %v8296_v33, %v10269_v38  ;;  %v3185_v33 = vrot.slane %v3177_v20, %v8708_v51 }
 0x3d4   :  { %8036 = vmatpush3.msra.mxu0 %v10027_v42 }
 0x3d5   :  { %8037 = vmatprep.subr.mxu0 %v10119_v46 }
 0x3d6   :  { %8038 = vmatpush3.msra.mxu0 %v10119_v46  ;;  %v8298_v16 = vpop.eup %8297 }
 0x3d7   :  { %8049 = vmatprep.subr.mxu0 %v10035_v4  ;;  %v5544_v44 = vmul.f32 %v8298_v16, %v10273_v47  ;;  %v3192_v16 = vrot.slane %v3178_v30, %v8708_v51 }
 0x3d9   :  { %8032 = vmatprep.mubr.msk.f32.mxu1 %vm5250_vm1, %v5544_v44 }
 0x3da   :  { %8033 = vmatmul.mubr.msk.f32.vlgmr.msra.gmra.mxu1 %vm5250_vm1, %v5546_v18 }
 0x3db   :  { %8043 = vmatpush3.msra.mxu1 %v10414_v10 }
 0x3e7   :  { %v5460_v2 = vpop.xlane.xlu0 %5459 }
 0x3e8   :  { %8299 = vrcp.f32 %v5460_v2 }
 0x3eb   :  { %v5457_v42 = vpop.xlane.xlu0 %5456 }
 0x3ec   :  { %8301 = vrcp.f32 %v5457_v42 }
 0x3ef   :  { %v5472_v27 = vpop.xlane.xlu1 %5471  ;;  %v5466_v46 = vpop.xlane.xlu0 %5465 }
 0x3f0   :  { %8303 = vrcp.f32 %v5472_v27 }
 0x3f3   :  { %v5463_v32 = vpop.xlane.xlu1 %5462  ;;  %v5469_v6 = vpop.xlane.xlu0 %5468 }
 0x3f4   :  { %8305 = vrcp.f32 %v5463_v32 }
 0x3f5   :  { %8307 = vrcp.f32 %v5469_v6  ;;  %v8300_v21 = vpop.eup %8299 }
 0x3f6   :  { %v5550_v62 = vmul.f32 %v8300_v21, %v10284_v7  ;;  %8309 = vrcp.f32 %v5466_v46 }
 0x3f7   :  { %v5478_v47 = vpop.xlane.xlu1 %5477 }
 0x3f8   :  { %8311 = vrcp.f32 %v5478_v47 }
 0x3f9   :  { %v8302_v38 = vpop.eup %8301 }
 0x3fa   :  { %v5548_v10 = vmul.f32 %v8302_v38, %v10290_v58 }
 0x3fb   :  { %v5484_v19 = vpop.xlane.xlu0 %5483  ;;  %v2758_v37 = vpop.permute.xlu1 %2757 }
 0x3fc   :  { %8039 = vmatprep.mubr.msk.f32.mxu0 %vm5250_vm1, %v5548_v10  ;;  %v3193_v63 = vcombine.low %v10461_v23, %v2758_v37  ;;  %v3194_v57 = vcombine.high %v10461_v23, %v2758_v37 }
 0x3fd   :  { %8040 = vmatmul.mubr.msk.f32.vlgmr.msra.gmra.mxu0 %vm5250_vm1, %v5550_v62  ;;  %v8304_v14 = vpop.eup %8303 }
 0x3fe   :  { %8050 = vmatpush3.msra.mxu0 %v10035_v4  ;;  %v3201_v17 = vrot.slane %v3193_v63, %v8708_v51  ;;  %v3208_v7 = vrot.slane %v3194_v57, %v8708_v51 }
 0x3ff   :  { %8051 = vmatprep.subr.mxu0 %v10037_v53  ;;  %v5475_v58 = vpop.xlane.xlu0 %5474 }
 0x400   :  { %v3209_v44 = vcombine.low %v3185_v33, %v3201_v17  ;;  %v3210_v23 = vcombine.high %v3185_v33, %v3201_v17  ;;  %v3225_v18 = vcombine.low %v3192_v16, %v3208_v7  ;;  %v3226_v2 = vcombine.high %v3192_v16, %v3208_v7  ;;  %8052 = vmatpush3.msra.mxu0 %v10037_v53 }
 0x401   :  { %v8306_v42 = vpop.eup %8305  ;;  %8063 = vmatprep.subr.mxu0 %v10057_v39  ;;  %8313 = vrcp.f32 %v5475_v58  ;;  %v5558_v53 = vmul.f32 %v8304_v14, %v10299_v61 }
 0x402   :  { %v8308_v4 = vpop.eup %8307  ;;  %v3217_v27 = vrot.slane %v3209_v44, %v8715_v59  ;;  %v3224_v46 = vrot.slane %v3210_v23, %v8715_v59  ;;  %v3233_v32 = vrot.slane %v3225_v18, %v8715_v59  ;;  %v3240_v6 = vrot.slane %v3226_v2, %v8715_v59 }
 0x403   :  { %8315 = vrcp.f32 %v5484_v19  ;;  %v5481_v47 = vpop.xlane.xlu0 %5480  ;;  %v5552_v21 = vmul.f32 %v8306_v42, %v10304_v26  ;;  %v5556_v38 = vmul.f32 %v8308_v4, %v10310_v13  ;;  %v8310_v16 = vpop.eup %8309 }
 0x404   :  { %v3721_v20 = vcombine.low %v3217_v27, %v3224_v46  ;;  %v7532_v30 = vcombine.high %v3217_v27, %v3224_v46  ;;  %v3737_v10 = vcombine.low %v3233_v32, %v3240_v6  ;;  %v7533_v62 = vcombine.high %v3233_v32, %v3240_v6  ;;  %v10854_v27 = vld [vmem:[#allocation22_spill] sm:$0xff] }
 0x405   :  { %8317 = vrcp.f32 %v5481_v47  ;;  %8046 = vmatprep.mubr.msk.f32.mxu1 %vm5250_vm1, %v5552_v21  ;;  %8053 = vmatprep.mubr.msk.f32.mxu0 %vm5250_vm1, %v5556_v38  ;;  %v5554_v14 = vmul.f32 %v8310_v16, %v10295_v35  ;;  %v10856_v32 = vld [vmem:[#allocation18_spill] sm:$0xff] }
 0x406   :  { %8054 = vmatmul.mubr.msk.f32.vlgmr.msra.gmra.mxu0 %vm5250_vm1, %v5558_v53  ;;  %v10508_v19 = vrot.slane %v3721_v20, %v8708_v51  ;;  %v10511_v26 = vrot.slane %v7532_v30, %v8708_v51  ;;  %v10514_v13 = vrot.slane %v3737_v10, %v8708_v51  ;;  %v10517_v61 = vrot.slane %v7533_v62, %v8708_v51  ;;  %v10857_v10 = vld [vmem:[#allocation17_spill] sm:$0xff] }
 0x407   :  { %8064 = vmatpush3.msra.mxu0 %v10057_v39  ;;  %v5490_v37 = vpop.xlane.xlu0 %5489  ;;  %v8312_v39 = vpop.eup %8311 }
 0x408   :  { %8065 = vmatprep.subr.mxu0 %v10121_v9  ;;  %v3753_v63 = vcombine.low %v10508_v19, %v10511_v26  ;;  %v3769_v57 = vcombine.low %v10514_v13, %v10517_v61  ;;  %v5562_v35 = vmul.f32 %v8312_v39, %v10315_v50  ;;  %v3754_v39 = vcombine.high %v10508_v19, %v10511_v26 }
 0x409   :  { %8066 = vmatpush3.msra.mxu0 %v10121_v9 }
 0x40a   :  { %8077 = vmatprep.subr.mxu0 %v10039_v34  ;;  %v3761_v33 = vrot.slane %v3753_v63, %v8715_v59  ;;  %v3777_v51 = vrot.slane %v3769_v57, %v8715_v59  ;;  %v10858_v63 = vld [vmem:[#allocation19_spill] sm:$0xff]  ;;  %v3768_v26 = vrot.slane %v3754_v39, %v8715_v59 }
 0x40b   :  { %v5496_v17 = vpop.xlane.xlu0 %5495 }
 0x40c   :  { %v3785_v7 = vcombine.low %v3761_v33, %v3777_v51  ;;  %8319 = vrcp.f32 %v5496_v17  ;;  %v3786_v4 = vcombine.high %v3761_v33, %v3777_v51 }
 0x40e   :  { %v8314_v58 = vpop.eup %8313  ;;  %8044 = vmatprep.subr.mxu1 %v3785_v7 }
 0x40f   :  { %v5493_v44 = vpop.xlane.xlu0 %5492  ;;  %8045 = vmatpush3.msra.mxu1 %v3785_v7  ;;  %v5560_v23 = vmul.f32 %v8314_v58, %v10325_v24  ;;  %v3770_v7 = vcombine.high %v10514_v13, %v10517_v61  ;;  %v10861_v13 = vld [vmem:[#allocation26_spill] sm:$0xff]  ;;  %v10862_v61 = vld [vmem:[#allocation23_spill] sm:$0xff] }
 0x410   :  { %v8316_v9 = vpop.eup %8315  ;;  %8321 = vrcp.f32 %v5493_v44  ;;  %8047 = vmatmul.mubr.msk.f32.vlgmr.msra.gmra.mxu1 %vm5250_vm1, %v5554_v14  ;;  %8056 = vmatprep.subr.mxu1 %v10049_v12  ;;  %v10859_v14 = vld [vmem:[#allocation16_spill] sm:$0xff] }
 0x411   :  { %8057 = vmatpush3.msra.mxu1 %v10049_v12  ;;  %8060 = vmatprep.mubr.msk.f32.mxu1 %vm5250_vm1, %v5560_v23  ;;  %v5566_v42 = vmul.f32 %v8316_v9, %v10320_v55 }
 0x412   :  { %v8318_v18 = vpop.eup %8317  ;;  %8058 = vmatprep.subr.mxu1 %v10105_v56 }
 0x413   :  { %v5502_v2 = vpop.xlane.xlu0 %5501  ;;  %8059 = vmatpush3.msra.mxu1 %v10105_v56  ;;  %v5564_v24 = vmul.f32 %v8318_v18, %v10332_v41 }
 0x414   :  { %8061 = vmatmul.mubr.msk.f32.vlgmr.msra.gmra.mxu1 %vm5250_vm1, %v5562_v35  ;;  %8070 = vmatprep.subr.mxu1 %v10416_v60 }
 0x415   :  { %8067 = vmatprep.mubr.msk.f32.mxu0 %vm5250_vm1, %v5564_v24  ;;  %8071 = vmatpush3.msra.mxu1 %v10416_v60 }
 0x416   :  { %8068 = vmatmul.mubr.msk.f32.vlgmr.msra.gmra.mxu0 %vm5250_vm1, %v5566_v42  ;;  %8072 = vmatprep.subr.mxu1 %v3786_v4 }
 0x417   :  { %8078 = vmatpush3.msra.mxu0 %v10039_v34  ;;  %v5508_v12 = vpop.xlane.xlu0 %5507  ;;  %8073 = vmatpush3.msra.mxu1 %v3786_v4  ;;  %v10855_v34 = vld [vmem:[#allocation47_spill] sm:$0xff] }
 0x418   :  { %8079 = vmatprep.subr.mxu0 %v10041_v40  ;;  %8084 = vmatprep.subr.mxu1 %v10051_v31  ;;  %8323 = vrcp.f32 %v5508_v12 }
 0x419   :  { %8080 = vmatpush3.msra.mxu0 %v10041_v40  ;;  %v8320_v50 = vpop.eup %8319 }
 0x41a   :  { %8091 = vmatprep.subr.mxu0 %v10059_v54  ;;  %v5574_v46 = vmul.f32 %v8320_v50, %v10854_v27  ;;  %v10864_v50 = vld [vmem:[#allocation21_spill] sm:$0xff] }
 0x41b   :  { %v5499_v56 = vpop.xlane.xlu0 %5498 }
 0x41d   :  { %v8322_v55 = vpop.eup %8321 }
 0x41e   :  { %v5572_v41 = vmul.f32 %v8322_v55, %v10355_v25 }
 0x41f   :  { %v5505_v60 = vpop.xlane.xlu0 %5504 }
 0x420   :  { %8325 = vrcp.f32 %v5505_v60  ;;  %8081 = vmatprep.mubr.msk.f32.mxu0 %vm5250_vm1, %v5572_v41  ;;  %v6905_v41 = vld [vmem:[#allocation7 + $0x30] sm:$0xff]  ;;  %v6903_v60 = vld [vmem:[#allocation7 + $0x20] sm:$0xff] }
 0x421   :  { %8082 = vmatmul.mubr.msk.f32.vlgmr.msra.gmra.mxu0 %vm5250_vm1, %v5574_v46 }
 0x422   :  { %8092 = vmatpush3.msra.mxu0 %v10059_v54 }
 0x423   :  { %8093 = vmatprep.subr.mxu0 %v10855_v34  ;;  %v5511_v40 = vpop.xlane.xlu0 %5510 }
 0x424   :  { %8094 = vmatpush3.msra.mxu0 %v10855_v34 }
 0x425   :  { %8105 = vmatprep.subr.mxu0 %v10856_v32  ;;  %v8324_v47 = vpop.eup %8323 }
 0x426   :  { %v5582_v20 = vmul.f32 %v8324_v47, %v10371_v43  ;;  %v6914_v47 = vld [vmem:[#allocation7 + $0x78] sm:$0xff] }
 0x427   :  { %v5517_v6 = vpop.xlane.xlu0 %5516 }
 0x428   :  { %8327 = vrcp.f32 %v5517_v6  ;;  %v6900_v6 = vld [vmem:[#allocation7 + $0x8] sm:$0xff] }
 0x429   :  { %8329 = vrcp.f32 %v5490_v37 }
 0x42b   :  { %v5520_v25 = vpop.xlane.xlu0 %5519 }
 0x42c   :  { %8331 = vrcp.f32 %v5520_v25  ;;  %v5487_v21 = vpop.xlane.xlu1 %5486  ;;  %v6899_v25 = vld [vmem:[#allocation7] sm:$0xff] }
 0x42d   :  { %v8326_v38 = vpop.eup %8325  ;;  %8333 = vrcp.f32 %v5487_v21  ;;  %v6910_v21 = vld [vmem:[#allocation7 + $0x58] sm:$0xff] }
 0x42e   :  { %8335 = vrcp.f32 %v5499_v56  ;;  %v5580_v53 = vmul.f32 %v8326_v38, %v10394_v15  ;;  %v10863_v56 = vld [vmem:[#allocation20_spill] sm:$0xff]  ;;  %v6913_v38 = vld [vmem:[#allocation7 + $0x70] sm:$0xff] }
 0x42f   :  { %v5526_v54 = vpop.xlane.xlu0 %5525  ;;  %8337 = vrcp.f32 %v5502_v2 }
 0x430   :  { %8095 = vmatprep.mubr.msk.f32.mxu0 %vm5250_vm1, %v5580_v53  ;;  %v5514_v30 = vpop.xlane.xlu1 %5513  ;;  %8339 = vrcp.f32 %v5511_v40  ;;  %v6912_v53 = vld [vmem:[#allocation7 + $0x68] sm:$0xff] }
 0x431   :  { %8096 = vmatmul.mubr.msk.f32.vlgmr.msra.gmra.mxu0 %vm5250_vm1, %v5582_v20  ;;  %8341 = vrcp.f32 %v5514_v30 }
 0x432   :  { %8106 = vmatpush3.msra.mxu0 %v10856_v32  ;;  %v6901_v32 = vld [vmem:[#allocation7 + $0x10] sm:$0xff] }
 0x433   :  { %8107 = vmatprep.subr.mxu0 %v10857_v10  ;;  %v5532_v15 = vpop.xlane.xlu0 %5531 }
 0x434   :  { %8108 = vmatpush3.msra.mxu0 %v10857_v10  ;;  %v5523_v62 = vpop.xlane.xlu1 %5522 }
 0x435   :  { %v8328_v37 = vpop.eup %8327  ;;  %8119 = vmatprep.subr.mxu0 %v10858_v63  ;;  %8343 = vrcp.f32 %v5523_v62 }
 0x436   :  { %v5588_v43 = vmul.f32 %v8328_v37, %v10422_v52  ;;  %8345 = vrcp.f32 %v5526_v54  ;;  %v8330_v57 = vpop.eup %8329  ;;  %v6911_v54 = vld [vmem:[#allocation7 + $0x60] sm:$0xff] }
 0x437   :  { %8347 = vrcp.f32 %v5532_v15  ;;  %v5570_v44 = vmul.f32 %v8330_v57, %v10859_v14  ;;  %v6907_v57 = vld [vmem:[#allocation7 + $0x40] sm:$0xff] }
 0x438   :  { %8109 = vmatprep.mubr.msk.f32.mxu0 %vm5250_vm1, %v5588_v43  ;;  %v5529_v33 = vpop.xlane.xlu1 %5528  ;;  %v6908_v43 = vld [vmem:[#allocation7 + $0x48] sm:$0xff] }
 0x439   :  { %v8332_v51 = vpop.eup %8331  ;;  %8349 = vrcp.f32 %v5529_v33 }
 0x43a   :  { %v8334_v16 = vpop.eup %8333  ;;  %v5590_v17 = vmul.f32 %v8332_v51, %v10427_v49  ;;  %v10860_v49 = vld [vmem:[#allocation56_spill] sm:$0xff] }
 0x43b   :  { %v8336_v58 = vpop.eup %8335  ;;  %v5568_v52 = vmul.f32 %v8334_v16, %v10431_v22  ;;  %v3784_v22 = vrot.slane %v3770_v7, %v8715_v59 }
 0x43c   :  { %8110 = vmatmul.mubr.msk.f32.vlgmr.msra.gmra.mxu0 %vm5250_vm1, %v5590_v17  ;;  %v8338_v23 = vpop.eup %8337  ;;  %v5576_v19 = vmul.f32 %v8336_v58, %v10382_v36  ;;  %v6906_v36 = vld [vmem:[#allocation7 + $0x38] sm:$0xff] }
 0x43d   :  { %8120 = vmatpush3.msra.mxu0 %v10858_v63  ;;  %8074 = vmatprep.mubr.msk.f32.mxu1 %vm5250_vm1, %v5568_v52  ;;  %v8340_v9 = vpop.eup %8339  ;;  %v5578_v18 = vmul.f32 %v8338_v23, %v10862_v61  ;;  %v3787_v59 = vcombine.low %v3768_v26, %v3784_v22  ;;  %v3788_v55 = vcombine.high %v3768_v26, %v3784_v22  ;;  %v6909_v63 = vld [vmem:[#allocation7 + $0x50] sm:$0xff] }
 0x43e   :  { %8121 = vmatprep.subr.mxu0 %v10860_v49  ;;  %8075 = vmatmul.mubr.msk.f32.vlgmr.msra.gmra.mxu1 %vm5250_vm1, %v5570_v44  ;;  %v8342_v35 = vpop.eup %8341  ;;  %v5584_v2 = vmul.f32 %v8340_v9, %v10404_v45 }
 0x43f   :  { %8122 = vmatpush3.msra.mxu0 %v10860_v49  ;;  %8085 = vmatpush3.msra.mxu1 %v10051_v31  ;;  %v5586_v42 = vmul.f32 %v8342_v35, %v10439_v3 }
 0x440   :  { %8086 = vmatprep.subr.mxu1 %v10861_v13  ;;  %8088 = vmatprep.mubr.msk.f32.mxu1 %vm5250_vm1, %v5576_v19 }
 0x441   :  { %8087 = vmatpush3.msra.mxu1 %v10861_v13  ;;  %8133 = vmatprep.subr.mxu0 %v6906_v36 }
 0x442   :  { %v8344_v24 = vpop.eup %8343  ;;  %8098 = vmatprep.subr.mxu1 %v10418_v29  ;;  %8089 = vmatmul.mubr.msk.f32.vlgmr.msra.gmra.mxu1 %vm5250_vm1, %v5578_v18 }
 0x443   :  { %8099 = vmatpush3.msra.mxu1 %v10418_v29  ;;  %8102 = vmatprep.mubr.msk.f32.mxu1 %vm5250_vm1, %v5584_v2  ;;  %v8346_v31 = vpop.eup %8345  ;;  %v5592_v45 = vmul.f32 %v8344_v24, %v10447_v0 }
 0x444   :  { %8100 = vmatprep.subr.mxu1 %v3787_v59  ;;  %v8348_v4 = vpop.eup %8347  ;;  %v5594_v3 = vmul.f32 %v8346_v31, %v10433_v5  ;;  %v6904_v5 = vld [vmem:[#allocation7 + $0x28] sm:$0xff] }
 0x445   :  { %8101 = vmatpush3.msra.mxu1 %v3787_v59  ;;  %v5598_v0 = vmul.f32 %v8348_v4, %v10443_v8  ;;  %v5538_v8 = vpop.xlane.xlu0 %5537 }
 0x446   :  { %v8350_v12 = vpop.eup %8349  ;;  %8112 = vmatprep.subr.mxu1 %v10863_v56  ;;  %8103 = vmatmul.mubr.msk.f32.vlgmr.msra.gmra.mxu1 %vm5250_vm1, %v5586_v42  ;;  %8351 = vrcp.f32 %v5538_v8 }
 0x447   :  { %8113 = vmatpush3.msra.mxu1 %v10863_v56  ;;  %8116 = vmatprep.mubr.msk.f32.mxu1 %vm5250_vm1, %v5592_v45  ;;  %v5596_v29 = vmul.f32 %v8350_v12, %v10455_v1  ;;  %v6902_v1 = vld [vmem:[#allocation7 + $0x18] sm:$0xff] }
 0x448   :  { %8114 = vmatprep.subr.mxu1 %v10864_v50 }
 0x449   :  { %8115 = vmatpush3.msra.mxu1 %v10864_v50  ;;  %8123 = vmatprep.mubr.msk.f32.mxu0 %vm5250_vm1, %v5596_v29 }
 0x44a   :  { %8126 = vmatprep.subr.mxu1 %v10420_v48  ;;  %8117 = vmatmul.mubr.msk.f32.vlgmr.msra.gmra.mxu1 %vm5250_vm1, %v5594_v3 }
 0x44b   :  { %8124 = vmatmul.mubr.msk.f32.vlgmr.msra.gmra.mxu0 %vm5250_vm1, %v5598_v0  ;;  %8127 = vmatpush3.msra.mxu1 %v10420_v48 }
 0x44c   :  { %8128 = vmatprep.subr.mxu1 %v3788_v55  ;;  %8134 = vmatpush3.msra.mxu0 %v6906_v36 }
 0x44d   :  { %8129 = vmatpush3.msra.mxu1 %v3788_v55  ;;  %8135 = vmatprep.subr.mxu0 %v6905_v41 }
 0x44e   :  { %8153 = vmatprep.subr.mxu1 %v6902_v1  ;;  %8136 = vmatpush3.msra.mxu0 %v6905_v41 }
 0x44f   :  { %8137 = vmatprep.subr.mxu0 %v6904_v5 }
 0x450   :  { %8138 = vmatpush3.msra.mxu0 %v6904_v5 }
 0x451   :  { %8139 = vmatprep.subr.mxu0 %v6903_v60 }
 0x452   :  { %8140 = vmatpush3.msra.mxu0 %v6903_v60 }
 0x453   :  { %v8352_v46 = vpop.eup %8351  ;;  %8173 = vmatprep.subr.mxu0 %v6910_v21 }
 0x454   :  { %v5602_v40 = vmul.f32 %v8352_v46, %v10451_v28 }
 0x459   :  { %v5535_v27 = vpop.xlane.xlu1 %5534 }
 0x45a   :  { %8353 = vrcp.f32 %v5535_v27 }
 0x467   :  { %v8354_v34 = vpop.eup %8353 }
 0x468   :  { %v5600_v48 = vmul.f32 %v8354_v34, %v10464_v11 }
 0x46a   :  { %8130 = vmatprep.mubr.msk.f32.mxu1 %vm5250_vm1, %v5600_v48 }
 0x46b   :  { %8131 = vmatmul.mubr.msk.f32.vlgmr.msra.gmra.mxu1 %vm5250_vm1, %v5602_v40 }
 0x46c   :  { %8154 = vmatpush3.msra.mxu1 %v6902_v1 }
 0x46d   :  { %8155 = vmatprep.subr.mxu1 %v6901_v32 }
 0x46e   :  { %8156 = vmatpush3.msra.mxu1 %v6901_v32  ;;  %v7664_v32 = vld [vmem:[%s10659_s4] ss:$0 sm:$0xff]  ;;  %s8454_s4 = smov [#allocation8]  }
 0x46f   :  { %8157 = vmatprep.subr.mxu1 %v6900_v6  ;;  %s7475_s15 = sshll.u32 %s8454_s4, 4  ;;  %s7476_s15 = int_to_ptr.vmem [resolvable:$true] %s7475_s15 }
 0x470   :  { %8158 = vmatpush3.msra.mxu1 %v6900_v6  ;;  %s8415_s16 = scalar_lea.vmem %s7476_s15, 1024  ;;  %p8420_p2 = scmp.lt.s32.totalorder %s7476_s15, %s7476_s15 }
 0x471   :  { %8159 = vmatprep.subr.mxu1 %v6899_v25  ;;  %p8416_p1 = scmp.ne.s32.totalorder %s7476_s15, %s8415_s16  ;;  %p8421_p3 = scmp.lt.s32.totalorder %s8415_s16, %s8415_s16 }
 0x472   :  { %8160 = vmatpush3.msra.mxu1 %v6899_v25 }
 0x473   :  { %8193 = vmatprep.subr.mxu1 %v6914_v47  ;;  %p8422_p4 = por %p8421_p3, %p8420_p2 }
 0x475   :  { %p8423_p5 = pnand %p8422_p4, %p8416_p1 }
 0x493   :  { %v8027_v11 = vpop.f32.mrf.mxu0 }
 0x495   :  { %v5675_v28 = vpop.f32.mrf.mxu0 }
 0x496   :  { %8161 = vmatprep.mubr.msk.f32.mxu1 %vm3857_vm0, %v5675_v28 }
 0x497   :  { %8162 = vmatmul.mubr.msk.f32.vlgmr.msra.gmra.mxu1 %vm3857_vm0, %v8027_v11 }
 0x498   :  { %8194 = vmatpush3.msra.mxu1 %v6914_v47 }
 0x499   :  { %8195 = vmatprep.subr.mxu1 %v6913_v38 }
 0x49a   :  { %8196 = vmatpush3.msra.mxu1 %v6913_v38  ;;  %v8034_v20 = vpop.f32.mrf.mxu1 }
 0x49b   :  { %8197 = vmatprep.subr.mxu1 %v6912_v53 }
 0x49c   :  { %8198 = vmatpush3.msra.mxu1 %v6912_v53  ;;  %v5756_v30 = vpop.f32.mrf.mxu1 }
 0x49d   :  { %8199 = vmatprep.subr.mxu1 %v6911_v54  ;;  %8164 = vmatprep.mubr.msk.f32.mxu1 %vm3857_vm0, %v5756_v30 }
 0x49e   :  { %8200 = vmatpush3.msra.mxu1 %v6911_v54 }
 0x49f   :  { %8165 = vmatmul.mubr.msk.f32.gmra.mxu1 %vm3857_vm0, %v8034_v20 }
 0x4bd   :  { %v8041_v10 = vpop.f32.mrf.mxu0 }
 0x4bf   :  { %v5837_v62 = vpop.f32.mrf.mxu0 }
 0x4c0   :  { %8167 = vmatprep.mubr.msk.f32.mxu1 %vm3857_vm0, %v5837_v62 }
 0x4c1   :  { %8168 = vmatmul.mubr.msk.f32.gmra.mxu1 %vm3857_vm0, %v8041_v10 }
 0x4c6   :  { %v8055_v37 = vpop.f32.mrf.mxu0 }
 0x4c8   :  { %v5999_v15 = vpop.f32.mrf.mxu0 }
 0x4c9   :  { %8141 = vmatprep.mubr.msk.f32.mxu0 %vm3857_vm0, %v5999_v15 }
 0x4ca   :  { %8142 = vmatmul.mubr.msk.f32.vlgmr.msra.gmra.mxu0 %vm3857_vm0, %v8055_v37 }
 0x4cb   :  { %8174 = vmatpush3.msra.mxu0 %v6910_v21 }
 0x4cc   :  { %8175 = vmatprep.subr.mxu0 %v6909_v63 }
 0x4cd   :  { %8176 = vmatpush3.msra.mxu0 %v6909_v63 }
 0x4ce   :  { %8177 = vmatprep.subr.mxu0 %v6908_v43 }
 0x4cf   :  { %8178 = vmatpush3.msra.mxu0 %v6908_v43 }
 0x4d0   :  { %v8048_v33 = vpop.f32.mrf.mxu1  ;;  %8179 = vmatprep.subr.mxu0 %v6907_v57 }
 0x4d1   :  { %8180 = vmatpush3.msra.mxu0 %v6907_v57 }
 0x4d2   :  { %v5918_v51 = vpop.f32.mrf.mxu1 }
 0x4d3   :  { %8170 = vmatprep.mubr.msk.f32.mxu1 %vm3857_vm0, %v5918_v51 }
 0x4d4   :  { %v8062_v16 = vpop.f32.mrf.mxu1  ;;  %8171 = vmatmul.mubr.msk.f32.gmra.mxu1 %vm3857_vm0, %v8048_v33 }
 0x4d6   :  { %v8069_v17 = vpop.f32.mrf.mxu0  ;;  %v6080_v39 = vpop.f32.mrf.mxu1 }
 0x4d7   :  { %8144 = vmatprep.mubr.msk.f32.mxu0 %vm3857_vm0, %v6080_v39 }
 0x4d8   :  { %v6161_v7 = vpop.f32.mrf.mxu0  ;;  %8145 = vmatmul.mubr.msk.f32.gmra.mxu0 %vm3857_vm0, %v8062_v16 }
 0x4d9   :  { %8147 = vmatprep.mubr.msk.f32.mxu0 %vm3857_vm0, %v6161_v7 }
 0x4dc   :  { %8148 = vmatmul.mubr.msk.f32.gmra.mxu0 %vm3857_vm0, %v8069_v17 }
 0x4e1   :  { %v8083_v58 = vpop.f32.mrf.mxu0 }
 0x4e3   :  { %v6323_v52 = vpop.f32.mrf.mxu0 }
 0x4f1   :  { %v8097_v14 = vpop.f32.mrf.mxu0 }
 0x4f3   :  { %v6485_v44 = vpop.f32.mrf.mxu0 }
 0x4fc   :  { %v8111_v23 = vpop.f32.mrf.mxu0 }
 0x4fe   :  { %v6647_v9 = vpop.f32.mrf.mxu0  ;;  %v8076_v49 = vpop.f32.mrf.mxu1 }
 0x4ff   :  { %8201 = vmatprep.mubr.msk.f32.mxu1 %vm3857_vm0, %v6647_v9 }
 0x500   :  { %8202 = vmatmul.mubr.msk.f32.vlgmr.msra.gmra.mxu1 %vm3857_vm0, %v8111_v23  ;;  %v6242_v19 = vpop.f32.mrf.mxu1 }
 0x501   :  { %8150 = vmatprep.mubr.msk.f32.mxu0 %vm3857_vm0, %v6242_v19 }
 0x502   :  { %v8090_v26 = vpop.f32.mrf.mxu1  ;;  %8151 = vmatmul.mubr.msk.f32.gmra.mxu0 %vm3857_vm0, %v8076_v49 }
 0x503   :  { %8181 = vmatprep.mubr.msk.f32.mxu0 %vm3857_vm0, %v6323_v52 }
 0x504   :  { %v6404_v22 = vpop.f32.mrf.mxu1 }
 0x506   :  { %v8104_v13 = vpop.f32.mrf.mxu1  ;;  %8182 = vmatmul.mubr.msk.f32.vlgmr.msra.gmra.mxu0 %vm3857_vm0, %v8083_v58 }
 0x507   :  { %8184 = vmatprep.mubr.msk.f32.mxu0 %vm3857_vm0, %v6404_v22 }
 0x508   :  { %v6566_v61 = vpop.f32.mrf.mxu1 }
 0x50a   :  { %v8118_v18 = vpop.f32.mrf.mxu1  ;;  %8185 = vmatmul.mubr.msk.f32.gmra.mxu0 %vm3857_vm0, %v8090_v26 }
 0x50b   :  { %v8125_v35 = vpop.f32.mrf.mxu0  ;;  %8187 = vmatprep.mubr.msk.f32.mxu0 %vm3857_vm0, %v6485_v44 }
 0x50c   :  { %v6728_v2 = vpop.f32.mrf.mxu1 }
 0x50d   :  { %8204 = vmatprep.mubr.msk.f32.mxu1 %vm3857_vm0, %v6728_v2  ;;  %v6809_v36 = vpop.f32.mrf.mxu0 }
 0x50e   :  { %8188 = vmatmul.mubr.msk.f32.gmra.mxu0 %vm3857_vm0, %v8097_v14  ;;  %8205 = vmatmul.mubr.msk.f32.gmra.mxu1 %vm3857_vm0, %v8118_v18 }
 0x50f   :  { %8190 = vmatprep.mubr.msk.f32.mxu0 %vm3857_vm0, %v6566_v61  ;;  %8207 = vmatprep.mubr.msk.f32.mxu1 %vm3857_vm0, %v6809_v36 }
 0x512   :  { %8191 = vmatmul.mubr.msk.f32.gmra.mxu0 %vm3857_vm0, %v8104_v13  ;;  %8208 = vmatmul.mubr.msk.f32.gmra.mxu1 %vm3857_vm0, %v8125_v35 }
 0x52b   :  { %v8132_v24 = vpop.f32.mrf.mxu1 }
 0x52d   :  { %v6890_v59 = vpop.f32.mrf.mxu1 }
 0x52e   :  { %8210 = vmatprep.mubr.msk.f32.mxu1 %vm3857_vm0, %v6890_v59 }
 0x52f   :  { %8211 = vmatmul.mubr.msk.f32.gmra.mxu1 %vm3857_vm0, %v8132_v24 }
 0x557   :  { %v8163_v31 = vpop.f32.mrf.mxu1 }
 0x559   :  { %v7134_v4 = vpop.f32.mrf.mxu1 }
 0x55f   :  { %v8166_v12 = vpop.f32.mrf.mxu1 }
 0x561   :  { %v7144_v29 = vpop.f32.mrf.mxu1 }
 0x581   :  { %v8169_v3 = vpop.f32.mrf.mxu1 }
 0x583   :  { %v7154_v55 = vpop.f32.mrf.mxu1 }
 0x58a   :  { %v8143_v42 = vpop.f32.mrf.mxu0 }
 0x58b   :  { %v7140_v27 = vadd.f32 %v8163_v31, %v8143_v42 }
 0x58c   :  { %v7005_v45 = vpop.f32.mrf.mxu0 }
 0x58d   :  { %v7135_v48 = vadd.f32 %v7134_v4, %v7005_v45 }
 0x594   :  { %v8172_v41 = vpop.f32.mrf.mxu1 }
 0x596   :  { %v7164_v60 = vpop.f32.mrf.mxu1 }
 0x598   :  { %v8146_v56 = vpop.f32.mrf.mxu0 }
 0x599   :  { %v7150_v28 = vadd.f32 %v8166_v12, %v8146_v56 }
 0x59a   :  { %v7015_v50 = vpop.f32.mrf.mxu0 }
 0x59b   :  { %v7145_v20 = vadd.f32 %v7144_v29, %v7015_v50 }
 0x59c   :  { %v8149_v0 = vpop.f32.mrf.mxu0 }
 0x59d   :  { %v7160_v15 = vadd.f32 %v8169_v3, %v8149_v0 }
 0x59e   :  { %v7025_v1 = vpop.f32.mrf.mxu0 }
 0x59f   :  { %v7155_v51 = vadd.f32 %v7154_v55, %v7025_v1 }
 0x5c0   :  { %v8203_v46 = vpop.f32.mrf.mxu1 }
 0x5c2   :  { %v8152_v5 = vpop.f32.mrf.mxu0  ;;  %v7400_v21 = vpop.f32.mrf.mxu1 }
 0x5c3   :  { %v7170_v26 = vadd.f32 %v8172_v41, %v8152_v5 }
 0x5c4   :  { %v7035_v8 = vpop.f32.mrf.mxu0 }
 0x5c5   :  { %v7165_v13 = vadd.f32 %v7164_v60, %v7035_v8 }
 0x5c6   :  { %v8183_v34 = vpop.f32.mrf.mxu0 }
 0x5c7   :  { %v7303_v40 = vadd.f32 %v8183_v34, %v7140_v27 }
 0x5c8   :  { %v7263_v6 = vpop.f32.mrf.mxu0 }
 0x5c9   :  { %v7440_v25 = vadd.f32 %v8203_v46, %v7303_v40  ;;  %v7302_v47 = vadd.f32 %v7263_v6, %v7135_v48 }
 0x5ca   :  { %v8186_v11 = vpop.f32.mrf.mxu0 }
 0x5cb   :  { %v7455_v38 = vadd.f32 %v7664_v32, %v7440_v25  ;;  %v7439_v53 = vadd.f32 %v7400_v21, %v7302_v47  ;;  %v7305_v10 = vadd.f32 %v8186_v11, %v7150_v28 }
 0x5cc   :  { %v7273_v54 = vpop.f32.mrf.mxu0 }
 0x5cd   :  { %7463 = vst [vmem:[#allocation8 + $0x8] sm:$0xff] %v7455_v38  ;;  %v7454_v30 = vadd.f32 %v7664_v32, %v7439_v53  ;;  %v7304_v63 = vadd.f32 %v7273_v54, %v7145_v20 }
 0x5ce   :  { %v8189_v62 = vpop.f32.mrf.mxu0  ;;  %v8206_v37 = vpop.f32.mrf.mxu1 }
 0x5cf   :  { %7462 = vst [vmem:[#allocation8] sm:$0xff] %v7454_v30  ;;  %v7442_v43 = vadd.f32 %v8206_v37, %v7305_v10  ;;  %v7307_v16 = vadd.f32 %v8189_v62, %v7160_v15 }
 0x5d0   :  { %v7283_v57 = vpop.f32.mrf.mxu0  ;;  %v7410_v33 = vpop.f32.mrf.mxu1 }
 0x5d1   :  { %v7457_v17 = vadd.f32 %v7664_v32, %v7442_v43  ;;  %v7441_v39 = vadd.f32 %v7410_v33, %v7304_v63  ;;  %v7306_v58 = vadd.f32 %v7283_v57, %v7155_v51 }
 0x5d2   :  { %v8209_v7 = vpop.f32.mrf.mxu1  ;;  %v8192_v19 = vpop.f32.mrf.mxu0 }
 0x5d3   :  { %7465 = vst [vmem:[#allocation8 + $0x18] sm:$0xff] %v7457_v17  ;;  %v7456_v52 = vadd.f32 %v7664_v32, %v7441_v39  ;;  %v7444_v14 = vadd.f32 %v8209_v7, %v7307_v16  ;;  %v7309_v61 = vadd.f32 %v8192_v19, %v7170_v26 }
 0x5d4   :  { %v7420_v44 = vpop.f32.mrf.mxu1  ;;  %v7293_v22 = vpop.f32.mrf.mxu0 }
 0x5d5   :  { %7464 = vst [vmem:[#allocation8 + $0x10] sm:$0xff] %v7456_v52  ;;  %v7459_v23 = vadd.f32 %v7664_v32, %v7444_v14  ;;  %v7443_v9 = vadd.f32 %v7420_v44, %v7306_v58  ;;  %v7308_v35 = vadd.f32 %v7293_v22, %v7165_v13 }
 0x5d7   :  { %7467 = vst [vmem:[#allocation8 + $0x28] sm:$0xff] %v7459_v23  ;;  %v7458_v49 = vadd.f32 %v7664_v32, %v7443_v9 }
 0x5d9   :  { %7466 = vst [vmem:[#allocation8 + $0x20] sm:$0xff] %v7458_v49 }
 0x5ef   :  { %v8212_v18 = vpop.f32.mrf.mxu1 }
 0x5f0   :  { %v7446_v2 = vadd.f32 %v8212_v18, %v7309_v61 }
 0x5f1   :  { %v7430_v36 = vpop.f32.mrf.mxu1 }
 0x5f2   :  { %v7461_v24 = vadd.f32 %v7664_v32, %v7446_v2  ;;  %v7445_v59 = vadd.f32 %v7430_v36, %v7308_v35 }
 0x5f4   :  { %7469 = vst [vmem:[#allocation8 + $0x38] sm:$0xff] %v7461_v24  ;;  %v7460_v31 = vadd.f32 %v7664_v32, %v7445_v59 }
 0x5f6   :  { %7468 = vst [vmem:[#allocation8 + $0x30] sm:$0xff] %v7460_v31 }
 0x5f7   :  { %8426 = shalt.err (!%p8423_p5)
}
 0x5f8   :  { %7481 = dma.vmem_to_hbm [thread:$0]  %s7476_s15, 1024, %s10660_s5, [#allocation4], %s8445_s28, %s8445_s28, %s8446_s29  }
 0x5f9   :  { %8439 = dma.done.wait [#allocation4], 1024  }
 0x5fa   :  { %8440 = vsyncadd [#allocation4], 4294966272 }
 0x5fb   :  { %7485 = vsyncpa [#allocation3], 1 }
 0x5fc   :  { %7486 = vsyncpa [#allocation6], 1 }
 0x5fd   :  { %7487 = vsyncpa [#allocation4], 1 }

</bundles_post_ra>
